<compile_context>
chip_gen: v7x
topology: tpu7x:2x2x1
jax: 0.10.0
libtpu: 0.0.40
codegen_flags: <defaults>
</compile_context>

<pallas_src>
import functools

import jax
import jax.numpy as jnp
from jax.experimental import pallas as pl
from jax.experimental.pallas import tpu as pltpu

EPS = 1e-5


# --------------------------------------------------------------- helpers ----
def _im2col_3x3(x):
    """(N,H,W,C) -> (N*H*W, 9*C) patch matrix for a 3x3 / pad=1 / stride=1 conv.

    Wrapper-side (pure XLA) layout plumbing so the kernel issues a single
    MXU matmul for conv1.  At realistic shapes this 9x input inflation should
    move in-kernel behind a gridded pipeline instead.
    """
    n, h, w, c = x.shape
    xp = jnp.pad(x, ((0, 0), (1, 1), (1, 1), (0, 0)))
    cols = [xp[:, kh:kh + h, kw:kw + w, :] for kh in range(3) for kw in range(3)]
    return jnp.concatenate(cols, axis=-1).reshape(n * h * w, 9 * c)


def _bn_train(y, gamma, beta, inv_count):
    """Training-mode BatchNorm on flattened (NHW, C), single pass.

    sum and sum-of-squares in one sweep; biased variance; gamma/beta folded
    into one scale+shift applied to y.
    """
    s1 = jnp.sum(y, axis=0, keepdims=True)
    s2 = jnp.sum(y * y, axis=0, keepdims=True)
    mean = s1 * inv_count
    var = s2 * inv_count - mean * mean
    scale = gamma * jax.lax.rsqrt(var + EPS)
    shift = beta - mean * scale
    return y * scale + shift


# ---------------------------------------------------------------- kernel ----
def residual_block_kernel(*refs, projection):
    if projection:
        (p1_ref, xs_ref, w1_ref, g1_ref, b1_ref,
         w2_ref, g2_ref, b2_ref, ws_ref, gs_ref, bs_ref,
         out_ref, y1p_ref) = refs
    else:
        (p1_ref, xs_ref, w1_ref, g1_ref, b1_ref,
         w2_ref, g2_ref, b2_ref,
         out_ref, y1p_ref) = refs

    n, h, w, cout = out_ref.shape
    inv_count = 1.0 / float(n * h * w)

    # ---- conv1: single im2col matmul (K = 9*Cin) -> BN -> ReLU ----
    y1 = jnp.dot(p1_ref[...], w1_ref[...], preferred_element_type=jnp.float32)
    y1 = _bn_train(y1, g1_ref[...], b1_ref[...], inv_count)
    y1 = jnp.maximum(y1, 0.0)

    # ---- re-pad y1 for conv2: zero ONLY the 1-wide halo, one interior store
    y1p_ref[:, 0:1, :, :] = jnp.zeros((n, 1, w + 2, cout), jnp.float32)
    y1p_ref[:, h + 1:h + 2, :, :] = jnp.zeros((n, 1, w + 2, cout), jnp.float32)
    y1p_ref[:, :, 0:1, :] = jnp.zeros((n, h + 2, 1, cout), jnp.float32)
    y1p_ref[:, :, w + 1:w + 2, :] = jnp.zeros((n, h + 2, 1, cout), jnp.float32)
    y1p_ref[:, 1:h + 1, 1:w + 1, :] = y1.reshape(n, h, w, cout)

    # ---- conv2: assemble (NHW, 9*Cout) patches along lanes -> ONE matmul -> BN
    taps = [y1p_ref[:, kh:kh + h, kw:kw + w, :]
            for kh in range(3) for kw in range(3)]
    p2 = jnp.concatenate(taps, axis=-1).reshape(n * h * w, 9 * cout)
    y2 = jnp.dot(p2, w2_ref[...], preferred_element_type=jnp.float32)
    y2 = _bn_train(y2, g2_ref[...], b2_ref[...], inv_count)

    # ---- shortcut: 1x1 conv + BN (projection) or identity, from unpadded x
    if projection:
        sc = jnp.dot(xs_ref[...], ws_ref[...], preferred_element_type=jnp.float32)
        sc = _bn_train(sc, gs_ref[...], bs_ref[...], inv_count)
    else:
        sc = xs_ref[...]

    # ---- residual add + final ReLU ----
    out_ref[...] = jnp.maximum(y2 + sc, 0.0).reshape(n, h, w, cout)


# --------------------------------------------------------------- wrapper ----
def residual_block(x_nchw, params):
    """params = (w1, g1, b1, w2, g2, b2, shortcut); shortcut = (ws, gs, bs) or None."""
    w1, g1, b1, w2, g2, b2, shortcut = params
    x = jnp.transpose(x_nchw, (0, 2, 3, 1)).astype(jnp.float32)   # NCHW -> NHWC
    n, h, w, cin = x.shape
    cout = w1.shape[-1]
    projection = shortcut is not None

    patches1 = _im2col_3x3(x)                           # (NHW, 9*Cin)
    x_flat = x.reshape(n * h * w, cin)                  # contiguous shortcut input
    w1r = w1.reshape(9 * cin, cout).astype(jnp.float32)   # (kh,kw,ci) row-major
    w2r = w2.reshape(9 * cout, cout).astype(jnp.float32)

    inputs = [patches1, x_flat,
              w1r, g1.reshape(1, cout).astype(jnp.float32),
              b1.reshape(1, cout).astype(jnp.float32),
              w2r, g2.reshape(1, cout).astype(jnp.float32),
              b2.reshape(1, cout).astype(jnp.float32)]
    if projection:
        ws, gs, bs = shortcut
        inputs += [ws.astype(jnp.float32),
                   gs.reshape(1, cout).astype(jnp.float32),
                   bs.reshape(1, cout).astype(jnp.float32)]

    vmem = pl.BlockSpec(memory_space=pltpu.MemorySpace.VMEM)
    kernel = functools.partial(residual_block_kernel, projection=projection)

    out_nhwc = pl.pallas_call(
        kernel,
        out_shape=jax.ShapeDtypeStruct((n, h, w, cout), jnp.float32),
        in_specs=[vmem] * len(inputs),
        out_specs=vmem,
        scratch_shapes=[pltpu.VMEM((n, h + 2, w + 2, cout), jnp.float32)],
        compiler_params=pltpu.CompilerParams(
            vmem_limit_bytes=32 * 1024 * 1024),
    )(*inputs)

    return jnp.transpose(out_nhwc, (0, 3, 1, 2))                  # NHWC -> NCHW


# -------------------------------------------------- pure-JAX reference ------
def residual_block_ref(x_nchw, params):
    w1, g1, b1, w2, g2, b2, shortcut = params
    x = jnp.transpose(x_nchw, (0, 2, 3, 1)).astype(jnp.float32)

    def conv(z, wgt, pad):
        return jax.lax.conv_general_dilated(
            z, wgt, window_strides=(1, 1), padding=[(pad, pad), (pad, pad)],
            dimension_numbers=('NHWC', 'HWIO', 'NHWC'))

    def bn(y, g, b):
        mean = jnp.mean(y, axis=(0, 1, 2), keepdims=True)
        var = jnp.mean((y - mean) ** 2, axis=(0, 1, 2), keepdims=True)
        return g * (y - mean) * jax.lax.rsqrt(var + EPS) + b

    y = jnp.maximum(bn(conv(x, w1, 1), g1, b1), 0.0)
    y = bn(conv(y, w2, 1), g2, b2)
    if shortcut is not None:
        ws, gs, bs = shortcut
        sc = bn(conv(x, ws.reshape(1, 1, *ws.shape), 0), gs, bs)
    else:
        sc = x
    out = jnp.maximum(y + sc, 0.0)
    return jnp.transpose(out, (0, 3, 1, 2))


# ------------------------------------------------------------------ main ----
if __name__ == "__main__":
    key = jax.random.PRNGKey(0)

    def make_params(k, cin, cout):
        ks = jax.random.split(k, 9)
        w1 = 0.1 * jax.random.normal(ks[0], (3, 3, cin, cout), jnp.float32)  # HWIO
        g1 = 1.0 + 0.1 * jax.random.normal(ks[1], (cout,), jnp.float32)
        b1 = 0.1 * jax.random.normal(ks[2], (cout,), jnp.float32)
        w2 = 0.1 * jax.random.normal(ks[3], (3, 3, cout, cout), jnp.float32)
        g2 = 1.0 + 0.1 * jax.random.normal(ks[4], (cout,), jnp.float32)
        b2 = 0.1 * jax.random.normal(ks[5], (cout,), jnp.float32)
        if cin != cout:
            ws = 0.1 * jax.random.normal(ks[6], (cin, cout), jnp.float32)   # 1x1 conv
            gs = 1.0 + 0.1 * jax.random.normal(ks[7], (cout,), jnp.float32)
            bs = 0.1 * jax.random.normal(ks[8], (cout,), jnp.float32)
            shortcut = (ws, gs, bs)
        else:
            shortcut = None                       # identity shortcut (Cin == Cout)
        return (w1, g1, b1, w2, g2, b2, shortcut)

    def check(x, params, tag):
        out = jax.block_until_ready(jax.jit(residual_block)(x, params))
        ref = residual_block_ref(x, params)
        assert out.shape == ref.shape, (tag, out.shape, ref.shape)
        if not bool(jnp.allclose(out, ref, rtol=2e-2, atol=2e-2)):
            raise AssertionError(
                f"{tag}: max abs err = {float(jnp.max(jnp.abs(out - ref)))}")

    k1, k2, k3, k4 = jax.random.split(key, 4)

    # 1) projection shortcut (Cin != Cout) — exercises the 1x1 conv + BN path
    N, Cin, H, W, Cout = 2, 4, 16, 16, 8
    x = jax.random.normal(k1, (N, Cin, H, W), jnp.float32)        # NCHW like PyTorch
    check(x, make_params(k2, Cin, Cout), "projection")

    # 2) identity shortcut (Cin == Cout) — matches torch.nn.Identity branch
    x2 = jax.random.normal(k3, (N, Cout, H, W), jnp.float32)
    check(x2, make_params(k4, Cout, Cout), "identity")

    print("KERNEL_OK")
</pallas_src>

<mosaic_0001>
module attributes {stable_mosaic.version = 11 : i64} {
  func.func @residual_block_kernel(%arg0: memref<512x36xf32, #tpu.memory_space<vmem>>, %arg1: memref<512x4xf32, #tpu.memory_space<vmem>>, %arg2: memref<36x8xf32, #tpu.memory_space<vmem>>, %arg3: memref<1x8xf32, #tpu.memory_space<vmem>>, %arg4: memref<1x8xf32, #tpu.memory_space<vmem>>, %arg5: memref<72x8xf32, #tpu.memory_space<vmem>>, %arg6: memref<1x8xf32, #tpu.memory_space<vmem>>, %arg7: memref<1x8xf32, #tpu.memory_space<vmem>>, %arg8: memref<4x8xf32, #tpu.memory_space<vmem>>, %arg9: memref<1x8xf32, #tpu.memory_space<vmem>>, %arg10: memref<1x8xf32, #tpu.memory_space<vmem>>, %arg11: memref<2x16x16x8xf32, #tpu.memory_space<vmem>>, %arg12: memref<2x18x18x8xf32, #tpu.memory_space<vmem>>) attributes {dimension_semantics = [], scalar_prefetch = 0 : i64, scratch_operands = 1 : i64, tpu.core_type = #tpu.core_type<tc>} {
    %c0 = arith.constant 0 : index
    %c0_0 = arith.constant 0 : index
    %0 = vector.load %arg0[%c0, %c0_0] : memref<512x36xf32, #tpu.memory_space<vmem>>, vector<512x36xf32>
    %c0_1 = arith.constant 0 : index
    %c0_2 = arith.constant 0 : index
    %1 = vector.load %arg2[%c0_1, %c0_2] : memref<36x8xf32, #tpu.memory_space<vmem>>, vector<36x8xf32>
    %cst = arith.constant dense<0.000000e+00> : vector<512x8xf32>
    %2 = tpu.matmul %0, %1, %cst {dimension_numbers = #tpu.dot_dimension_numbers<[1], [0], [0], [1], [0, 0, 1, 1], [], []>} : vector<512x36xf32>, vector<36x8xf32>, vector<512x8xf32> -> vector<512x8xf32>
    %c0_3 = arith.constant 0 : index
    %c0_4 = arith.constant 0 : index
    %3 = vector.load %arg3[%c0_3, %c0_4] : memref<1x8xf32, #tpu.memory_space<vmem>>, vector<1x8xf32>
    %c0_5 = arith.constant 0 : index
    %c0_6 = arith.constant 0 : index
    %4 = vector.load %arg4[%c0_5, %c0_6] : memref<1x8xf32, #tpu.memory_space<vmem>>, vector<1x8xf32>
    %cst_7 = arith.constant dense<0.000000e+00> : vector<8xf32>
    %5 = vector.multi_reduction <add>, %2, %cst_7 [0] : vector<512x8xf32> to vector<8xf32>
    %6 = vector.shape_cast %5 : vector<8xf32> to vector<1x8xf32>
    %7 = arith.mulf %2, %2 : vector<512x8xf32>
    %cst_8 = arith.constant dense<0.000000e+00> : vector<8xf32>
    %8 = vector.multi_reduction <add>, %7, %cst_8 [0] : vector<512x8xf32> to vector<8xf32>
    %9 = vector.shape_cast %8 : vector<8xf32> to vector<1x8xf32>
    %cst_9 = arith.constant 0.001953125 : f32
    %10 = vector.broadcast %cst_9 : f32 to vector<1x8xf32>
    %11 = arith.mulf %6, %10 : vector<1x8xf32>
    %cst_10 = arith.constant 0.001953125 : f32
    %12 = vector.broadcast %cst_10 : f32 to vector<1x8xf32>
    %13 = arith.mulf %9, %12 : vector<1x8xf32>
    %14 = arith.mulf %11, %11 : vector<1x8xf32>
    %15 = arith.subf %13, %14 : vector<1x8xf32>
    %cst_11 = arith.constant 9.99999974E-6 : f32
    %16 = vector.broadcast %cst_11 : f32 to vector<1x8xf32>
    %17 = arith.addf %15, %16 : vector<1x8xf32>
    %18 = math.rsqrt %17 : vector<1x8xf32>
    %19 = arith.mulf %3, %18 : vector<1x8xf32>
    %20 = arith.mulf %11, %19 : vector<1x8xf32>
    %21 = arith.subf %4, %20 : vector<1x8xf32>
    %22 = vector.broadcast %19 : vector<1x8xf32> to vector<512x8xf32>
    %23 = arith.mulf %2, %22 : vector<512x8xf32>
    %24 = vector.broadcast %21 : vector<1x8xf32> to vector<512x8xf32>
    %25 = arith.addf %23, %24 : vector<512x8xf32>
    %cst_12 = arith.constant 0.000000e+00 : f32
    %26 = vector.broadcast %cst_12 : f32 to vector<512x8xf32>
    %27 = arith.maximumf %25, %26 : vector<512x8xf32>
    %cst_13 = arith.constant 0.000000e+00 : f32
    %28 = vector.broadcast %cst_13 : f32 to vector<2x1x18x8xf32>
    %c0_14 = arith.constant 0 : index
    %c0_15 = arith.constant 0 : index
    %c0_16 = arith.constant 0 : index
    %c0_17 = arith.constant 0 : index
    %29 = vector.load %arg12[%c0_14, %c0_15, %c0_16, %c0_17] : memref<2x18x18x8xf32, #tpu.memory_space<vmem>>, vector<2x1x18x8xf32>
    tpu.vector_store %arg12[%c0_14, %c0_15, %c0_16, %c0_17], %28 {strides = array<i32>} : memref<2x18x18x8xf32, #tpu.memory_space<vmem>>, vector<2x1x18x8xf32>,
    %cst_18 = arith.constant 0.000000e+00 : f32
    %30 = vector.broadcast %cst_18 : f32 to vector<2x1x18x8xf32>
    %c0_19 = arith.constant 0 : index
    %c17 = arith.constant 17 : index
    %c0_20 = arith.constant 0 : index
    %c0_21 = arith.constant 0 : index
    %31 = vector.load %arg12[%c0_19, %c17, %c0_20, %c0_21] : memref<2x18x18x8xf32, #tpu.memory_space<vmem>>, vector<2x1x18x8xf32>
    tpu.vector_store %arg12[%c0_19, %c17, %c0_20, %c0_21], %30 {strides = array<i32>} : memref<2x18x18x8xf32, #tpu.memory_space<vmem>>, vector<2x1x18x8xf32>,
    %cst_22 = arith.constant 0.000000e+00 : f32
    %32 = vector.broadcast %cst_22 : f32 to vector<2x18x1x8xf32>
    %c0_23 = arith.constant 0 : index
    %c0_24 = arith.constant 0 : index
    %c0_25 = arith.constant 0 : index
    %c0_26 = arith.constant 0 : index
    %33 = vector.load %arg12[%c0_23, %c0_24, %c0_25, %c0_26] : memref<2x18x18x8xf32, #tpu.memory_space<vmem>>, vector<2x18x1x8xf32>
    tpu.vector_store %arg12[%c0_23, %c0_24, %c0_25, %c0_26], %32 {strides = array<i32>} : memref<2x18x18x8xf32, #tpu.memory_space<vmem>>, vector<2x18x1x8xf32>,
    %cst_27 = arith.constant 0.000000e+00 : f32
    %34 = vector.broadcast %cst_27 : f32 to vector<2x18x1x8xf32>
    %c0_28 = arith.constant 0 : index
    %c0_29 = arith.constant 0 : index
    %c17_30 = arith.constant 17 : index
    %c0_31 = arith.constant 0 : index
    %35 = vector.load %arg12[%c0_28, %c0_29, %c17_30, %c0_31] : memref<2x18x18x8xf32, #tpu.memory_space<vmem>>, vector<2x18x1x8xf32>
    tpu.vector_store %arg12[%c0_28, %c0_29, %c17_30, %c0_31], %34 {strides = array<i32>} : memref<2x18x18x8xf32, #tpu.memory_space<vmem>>, vector<2x18x1x8xf32>,
    %36 = vector.shape_cast %27 : vector<512x8xf32> to vector<2x16x16x8xf32>
    %c0_32 = arith.constant 0 : index
    %c1 = arith.constant 1 : index
    %c1_33 = arith.constant 1 : index
    %c0_34 = arith.constant 0 : index
    %37 = vector.load %arg12[%c0_32, %c1, %c1_33, %c0_34] : memref<2x18x18x8xf32, #tpu.memory_space<vmem>>, vector<2x16x16x8xf32>
    tpu.vector_store %arg12[%c0_32, %c1, %c1_33, %c0_34], %36 {strides = array<i32>} : memref<2x18x18x8xf32, #tpu.memory_space<vmem>>, vector<2x16x16x8xf32>,
    %c0_35 = arith.constant 0 : index
    %c0_36 = arith.constant 0 : index
    %c0_37 = arith.constant 0 : index
    %c0_38 = arith.constant 0 : index
    %38 = vector.load %arg12[%c0_35, %c0_36, %c0_37, %c0_38] : memref<2x18x18x8xf32, #tpu.memory_space<vmem>>, vector<2x16x16x8xf32>
    %c0_39 = arith.constant 0 : index
    %c0_40 = arith.constant 0 : index
    %c1_41 = arith.constant 1 : index
    %c0_42 = arith.constant 0 : index
    %39 = vector.load %arg12[%c0_39, %c0_40, %c1_41, %c0_42] : memref<2x18x18x8xf32, #tpu.memory_space<vmem>>, vector<2x16x16x8xf32>
    %c0_43 = arith.constant 0 : index
    %c0_44 = arith.constant 0 : index
    %c2 = arith.constant 2 : index
    %c0_45 = arith.constant 0 : index
    %40 = vector.load %arg12[%c0_43, %c0_44, %c2, %c0_45] : memref<2x18x18x8xf32, #tpu.memory_space<vmem>>, vector<2x16x16x8xf32>
    %c0_46 = arith.constant 0 : index
    %c1_47 = arith.constant 1 : index
    %c0_48 = arith.constant 0 : index
    %c0_49 = arith.constant 0 : index
    %41 = vector.load %arg12[%c0_46, %c1_47, %c0_48, %c0_49] : memref<2x18x18x8xf32, #tpu.memory_space<vmem>>, vector<2x16x16x8xf32>
    %c0_50 = arith.constant 0 : index
    %c1_51 = arith.constant 1 : index
    %c1_52 = arith.constant 1 : index
    %c0_53 = arith.constant 0 : index
    %42 = vector.load %arg12[%c0_50, %c1_51, %c1_52, %c0_53] : memref<2x18x18x8xf32, #tpu.memory_space<vmem>>, vector<2x16x16x8xf32>
    %c0_54 = arith.constant 0 : index
    %c1_55 = arith.constant 1 : index
    %c2_56 = arith.constant 2 : index
    %c0_57 = arith.constant 0 : index
    %43 = vector.load %arg12[%c0_54, %c1_55, %c2_56, %c0_57] : memref<2x18x18x8xf32, #tpu.memory_space<vmem>>, vector<2x16x16x8xf32>
    %c0_58 = arith.constant 0 : index
    %c2_59 = arith.constant 2 : index
    %c0_60 = arith.constant 0 : index
    %c0_61 = arith.constant 0 : index
    %44 = vector.load %arg12[%c0_58, %c2_59, %c0_60, %c0_61] : memref<2x18x18x8xf32, #tpu.memory_space<vmem>>, vector<2x16x16x8xf32>
    %c0_62 = arith.constant 0 : index
    %c2_63 = arith.constant 2 : index
    %c1_64 = arith.constant 1 : index
    %c0_65 = arith.constant 0 : index
    %45 = vector.load %arg12[%c0_62, %c2_63, %c1_64, %c0_65] : memref<2x18x18x8xf32, #tpu.memory_space<vmem>>, vector<2x16x16x8xf32>
    %c0_66 = arith.constant 0 : index
    %c2_67 = arith.constant 2 : index
    %c2_68 = arith.constant 2 : index
    %c0_69 = arith.constant 0 : index
    %46 = vector.load %arg12[%c0_66, %c2_67, %c2_68, %c0_69] : memref<2x18x18x8xf32, #tpu.memory_space<vmem>>, vector<2x16x16x8xf32>
    %47 = tpu.concatenate %38, %39, %40, %41, %42, %43, %44, %45, %46 in 3 : vector<2x16x16x8xf32>, vector<2x16x16x8xf32>, vector<2x16x16x8xf32>, vector<2x16x16x8xf32>, vector<2x16x16x8xf32>, vector<2x16x16x8xf32>, vector<2x16x16x8xf32>, vector<2x16x16x8xf32>, vector<2x16x16x8xf32> -> vector<2x16x16x72xf32>
    %48 = vector.shape_cast %47 : vector<2x16x16x72xf32> to vector<512x72xf32>
    %c0_70 = arith.constant 0 : index
    %c0_71 = arith.constant 0 : index
    %49 = vector.load %arg5[%c0_70, %c0_71] : memref<72x8xf32, #tpu.memory_space<vmem>>, vector<72x8xf32>
    %cst_72 = arith.constant dense<0.000000e+00> : vector<512x8xf32>
    %50 = tpu.matmul %48, %49, %cst_72 {dimension_numbers = #tpu.dot_dimension_numbers<[1], [0], [0], [1], [0, 0, 1, 1], [], []>} : vector<512x72xf32>, vector<72x8xf32>, vector<512x8xf32> -> vector<512x8xf32>
    %c0_73 = arith.constant 0 : index
    %c0_74 = arith.constant 0 : index
    %51 = vector.load %arg6[%c0_73, %c0_74] : memref<1x8xf32, #tpu.memory_space<vmem>>, vector<1x8xf32>
    %c0_75 = arith.constant 0 : index
    %c0_76 = arith.constant 0 : index
    %52 = vector.load %arg7[%c0_75, %c0_76] : memref<1x8xf32, #tpu.memory_space<vmem>>, vector<1x8xf32>
    %cst_77 = arith.constant dense<0.000000e+00> : vector<8xf32>
    %53 = vector.multi_reduction <add>, %50, %cst_77 [0] : vector<512x8xf32> to vector<8xf32>
    %54 = vector.shape_cast %53 : vector<8xf32> to vector<1x8xf32>
    %55 = arith.mulf %50, %50 : vector<512x8xf32>
    %cst_78 = arith.constant dense<0.000000e+00> : vector<8xf32>
    %56 = vector.multi_reduction <add>, %55, %cst_78 [0] : vector<512x8xf32> to vector<8xf32>
    %57 = vector.shape_cast %56 : vector<8xf32> to vector<1x8xf32>
    %cst_79 = arith.constant 0.001953125 : f32
    %58 = vector.broadcast %cst_79 : f32 to vector<1x8xf32>
    %59 = arith.mulf %54, %58 : vector<1x8xf32>
    %cst_80 = arith.constant 0.001953125 : f32
    %60 = vector.broadcast %cst_80 : f32 to vector<1x8xf32>
    %61 = arith.mulf %57, %60 : vector<1x8xf32>
    %62 = arith.mulf %59, %59 : vector<1x8xf32>
    %63 = arith.subf %61, %62 : vector<1x8xf32>
    %cst_81 = arith.constant 9.99999974E-6 : f32
    %64 = vector.broadcast %cst_81 : f32 to vector<1x8xf32>
    %65 = arith.addf %63, %64 : vector<1x8xf32>
    %66 = math.rsqrt %65 : vector<1x8xf32>
    %67 = arith.mulf %51, %66 : vector<1x8xf32>
    %68 = arith.mulf %59, %67 : vector<1x8xf32>
    %69 = arith.subf %52, %68 : vector<1x8xf32>
    %70 = vector.broadcast %67 : vector<1x8xf32> to vector<512x8xf32>
    %71 = arith.mulf %50, %70 : vector<512x8xf32>
    %72 = vector.broadcast %69 : vector<1x8xf32> to vector<512x8xf32>
    %73 = arith.addf %71, %72 : vector<512x8xf32>
    %c0_82 = arith.constant 0 : index
    %c0_83 = arith.constant 0 : index
    %74 = vector.load %arg1[%c0_82, %c0_83] : memref<512x4xf32, #tpu.memory_space<vmem>>, vector<512x4xf32>
    %c0_84 = arith.constant 0 : index
    %c0_85 = arith.constant 0 : index
    %75 = vector.load %arg8[%c0_84, %c0_85] : memref<4x8xf32, #tpu.memory_space<vmem>>, vector<4x8xf32>
    %cst_86 = arith.constant dense<0.000000e+00> : vector<512x8xf32>
    %76 = tpu.matmul %74, %75, %cst_86 {dimension_numbers = #tpu.dot_dimension_numbers<[1], [0], [0], [1], [0, 0, 1, 1], [], []>} : vector<512x4xf32>, vector<4x8xf32>, vector<512x8xf32> -> vector<512x8xf32>
    %c0_87 = arith.constant 0 : index
    %c0_88 = arith.constant 0 : index
    %77 = vector.load %arg9[%c0_87, %c0_88] : memref<1x8xf32, #tpu.memory_space<vmem>>, vector<1x8xf32>
    %c0_89 = arith.constant 0 : index
    %c0_90 = arith.constant 0 : index
    %78 = vector.load %arg10[%c0_89, %c0_90] : memref<1x8xf32, #tpu.memory_space<vmem>>, vector<1x8xf32>
    %cst_91 = arith.constant dense<0.000000e+00> : vector<8xf32>
    %79 = vector.multi_reduction <add>, %76, %cst_91 [0] : vector<512x8xf32> to vector<8xf32>
    %80 = vector.shape_cast %79 : vector<8xf32> to vector<1x8xf32>
    %81 = arith.mulf %76, %76 : vector<512x8xf32>
    %cst_92 = arith.constant dense<0.000000e+00> : vector<8xf32>
    %82 = vector.multi_reduction <add>, %81, %cst_92 [0] : vector<512x8xf32> to vector<8xf32>
    %83 = vector.shape_cast %82 : vector<8xf32> to vector<1x8xf32>
    %cst_93 = arith.constant 0.001953125 : f32
    %84 = vector.broadcast %cst_93 : f32 to vector<1x8xf32>
    %85 = arith.mulf %80, %84 : vector<1x8xf32>
    %cst_94 = arith.constant 0.001953125 : f32
    %86 = vector.broadcast %cst_94 : f32 to vector<1x8xf32>
    %87 = arith.mulf %83, %86 : vector<1x8xf32>
    %88 = arith.mulf %85, %85 : vector<1x8xf32>
    %89 = arith.subf %87, %88 : vector<1x8xf32>
    %cst_95 = arith.constant 9.99999974E-6 : f32
    %90 = vector.broadcast %cst_95 : f32 to vector<1x8xf32>
    %91 = arith.addf %89, %90 : vector<1x8xf32>
    %92 = math.rsqrt %91 : vector<1x8xf32>
    %93 = arith.mulf %77, %92 : vector<1x8xf32>
    %94 = arith.mulf %85, %93 : vector<1x8xf32>
    %95 = arith.subf %78, %94 : vector<1x8xf32>
    %96 = vector.broadcast %93 : vector<1x8xf32> to vector<512x8xf32>
    %97 = arith.mulf %76, %96 : vector<512x8xf32>
    %98 = vector.broadcast %95 : vector<1x8xf32> to vector<512x8xf32>
    %99 = arith.addf %97, %98 : vector<512x8xf32>
    %100 = arith.addf %73, %99 : vector<512x8xf32>
    %cst_96 = arith.constant 0.000000e+00 : f32
    %101 = vector.broadcast %cst_96 : f32 to vector<512x8xf32>
    %102 = arith.maximumf %100, %101 : vector<512x8xf32>
    %103 = vector.shape_cast %102 : vector<512x8xf32> to vector<2x16x16x8xf32>
    %c0_97 = arith.constant 0 : index
    %c0_98 = arith.constant 0 : index
    %c0_99 = arith.constant 0 : index
    %c0_100 = arith.constant 0 : index
    %104 = vector.load %arg11[%c0_97, %c0_98, %c0_99, %c0_100] : memref<2x16x16x8xf32, #tpu.memory_space<vmem>>, vector<2x16x16x8xf32>
    tpu.vector_store %arg11[%c0_97, %c0_98, %c0_99, %c0_100], %103 {strides = array<i32>} : memref<2x16x16x8xf32, #tpu.memory_space<vmem>>, vector<2x16x16x8xf32>,
    return
  }
}

</mosaic_0001>

<bundles_post_ra>
// kernel: residual_block.1
= control target key start
LH: loop header
LB: loop body
LE: loop exit
PB: predicated region body
PF: predicated region fallthrough
CT: control target
= control target key end

     0   :  { %vm107_vm0 = vcmask 293888   ;;  %vm300_vm1 = vcmask 1043456   ;;  %vm691_vm2 = vcmask 64512   ;;  %vm1237_vm3 = vcmask 58368   ;;  %s7748_s15 = smov 16   ;;  %s7751_s20 = smov 40   ;;  %s14434_s2 = inlined_call_operand.vmem [shape: f32[36,8], index: 2, kind: input, shape index: {}]   ;;  %s14435_s0 = inlined_call_operand.vmem [shape: f32[512,36], index: 0, kind: input, shape index: {}]   ;;  %s14436_s3 = inlined_call_operand.vmem [shape: f32[1,8], index: 3, kind: input, shape index: {}]   ;;  %s14437_s4 = inlined_call_operand.vmem [shape: f32[1,8], index: 4, kind: input, shape index: {}]   ;;  %s14438_s5 = inlined_call_operand.vmem [shape: f32[72,8], index: 5, kind: input, shape index: {}]   ;;  %s14439_s8 = inlined_call_operand.vmem [shape: f32[4,8], index: 8, kind: input, shape index: {}]   ;;  %s14440_s1 = inlined_call_operand.vmem [shape: f32[512,4], index: 1, kind: input, shape index: {}]   ;;  %s14441_s9 = inlined_call_operand.vmem [shape: f32[1,8], index: 9, kind: input, shape index: {}]   ;;  %s14442_s10 = inlined_call_operand.vmem [shape: f32[1,8], index: 10, kind: input, shape index: {}]   ;;  %s14443_s6 = inlined_call_operand.vmem [shape: f32[1,8], index: 6, kind: input, shape index: {}]   ;;  %s14444_s7 = inlined_call_operand.vmem [shape: f32[1,8], index: 7, kind: input, shape index: {}]   ;;  %s14445_s11 = inlined_call_operand.vmem [shape: f32[2,16,16,8], index: 11, kind: output, shape index: {}]  }
   0x1   :  { %v102_v0 = vld [vmem:[%s14434_s2] sm:$0xff]  ;;  %v103_v1 = vld [vmem:[%s14434_s2 + $0x8] sm:$0xff]  ;;  %v104_v2 = vld [vmem:[%s14434_s2 + $0x10] sm:$0xff]  ;;  %vm1249_vm4 = vcmask 57344   ;;  %s7752_s16 = smov 48   ;;  %s7753_s19 = smov 56  }
   0x2   :  { %v7641_v3 = vpack.c.bf16 %v103_v1, %v102_v0  ;;  %v105_v4 = vld [vmem:[%s14434_s2 + $0x18] sm:$0xff]  ;;  %v38_v5 = vld [vmem:[%s14435_s0] sm:$0xff]  ;;  %v39_v8 = vld [vmem:[%s14435_s0 + $0x8] sm:$0xff]  ;;  %vm4076_vm5 = vcmask 130048   ;;  %vm4141_vm6 = vcmask 195584   ;;  %vm4206_vm7 = vcmask 261120  }
   0x3   :  { %v7645_v6 = vpack.c.bf16 %v105_v4, %v104_v2  ;;  %7333 = vmatprep.mubr.msk.f32.mxu0 %vm107_vm0, %v38_v5  ;;  %v106_v7 = vld [vmem:[%s14434_s2 + $0x20] sm:$0xf]  ;;  %v40_v9 = vld [vmem:[%s14435_s0 + $0x10] sm:$0xff]  ;;  %v71_v11 = vld [vmem:[%s14435_s0 + $0x108] sm:$0xff]  ;;  %vm4271_vm8 = vcmask 326656   ;;  %vm4336_vm9 = vcmask 392192  }
   0x4   :  { %7642 = vmatprep.subr.bf16.mxu0 %v7641_v3  ;;  %7665 = vmatprep.subr.bf16.mxu1 %v7641_v3  ;;  %v70_v10 = vld [vmem:[%s14435_s0 + $0x100] sm:$0xff]  ;;  %v72_v12 = vld [vmem:[%s14435_s0 + $0x110] sm:$0xff]  ;;  %v41_v13 = vld [vmem:[%s14435_s0 + $0x18] sm:$0xff]  ;;  %vm4401_vm10 = vcmask 457728   ;;  %vm4466_vm11 = vcmask 523264   ;;  %vm4540_vm12 = vcmask 588800  }
   0x5   :  { %7644 = vmatpush3.bf16.msra.mxu0 %v7641_v3  ;;  %7668 = vmatpush3.bf16.msra.mxu1 %v7641_v3  ;;  %v42_v14 = vld [vmem:[%s14435_s0 + $0x20] sm:$0xff]  ;;  %v73_v15 = vld [vmem:[%s14435_s0 + $0x118] sm:$0xff]  ;;  %v43_v17 = vld [vmem:[%s14435_s0 + $0x28] sm:$0xff]  ;;  %vm5664_vm13 = vcmask 31744  }
   0x6   :  { %7646 = vmatprep.subr.bf16.mxu0 %v7645_v6  ;;  %7666 = vmatprep.subr.bf16.mxu1 %v7645_v6  ;;  %v74_v16 = vld [vmem:[%s14435_s0 + $0x120] sm:$0xff]  ;;  %v44_v18 = vld [vmem:[%s14435_s0 + $0x30] sm:$0xff]  ;;  %v75_v19 = vld [vmem:[%s14435_s0 + $0x128] sm:$0xff] }
   0x7   :  { %7381 = vmatprep.mubr.msk.f32.mxu1 %vm107_vm0, %v70_v10  ;;  %v76_v20 = vld [vmem:[%s14435_s0 + $0x130] sm:$0xff]  ;;  %v45_v21 = vld [vmem:[%s14435_s0 + $0x38] sm:$0xff]  ;;  %v46_v22 = vld [vmem:[%s14435_s0 + $0x40] sm:$0xff] }
   0x8   :  { %v77_v23 = vld [vmem:[%s14435_s0 + $0x138] sm:$0xff]  ;;  %v78_v24 = vld [vmem:[%s14435_s0 + $0x140] sm:$0xff]  ;;  %v47_v25 = vld [vmem:[%s14435_s0 + $0x48] sm:$0xff] }
   0x9   :  { %7648 = vmatpush3.bf16.msra.mxu0 %v7645_v6  ;;  %7669 = vmatpush3.bf16.msra.mxu1 %v7645_v6  ;;  %v48_v26 = vld [vmem:[%s14435_s0 + $0x50] sm:$0xff]  ;;  %v79_v27 = vld [vmem:[%s14435_s0 + $0x148] sm:$0xff]  ;;  %v49_v29 = vld [vmem:[%s14435_s0 + $0x58] sm:$0xff] }
   0xa   :  { %7331 = vmatprep.subr.msk.mxu0 %vm300_vm1, %v106_v7  ;;  %7667 = vmatprep.subr.msk.mxu1 %vm300_vm1, %v106_v7  ;;  %v80_v28 = vld [vmem:[%s14435_s0 + $0x150] sm:$0xff]  ;;  %v50_v30 = vld [vmem:[%s14435_s0 + $0x60] sm:$0xff]  ;;  %v81_v31 = vld [vmem:[%s14435_s0 + $0x158] sm:$0xff] }
   0xb   :  { %v82_v32 = vld [vmem:[%s14435_s0 + $0x160] sm:$0xff]  ;;  %v51_v33 = vld [vmem:[%s14435_s0 + $0x68] sm:$0xff]  ;;  %v52_v34 = vld [vmem:[%s14435_s0 + $0x70] sm:$0xff] }
   0xc   :  { %v83_v35 = vld [vmem:[%s14435_s0 + $0x168] sm:$0xff]  ;;  %v84_v36 = vld [vmem:[%s14435_s0 + $0x170] sm:$0xff]  ;;  %v53_v37 = vld [vmem:[%s14435_s0 + $0x78] sm:$0xff] }
   0xd   :  { %7332 = vmatpush3.msk.msra.mxu0 %vm300_vm1, %v106_v7  ;;  %7670 = vmatpush3.msk.msra.mxu1 %vm300_vm1, %v106_v7  ;;  %v54_v38 = vld [vmem:[%s14435_s0 + $0x80] sm:$0xff]  ;;  %v85_v39 = vld [vmem:[%s14435_s0 + $0x178] sm:$0xff]  ;;  %v55_v41 = vld [vmem:[%s14435_s0 + $0x88] sm:$0xff] }
   0xe   :  { %7334 = vmatmul.mubr.msk.f32.vlgmr.msra.gmra.mrb[0].mxu0 %vm107_vm0, %v39_v8  ;;  %7382 = vmatmul.mubr.msk.f32.vlgmr.msra.gmra.mrb[0].mxu1 %vm107_vm0, %v71_v11  ;;  %v86_v40 = vld [vmem:[%s14435_s0 + $0x180] sm:$0xff]  ;;  %v56_v42 = vld [vmem:[%s14435_s0 + $0x90] sm:$0xff]  ;;  %v87_v43 = vld [vmem:[%s14435_s0 + $0x188] sm:$0xff] }
   0xf   :  { %7336 = vmatprep.mubr.msk.f32.mxu0 %vm107_vm0, %v40_v9  ;;  %7384 = vmatprep.mubr.msk.f32.mxu1 %vm107_vm0, %v72_v12  ;;  %v88_v44 = vld [vmem:[%s14435_s0 + $0x190] sm:$0xff]  ;;  %v57_v45 = vld [vmem:[%s14435_s0 + $0x98] sm:$0xff]  ;;  %v58_v46 = vld [vmem:[%s14435_s0 + $0xa0] sm:$0xff] }
  0x10   :  { %v89_v47 = vld [vmem:[%s14435_s0 + $0x198] sm:$0xff]  ;;  %v90_v48 = vld [vmem:[%s14435_s0 + $0x1a0] sm:$0xff]  ;;  %v59_v49 = vld [vmem:[%s14435_s0 + $0xa8] sm:$0xff] }
  0x11   :  { %v60_v50 = vld [vmem:[%s14435_s0 + $0xb0] sm:$0xff]  ;;  %v91_v51 = vld [vmem:[%s14435_s0 + $0x1a8] sm:$0xff]  ;;  %v61_v53 = vld [vmem:[%s14435_s0 + $0xb8] sm:$0xff] }
  0x12   :  { %7337 = vmatmul.mubr.msk.f32.gmra.mrb[2].mxu0 %vm107_vm0, %v41_v13  ;;  %7385 = vmatmul.mubr.msk.f32.gmra.mrb[2].mxu1 %vm107_vm0, %v73_v15  ;;  %v92_v52 = vld [vmem:[%s14435_s0 + $0x1b0] sm:$0xff]  ;;  %v62_v54 = vld [vmem:[%s14435_s0 + $0xc0] sm:$0xff]  ;;  %v93_v55 = vld [vmem:[%s14435_s0 + $0x1b8] sm:$0xff] }
  0x13   :  { %7339 = vmatprep.mubr.msk.f32.mxu0 %vm107_vm0, %v42_v14  ;;  %7387 = vmatprep.mubr.msk.f32.mxu1 %vm107_vm0, %v74_v16  ;;  %v94_v56 = vld [vmem:[%s14435_s0 + $0x1c0] sm:$0xff]  ;;  %v63_v57 = vld [vmem:[%s14435_s0 + $0xc8] sm:$0xff]  ;;  %v64_v58 = vld [vmem:[%s14435_s0 + $0xd0] sm:$0xff] }
  0x14   :  { %v95_v59 = vld [vmem:[%s14435_s0 + $0x1c8] sm:$0xff]  ;;  %v96_v60 = vld [vmem:[%s14435_s0 + $0x1d0] sm:$0xff]  ;;  %v65_v61 = vld [vmem:[%s14435_s0 + $0xd8] sm:$0xff] }
  0x15   :  { %v66_v62 = vld [vmem:[%s14435_s0 + $0xe0] sm:$0xff]  ;;  %v97_v63 = vld [vmem:[%s14435_s0 + $0x1d8] sm:$0xff]  ;;  %v67_v1 = vld [vmem:[%s14435_s0 + $0xe8] sm:$0xff] }
  0x16   :  { %7340 = vmatmul.mubr.msk.f32.gmra.mrb[4].mxu0 %vm107_vm0, %v43_v17  ;;  %7388 = vmatmul.mubr.msk.f32.gmra.mrb[4].mxu1 %vm107_vm0, %v75_v19  ;;  %v98_v0 = vld [vmem:[%s14435_s0 + $0x1e0] sm:$0xff]  ;;  %v68_v2 = vld [vmem:[%s14435_s0 + $0xf0] sm:$0xff]  ;;  %v99_v3 = vld [vmem:[%s14435_s0 + $0x1e8] sm:$0xff] }
  0x17   :  { %7342 = vmatprep.mubr.msk.f32.mxu0 %vm107_vm0, %v44_v18  ;;  %7390 = vmatprep.mubr.msk.f32.mxu1 %vm107_vm0, %v76_v20  ;;  %v100_v4 = vld [vmem:[%s14435_s0 + $0x1f0] sm:$0xff]  ;;  %v69_v5 = vld [vmem:[%s14435_s0 + $0xf8] sm:$0xff] }
  0x18   :  { %v101_v6 = vld [vmem:[%s14435_s0 + $0x1f8] sm:$0xff]  ;;  %s7747_s0 = smov 8  }
  0x1a   :  { %7343 = vmatmul.mubr.msk.f32.gmra.mrb[6].mxu0 %vm107_vm0, %v45_v21  ;;  %7391 = vmatmul.mubr.msk.f32.gmra.mrb[6].mxu1 %vm107_vm0, %v77_v23 }
  0x1b   :  { %7345 = vmatprep.mubr.msk.f32.mxu0 %vm107_vm0, %v46_v22  ;;  %7393 = vmatprep.mubr.msk.f32.mxu1 %vm107_vm0, %v78_v24 }
  0x1e   :  { %7346 = vmatmul.mubr.msk.f32.gmra.mrb[8].mxu0 %vm107_vm0, %v47_v25  ;;  %7394 = vmatmul.mubr.msk.f32.gmra.mrb[8].mxu1 %vm107_vm0, %v79_v27 }
  0x1f   :  { %7348 = vmatprep.mubr.msk.f32.mxu0 %vm107_vm0, %v48_v26  ;;  %7396 = vmatprep.mubr.msk.f32.mxu1 %vm107_vm0, %v80_v28 }
  0x22   :  { %7349 = vmatmul.mubr.msk.f32.gmra.mrb[10].mxu0 %vm107_vm0, %v49_v29  ;;  %7397 = vmatmul.mubr.msk.f32.gmra.mrb[10].mxu1 %vm107_vm0, %v81_v31 }
  0x23   :  { %7351 = vmatprep.mubr.msk.f32.mxu0 %vm107_vm0, %v50_v30  ;;  %7399 = vmatprep.mubr.msk.f32.mxu1 %vm107_vm0, %v82_v32 }
  0x26   :  { %7352 = vmatmul.mubr.msk.f32.gmra.mrb[12].mxu0 %vm107_vm0, %v51_v33  ;;  %7400 = vmatmul.mubr.msk.f32.gmra.mrb[12].mxu1 %vm107_vm0, %v83_v35 }
  0x27   :  { %7354 = vmatprep.mubr.msk.f32.mxu0 %vm107_vm0, %v52_v34  ;;  %7402 = vmatprep.mubr.msk.f32.mxu1 %vm107_vm0, %v84_v36 }
  0x2a   :  { %7355 = vmatmul.mubr.msk.f32.gmra.mrb[14].mxu0 %vm107_vm0, %v53_v37  ;;  %7403 = vmatmul.mubr.msk.f32.gmra.mrb[14].mxu1 %vm107_vm0, %v85_v39 }
  0x2b   :  { %7357 = vmatprep.mubr.msk.f32.mxu0 %vm107_vm0, %v54_v38  ;;  %7405 = vmatprep.mubr.msk.f32.mxu1 %vm107_vm0, %v86_v40 }
  0x2e   :  { %7358 = vmatmul.mubr.msk.f32.gmra.mrb[16].mxu0 %vm107_vm0, %v55_v41  ;;  %7406 = vmatmul.mubr.msk.f32.gmra.mrb[16].mxu1 %vm107_vm0, %v87_v43 }
  0x2f   :  { %7360 = vmatprep.mubr.msk.f32.mxu0 %vm107_vm0, %v56_v42  ;;  %7408 = vmatprep.mubr.msk.f32.mxu1 %vm107_vm0, %v88_v44 }
  0x32   :  { %7361 = vmatmul.mubr.msk.f32.gmra.mrb[18].mxu0 %vm107_vm0, %v57_v45  ;;  %7409 = vmatmul.mubr.msk.f32.gmra.mrb[18].mxu1 %vm107_vm0, %v89_v47 }
  0x33   :  { %7363 = vmatprep.mubr.msk.f32.mxu0 %vm107_vm0, %v58_v46  ;;  %7411 = vmatprep.mubr.msk.f32.mxu1 %vm107_vm0, %v90_v48 }
  0x36   :  { %7364 = vmatmul.mubr.msk.f32.gmra.mrb[20].mxu0 %vm107_vm0, %v59_v49  ;;  %7412 = vmatmul.mubr.msk.f32.gmra.mrb[20].mxu1 %vm107_vm0, %v91_v51 }
  0x37   :  { %7366 = vmatprep.mubr.msk.f32.mxu0 %vm107_vm0, %v60_v50  ;;  %7414 = vmatprep.mubr.msk.f32.mxu1 %vm107_vm0, %v92_v52 }
  0x3a   :  { %7367 = vmatmul.mubr.msk.f32.gmra.mrb[22].mxu0 %vm107_vm0, %v61_v53  ;;  %7415 = vmatmul.mubr.msk.f32.gmra.mrb[22].mxu1 %vm107_vm0, %v93_v55 }
  0x3b   :  { %7369 = vmatprep.mubr.msk.f32.mxu0 %vm107_vm0, %v62_v54  ;;  %7417 = vmatprep.mubr.msk.f32.mxu1 %vm107_vm0, %v94_v56 }
  0x3e   :  { %7370 = vmatmul.mubr.msk.f32.gmra.mrb[24].mxu0 %vm107_vm0, %v63_v57  ;;  %7418 = vmatmul.mubr.msk.f32.gmra.mrb[24].mxu1 %vm107_vm0, %v95_v59 }
  0x3f   :  { %7372 = vmatprep.mubr.msk.f32.mxu0 %vm107_vm0, %v64_v58  ;;  %7420 = vmatprep.mubr.msk.f32.mxu1 %vm107_vm0, %v96_v60 }
  0x42   :  { %7373 = vmatmul.mubr.msk.f32.gmra.mrb[26].mxu0 %vm107_vm0, %v65_v61  ;;  %7421 = vmatmul.mubr.msk.f32.gmra.mrb[26].mxu1 %vm107_vm0, %v97_v63 }
  0x43   :  { %7375 = vmatprep.mubr.msk.f32.mxu0 %vm107_vm0, %v66_v62  ;;  %7423 = vmatprep.mubr.msk.f32.mxu1 %vm107_vm0, %v98_v0 }
  0x46   :  { %7376 = vmatmul.mubr.msk.f32.gmra.mrb[28].mxu0 %vm107_vm0, %v67_v1  ;;  %7424 = vmatmul.mubr.msk.f32.gmra.mrb[28].mxu1 %vm107_vm0, %v99_v3 }
  0x47   :  { %7378 = vmatprep.mubr.msk.f32.mxu0 %vm107_vm0, %v68_v2  ;;  %7426 = vmatprep.mubr.msk.f32.mxu1 %vm107_vm0, %v100_v4 }
  0x4a   :  { %7379 = vmatmul.mubr.msk.f32.gmra.mrb[30].mxu0 %vm107_vm0, %v69_v5  ;;  %7427 = vmatmul.mubr.msk.f32.gmra.mrb[30].mxu1 %vm107_vm0, %v101_v6 }
  0xe1   :  { %v8090_v7 = vpop.f32.mrb[0].mxu0  ;;  %v8098_v11 = vpop.f32.mrb[0].mxu1 }
  0xe2   :  { %v693_v8 = vsel %vm691_vm2, %v8090_v7, 0.0  ;;  %v826_v9 = vmul.f32 %v8090_v7, %v8090_v7  ;;  %v8096_v10 = vpop.f32.mrb[1].mxu0  ;;  %v8104_v14 = vpop.f32.mrb[1].mxu1 }
  0xe3   :  { %v692_v12 = vsel %vm691_vm2, %v8096_v10, 0.0  ;;  %v825_v13 = vmul.f32 %v8096_v10, %v8096_v10 }
  0xe4   :  { %v890_v15 = vsel %vm691_vm2, %v826_v9, 0.0  ;;  %v694_v16 = vadd.f32 %v693_v8, %v692_v12 }
  0xe5   :  { %v889_v17 = vsel %vm691_vm2, %v825_v13, 0.0  ;;  %v8108_v18 = vpop.f32.mrb[2].mxu0  ;;  %v8112_v21 = vpop.f32.mrb[2].mxu1 }
  0xe6   :  { %v891_v19 = vadd.f32 %v890_v15, %v889_v17  ;;  %v8110_v20 = vpop.f32.mrb[3].mxu0  ;;  %v828_v22 = vmul.f32 %v8108_v18, %v8108_v18  ;;  %v8120_v25 = vpop.f32.mrb[3].mxu1  ;;  %v697_v27 = vsel %vm691_vm2, %v8108_v18, 0.0 }
  0xe7   :  { %v695_v23 = vsel %vm691_vm2, %v8110_v20, 0.0  ;;  %v827_v24 = vmul.f32 %v8110_v20, %v8110_v20 }
  0xe8   :  { %v696_v26 = vadd.f32 %v695_v23, %v694_v16  ;;  %v894_v34 = vsel %vm691_vm2, %v828_v22, 0.0 }
  0xe9   :  { %v892_v28 = vsel %vm691_vm2, %v827_v24, 0.0  ;;  %v8125_v29 = vpop.f32.mrb[4].mxu0  ;;  %v8129_v33 = vpop.f32.mrb[4].mxu1 }
  0xea   :  { %v698_v30 = vadd.f32 %v697_v27, %v696_v26  ;;  %v893_v31 = vadd.f32 %v892_v28, %v891_v19  ;;  %v8127_v32 = vpop.f32.mrb[5].mxu0  ;;  %v830_v35 = vmul.f32 %v8125_v29, %v8125_v29  ;;  %v8138_v38 = vpop.f32.mrb[5].mxu1  ;;  %v701_v41 = vsel %vm691_vm2, %v8125_v29, 0.0 }
  0xeb   :  { %v699_v36 = vsel %vm691_vm2, %v8127_v32, 0.0  ;;  %v829_v37 = vmul.f32 %v8127_v32, %v8127_v32 }
  0xec   :  { %v895_v39 = vadd.f32 %v894_v34, %v893_v31  ;;  %v700_v40 = vadd.f32 %v699_v36, %v698_v30  ;;  %v898_v48 = vsel %vm691_vm2, %v830_v35, 0.0 }
  0xed   :  { %v896_v42 = vsel %vm691_vm2, %v829_v37, 0.0  ;;  %v8143_v43 = vpop.f32.mrb[6].mxu0  ;;  %v8147_v47 = vpop.f32.mrb[6].mxu1 }
  0xee   :  { %v897_v44 = vadd.f32 %v896_v42, %v895_v39  ;;  %v8145_v45 = vpop.f32.mrb[7].mxu0  ;;  %v702_v46 = vadd.f32 %v701_v41, %v700_v40  ;;  %v832_v49 = vmul.f32 %v8143_v43, %v8143_v43  ;;  %v8156_v52 = vpop.f32.mrb[7].mxu1  ;;  %v705_v55 = vsel %vm691_vm2, %v8143_v43, 0.0 }
  0xef   :  { %v703_v50 = vsel %vm691_vm2, %v8145_v45, 0.0  ;;  %v831_v51 = vmul.f32 %v8145_v45, %v8145_v45  ;;  %14541 = vst [vmem:[#allocation3_spill] sm:$0xff] %v8156_v52 }
  0xf0   :  { %v704_v53 = vadd.f32 %v703_v50, %v702_v46  ;;  %v899_v54 = vadd.f32 %v898_v48, %v897_v44  ;;  %v902_v62 = vsel %vm691_vm2, %v832_v49, 0.0 }
  0xf1   :  { %v900_v56 = vsel %vm691_vm2, %v831_v51, 0.0  ;;  %v8161_v57 = vpop.f32.mrb[8].mxu0  ;;  %v8165_v61 = vpop.f32.mrb[8].mxu1 }
  0xf2   :  { %v901_v58 = vadd.f32 %v900_v56, %v899_v54  ;;  %v8163_v59 = vpop.f32.mrb[9].mxu0  ;;  %v706_v60 = vadd.f32 %v705_v55, %v704_v53  ;;  %v834_v63 = vmul.f32 %v8161_v57, %v8161_v57  ;;  %v8174_v2 = vpop.f32.mrb[9].mxu1  ;;  %v709_v5 = vsel %vm691_vm2, %v8161_v57, 0.0 }
  0xf3   :  { %v707_v0 = vsel %vm691_vm2, %v8163_v59, 0.0  ;;  %v833_v1 = vmul.f32 %v8163_v59, %v8163_v59 }
  0xf4   :  { %v708_v3 = vadd.f32 %v707_v0, %v706_v60  ;;  %v903_v4 = vadd.f32 %v902_v62, %v901_v58  ;;  %v906_v16 = vsel %vm691_vm2, %v834_v63, 0.0 }
  0xf5   :  { %v904_v6 = vsel %vm691_vm2, %v833_v1, 0.0  ;;  %v8179_v8 = vpop.f32.mrb[10].mxu0  ;;  %v8183_v15 = vpop.f32.mrb[10].mxu1 }
  0xf6   :  { %v905_v9 = vadd.f32 %v904_v6, %v903_v4  ;;  %v8181_v12 = vpop.f32.mrb[11].mxu0  ;;  %v710_v13 = vadd.f32 %v709_v5, %v708_v3  ;;  %v836_v17 = vmul.f32 %v8179_v8, %v8179_v8  ;;  %v8192_v23 = vpop.f32.mrb[11].mxu1  ;;  %v713_v27 = vsel %vm691_vm2, %v8179_v8, 0.0 }
  0xf7   :  { %v711_v19 = vsel %vm691_vm2, %v8181_v12, 0.0  ;;  %v835_v22 = vmul.f32 %v8181_v12, %v8181_v12 }
  0xf8   :  { %v712_v24 = vadd.f32 %v711_v19, %v710_v13  ;;  %v907_v26 = vadd.f32 %v906_v16, %v905_v9  ;;  %v910_v37 = vsel %vm691_vm2, %v836_v17, 0.0 }
  0xf9   :  { %v908_v28 = vsel %vm691_vm2, %v835_v22, 0.0  ;;  %v8197_v30 = vpop.f32.mrb[12].mxu0  ;;  %v8201_v36 = vpop.f32.mrb[12].mxu1 }
  0xfa   :  { %v909_v31 = vadd.f32 %v908_v28, %v907_v26  ;;  %v8199_v34 = vpop.f32.mrb[13].mxu0  ;;  %v714_v35 = vadd.f32 %v713_v27, %v712_v24  ;;  %v838_v39 = vmul.f32 %v8197_v30, %v8197_v30  ;;  %v8210_v42 = vpop.f32.mrb[13].mxu1  ;;  %v717_v48 = vsel %vm691_vm2, %v8197_v30, 0.0 }
  0xfb   :  { %v715_v40 = vsel %vm691_vm2, %v8199_v34, 0.0  ;;  %v837_v41 = vmul.f32 %v8199_v34, %v8199_v34 }
  0xfc   :  { %v716_v44 = vadd.f32 %v715_v40, %v714_v35  ;;  %v911_v46 = vadd.f32 %v910_v37, %v909_v31  ;;  %v914_v56 = vsel %vm691_vm2, %v838_v39, 0.0 }
  0xfd   :  { %v912_v49 = vsel %vm691_vm2, %v837_v41, 0.0  ;;  %v8215_v50 = vpop.f32.mrb[14].mxu0  ;;  %v8219_v55 = vpop.f32.mrb[14].mxu1 }
  0xfe   :  { %14542 = vst [vmem:[#allocation4_spill] sm:$0xff] %v8215_v50  ;;  %v913_v51 = vadd.f32 %v912_v49, %v911_v46  ;;  %v8217_v53 = vpop.f32.mrb[15].mxu0  ;;  %v718_v54 = vadd.f32 %v717_v48, %v716_v44  ;;  %v840_v58 = vmul.f32 %v8215_v50, %v8215_v50  ;;  %v8228_v63 = vpop.f32.mrb[15].mxu1  ;;  %v721_v3 = vsel %vm691_vm2, %v8215_v50, 0.0 }
  0xff   :  { %14543 = vst [vmem:[#allocation5_spill] sm:$0xff] %v8217_v53  ;;  %v719_v60 = vsel %vm691_vm2, %v8217_v53, 0.0  ;;  %v839_v62 = vmul.f32 %v8217_v53, %v8217_v53 }
 0x100   :  { %v720_v0 = vadd.f32 %v719_v60, %v718_v54  ;;  %v915_v1 = vadd.f32 %v914_v56, %v913_v51  ;;  %v918_v17 = vsel %vm691_vm2, %v840_v58, 0.0 }
 0x101   :  { %v916_v4 = vsel %vm691_vm2, %v839_v62, 0.0  ;;  %v8233_v5 = vpop.f32.mrb[16].mxu0  ;;  %v8237_v16 = vpop.f32.mrb[16].mxu1 }
 0x102   :  { %14544 = vst [vmem:[#allocation6_spill] sm:$0xff] %v8233_v5  ;;  %v917_v6 = vadd.f32 %v916_v4, %v915_v1  ;;  %v8235_v9 = vpop.f32.mrb[17].mxu0  ;;  %v722_v13 = vadd.f32 %v721_v3, %v720_v0  ;;  %v842_v19 = vmul.f32 %v8233_v5, %v8233_v5  ;;  %v8246_v26 = vpop.f32.mrb[17].mxu1  ;;  %v725_v31 = vsel %vm691_vm2, %v8233_v5, 0.0 }
 0x103   :  { %14545 = vst [vmem:[#allocation7_spill] sm:$0xff] %v8235_v9  ;;  %v723_v22 = vsel %vm691_vm2, %v8235_v9, 0.0  ;;  %v841_v24 = vmul.f32 %v8235_v9, %v8235_v9  ;;  %v857_v5 = vmul.f32 %v8104_v14, %v8104_v14 }
 0x104   :  { %v724_v27 = vadd.f32 %v723_v22, %v722_v13  ;;  %v919_v28 = vadd.f32 %v918_v17, %v917_v6  ;;  %v922_v46 = vsel %vm691_vm2, %v842_v19, 0.0 }
 0x105   :  { %v920_v35 = vsel %vm691_vm2, %v841_v24, 0.0  ;;  %v8251_v37 = vpop.f32.mrb[18].mxu0  ;;  %v8255_v44 = vpop.f32.mrb[18].mxu1 }
 0x106   :  { %14546 = vst [vmem:[#allocation8_spill] sm:$0xff] %v8251_v37  ;;  %v921_v39 = vadd.f32 %v920_v35, %v919_v28  ;;  %v8253_v40 = vpop.f32.mrb[19].mxu0  ;;  %v726_v41 = vadd.f32 %v725_v31, %v724_v27  ;;  %v844_v48 = vmul.f32 %v8251_v37, %v8251_v37  ;;  %v8264_v54 = vpop.f32.mrb[19].mxu1  ;;  %v729_v60 = vsel %vm691_vm2, %v8251_v37, 0.0 }
 0x107   :  { %14547 = vst [vmem:[#allocation9_spill] sm:$0xff] %v8253_v40  ;;  %v727_v49 = vsel %vm691_vm2, %v8253_v40, 0.0  ;;  %v843_v51 = vmul.f32 %v8253_v40, %v8253_v40 }
 0x108   :  { %v728_v56 = vadd.f32 %v727_v49, %v726_v41  ;;  %v923_v58 = vadd.f32 %v922_v46, %v921_v39  ;;  %v926_v13 = vsel %vm691_vm2, %v844_v48, 0.0 }
 0x109   :  { %v924_v62 = vsel %vm691_vm2, %v843_v51, 0.0  ;;  %v8269_v0 = vpop.f32.mrb[20].mxu0  ;;  %v8273_v6 = vpop.f32.mrb[20].mxu1 }
 0x10a   :  { %14548 = vst [vmem:[#allocation10_spill] sm:$0xff] %v8269_v0  ;;  %v925_v1 = vadd.f32 %v924_v62, %v923_v58  ;;  %v8271_v3 = vpop.f32.mrb[21].mxu0  ;;  %v730_v4 = vadd.f32 %v729_v60, %v728_v56  ;;  %v846_v17 = vmul.f32 %v8269_v0, %v8269_v0  ;;  %v8282_v24 = vpop.f32.mrb[21].mxu1  ;;  %v733_v31 = vsel %vm691_vm2, %v8269_v0, 0.0 }
 0x10b   :  { %14549 = vst [vmem:[#allocation11_spill] sm:$0xff] %v8271_v3  ;;  %v731_v19 = vsel %vm691_vm2, %v8271_v3, 0.0  ;;  %v845_v22 = vmul.f32 %v8271_v3, %v8271_v3 }
 0x10c   :  { %v732_v27 = vadd.f32 %v731_v19, %v730_v4  ;;  %v927_v28 = vadd.f32 %v926_v13, %v925_v1  ;;  %v930_v51 = vsel %vm691_vm2, %v846_v17, 0.0 }
 0x10d   :  { %v928_v35 = vsel %vm691_vm2, %v845_v22, 0.0  ;;  %v8287_v39 = vpop.f32.mrb[22].mxu0  ;;  %v8291_v49 = vpop.f32.mrb[22].mxu1 }
 0x10e   :  { %14550 = vst [vmem:[#allocation12_spill] sm:$0xff] %v8287_v39  ;;  %v929_v41 = vadd.f32 %v928_v35, %v927_v28  ;;  %v8289_v46 = vpop.f32.mrb[23].mxu0  ;;  %v734_v48 = vadd.f32 %v733_v31, %v732_v27  ;;  %v848_v56 = vmul.f32 %v8287_v39, %v8287_v39  ;;  %v8300_v62 = vpop.f32.mrb[23].mxu1  ;;  %v737_v13 = vsel %vm691_vm2, %v8287_v39, 0.0 }
 0x10f   :  { %14551 = vst [vmem:[#allocation13_spill] sm:$0xff] %v8289_v46  ;;  %v735_v58 = vsel %vm691_vm2, %v8289_v46, 0.0  ;;  %v847_v60 = vmul.f32 %v8289_v46, %v8289_v46 }
 0x110   :  { %v736_v1 = vadd.f32 %v735_v58, %v734_v48  ;;  %v931_v4 = vadd.f32 %v930_v51, %v929_v41  ;;  %v934_v35 = vsel %vm691_vm2, %v848_v56, 0.0 }
 0x111   :  { %v932_v19 = vsel %vm691_vm2, %v847_v60, 0.0  ;;  %v8305_v22 = vpop.f32.mrb[24].mxu0  ;;  %v8309_v31 = vpop.f32.mrb[24].mxu1 }
 0x112   :  { %14552 = vst [vmem:[#allocation14_spill] sm:$0xff] %v8305_v22  ;;  %v933_v17 = vadd.f32 %v932_v19, %v931_v4  ;;  %v8307_v27 = vpop.f32.mrb[25].mxu0  ;;  %v738_v28 = vadd.f32 %v737_v13, %v736_v1  ;;  %14554 = vst [vmem:[#allocation16_spill] sm:$0xff] %v8309_v31  ;;  %v850_v46 = vmul.f32 %v8305_v22, %v8305_v22  ;;  %v8318_v51 = vpop.f32.mrb[25].mxu1  ;;  %v741_v1 = vsel %vm691_vm2, %v8305_v22, 0.0 }
 0x113   :  { %14553 = vst [vmem:[#allocation15_spill] sm:$0xff] %v8307_v27  ;;  %v739_v41 = vsel %vm691_vm2, %v8307_v27, 0.0  ;;  %v849_v48 = vmul.f32 %v8307_v27, %v8307_v27 }
 0x114   :  { %v740_v58 = vadd.f32 %v739_v41, %v738_v28  ;;  %v935_v60 = vadd.f32 %v934_v35, %v933_v17  ;;  %v938_v3 = vsel %vm691_vm2, %v850_v46, 0.0 }
 0x115   :  { %v936_v4 = vsel %vm691_vm2, %v849_v48, 0.0  ;;  %v8323_v13 = vpop.f32.mrb[26].mxu0  ;;  %v8327_v0 = vpop.f32.mrb[26].mxu1 }
 0x116   :  { %14555 = vst [vmem:[#allocation17_spill] sm:$0xff] %v8323_v13  ;;  %v937_v56 = vadd.f32 %v936_v4, %v935_v60  ;;  %v8325_v19 = vpop.f32.mrb[27].mxu0  ;;  %v742_v39 = vadd.f32 %v741_v1, %v740_v58  ;;  %14557 = vst [vmem:[#allocation19_spill] sm:$0xff] %v8327_v0  ;;  %v852_v27 = vmul.f32 %v8323_v13, %v8323_v13  ;;  %v8336_v35 = vpop.f32.mrb[27].mxu1  ;;  %v745_v58 = vsel %vm691_vm2, %v8323_v13, 0.0 }
 0x117   :  { %14556 = vst [vmem:[#allocation18_spill] sm:$0xff] %v8325_v19  ;;  %v743_v17 = vsel %vm691_vm2, %v8325_v19, 0.0  ;;  %v851_v28 = vmul.f32 %v8325_v19, %v8325_v19  ;;  %14558 = vst [vmem:[#allocation20_spill] sm:$0xff] %v8336_v35 }
 0x118   :  { %v744_v41 = vadd.f32 %v743_v17, %v742_v39  ;;  %v939_v48 = vadd.f32 %v938_v3, %v937_v56  ;;  %v942_v40 = vsel %vm691_vm2, %v852_v27, 0.0 }
 0x119   :  { %v940_v60 = vsel %vm691_vm2, %v851_v28, 0.0  ;;  %v8341_v1 = vpop.f32.mrb[28].mxu0  ;;  %v8345_v37 = vpop.f32.mrb[28].mxu1 }
 0x11a   :  { %14559 = vst [vmem:[#allocation21_spill] sm:$0xff] %v8341_v1  ;;  %v941_v46 = vadd.f32 %v940_v60, %v939_v48  ;;  %v8343_v4 = vpop.f32.mrb[29].mxu0  ;;  %v746_v22 = vadd.f32 %v745_v58, %v744_v41  ;;  %14561 = vst [vmem:[#allocation23_spill] sm:$0xff] %v8345_v37  ;;  %v854_v19 = vmul.f32 %v8341_v1, %v8341_v1  ;;  %v8354_v56 = vpop.f32.mrb[29].mxu1  ;;  %v749_v41 = vsel %vm691_vm2, %v8341_v1, 0.0 }
 0x11b   :  { %14560 = vst [vmem:[#allocation22_spill] sm:$0xff] %v8343_v4  ;;  %v747_v3 = vsel %vm691_vm2, %v8343_v4, 0.0  ;;  %v853_v39 = vmul.f32 %v8343_v4, %v8343_v4  ;;  %14562 = vst [vmem:[#allocation24_spill] sm:$0xff] %v8354_v56  ;;  %v858_v1 = vmul.f32 %v8098_v11, %v8098_v11 }
 0x11c   :  { %v748_v17 = vadd.f32 %v747_v3, %v746_v22  ;;  %v943_v28 = vadd.f32 %v942_v40, %v941_v46  ;;  %v946_v4 = vsel %vm691_vm2, %v854_v19, 0.0  ;;  %v755_v19 = vsel %vm691_vm2, %v8104_v14, 0.0 }
 0x11d   :  { %v944_v48 = vsel %vm691_vm2, %v853_v39, 0.0  ;;  %v8359_v58 = vpop.f32.mrb[30].mxu0  ;;  %v8365_v9 = vpop.f32.mrb[30].mxu1 }
 0x11e   :  { %v945_v27 = vadd.f32 %v944_v48, %v943_v28  ;;  %v8361_v60 = vpop.f32.mrb[31].mxu0  ;;  %v750_v13 = vadd.f32 %v749_v41, %v748_v17  ;;  %14564 = vst [vmem:[#allocation26_spill] sm:$0xff] %v8365_v9  ;;  %v856_v40 = vmul.f32 %v8359_v58, %v8359_v58  ;;  %v8374_v3 = vpop.f32.mrb[31].mxu1  ;;  %v753_v28 = vsel %vm691_vm2, %v8359_v58, 0.0 }
 0x11f   :  { %14563 = vst [vmem:[#allocation25_spill] sm:$0xff] %v8361_v60  ;;  %v751_v22 = vsel %vm691_vm2, %v8361_v60, 0.0  ;;  %v855_v46 = vmul.f32 %v8361_v60, %v8361_v60  ;;  %v952_v60 = vsel %vm691_vm2, %v857_v5, 0.0 }
 0x120   :  { %v752_v39 = vadd.f32 %v751_v22, %v750_v13  ;;  %v947_v17 = vadd.f32 %v946_v4, %v945_v27  ;;  %v950_v53 = vsel %vm691_vm2, %v856_v40, 0.0  ;;  %v859_v13 = vmul.f32 %v8120_v25, %v8120_v25 }
 0x121   :  { %v948_v41 = vsel %vm691_vm2, %v855_v46, 0.0  ;;  %v7746_v4 = vmov 0.0   ;;  %v757_v40 = vsel %vm691_vm2, %v8098_v11, 0.0  ;;  %v759_v22 = vsel %vm691_vm2, %v8120_v25, 0.0 }
 0x122   :  { %v949_v48 = vadd.f32 %v948_v41, %v947_v17  ;;  %v754_v50 = vadd.f32 %v753_v28, %v752_v39  ;;  %1235 = vst.msk [vmem:[#allocation2] sm:$0xff] %vm691_vm2, %v7746_v4  ;;  %1236 = vst.msk [vmem:[#allocation2 + $0x8] sm:$0xff] %vm691_vm2, %v7746_v4  ;;  %v954_v17 = vsel %vm691_vm2, %v858_v1, 0.0  ;;  %v8419_v28 = vmul.f32 %v8138_v38, %v8138_v38 }
 0x123   :  { %1239 = vst.msk [vmem:[#allocation2 + $0x1b0] sm:$0xff] %vm691_vm2, %v7746_v4  ;;  %1240 = vst.msk [vmem:[#allocation2 + $0x1b8] sm:$0xff] %vm691_vm2, %v7746_v4 }
 0x124   :  { %1243 = vst.msk [vmem:[#allocation2 + $0x198] sm:$0xff] %vm691_vm2, %v7746_v4  ;;  %1244 = vst.msk [vmem:[#allocation2 + $0x1a0] sm:$0xff] %vm691_vm2, %v7746_v4  ;;  %v756_v5 = vadd.f32 %v755_v19, %v754_v50  ;;  %v951_v27 = vadd.f32 %v950_v53, %v949_v48  ;;  %v8414_v50 = vmul.f32 %v8112_v21, %v8112_v21  ;;  %v956_v53 = vsel %vm691_vm2, %v859_v13, 0.0 }
 0x125   :  { %1246 = vst.msk [vmem:[#allocation2 + $0x348] sm:$0xff] %vm691_vm2, %v7746_v4  ;;  %1247 = vst.msk [vmem:[#allocation2 + $0x350] sm:$0xff] %vm691_vm2, %v7746_v4  ;;  %v761_v48 = vsel %vm691_vm2, %v8112_v21, 0.0 }
 0x126   :  { %1238 = vst.msk [vmem:[#allocation2 + $0x10] sm:$0x3] %vm1237_vm3, %v7746_v4  ;;  %1241 = vst.msk [vmem:[#allocation2 + $0x1c0] sm:$0x3] %vm1237_vm3, %v7746_v4  ;;  %v953_v46 = vadd.f32 %v952_v60, %v951_v27  ;;  %v758_v39 = vadd.f32 %v757_v40, %v756_v5  ;;  %v8425_v60 = vsel %vm691_vm2, %v8138_v38, 0.0  ;;  %v958_v13 = vsel %vm691_vm2, %v8414_v50, 0.0 }
 0x127   :  { %1245 = vst.msk [vmem:[#allocation2 + $0x1a8] sm:$0x3] %vm1237_vm3, %v7746_v4  ;;  %1248 = vst.msk [vmem:[#allocation2 + $0x358] sm:$0x3] %vm1237_vm3, %v7746_v4  ;;  %v862_v40 = vmul.f32 %v8129_v33, %v8129_v33  ;;  %v765_v50 = vsel %vm691_vm2, %v8129_v33, 0.0 }
 0x128   :  { %v760_v41 = vadd.f32 %v759_v22, %v758_v39  ;;  %v955_v19 = vadd.f32 %v954_v17, %v953_v46  ;;  %1286 = vst.msk [vmem:[#allocation2 + $0x11] sm:$0x1] %vm1249_vm4, %v7746_v4  ;;  %1250 = vst.msk [vmem:[#allocation2] sm:$0x1] %vm1249_vm4, %v7746_v4  ;;  %v960_v22 = vsel %vm691_vm2, %v8419_v28, 0.0  ;;  %v863_v46 = vmul.f32 %v8156_v52, %v8156_v52 }
 0x129   :  { %v8431_v27 = vld [vmem:[#allocation2 + $0x1] sm:$0xff]  ;;  %1251 = vst.msk [vmem:[#allocation2 + $0x18] sm:$0x1] %vm1249_vm4, %v7746_v4  ;;  %1252 = vst.msk [vmem:[#allocation2 + $0x30] sm:$0x1] %vm1249_vm4, %v7746_v4 }
 0x12a   :  { %v8427_v1 = vadd.f32 %v956_v53, %v955_v19  ;;  %v8429_v5 = vadd.f32 %v761_v48, %v760_v41  ;;  %1253 = vst.msk [vmem:[#allocation2 + $0x48] sm:$0x1] %vm1249_vm4, %v7746_v4  ;;  %1254 = vst.msk [vmem:[#allocation2 + $0x60] sm:$0x1] %vm1249_vm4, %v7746_v4  ;;  %2028 = vrot.lane.b32.xlu0 %v8431_v27, %s7747_s0  ;;  %v767_v53 = vsel %vm691_vm2, %v8156_v52, 0.0  ;;  %v962_v48 = vsel %vm691_vm2, %v862_v40, 0.0 }
 0x12b   :  { %1255 = vst.msk [vmem:[#allocation2 + $0x78] sm:$0x1] %vm1249_vm4, %v7746_v4  ;;  %1256 = vst.msk [vmem:[#allocation2 + $0x90] sm:$0x1] %vm1249_vm4, %v7746_v4  ;;  %v864_v27 = vmul.f32 %v8147_v47, %v8147_v47  ;;  %v1483_v52 = vld [vmem:[#allocation2 + $0x1b1] sm:$0xff] }
 0x12c   :  { %1257 = vst.msk [vmem:[#allocation2 + $0xa8] sm:$0x1] %vm1249_vm4, %v7746_v4  ;;  %1258 = vst.msk [vmem:[#allocation2 + $0xc0] sm:$0x1] %vm1249_vm4, %v7746_v4  ;;  %v764_v39 = vadd.f32 %v8425_v60, %v8429_v5  ;;  %v964_v60 = vsel %vm691_vm2, %v863_v46, 0.0 }
 0x12d   :  { %1259 = vst.msk [vmem:[#allocation2 + $0xd8] sm:$0x1] %vm1249_vm4, %v7746_v4  ;;  %1260 = vst.msk [vmem:[#allocation2 + $0xf0] sm:$0x1] %vm1249_vm4, %v7746_v4  ;;  %v1452_v17 = vld [vmem:[#allocation2 + $0x9] sm:$0xff]  ;;  %v1484_v28 = vld [vmem:[#allocation2 + $0x1b9] sm:$0xff] }
 0x12e   :  { %1261 = vst.msk [vmem:[#allocation2 + $0x108] sm:$0x1] %vm1249_vm4, %v7746_v4  ;;  %1262 = vst.msk [vmem:[#allocation2 + $0x120] sm:$0x1] %vm1249_vm4, %v7746_v4  ;;  %v766_v19 = vadd.f32 %v765_v50, %v764_v39  ;;  %2094 = vrot.lane.b32.xlu1 %v1484_v28, %s7747_s0  ;;  %2030 = vrot.lane.b32.xlu0 %v1452_v17, %s7747_s0  ;;  %v771_v39 = vsel %vm691_vm2, %v8174_v2, 0.0  ;;  %v966_v46 = vsel %vm691_vm2, %v864_v27, 0.0 }
 0x12f   :  { %1263 = vst.msk [vmem:[#allocation2 + $0x138] sm:$0x1] %vm1249_vm4, %v7746_v4  ;;  %1264 = vst.msk [vmem:[#allocation2 + $0x150] sm:$0x1] %vm1249_vm4, %v7746_v4  ;;  %v1516_v40 = vld [vmem:[#allocation2 + $0xa] sm:$0xff]  ;;  %v866_v17 = vmul.f32 %v8165_v61, %v8165_v61  ;;  %v867_v28 = vmul.f32 %v8192_v23, %v8192_v23 }
 0x130   :  { %1265 = vst.msk [vmem:[#allocation2 + $0x168] sm:$0x1] %vm1249_vm4, %v7746_v4  ;;  %1266 = vst.msk [vmem:[#allocation2 + $0x180] sm:$0x1] %vm1249_vm4, %v7746_v4  ;;  %v768_v5 = vadd.f32 %v767_v53, %v766_v19 }
 0x131   :  { %1267 = vst.msk [vmem:[#allocation2 + $0x198] sm:$0x1] %vm1249_vm4, %v7746_v4  ;;  %1268 = vst.msk [vmem:[#allocation2 + $0x1b0] sm:$0x1] %vm1249_vm4, %v7746_v4 }
 0x132   :  { %1269 = vst.msk [vmem:[#allocation2 + $0x1c8] sm:$0x1] %vm1249_vm4, %v7746_v4  ;;  %1270 = vst.msk [vmem:[#allocation2 + $0x1e0] sm:$0x1] %vm1249_vm4, %v7746_v4  ;;  %2286 = vrot.lane.b32.xlu1 %v1516_v40, %s7748_s15  ;;  %2092 = vrot.lane.b32.xlu0 %v1483_v52, %s7747_s0  ;;  %v868_v40 = vmul.f32 %v8183_v15, %v8183_v15  ;;  %v972_v52 = vsel %vm691_vm2, %v867_v28, 0.0  ;;  %v870_v28 = vmul.f32 %v8201_v36, %v8201_v36 }
 0x133   :  { %1271 = vst.msk [vmem:[#allocation2 + $0x1f8] sm:$0x1] %vm1249_vm4, %v7746_v4  ;;  %1272 = vst.msk [vmem:[#allocation2 + $0x210] sm:$0x1] %vm1249_vm4, %v7746_v4 }
 0x134   :  { %1273 = vst.msk [vmem:[#allocation2 + $0x228] sm:$0x1] %vm1249_vm4, %v7746_v4  ;;  %1274 = vst.msk [vmem:[#allocation2 + $0x240] sm:$0x1] %vm1249_vm4, %v7746_v4 }
 0x135   :  { %1275 = vst.msk [vmem:[#allocation2 + $0x258] sm:$0x1] %vm1249_vm4, %v7746_v4  ;;  %1276 = vst.msk [vmem:[#allocation2 + $0x270] sm:$0x1] %vm1249_vm4, %v7746_v4 }
 0x136   :  { %1277 = vst.msk [vmem:[#allocation2 + $0x288] sm:$0x1] %vm1249_vm4, %v7746_v4  ;;  %1278 = vst.msk [vmem:[#allocation2 + $0x2a0] sm:$0x1] %vm1249_vm4, %v7746_v4 }
 0x137   :  { %1279 = vst.msk [vmem:[#allocation2 + $0x2b8] sm:$0x1] %vm1249_vm4, %v7746_v4  ;;  %1280 = vst.msk [vmem:[#allocation2 + $0x2d0] sm:$0x1] %vm1249_vm4, %v7746_v4 }
 0x138   :  { %1281 = vst.msk [vmem:[#allocation2 + $0x2e8] sm:$0x1] %vm1249_vm4, %v7746_v4  ;;  %1282 = vst.msk [vmem:[#allocation2 + $0x300] sm:$0x1] %vm1249_vm4, %v7746_v4 }
 0x139   :  { %1283 = vst.msk [vmem:[#allocation2 + $0x318] sm:$0x1] %vm1249_vm4, %v7746_v4  ;;  %1284 = vst.msk [vmem:[#allocation2 + $0x330] sm:$0x1] %vm1249_vm4, %v7746_v4 }
 0x13a   :  { %1285 = vst.msk [vmem:[#allocation2 + $0x348] sm:$0x1] %vm1249_vm4, %v7746_v4  ;;  %1287 = vst.msk [vmem:[#allocation2 + $0x29] sm:$0x1] %vm1249_vm4, %v7746_v4 }
 0x13b   :  { %1288 = vst.msk [vmem:[#allocation2 + $0x41] sm:$0x1] %vm1249_vm4, %v7746_v4  ;;  %1289 = vst.msk [vmem:[#allocation2 + $0x59] sm:$0x1] %vm1249_vm4, %v7746_v4 }
 0x13c   :  { %1290 = vst.msk [vmem:[#allocation2 + $0x71] sm:$0x1] %vm1249_vm4, %v7746_v4  ;;  %1291 = vst.msk [vmem:[#allocation2 + $0x89] sm:$0x1] %vm1249_vm4, %v7746_v4 }
 0x13d   :  { %1292 = vst.msk [vmem:[#allocation2 + $0xa1] sm:$0x1] %vm1249_vm4, %v7746_v4  ;;  %1293 = vst.msk [vmem:[#allocation2 + $0xb9] sm:$0x1] %vm1249_vm4, %v7746_v4 }
 0x13e   :  { %1294 = vst.msk [vmem:[#allocation2 + $0xd1] sm:$0x1] %vm1249_vm4, %v7746_v4  ;;  %1295 = vst.msk [vmem:[#allocation2 + $0xe9] sm:$0x1] %vm1249_vm4, %v7746_v4 }
 0x13f   :  { %1296 = vst.msk [vmem:[#allocation2 + $0x101] sm:$0x1] %vm1249_vm4, %v7746_v4  ;;  %1297 = vst.msk [vmem:[#allocation2 + $0x119] sm:$0x1] %vm1249_vm4, %v7746_v4 }
 0x140   :  { %1298 = vst.msk [vmem:[#allocation2 + $0x131] sm:$0x1] %vm1249_vm4, %v7746_v4  ;;  %1299 = vst.msk [vmem:[#allocation2 + $0x149] sm:$0x1] %vm1249_vm4, %v7746_v4 }
 0x141   :  { %1300 = vst.msk [vmem:[#allocation2 + $0x161] sm:$0x1] %vm1249_vm4, %v7746_v4  ;;  %1301 = vst.msk [vmem:[#allocation2 + $0x179] sm:$0x1] %vm1249_vm4, %v7746_v4 }
 0x142   :  { %1302 = vst.msk [vmem:[#allocation2 + $0x191] sm:$0x1] %vm1249_vm4, %v7746_v4  ;;  %1303 = vst.msk [vmem:[#allocation2 + $0x1a9] sm:$0x1] %vm1249_vm4, %v7746_v4 }
 0x143   :  { %1304 = vst.msk [vmem:[#allocation2 + $0x1c1] sm:$0x1] %vm1249_vm4, %v7746_v4  ;;  %1305 = vst.msk [vmem:[#allocation2 + $0x1d9] sm:$0x1] %vm1249_vm4, %v7746_v4 }
 0x144   :  { %1306 = vst.msk [vmem:[#allocation2 + $0x1f1] sm:$0x1] %vm1249_vm4, %v7746_v4  ;;  %1307 = vst.msk [vmem:[#allocation2 + $0x209] sm:$0x1] %vm1249_vm4, %v7746_v4 }
 0x145   :  { %1308 = vst.msk [vmem:[#allocation2 + $0x221] sm:$0x1] %vm1249_vm4, %v7746_v4  ;;  %1309 = vst.msk [vmem:[#allocation2 + $0x239] sm:$0x1] %vm1249_vm4, %v7746_v4 }
 0x146   :  { %1310 = vst.msk [vmem:[#allocation2 + $0x251] sm:$0x1] %vm1249_vm4, %v7746_v4  ;;  %1311 = vst.msk [vmem:[#allocation2 + $0x269] sm:$0x1] %vm1249_vm4, %v7746_v4 }
 0x147   :  { %1312 = vst.msk [vmem:[#allocation2 + $0x281] sm:$0x1] %vm1249_vm4, %v7746_v4  ;;  %1313 = vst.msk [vmem:[#allocation2 + $0x299] sm:$0x1] %vm1249_vm4, %v7746_v4 }
 0x148   :  { %1314 = vst.msk [vmem:[#allocation2 + $0x2b1] sm:$0x1] %vm1249_vm4, %v7746_v4  ;;  %1315 = vst.msk [vmem:[#allocation2 + $0x2c9] sm:$0x1] %vm1249_vm4, %v7746_v4 }
 0x149   :  { %1316 = vst.msk [vmem:[#allocation2 + $0x2e1] sm:$0x1] %vm1249_vm4, %v7746_v4  ;;  %1317 = vst.msk [vmem:[#allocation2 + $0x2f9] sm:$0x1] %vm1249_vm4, %v7746_v4 }
 0x14a   :  { %1318 = vst.msk [vmem:[#allocation2 + $0x311] sm:$0x1] %vm1249_vm4, %v7746_v4  ;;  %1319 = vst.msk [vmem:[#allocation2 + $0x329] sm:$0x1] %vm1249_vm4, %v7746_v4  ;;  %v1548_v27 = vld [vmem:[#allocation2 + $0x1ba] sm:$0xff] }
 0x14b   :  { %1320 = vst.msk [vmem:[#allocation2 + $0x341] sm:$0x1] %vm1249_vm4, %v7746_v4  ;;  %1321 = vst.msk [vmem:[#allocation2 + $0x359] sm:$0x1] %vm1249_vm4, %v7746_v4  ;;  %v959_v4 = vadd.f32 %v958_v13, %v8427_v1  ;;  %v865_v1 = vmul.f32 %v8174_v2, %v8174_v2  ;;  %2350 = vrot.lane.b32.xlu1 %v1548_v27, %s7748_s15 }
 0x14d   :  { %v961_v41 = vadd.f32 %v960_v22, %v959_v4  ;;  %v769_v22 = vsel %vm691_vm2, %v8147_v47, 0.0  ;;  %v968_v53 = vsel %vm691_vm2, %v865_v1, 0.0  ;;  %v970_v1 = vsel %vm691_vm2, %v866_v17, 0.0 }
 0x14e   :  { %v770_v50 = vadd.f32 %v769_v22, %v768_v5  ;;  %v775_v5 = vsel %vm691_vm2, %v8192_v23, 0.0 }
 0x14f   :  { %v963_v13 = vadd.f32 %v962_v48, %v961_v41  ;;  %v1515_v48 = vld [vmem:[#allocation2 + $0x2] sm:$0xff] }
 0x150   :  { %v772_v41 = vadd.f32 %v771_v39, %v770_v50  ;;  %v869_v39 = vmul.f32 %v8210_v42, %v8210_v42  ;;  %2284 = vrot.lane.b32.xlu0 %v1515_v48, %s7748_s15  ;;  %v871_v48 = vmul.f32 %v8228_v63, %v8228_v63 }
 0x151   :  { %v965_v4 = vadd.f32 %v964_v60, %v963_v13  ;;  %v773_v60 = vsel %vm691_vm2, %v8165_v61, 0.0 }
 0x152   :  { %v774_v22 = vadd.f32 %v773_v60, %v772_v41  ;;  %v1547_v41 = vld [vmem:[#allocation2 + $0x1b2] sm:$0xff]  ;;  %v974_v60 = vsel %vm691_vm2, %v868_v40, 0.0  ;;  %v976_v27 = vsel %vm691_vm2, %v869_v39, 0.0  ;;  %v872_v39 = vmul.f32 %v8219_v55, %v8219_v55 }
 0x153   :  { %v967_v19 = vadd.f32 %v966_v46, %v965_v4  ;;  %v777_v46 = vsel %vm691_vm2, %v8183_v15, 0.0 }
 0x154   :  { %v776_v4 = vadd.f32 %v775_v5, %v774_v22  ;;  %2348 = vrot.lane.b32.xlu0 %v1547_v41, %s7748_s15  ;;  %v781_v22 = vsel %vm691_vm2, %v8201_v36, 0.0 }
 0x155   :  { %v969_v13 = vadd.f32 %v968_v53, %v967_v19  ;;  %v779_v53 = vsel %vm691_vm2, %v8210_v42, 0.0 }
 0x156   :  { %v778_v19 = vadd.f32 %v777_v46, %v776_v4  ;;  %v978_v4 = vsel %vm691_vm2, %v870_v28, 0.0  ;;  %v873_v46 = vmul.f32 %v8246_v26, %v8246_v26  ;;  %v982_v28 = vsel %vm691_vm2, %v872_v39, 0.0 }
 0x157   :  { %v971_v50 = vadd.f32 %v970_v1, %v969_v13  ;;  %v783_v1 = vsel %vm691_vm2, %v8228_v63, 0.0 }
 0x158   :  { %v780_v5 = vadd.f32 %v779_v53, %v778_v19  ;;  %v787_v19 = vsel %vm691_vm2, %v8246_v26, 0.0 }
 0x159   :  { %v973_v17 = vadd.f32 %v972_v52, %v971_v50  ;;  %v980_v50 = vsel %vm691_vm2, %v871_v48, 0.0  ;;  %v984_v48 = vsel %vm691_vm2, %v873_v46, 0.0 }
 0x15a   :  { %v782_v40 = vadd.f32 %v781_v22, %v780_v5  ;;  %v874_v5 = vmul.f32 %v8237_v16, %v8237_v16 }
 0x15b   :  { %v975_v13 = vadd.f32 %v974_v60, %v973_v17  ;;  %v785_v17 = vsel %vm691_vm2, %v8219_v55, 0.0 }
 0x15c   :  { %v784_v53 = vadd.f32 %v783_v1, %v782_v40  ;;  %v791_v40 = vsel %vm691_vm2, %v8264_v54, 0.0  ;;  %v986_v39 = vsel %vm691_vm2, %v874_v5, 0.0 }
 0x15d   :  { %v977_v52 = vadd.f32 %v976_v27, %v975_v13  ;;  %v875_v13 = vmul.f32 %v8264_v54, %v8264_v54 }
 0x15e   :  { %v786_v27 = vadd.f32 %v785_v17, %v784_v53  ;;  %v876_v53 = vmul.f32 %v8255_v44, %v8255_v44 }
 0x15f   :  { %v979_v41 = vadd.f32 %v978_v4, %v977_v52  ;;  %v789_v52 = vsel %vm691_vm2, %v8237_v16, 0.0  ;;  %v988_v46 = vsel %vm691_vm2, %v875_v13, 0.0 }
 0x160   :  { %v788_v22 = vadd.f32 %v787_v19, %v786_v27  ;;  %v795_v27 = vsel %vm691_vm2, %v8282_v24, 0.0  ;;  %v990_v5 = vsel %vm691_vm2, %v876_v53, 0.0 }
 0x161   :  { %v981_v60 = vadd.f32 %v980_v50, %v979_v41  ;;  %v877_v41 = vmul.f32 %v8282_v24, %v8282_v24 }
 0x162   :  { %v790_v50 = vadd.f32 %v789_v52, %v788_v22  ;;  %v878_v22 = vmul.f32 %v8273_v6, %v8273_v6 }
 0x163   :  { %v983_v1 = vadd.f32 %v982_v28, %v981_v60  ;;  %v793_v60 = vsel %vm691_vm2, %v8255_v44, 0.0  ;;  %v992_v13 = vsel %vm691_vm2, %v877_v41, 0.0 }
 0x164   :  { %v792_v17 = vadd.f32 %v791_v40, %v790_v50  ;;  %v799_v50 = vsel %vm691_vm2, %v8300_v62, 0.0  ;;  %v994_v53 = vsel %vm691_vm2, %v878_v22, 0.0 }
 0x165   :  { %v985_v4 = vadd.f32 %v984_v48, %v983_v1  ;;  %v879_v1 = vmul.f32 %v8300_v62, %v8300_v62 }
 0x166   :  { %v794_v48 = vadd.f32 %v793_v60, %v792_v17  ;;  %v880_v17 = vmul.f32 %v8291_v49, %v8291_v49 }
 0x167   :  { %v987_v19 = vadd.f32 %v986_v39, %v985_v4  ;;  %v797_v4 = vsel %vm691_vm2, %v8273_v6, 0.0  ;;  %v996_v41 = vsel %vm691_vm2, %v879_v1, 0.0 }
 0x168   :  { %v796_v52 = vadd.f32 %v795_v27, %v794_v48  ;;  %v803_v48 = vsel %vm691_vm2, %v8318_v51, 0.0  ;;  %v998_v22 = vsel %vm691_vm2, %v880_v17, 0.0 }
 0x169   :  { %v989_v28 = vadd.f32 %v988_v46, %v987_v19  ;;  %v881_v19 = vmul.f32 %v8318_v51, %v8318_v51 }
 0x16a   :  { %v798_v46 = vadd.f32 %v797_v4, %v796_v52  ;;  %v882_v52 = vmul.f32 %v8309_v31, %v8309_v31 }
 0x16b   :  { %v991_v40 = vadd.f32 %v990_v5, %v989_v28  ;;  %v801_v28 = vsel %vm691_vm2, %v8291_v49, 0.0  ;;  %v1000_v1 = vsel %vm691_vm2, %v881_v19, 0.0 }
 0x16c   :  { %v800_v60 = vadd.f32 %v799_v50, %v798_v46  ;;  %v807_v46 = vsel %vm691_vm2, %v8336_v35, 0.0  ;;  %v1002_v17 = vsel %vm691_vm2, %v882_v52, 0.0 }
 0x16d   :  { %v993_v39 = vadd.f32 %v992_v13, %v991_v40  ;;  %v883_v40 = vmul.f32 %v8336_v35, %v8336_v35 }
 0x16e   :  { %v802_v13 = vadd.f32 %v801_v28, %v800_v60  ;;  %v884_v60 = vmul.f32 %v8327_v0, %v8327_v0 }
 0x16f   :  { %v995_v27 = vadd.f32 %v994_v53, %v993_v39  ;;  %v805_v39 = vsel %vm691_vm2, %v8309_v31, 0.0  ;;  %v1004_v19 = vsel %vm691_vm2, %v883_v40, 0.0 }
 0x170   :  { %v804_v4 = vadd.f32 %v803_v48, %v802_v13  ;;  %v811_v13 = vsel %vm691_vm2, %v8354_v56, 0.0  ;;  %v1006_v52 = vsel %vm691_vm2, %v884_v60, 0.0 }
 0x171   :  { %v997_v5 = vadd.f32 %v996_v41, %v995_v27  ;;  %v885_v27 = vmul.f32 %v8354_v56, %v8354_v56 }
 0x172   :  { %v806_v41 = vadd.f32 %v805_v39, %v804_v4  ;;  %v886_v4 = vmul.f32 %v8345_v37, %v8345_v37 }
 0x173   :  { %v999_v50 = vadd.f32 %v998_v22, %v997_v5  ;;  %v809_v5 = vsel %vm691_vm2, %v8327_v0, 0.0  ;;  %v1008_v40 = vsel %vm691_vm2, %v885_v27, 0.0 }
 0x174   :  { %v808_v28 = vadd.f32 %v807_v46, %v806_v41  ;;  %v815_v41 = vsel %vm691_vm2, %v8374_v3, 0.0  ;;  %v1010_v60 = vsel %vm691_vm2, %v886_v4, 0.0 }
 0x175   :  { %v1001_v53 = vadd.f32 %v1000_v1, %v999_v50  ;;  %v887_v50 = vmul.f32 %v8374_v3, %v8374_v3 }
 0x176   :  { %v810_v1 = vadd.f32 %v809_v5, %v808_v28  ;;  %v888_v28 = vmul.f32 %v8365_v9, %v8365_v9 }
 0x177   :  { %v1003_v48 = vadd.f32 %v1002_v17, %v1001_v53  ;;  %v813_v53 = vsel %vm691_vm2, %v8345_v37, 0.0  ;;  %v1012_v27 = vsel %vm691_vm2, %v887_v50, 0.0 }
 0x178   :  { %v812_v39 = vadd.f32 %v811_v13, %v810_v1  ;;  %v817_v13 = vsel %vm691_vm2, %v8365_v9, 0.0 }
 0x179   :  { %v1005_v22 = vadd.f32 %v1004_v19, %v1003_v48 }
 0x17a   :  { %v814_v19 = vadd.f32 %v813_v53, %v812_v39 }
 0x17b   :  { %v1007_v46 = vadd.f32 %v1006_v52, %v1005_v22  ;;  %v1014_v52 = vsel %vm691_vm2, %v888_v28, 0.0  ;;  %v1032_v28 = vlaneseq }
 0x17c   :  { %v816_v48 = vadd.f32 %v815_v41, %v814_v19 }
 0x17d   :  { %v1009_v17 = vadd.f32 %v1008_v40, %v1007_v46 }
 0x17e   :  { %v818_v22 = vadd.f32 %v817_v13, %v816_v48 }
 0x17f   :  { %v1011_v5 = vadd.f32 %v1010_v60, %v1009_v17 }
 0x180   :  { %v819_v37 = vrot.slane %v818_v22, 4 }
 0x181   :  { %v1013_v1 = vadd.f32 %v1012_v27, %v1011_v5  ;;  %v1033_v5 = vshrl.u32 %v1032_v28, 7 }
 0x182   :  { %v820_v40 = vadd.f32 %v819_v37, %v818_v22  ;;  %v689_v37 = vld [vmem:[%s14436_s3] sm:$0x1]  ;;  %s7749_s3 = smov 24  }
 0x183   :  { %v1015_v56 = vadd.f32 %v1014_v52, %v1013_v1 }
 0x184   :  { %v821_v46 = vrot.slane %v820_v40, 2 }
 0x185   :  { %v1016_v39 = vrot.slane %v1015_v56, 4 }
 0x186   :  { %v822_v53 = vadd.f32 %v821_v46, %v820_v40 }
 0x187   :  { %v1017_v4 = vadd.f32 %v1016_v39, %v1015_v56  ;;  %v8731_v56 = vsub.s32 0, %v1033_v5  ;;  %v14572_v5 = vld [vmem:[#allocation11_spill] sm:$0xff] }
 0x188   :  { %v823_v35 = vrot.slane %v822_v53, 1 }
 0x189   :  { %v1018_v0 = vrot.slane %v1017_v4, 2  ;;  %14565 = vst [vmem:[#allocation27_spill] sm:$0xff] %v8731_v56 }
 0x18a   :  { %v824_v50 = vadd.f32 %v823_v35, %v822_v53 }
 0x18b   :  { %v1019_v31 = vadd.f32 %v1018_v0, %v1017_v4  ;;  %v690_v0 = vld [vmem:[%s14437_s4] sm:$0x1]  ;;  %s7750_s4 = smov 32  }
 0x18c   :  { %v1022_v19 = vmul.f32 0.001953125, %v824_v50 }
 0x18d   :  { %v1020_v41 = vrot.slane %v1019_v31, 1 }
 0x18e   :  { %v1024_v9 = vmul.f32 %v1022_v19, %v1022_v19 }
 0x18f   :  { %v1021_v17 = vadd.f32 %v1020_v41, %v1019_v31 }
 0x191   :  { %v1023_v60 = vmul.f32 0.001953125, %v1021_v17 }
 0x193   :  { %v1025_v48 = vsub.f32 %v1023_v60, %v1024_v9  ;;  %v14570_v60 = vld [vmem:[#allocation9_spill] sm:$0xff] }
 0x195   :  { %v1026_v27 = vadd.f32 1e-05, %v1025_v48  ;;  %v14571_v48 = vld [vmem:[#allocation8_spill] sm:$0xff] }
 0x197   :  { %7680 = vrsqrt.f32 %v1026_v27 }
 0x1a1   :  { %v7681_v13 = vpop.eup %7680 }
 0x1a2   :  { %v1028_v22 = vmul.f32 %v7681_v13, %v689_v37  ;;  %v14573_v13 = vld [vmem:[#allocation10_spill] sm:$0xff] }
 0x1a4   :  { %v1029_v31 = vmul.f32 %v1028_v22, %v1022_v19  ;;  %v8737_v35 = vrot.slane %v1028_v22, %v8731_v56 }
 0x1a6   :  { %v1030_v9 = vsub.f32 %v690_v0, %v1029_v31  ;;  %v1099_v1 = vmul.f32 %v8737_v35, %v8374_v3  ;;  %v8743_v52 = vmul.f32 %v8737_v35, %v8096_v10  ;;  %v8747_v40 = vmul.f32 %v8090_v7, %v8737_v35  ;;  %v14574_v0 = vld [vmem:[#allocation13_spill] sm:$0xff] }
 0x1a7   :  { %v8751_v39 = vmul.f32 %v8737_v35, %v8110_v20  ;;  %v8755_v46 = vmul.f32 %v8108_v18, %v8737_v35  ;;  %v8759_v4 = vmul.f32 %v8737_v35, %v8127_v32  ;;  %v8763_v10 = vmul.f32 %v8125_v29, %v8737_v35 }
 0x1a8   :  { %v8766_v3 = vrot.slane %v1030_v9, %v8731_v56  ;;  %v8770_v7 = vmul.f32 %v8737_v35, %v8145_v45  ;;  %v8774_v20 = vmul.f32 %v8143_v43, %v8737_v35  ;;  %v8778_v18 = vmul.f32 %v8737_v35, %v8163_v59  ;;  %v14575_v9 = vld [vmem:[#allocation12_spill] sm:$0xff] }
 0x1a9   :  { %v8782_v32 = vmul.f32 %v8161_v57, %v8737_v35  ;;  %v8786_v29 = vmul.f32 %v8737_v35, %v8181_v12  ;;  %v8790_v45 = vmul.f32 %v8179_v8, %v8737_v35  ;;  %v8794_v43 = vmul.f32 %v8737_v35, %v8199_v34  ;;  %v14566_v57 = vld [vmem:[#allocation5_spill] sm:$0xff]  ;;  %v14567_v12 = vld [vmem:[#allocation4_spill] sm:$0xff]  ;;  %v14568_v8 = vld [vmem:[#allocation7_spill] sm:$0xff] }
 0x1aa   :  { %v1169_v53 = vadd.f32 %v8766_v3, %v1099_v1  ;;  %v8799_v59 = vmul.f32 %v8197_v30, %v8737_v35  ;;  %v8803_v50 = vmul.f32 %v8737_v35, %v14566_v57  ;;  %v8807_v41 = vmul.f32 %v14567_v12, %v8737_v35  ;;  %v14569_v34 = vld [vmem:[#allocation6_spill] sm:$0xff]  ;;  %v14576_v57 = vld [vmem:[#allocation15_spill] sm:$0xff] }
 0x1ab   :  { %v8811_v17 = vmul.f32 %v8737_v35, %v14568_v8  ;;  %v8815_v19 = vmul.f32 %v14569_v34, %v8737_v35  ;;  %v8819_v30 = vmul.f32 %v8737_v35, %v14570_v60  ;;  %v8823_v27 = vmul.f32 %v14571_v48, %v8737_v35  ;;  %v14578_v34 = vld [vmem:[#allocation18_spill] sm:$0xff]  ;;  %v14579_v48 = vld [vmem:[#allocation17_spill] sm:$0xff] }
 0x1ac   :  { %v1233_v28 = vmax.f32 %v1169_v53, 0.0  ;;  %v8827_v37 = vmul.f32 %v8737_v35, %v14572_v5  ;;  %v8831_v22 = vmul.f32 %v14573_v13, %v8737_v35  ;;  %v8835_v31 = vmul.f32 %v8737_v35, %v14574_v0  ;;  %v14577_v53 = vld [vmem:[#allocation14_spill] sm:$0xff] }
 0x1ad   :  { %v8839_v1 = vmul.f32 %v14575_v9, %v8737_v35  ;;  %v8843_v12 = vmul.f32 %v8737_v35, %v14576_v57  ;;  %v8847_v8 = vmul.f32 %v14577_v53, %v8737_v35  ;;  %v8851_v60 = vmul.f32 %v8737_v35, %v14578_v34  ;;  %v14580_v13 = vld [vmem:[#allocation22_spill] sm:$0xff]  ;;  %v14581_v9 = vld [vmem:[#allocation21_spill] sm:$0xff] }
 0x1ae   :  { %1385 = vst.msk [vmem:[#allocation2 + $0x331] sm:$0xff] %vm691_vm2, %v1233_v28  ;;  %v8856_v5 = vmul.f32 %v14579_v48, %v8737_v35  ;;  %v8860_v0 = vmul.f32 %v8737_v35, %v14580_v13  ;;  %v8864_v57 = vmul.f32 %v14581_v9, %v8737_v35  ;;  %v14582_v53 = vld [vmem:[#allocation25_spill] sm:$0xff]  ;;  %v8872_v34 = vmul.f32 %v8359_v58, %v8737_v35 }
 0x1af   :  { %v8868_v56 = vmul.f32 %v8737_v35, %v14582_v53  ;;  %v8876_v28 = vmul.f32 %v8737_v35, %v8104_v14  ;;  %v8880_v48 = vmul.f32 %v8098_v11, %v8737_v35  ;;  %v8884_v13 = vmul.f32 %v8737_v35, %v8120_v25  ;;  %v14583_v53 = vld [vmem:[#allocation3_spill] sm:$0xff] }
 0x1b0   :  { %v8888_v9 = vmul.f32 %v8112_v21, %v8737_v35  ;;  %v8892_v58 = vmul.f32 %v8737_v35, %v8138_v38  ;;  %v8896_v14 = vmul.f32 %v8129_v33, %v8737_v35  ;;  %v8900_v11 = vmul.f32 %v8737_v35, %v14583_v53 }
 0x1b1   :  { %v8904_v25 = vmul.f32 %v8147_v47, %v8737_v35  ;;  %v8908_v21 = vmul.f32 %v8737_v35, %v8174_v2  ;;  %v8912_v38 = vmul.f32 %v8165_v61, %v8737_v35  ;;  %v8916_v33 = vmul.f32 %v8737_v35, %v8192_v23 }
 0x1b2   :  { %v8920_v53 = vmul.f32 %v8183_v15, %v8737_v35  ;;  %v8924_v47 = vmul.f32 %v8737_v35, %v8210_v42  ;;  %v8928_v2 = vmul.f32 %v8201_v36, %v8737_v35  ;;  %v8932_v61 = vmul.f32 %v8737_v35, %v8228_v63 }
 0x1b3   :  { %v8936_v23 = vmul.f32 %v8219_v55, %v8737_v35  ;;  %v8940_v15 = vmul.f32 %v8737_v35, %v8246_v26  ;;  %v8944_v42 = vmul.f32 %v8237_v16, %v8737_v35  ;;  %v8948_v36 = vmul.f32 %v8737_v35, %v8264_v54 }
 0x1b4   :  { %v8952_v63 = vmul.f32 %v8255_v44, %v8737_v35  ;;  %v8956_v55 = vmul.f32 %v8737_v35, %v8282_v24  ;;  %v8960_v26 = vmul.f32 %v8273_v6, %v8737_v35  ;;  %v8964_v16 = vmul.f32 %v8737_v35, %v8300_v62 }
 0x1b5   :  { %v8968_v54 = vmul.f32 %v8291_v49, %v8737_v35  ;;  %v8972_v44 = vmul.f32 %v8737_v35, %v8318_v51 }
 0x1b6   :  { %14584 = vst [vmem:[#allocation5_spill] sm:$0xff] %v8952_v63  ;;  %14585 = vst [vmem:[#allocation4_spill] sm:$0xff] %v8956_v55  ;;  %v14590_v63 = vld [vmem:[#allocation16_spill] sm:$0xff] }
 0x1b7   :  { %14586 = vst [vmem:[#allocation7_spill] sm:$0xff] %v8960_v26  ;;  %14587 = vst [vmem:[#allocation6_spill] sm:$0xff] %v8964_v16  ;;  %v8976_v24 = vmul.f32 %v14590_v63, %v8737_v35  ;;  %v14591_v55 = vld [vmem:[#allocation20_spill] sm:$0xff]  ;;  %v14592_v26 = vld [vmem:[#allocation19_spill] sm:$0xff] }
 0x1b8   :  { %14588 = vst [vmem:[#allocation9_spill] sm:$0xff] %v8968_v54  ;;  %14589 = vst [vmem:[#allocation8_spill] sm:$0xff] %v8972_v44  ;;  %v8980_v6 = vmul.f32 %v8737_v35, %v14591_v55  ;;  %v8984_v62 = vmul.f32 %v14592_v26, %v8737_v35  ;;  %v14593_v16 = vld [vmem:[#allocation24_spill] sm:$0xff]  ;;  %v14594_v54 = vld [vmem:[#allocation23_spill] sm:$0xff]  ;;  %v9000_v55 = vadd.f32 %v8766_v3, %v8743_v52 }
 0x1b9   :  { %v8988_v49 = vmul.f32 %v8737_v35, %v14593_v16  ;;  %v8992_v51 = vmul.f32 %v14594_v54, %v8737_v35  ;;  %v14595_v44 = vld [vmem:[#allocation26_spill] sm:$0xff]  ;;  %v9004_v26 = vadd.f32 %v8766_v3, %v8747_v40  ;;  %v9008_v16 = vadd.f32 %v8766_v3, %v8751_v39 }
 0x1ba   :  { %v8996_v63 = vmul.f32 %v14595_v44, %v8737_v35  ;;  %v9012_v54 = vadd.f32 %v8766_v3, %v8755_v46  ;;  %v9016_v35 = vadd.f32 %v8766_v3, %v8759_v4  ;;  %v9020_v52 = vadd.f32 %v8766_v3, %v8763_v10 }
 0x1bb   :  { %v9024_v40 = vadd.f32 %v8766_v3, %v8770_v7  ;;  %v9028_v39 = vadd.f32 %v8766_v3, %v8774_v20  ;;  %v9032_v46 = vadd.f32 %v8766_v3, %v8778_v18  ;;  %v9036_v4 = vadd.f32 %v8766_v3, %v8782_v32 }
 0x1bc   :  { %v9040_v10 = vadd.f32 %v8766_v3, %v8786_v29  ;;  %v9044_v7 = vadd.f32 %v8766_v3, %v8790_v45  ;;  %v9048_v20 = vadd.f32 %v8766_v3, %v8794_v43  ;;  %v9052_v18 = vadd.f32 %v8766_v3, %v8799_v59 }
 0x1bd   :  { %v9056_v32 = vadd.f32 %v8766_v3, %v8803_v50  ;;  %v9060_v29 = vadd.f32 %v8766_v3, %v8807_v41  ;;  %v9064_v45 = vadd.f32 %v8766_v3, %v8811_v17  ;;  %v9068_v43 = vadd.f32 %v8766_v3, %v8815_v19  ;;  %v14601_v44 = vld [vmem:[#allocation5_spill] sm:$0xff] }
 0x1be   :  { %v9072_v59 = vadd.f32 %v8766_v3, %v8819_v30  ;;  %v9076_v50 = vadd.f32 %v8766_v3, %v8823_v27  ;;  %v9080_v41 = vadd.f32 %v8766_v3, %v8827_v37  ;;  %v9084_v17 = vadd.f32 %v8766_v3, %v8831_v22 }
 0x1bf   :  { %v9088_v19 = vadd.f32 %v8766_v3, %v8835_v31  ;;  %v9092_v30 = vadd.f32 %v8766_v3, %v8839_v1  ;;  %v9096_v27 = vadd.f32 %v8766_v3, %v8843_v12  ;;  %v9100_v37 = vadd.f32 %v8766_v3, %v8847_v8 }
 0x1c0   :  { %v9104_v22 = vadd.f32 %v8766_v3, %v8851_v60  ;;  %v9108_v31 = vadd.f32 %v8766_v3, %v8856_v5  ;;  %v9112_v1 = vadd.f32 %v8766_v3, %v8860_v0  ;;  %v9116_v12 = vadd.f32 %v8766_v3, %v8864_v57 }
 0x1c1   :  { %v9120_v8 = vadd.f32 %v8766_v3, %v8868_v56  ;;  %v9124_v60 = vadd.f32 %v8766_v3, %v8872_v34  ;;  %v9128_v5 = vadd.f32 %v8766_v3, %v8876_v28  ;;  %v9132_v0 = vadd.f32 %v8766_v3, %v8880_v48 }
 0x1c2   :  { %v9136_v57 = vadd.f32 %v8766_v3, %v8884_v13  ;;  %v9140_v56 = vadd.f32 %v8766_v3, %v8888_v9  ;;  %v9144_v34 = vadd.f32 %v8766_v3, %v8892_v58  ;;  %v9148_v28 = vadd.f32 %v8766_v3, %v8896_v14 }
 0x1c3   :  { %v9152_v48 = vadd.f32 %v8766_v3, %v8900_v11  ;;  %v9156_v13 = vadd.f32 %v8766_v3, %v8904_v25  ;;  %v9160_v9 = vadd.f32 %v8766_v3, %v8908_v21  ;;  %v9164_v58 = vadd.f32 %v8766_v3, %v8912_v38 }
 0x1c4   :  { %v9168_v14 = vadd.f32 %v8766_v3, %v8916_v33  ;;  %v9172_v11 = vadd.f32 %v8766_v3, %v8920_v53  ;;  %v9176_v25 = vadd.f32 %v8766_v3, %v8924_v47  ;;  %v9180_v21 = vadd.f32 %v8766_v3, %v8928_v2 }
 0x1c5   :  { %v9184_v38 = vadd.f32 %v8766_v3, %v8932_v61  ;;  %v9188_v33 = vadd.f32 %v8766_v3, %v8936_v23  ;;  %v9192_v53 = vadd.f32 %v8766_v3, %v8940_v15  ;;  %v9196_v47 = vadd.f32 %v8766_v3, %v8944_v42 }
 0x1c6   :  { %v9200_v2 = vadd.f32 %v8766_v3, %v8948_v36  ;;  %v9204_v61 = vadd.f32 %v8766_v3, %v14601_v44 }
 0x1c7   :  { %14596 = vst [vmem:[#allocation11_spill] sm:$0xff] %v9184_v38  ;;  %14597 = vst [vmem:[#allocation10_spill] sm:$0xff] %v9188_v33  ;;  %v14602_v38 = vld [vmem:[#allocation4_spill] sm:$0xff]  ;;  %v14603_v33 = vld [vmem:[#allocation7_spill] sm:$0xff] }
 0x1c8   :  { %14598 = vst [vmem:[#allocation13_spill] sm:$0xff] %v9192_v53  ;;  %14599 = vst [vmem:[#allocation12_spill] sm:$0xff] %v9196_v47  ;;  %v9208_v23 = vadd.f32 %v8766_v3, %v14602_v38  ;;  %v9212_v15 = vadd.f32 %v8766_v3, %v14603_v33  ;;  %v14604_v53 = vld [vmem:[#allocation6_spill] sm:$0xff]  ;;  %v14605_v47 = vld [vmem:[#allocation9_spill] sm:$0xff]  ;;  %v9228_v38 = vadd.f32 %v8766_v3, %v8976_v24 }
 0x1c9   :  { %14600 = vst [vmem:[#allocation15_spill] sm:$0xff] %v9200_v2  ;;  %v9216_v42 = vadd.f32 %v8766_v3, %v14604_v53  ;;  %v9220_v36 = vadd.f32 %v8766_v3, %v14605_v47  ;;  %v14606_v2 = vld [vmem:[#allocation8_spill] sm:$0xff]  ;;  %v9232_v33 = vadd.f32 %v8766_v3, %v8980_v6  ;;  %v9236_v53 = vadd.f32 %v8766_v3, %v8984_v62 }
 0x1ca   :  { %v9224_v44 = vadd.f32 %v8766_v3, %v14606_v2  ;;  %14607 = vst [vmem:[#allocation14_spill] sm:$0xff] %v9228_v38  ;;  %v9240_v47 = vadd.f32 %v8766_v3, %v8988_v49  ;;  %v9244_v2 = vadd.f32 %v8766_v3, %v8992_v51  ;;  %v9248_v24 = vadd.f32 %v8766_v3, %v8996_v63 }
 0x1cb   :  { %14608 = vst [vmem:[#allocation18_spill] sm:$0xff] %v9232_v33  ;;  %14609 = vst [vmem:[#allocation17_spill] sm:$0xff] %v9236_v53  ;;  %v1171_v38 = vmax.f32 %v9000_v55, 0.0  ;;  %v1172_v6 = vmax.f32 %v9004_v26, 0.0  ;;  %v1173_v33 = vmax.f32 %v9008_v16, 0.0  ;;  %v1174_v62 = vmax.f32 %v9012_v54, 0.0 }
 0x1cc   :  { %14610 = vst [vmem:[#allocation22_spill] sm:$0xff] %v9240_v47  ;;  %14611 = vst [vmem:[#allocation21_spill] sm:$0xff] %v9244_v2  ;;  %v1175_v53 = vmax.f32 %v9016_v35, 0.0  ;;  %v1176_v49 = vmax.f32 %v9020_v52, 0.0  ;;  %v1177_v47 = vmax.f32 %v9024_v40, 0.0  ;;  %v1178_v51 = vmax.f32 %v9028_v39, 0.0 }
 0x1cd   :  { %v1179_v2 = vmax.f32 %v9032_v46, 0.0  ;;  %1323 = vst.msk [vmem:[#allocation2 + $0x19] sm:$0xff] %vm691_vm2, %v1171_v38  ;;  %v1180_v3 = vmax.f32 %v9036_v4, 0.0  ;;  %v1181_v63 = vmax.f32 %v9040_v10, 0.0  ;;  %v1182_v55 = vmax.f32 %v9044_v7, 0.0  ;;  %1324 = vst.msk [vmem:[#allocation2 + $0x21] sm:$0xff] %vm691_vm2, %v1172_v6 }
 0x1ce   :  { %v1183_v26 = vmax.f32 %v9048_v20, 0.0  ;;  %1325 = vst.msk [vmem:[#allocation2 + $0x31] sm:$0xff] %vm691_vm2, %v1173_v33  ;;  %1326 = vst.msk [vmem:[#allocation2 + $0x39] sm:$0xff] %vm691_vm2, %v1174_v62  ;;  %v1184_v16 = vmax.f32 %v9052_v18, 0.0  ;;  %v1185_v54 = vmax.f32 %v9056_v32, 0.0  ;;  %v1186_v35 = vmax.f32 %v9060_v29, 0.0 }
 0x1cf   :  { %1327 = vst.msk [vmem:[#allocation2 + $0x49] sm:$0xff] %vm691_vm2, %v1175_v53  ;;  %v1187_v52 = vmax.f32 %v9064_v45, 0.0  ;;  %1328 = vst.msk [vmem:[#allocation2 + $0x51] sm:$0xff] %vm691_vm2, %v1176_v49  ;;  %v1188_v40 = vmax.f32 %v9068_v43, 0.0  ;;  %v1189_v39 = vmax.f32 %v9072_v59, 0.0  ;;  %v1190_v46 = vmax.f32 %v9076_v50, 0.0 }
 0x1d0   :  { %1329 = vst.msk [vmem:[#allocation2 + $0x61] sm:$0xff] %vm691_vm2, %v1177_v47  ;;  %1330 = vst.msk [vmem:[#allocation2 + $0x69] sm:$0xff] %vm691_vm2, %v1178_v51  ;;  %v1191_v4 = vmax.f32 %v9080_v41, 0.0  ;;  %v1192_v10 = vmax.f32 %v9084_v17, 0.0  ;;  %v1193_v7 = vmax.f32 %v9088_v19, 0.0  ;;  %v1194_v20 = vmax.f32 %v9092_v30, 0.0 }
 0x1d1   :  { %1331 = vst.msk [vmem:[#allocation2 + $0x79] sm:$0xff] %vm691_vm2, %v1179_v2  ;;  %1332 = vst.msk [vmem:[#allocation2 + $0x81] sm:$0xff] %vm691_vm2, %v1180_v3  ;;  %v1195_v18 = vmax.f32 %v9096_v27, 0.0  ;;  %v1196_v32 = vmax.f32 %v9100_v37, 0.0  ;;  %v1197_v29 = vmax.f32 %v9104_v22, 0.0  ;;  %v1198_v45 = vmax.f32 %v9108_v31, 0.0 }
 0x1d2   :  { %1333 = vst.msk [vmem:[#allocation2 + $0x91] sm:$0xff] %vm691_vm2, %v1181_v63  ;;  %1334 = vst.msk [vmem:[#allocation2 + $0x99] sm:$0xff] %vm691_vm2, %v1182_v55  ;;  %v1199_v43 = vmax.f32 %v9112_v1, 0.0  ;;  %v1200_v59 = vmax.f32 %v9116_v12, 0.0  ;;  %v1201_v50 = vmax.f32 %v9120_v8, 0.0  ;;  %v1202_v41 = vmax.f32 %v9124_v60, 0.0 }
 0x1d3   :  { %1335 = vst.msk [vmem:[#allocation2 + $0xa9] sm:$0xff] %vm691_vm2, %v1183_v26  ;;  %1336 = vst.msk [vmem:[#allocation2 + $0xb1] sm:$0xff] %vm691_vm2, %v1184_v16  ;;  %v1203_v17 = vmax.f32 %v9128_v5, 0.0  ;;  %v1204_v19 = vmax.f32 %v9132_v0, 0.0  ;;  %v1205_v30 = vmax.f32 %v9136_v57, 0.0  ;;  %v1206_v27 = vmax.f32 %v9140_v56, 0.0 }
 0x1d4   :  { %1337 = vst.msk [vmem:[#allocation2 + $0xc1] sm:$0xff] %vm691_vm2, %v1185_v54  ;;  %1338 = vst.msk [vmem:[#allocation2 + $0xc9] sm:$0xff] %vm691_vm2, %v1186_v35  ;;  %v1207_v37 = vmax.f32 %v9144_v34, 0.0  ;;  %v1453_v22 = vld [vmem:[#allocation2 + $0x19] sm:$0xff]  ;;  %v1208_v31 = vmax.f32 %v9148_v28, 0.0  ;;  %v1209_v1 = vmax.f32 %v9152_v48, 0.0 }
 0x1d5   :  { %1339 = vst.msk [vmem:[#allocation2 + $0xd9] sm:$0xff] %vm691_vm2, %v1187_v52  ;;  %1340 = vst.msk [vmem:[#allocation2 + $0xe1] sm:$0xff] %vm691_vm2, %v1188_v40  ;;  %v1210_v12 = vmax.f32 %v9156_v13, 0.0  ;;  %v1211_v8 = vmax.f32 %v9160_v9, 0.0  ;;  %v1455_v60 = vld [vmem:[#allocation2 + $0x31] sm:$0xff]  ;;  %2032 = vrot.lane.b32.xlu1 %v1453_v22, %s7747_s0  ;;  %v1212_v5 = vmax.f32 %v9164_v58, 0.0 }
 0x1d6   :  { %1341 = vst.msk [vmem:[#allocation2 + $0xf1] sm:$0xff] %vm691_vm2, %v1189_v39  ;;  %1342 = vst.msk [vmem:[#allocation2 + $0xf9] sm:$0xff] %vm691_vm2, %v1190_v46  ;;  %v1213_v0 = vmax.f32 %v9168_v14, 0.0  ;;  %v1214_v57 = vmax.f32 %v9172_v11, 0.0  ;;  %v1215_v56 = vmax.f32 %v9176_v25, 0.0  ;;  %2036 = vrot.lane.b32.xlu0 %v1455_v60, %s7747_s0  ;;  %v1216_v34 = vmax.f32 %v9180_v21, 0.0 }
 0x1d7   :  { %1343 = vst.msk [vmem:[#allocation2 + $0x109] sm:$0xff] %vm691_vm2, %v1191_v4  ;;  %1344 = vst.msk [vmem:[#allocation2 + $0x111] sm:$0xff] %vm691_vm2, %v1192_v10  ;;  %v14612_v28 = vld [vmem:[#allocation11_spill] sm:$0xff]  ;;  %v14613_v13 = vld [vmem:[#allocation10_spill] sm:$0xff]  ;;  %v1222_v21 = vmax.f32 %v9204_v61, 0.0  ;;  %v1223_v53 = vmax.f32 %v9208_v23, 0.0 }
 0x1d8   :  { %1345 = vst.msk [vmem:[#allocation2 + $0x121] sm:$0xff] %vm691_vm2, %v1193_v7  ;;  %1346 = vst.msk [vmem:[#allocation2 + $0x129] sm:$0xff] %vm691_vm2, %v1194_v20  ;;  %v1217_v48 = vmax.f32 %v14612_v28, 0.0  ;;  %v1218_v9 = vmax.f32 %v14613_v13, 0.0  ;;  %v14614_v58 = vld [vmem:[#allocation13_spill] sm:$0xff]  ;;  %v14615_v11 = vld [vmem:[#allocation12_spill] sm:$0xff] }
 0x1d9   :  { %1347 = vst.msk [vmem:[#allocation2 + $0x139] sm:$0xff] %vm691_vm2, %v1195_v18  ;;  %1348 = vst.msk [vmem:[#allocation2 + $0x141] sm:$0xff] %vm691_vm2, %v1196_v32  ;;  %v1219_v14 = vmax.f32 %v14614_v58, 0.0  ;;  %v1220_v25 = vmax.f32 %v14615_v11, 0.0  ;;  %v14616_v38 = vld [vmem:[#allocation15_spill] sm:$0xff]  ;;  %v1224_v2 = vmax.f32 %v9212_v15, 0.0  ;;  %v9420_v11 = vpop.permute.xlu0 %2028 }
 0x1da   :  { %1349 = vst.msk [vmem:[#allocation2 + $0x151] sm:$0xff] %vm691_vm2, %v1197_v29  ;;  %1350 = vst.msk [vmem:[#allocation2 + $0x159] sm:$0xff] %vm691_vm2, %v1198_v45  ;;  %v1221_v33 = vmax.f32 %v14616_v38, 0.0  ;;  %v1454_v47 = vld [vmem:[#allocation2 + $0x21] sm:$0xff]  ;;  %v1225_v6 = vmax.f32 %v9216_v42, 0.0  ;;  %v1226_v62 = vmax.f32 %v9220_v36, 0.0 }
 0x1db   :  { %1351 = vst.msk [vmem:[#allocation2 + $0x169] sm:$0xff] %vm691_vm2, %v1199_v43  ;;  %1352 = vst.msk [vmem:[#allocation2 + $0x171] sm:$0xff] %vm691_vm2, %v1200_v59  ;;  %v1227_v49 = vmax.f32 %v9224_v44, 0.0  ;;  %v1457_v61 = vld [vmem:[#allocation2 + $0x49] sm:$0xff]  ;;  %2034 = vrot.lane.b32.xlu1 %v1454_v47, %s7747_s0  ;;  %v14617_v23 = vld [vmem:[#allocation14_spill] sm:$0xff]  ;;  %v1234_v16 = vmax.f32 %v9248_v24, 0.0 }
 0x1dc   :  { %1353 = vst.msk [vmem:[#allocation2 + $0x181] sm:$0xff] %vm691_vm2, %v1201_v50  ;;  %1354 = vst.msk [vmem:[#allocation2 + $0x189] sm:$0xff] %vm691_vm2, %v1202_v41  ;;  %v1228_v51 = vmax.f32 %v14617_v23, 0.0  ;;  %v14618_v15 = vld [vmem:[#allocation18_spill] sm:$0xff]  ;;  %v14619_v42 = vld [vmem:[#allocation17_spill] sm:$0xff]  ;;  %2040 = vrot.lane.b32.xlu0 %v1457_v61, %s7747_s0 }
 0x1dd   :  { %1355 = vst.msk [vmem:[#allocation2 + $0x1c9] sm:$0xff] %vm691_vm2, %v1203_v17  ;;  %1356 = vst.msk [vmem:[#allocation2 + $0x1d1] sm:$0xff] %vm691_vm2, %v1204_v19  ;;  %v1229_v3 = vmax.f32 %v14618_v15, 0.0  ;;  %v1230_v63 = vmax.f32 %v14619_v42, 0.0  ;;  %v14620_v36 = vld [vmem:[#allocation22_spill] sm:$0xff]  ;;  %v14621_v44 = vld [vmem:[#allocation21_spill] sm:$0xff] }
 0x1de   :  { %1357 = vst.msk [vmem:[#allocation2 + $0x1e1] sm:$0xff] %vm691_vm2, %v1205_v30  ;;  %1358 = vst.msk [vmem:[#allocation2 + $0x1e9] sm:$0xff] %vm691_vm2, %v1206_v27  ;;  %v1231_v55 = vmax.f32 %v14620_v36, 0.0  ;;  %v1232_v26 = vmax.f32 %v14621_v44, 0.0  ;;  %v1456_v54 = vld [vmem:[#allocation2 + $0x39] sm:$0xff]  ;;  %v1459_v24 = vld [vmem:[#allocation2 + $0x61] sm:$0xff] }
 0x1df   :  { %1359 = vst.msk [vmem:[#allocation2 + $0x1f9] sm:$0xff] %vm691_vm2, %v1207_v37  ;;  %1360 = vst.msk [vmem:[#allocation2 + $0x201] sm:$0xff] %vm691_vm2, %v1208_v31  ;;  %2038 = vrot.lane.b32.xlu1 %v1456_v54, %s7747_s0  ;;  %v1458_v35 = vld [vmem:[#allocation2 + $0x51] sm:$0xff]  ;;  %v1461_v52 = vld [vmem:[#allocation2 + $0x79] sm:$0xff] }
 0x1e0   :  { %1361 = vst.msk [vmem:[#allocation2 + $0x211] sm:$0xff] %vm691_vm2, %v1209_v1  ;;  %1362 = vst.msk [vmem:[#allocation2 + $0x219] sm:$0xff] %vm691_vm2, %v1210_v12  ;;  %2044 = vrot.lane.b32.xlu0 %v1459_v24, %s7747_s0  ;;  %v1460_v40 = vld [vmem:[#allocation2 + $0x69] sm:$0xff]  ;;  %v1463_v39 = vld [vmem:[#allocation2 + $0x91] sm:$0xff] }
 0x1e1   :  { %1363 = vst.msk [vmem:[#allocation2 + $0x229] sm:$0xff] %vm691_vm2, %v1211_v8  ;;  %1364 = vst.msk [vmem:[#allocation2 + $0x231] sm:$0xff] %vm691_vm2, %v1212_v5  ;;  %v1462_v46 = vld [vmem:[#allocation2 + $0x81] sm:$0xff]  ;;  %v1465_v4 = vld [vmem:[#allocation2 + $0xa9] sm:$0xff] }
 0x1e2   :  { %1365 = vst.msk [vmem:[#allocation2 + $0x241] sm:$0xff] %vm691_vm2, %v1213_v0  ;;  %1366 = vst.msk [vmem:[#allocation2 + $0x249] sm:$0xff] %vm691_vm2, %v1214_v57  ;;  %v1464_v10 = vld [vmem:[#allocation2 + $0x99] sm:$0xff]  ;;  %v1467_v7 = vld [vmem:[#allocation2 + $0xc1] sm:$0xff] }
 0x1e3   :  { %1367 = vst.msk [vmem:[#allocation2 + $0x259] sm:$0xff] %vm691_vm2, %v1215_v56  ;;  %1368 = vst.msk [vmem:[#allocation2 + $0x261] sm:$0xff] %vm691_vm2, %v1216_v34  ;;  %2042 = vrot.lane.b32.xlu1 %v1458_v35, %s7747_s0  ;;  %v1466_v20 = vld [vmem:[#allocation2 + $0xb1] sm:$0xff]  ;;  %v1469_v18 = vld [vmem:[#allocation2 + $0xd9] sm:$0xff] }
 0x1e4   :  { %1369 = vst.msk [vmem:[#allocation2 + $0x271] sm:$0xff] %vm691_vm2, %v1217_v48  ;;  %1370 = vst.msk [vmem:[#allocation2 + $0x279] sm:$0xff] %vm691_vm2, %v1218_v9  ;;  %2048 = vrot.lane.b32.xlu0 %v1461_v52, %s7747_s0  ;;  %v1468_v32 = vld [vmem:[#allocation2 + $0xc9] sm:$0xff]  ;;  %v1471_v29 = vld [vmem:[#allocation2 + $0xf1] sm:$0xff] }
 0x1e5   :  { %1371 = vst.msk [vmem:[#allocation2 + $0x289] sm:$0xff] %vm691_vm2, %v1219_v14  ;;  %1372 = vst.msk [vmem:[#allocation2 + $0x291] sm:$0xff] %vm691_vm2, %v1220_v25  ;;  %v1470_v45 = vld [vmem:[#allocation2 + $0xe1] sm:$0xff]  ;;  %v1473_v43 = vld [vmem:[#allocation2 + $0x109] sm:$0xff] }
 0x1e6   :  { %1373 = vst.msk [vmem:[#allocation2 + $0x2a1] sm:$0xff] %vm691_vm2, %v1221_v33  ;;  %1374 = vst.msk [vmem:[#allocation2 + $0x2a9] sm:$0xff] %vm691_vm2, %v1222_v21  ;;  %v1472_v59 = vld [vmem:[#allocation2 + $0xf9] sm:$0xff]  ;;  %v1475_v50 = vld [vmem:[#allocation2 + $0x121] sm:$0xff]  ;;  %v9426_v21 = vpop.permute.xlu0 %2030 }
 0x1e7   :  { %1375 = vst.msk [vmem:[#allocation2 + $0x2b9] sm:$0xff] %vm691_vm2, %v1223_v53  ;;  %1376 = vst.msk [vmem:[#allocation2 + $0x2c1] sm:$0xff] %vm691_vm2, %v1224_v2  ;;  %2046 = vrot.lane.b32.xlu1 %v1460_v40, %s7747_s0  ;;  %v1474_v41 = vld [vmem:[#allocation2 + $0x111] sm:$0xff]  ;;  %v1477_v17 = vld [vmem:[#allocation2 + $0x139] sm:$0xff]  ;;  %v9430_v2 = vpop.permute.xlu1 %2094 }
 0x1e8   :  { %1377 = vst.msk [vmem:[#allocation2 + $0x2d1] sm:$0xff] %vm691_vm2, %v1225_v6  ;;  %1378 = vst.msk [vmem:[#allocation2 + $0x2d9] sm:$0xff] %vm691_vm2, %v1226_v62  ;;  %2052 = vrot.lane.b32.xlu0 %v1463_v39, %s7747_s0  ;;  %v1476_v19 = vld [vmem:[#allocation2 + $0x129] sm:$0xff]  ;;  %v1479_v30 = vld [vmem:[#allocation2 + $0x151] sm:$0xff] }
 0x1e9   :  { %1379 = vst.msk [vmem:[#allocation2 + $0x2e9] sm:$0xff] %vm691_vm2, %v1227_v49  ;;  %1380 = vst.msk [vmem:[#allocation2 + $0x2f1] sm:$0xff] %vm691_vm2, %v1228_v51  ;;  %v1478_v27 = vld [vmem:[#allocation2 + $0x141] sm:$0xff]  ;;  %v1481_v37 = vld [vmem:[#allocation2 + $0x169] sm:$0xff] }
 0x1ea   :  { %1381 = vst.msk [vmem:[#allocation2 + $0x301] sm:$0xff] %vm691_vm2, %v1229_v3  ;;  %1382 = vst.msk [vmem:[#allocation2 + $0x309] sm:$0xff] %vm691_vm2, %v1230_v63  ;;  %v1480_v22 = vld [vmem:[#allocation2 + $0x159] sm:$0xff]  ;;  %v1485_v31 = vld [vmem:[#allocation2 + $0x1c9] sm:$0xff]  ;;  %v9432_v6 = vpop.permute.xlu0 %2092 }
 0x1eb   :  { %1383 = vst.msk [vmem:[#allocation2 + $0x319] sm:$0xff] %vm691_vm2, %v1231_v55  ;;  %1384 = vst.msk [vmem:[#allocation2 + $0x321] sm:$0xff] %vm691_vm2, %v1232_v26  ;;  %2050 = vrot.lane.b32.xlu1 %v1462_v46, %s7747_s0  ;;  %v1482_v1 = vld [vmem:[#allocation2 + $0x171] sm:$0xff]  ;;  %v1487_v12 = vld [vmem:[#allocation2 + $0x1e1] sm:$0xff]  ;;  %v9436_v23 = vpop.permute.xlu1 %2286 }
 0x1ec   :  { %1386 = vst.msk [vmem:[#allocation2 + $0x339] sm:$0xff] %vm691_vm2, %v1234_v16  ;;  %2056 = vrot.lane.b32.xlu0 %v1465_v4, %s7747_s0  ;;  %v1486_v8 = vld [vmem:[#allocation2 + $0x1d1] sm:$0xff]  ;;  %v1489_v60 = vld [vmem:[#allocation2 + $0x1f9] sm:$0xff]  ;;  %v1488_v5 = vld [vmem:[#allocation2 + $0x1e9] sm:$0xff] }
 0x1ed   :  { %v1491_v0 = vld [vmem:[#allocation2 + $0x211] sm:$0xff]  ;;  %v1490_v57 = vld [vmem:[#allocation2 + $0x201] sm:$0xff]  ;;  %v1493_v56 = vld [vmem:[#allocation2 + $0x229] sm:$0xff]  ;;  %14622 = vst [vmem:[#allocation25_spill] sm:$0xff] %v9430_v2 }
 0x1ee   :  { %v1492_v34 = vld [vmem:[#allocation2 + $0x219] sm:$0xff]  ;;  %v1495_v28 = vld [vmem:[#allocation2 + $0x241] sm:$0xff]  ;;  %v1494_v48 = vld [vmem:[#allocation2 + $0x231] sm:$0xff]  ;;  %14623 = vst [vmem:[#allocation3_spill] sm:$0xff] %v9432_v6  ;;  %v9439_v15 = vpop.permute.xlu0 %2284 }
 0x1ef   :  { %2054 = vrot.lane.b32.xlu1 %v1464_v10, %s7747_s0  ;;  %v1497_v13 = vld [vmem:[#allocation2 + $0x259] sm:$0xff]  ;;  %v1496_v9 = vld [vmem:[#allocation2 + $0x249] sm:$0xff]  ;;  %v1499_v58 = vld [vmem:[#allocation2 + $0x271] sm:$0xff]  ;;  %v9446_v36 = vpop.permute.xlu1 %2350 }
 0x1f0   :  { %2060 = vrot.lane.b32.xlu0 %v1467_v7, %s7747_s0  ;;  %v1498_v14 = vld [vmem:[#allocation2 + $0x261] sm:$0xff]  ;;  %v1501_v25 = vld [vmem:[#allocation2 + $0x289] sm:$0xff]  ;;  %v1500_v38 = vld [vmem:[#allocation2 + $0x279] sm:$0xff]  ;;  %14625 = vst [vmem:[#allocation20_spill] sm:$0xff] %v9446_v36 }
 0x1f1   :  { %v1503_v33 = vld [vmem:[#allocation2 + $0x2a1] sm:$0xff]  ;;  %v1502_v53 = vld [vmem:[#allocation2 + $0x291] sm:$0xff]  ;;  %v1505_v47 = vld [vmem:[#allocation2 + $0x2b9] sm:$0xff] }
 0x1f2   :  { %v1504_v62 = vld [vmem:[#allocation2 + $0x2a9] sm:$0xff]  ;;  %v1507_v49 = vld [vmem:[#allocation2 + $0x2d1] sm:$0xff]  ;;  %v1506_v61 = vld [vmem:[#allocation2 + $0x2c1] sm:$0xff]  ;;  %v9444_v63 = vpop.permute.xlu0 %2348 }
 0x1f3   :  { %2058 = vrot.lane.b32.xlu1 %v1466_v20, %s7747_s0  ;;  %v1509_v51 = vld [vmem:[#allocation2 + $0x2e9] sm:$0xff]  ;;  %v1508_v3 = vld [vmem:[#allocation2 + $0x2d9] sm:$0xff]  ;;  %v1511_v42 = vld [vmem:[#allocation2 + $0x301] sm:$0xff]  ;;  %14624 = vst [vmem:[#allocation16_spill] sm:$0xff] %v9444_v63 }
 0x1f4   :  { %2064 = vrot.lane.b32.xlu0 %v1469_v18, %s7747_s0  ;;  %v1510_v55 = vld [vmem:[#allocation2 + $0x2f1] sm:$0xff]  ;;  %v1513_v44 = vld [vmem:[#allocation2 + $0x319] sm:$0xff]  ;;  %v1512_v54 = vld [vmem:[#allocation2 + $0x309] sm:$0xff] }
 0x1f5   :  { %v1517_v24 = vld [vmem:[#allocation2 + $0x1a] sm:$0xff]  ;;  %v1519_v39 = vld [vmem:[#allocation2 + $0x32] sm:$0xff]  ;;  %v1518_v10 = vld [vmem:[#allocation2 + $0x22] sm:$0xff] }
 0x1f6   :  { %v1514_v40 = vld [vmem:[#allocation2 + $0x321] sm:$0xff]  ;;  %v1521_v7 = vld [vmem:[#allocation2 + $0x4a] sm:$0xff] }
 0x1f7   :  { %2062 = vrot.lane.b32.xlu1 %v1468_v32, %s7747_s0  ;;  %v1520_v32 = vld [vmem:[#allocation2 + $0x3a] sm:$0xff]  ;;  %v1409_v2 = vld [vmem:[#allocation2 + $0x108] sm:$0xff] }
 0x1f8   :  { %2068 = vrot.lane.b32.xlu0 %v1471_v29, %s7747_s0  ;;  %v1523_v29 = vld [vmem:[#allocation2 + $0x62] sm:$0xff] }
 0x1f9   :  { %v1411_v6 = vld [vmem:[#allocation2 + $0x120] sm:$0xff] }
 0x1fb   :  { %2066 = vrot.lane.b32.xlu1 %v1470_v45, %s7747_s0 }
 0x1fc   :  { %2072 = vrot.lane.b32.xlu0 %v1473_v43, %s7747_s0 }
 0x1ff   :  { %2070 = vrot.lane.b32.xlu1 %v1472_v59, %s7747_s0  ;;  %v1522_v59 = vld [vmem:[#allocation2 + $0x52] sm:$0xff] }
 0x200   :  { %2076 = vrot.lane.b32.xlu0 %v1475_v50, %s7747_s0  ;;  %v1525_v50 = vld [vmem:[#allocation2 + $0x7a] sm:$0xff] }
 0x203   :  { %2074 = vrot.lane.b32.xlu1 %v1474_v41, %s7747_s0 }
 0x204   :  { %2080 = vrot.lane.b32.xlu0 %v1477_v17, %s7747_s0 }
 0x207   :  { %2078 = vrot.lane.b32.xlu1 %v1476_v19, %s7747_s0  ;;  %v1524_v19 = vld [vmem:[#allocation2 + $0x6a] sm:$0xff] }
 0x208   :  { %2084 = vrot.lane.b32.xlu0 %v1479_v30, %s7747_s0  ;;  %v1527_v30 = vld [vmem:[#allocation2 + $0x92] sm:$0xff] }
 0x20b   :  { %2082 = vrot.lane.b32.xlu1 %v1478_v27, %s7747_s0 }
 0x20c   :  { %2088 = vrot.lane.b32.xlu0 %v1481_v37, %s7747_s0 }
 0x20f   :  { %2086 = vrot.lane.b32.xlu1 %v1480_v22, %s7747_s0  ;;  %v1526_v22 = vld [vmem:[#allocation2 + $0x82] sm:$0xff] }
 0x210   :  { %2096 = vrot.lane.b32.xlu0 %v1485_v31, %s7747_s0  ;;  %v1529_v31 = vld [vmem:[#allocation2 + $0xaa] sm:$0xff] }
 0x213   :  { %2090 = vrot.lane.b32.xlu1 %v1482_v1, %s7747_s0 }
 0x214   :  { %2100 = vrot.lane.b32.xlu0 %v1487_v12, %s7747_s0 }
 0x217   :  { %2098 = vrot.lane.b32.xlu1 %v1486_v8, %s7747_s0  ;;  %v1528_v8 = vld [vmem:[#allocation2 + $0x9a] sm:$0xff] }
 0x218   :  { %2104 = vrot.lane.b32.xlu0 %v1489_v60, %s7747_s0  ;;  %v1531_v60 = vld [vmem:[#allocation2 + $0xc2] sm:$0xff] }
 0x21b   :  { %2102 = vrot.lane.b32.xlu1 %v1488_v5, %s7747_s0 }
 0x21c   :  { %2108 = vrot.lane.b32.xlu0 %v1491_v0, %s7747_s0 }
 0x21f   :  { %2106 = vrot.lane.b32.xlu1 %v1490_v57, %s7747_s0  ;;  %v1530_v57 = vld [vmem:[#allocation2 + $0xb2] sm:$0xff] }
 0x220   :  { %2112 = vrot.lane.b32.xlu0 %v1493_v56, %s7747_s0  ;;  %v1533_v56 = vld [vmem:[#allocation2 + $0xda] sm:$0xff] }
 0x223   :  { %2110 = vrot.lane.b32.xlu1 %v1492_v34, %s7747_s0 }
 0x224   :  { %2116 = vrot.lane.b32.xlu0 %v1495_v28, %s7747_s0 }
 0x227   :  { %2114 = vrot.lane.b32.xlu1 %v1494_v48, %s7747_s0  ;;  %v1532_v48 = vld [vmem:[#allocation2 + $0xca] sm:$0xff] }
 0x228   :  { %2120 = vrot.lane.b32.xlu0 %v1497_v13, %s7747_s0  ;;  %v1535_v13 = vld [vmem:[#allocation2 + $0xf2] sm:$0xff] }
 0x22b   :  { %2118 = vrot.lane.b32.xlu1 %v1496_v9, %s7747_s0 }
 0x22c   :  { %2124 = vrot.lane.b32.xlu0 %v1499_v58, %s7747_s0 }
 0x22f   :  { %2122 = vrot.lane.b32.xlu1 %v1498_v14, %s7747_s0  ;;  %v1534_v14 = vld [vmem:[#allocation2 + $0xe2] sm:$0xff] }
 0x230   :  { %2128 = vrot.lane.b32.xlu0 %v1501_v25, %s7747_s0  ;;  %v1537_v25 = vld [vmem:[#allocation2 + $0x10a] sm:$0xff] }
 0x233   :  { %2126 = vrot.lane.b32.xlu1 %v1500_v38, %s7747_s0 }
 0x234   :  { %2132 = vrot.lane.b32.xlu0 %v1503_v33, %s7747_s0 }
 0x237   :  { %2130 = vrot.lane.b32.xlu1 %v1502_v53, %s7747_s0  ;;  %v1536_v53 = vld [vmem:[#allocation2 + $0xfa] sm:$0xff] }
 0x238   :  { %2136 = vrot.lane.b32.xlu0 %v1505_v47, %s7747_s0  ;;  %v1539_v47 = vld [vmem:[#allocation2 + $0x122] sm:$0xff] }
 0x23b   :  { %2134 = vrot.lane.b32.xlu1 %v1504_v62, %s7747_s0 }
 0x23c   :  { %2140 = vrot.lane.b32.xlu0 %v1507_v49, %s7747_s0 }
 0x23f   :  { %2138 = vrot.lane.b32.xlu1 %v1506_v61, %s7747_s0  ;;  %v1538_v61 = vld [vmem:[#allocation2 + $0x112] sm:$0xff] }
 0x240   :  { %2144 = vrot.lane.b32.xlu0 %v1509_v51, %s7747_s0  ;;  %v1541_v51 = vld [vmem:[#allocation2 + $0x13a] sm:$0xff] }
 0x243   :  { %2142 = vrot.lane.b32.xlu1 %v1508_v3, %s7747_s0 }
 0x244   :  { %2148 = vrot.lane.b32.xlu0 %v1511_v42, %s7747_s0 }
 0x247   :  { %2146 = vrot.lane.b32.xlu1 %v1510_v55, %s7747_s0  ;;  %v9450_v26 = vpop.permute.xlu1 %2032  ;;  %v1540_v55 = vld [vmem:[#allocation2 + $0x12a] sm:$0xff] }
 0x248   :  { %2152 = vrot.lane.b32.xlu0 %v1513_v44, %s7747_s0  ;;  %v9452_v16 = vpop.permute.xlu0 %2036  ;;  %v1543_v44 = vld [vmem:[#allocation2 + $0x152] sm:$0xff] }
 0x249   :  { %14626 = vst [vmem:[#allocation19_spill] sm:$0xff] %v9452_v16 }
 0x24b   :  { %2150 = vrot.lane.b32.xlu1 %v1512_v54, %s7747_s0 }
 0x24c   :  { %2288 = vrot.lane.b32.xlu0 %v1517_v24, %s7748_s15 }
 0x24d   :  { %v9456_v35 = vpop.permute.xlu1 %2034 }
 0x24e   :  { %v9458_v52 = vpop.permute.xlu0 %2040 }
 0x24f   :  { %14627 = vst [vmem:[#allocation24_spill] sm:$0xff] %v9458_v52  ;;  %2154 = vrot.lane.b32.xlu1 %v1514_v40, %s7747_s0  ;;  %v1542_v40 = vld [vmem:[#allocation2 + $0x142] sm:$0xff] }
 0x250   :  { %2292 = vrot.lane.b32.xlu0 %v1519_v39, %s7748_s15  ;;  %v1545_v39 = vld [vmem:[#allocation2 + $0x16a] sm:$0xff]  ;;  %v10188_v52 = vld [vmem:[#allocation2 + $0x122] sm:$0xff] }
 0x251   :  { %v9462_v46 = vpop.permute.xlu1 %2038 }
 0x252   :  { %14628 = vst [vmem:[#allocation23_spill] sm:$0xff] %v9462_v46  ;;  %v9464_v4 = vpop.permute.xlu0 %2044 }
 0x253   :  { %14629 = vst [vmem:[#allocation26_spill] sm:$0xff] %v9464_v4  ;;  %2290 = vrot.lane.b32.xlu1 %v1518_v10, %s7748_s15  ;;  %v10140_v4 = vld [vmem:[#allocation2 + $0xc2] sm:$0xff] }
 0x254   :  { %2296 = vrot.lane.b32.xlu0 %v1521_v7, %s7748_s15 }
 0x255   :  { %v9468_v20 = vpop.permute.xlu1 %2042 }
 0x256   :  { %14630 = vst [vmem:[#allocation5_spill] sm:$0xff] %v9468_v20  ;;  %v9470_v18 = vpop.permute.xlu0 %2048  ;;  %v10164_v20 = vld [vmem:[#allocation2 + $0xf2] sm:$0xff] }
 0x257   :  { %14631 = vst [vmem:[#allocation4_spill] sm:$0xff] %v9470_v18  ;;  %2294 = vrot.lane.b32.xlu1 %v1520_v32, %s7748_s15  ;;  %v1544_v32 = vld [vmem:[#allocation2 + $0x15a] sm:$0xff]  ;;  %v10102_v18 = vld [vmem:[#allocation2 + $0x52] sm:$0xff] }
 0x258   :  { %2300 = vrot.lane.b32.xlu0 %v1523_v29, %s7748_s15  ;;  %v1549_v29 = vld [vmem:[#allocation2 + $0x1ca] sm:$0xff] }
 0x259   :  { %v9474_v45 = vpop.permute.xlu1 %2046 }
 0x25a   :  { %14632 = vst [vmem:[#allocation7_spill] sm:$0xff] %v9474_v45  ;;  %v9476_v43 = vpop.permute.xlu0 %2052  ;;  %v10116_v45 = vld [vmem:[#allocation2 + $0x92] sm:$0xff] }
 0x25b   :  { %14633 = vst [vmem:[#allocation6_spill] sm:$0xff] %v9476_v43  ;;  %2298 = vrot.lane.b32.xlu1 %v1522_v59, %s7748_s15  ;;  %v1707_v43 = vld [vmem:[#allocation2 + $0x1a] sm:$0xff] }
 0x25c   :  { %2304 = vrot.lane.b32.xlu0 %v1525_v50, %s7748_s15 }
 0x25d   :  { %v9480_v41 = vpop.permute.xlu1 %2050 }
 0x25e   :  { %14634 = vst [vmem:[#allocation9_spill] sm:$0xff] %v9480_v41  ;;  %v9482_v17 = vpop.permute.xlu0 %2056  ;;  %v10081_v41 = vld [vmem:[#allocation2 + $0x4a] sm:$0xff] }
 0x25f   :  { %14635 = vst [vmem:[#allocation8_spill] sm:$0xff] %v9482_v17  ;;  %2302 = vrot.lane.b32.xlu1 %v1524_v19, %s7748_s15  ;;  %v1546_v19 = vld [vmem:[#allocation2 + $0x172] sm:$0xff]  ;;  %v1663_v17 = vld [vmem:[#allocation2 + $0x109] sm:$0xff] }
 0x260   :  { %2308 = vrot.lane.b32.xlu0 %v1527_v30, %s7748_s15  ;;  %v1551_v30 = vld [vmem:[#allocation2 + $0x1e2] sm:$0xff] }
 0x261   :  { %v9486_v27 = vpop.permute.xlu1 %2054 }
 0x262   :  { %14636 = vst [vmem:[#allocation11_spill] sm:$0xff] %v9486_v27  ;;  %v9488_v37 = vpop.permute.xlu0 %2060  ;;  %v1667_v27 = vld [vmem:[#allocation2 + $0x139] sm:$0xff] }
 0x263   :  { %14637 = vst [vmem:[#allocation10_spill] sm:$0xff] %v9488_v37  ;;  %2306 = vrot.lane.b32.xlu1 %v1526_v22, %s7748_s15 }
 0x264   :  { %2312 = vrot.lane.b32.xlu0 %v1529_v31, %s7748_s15 }
 0x265   :  { %v9492_v1 = vpop.permute.xlu1 %2058 }
 0x266   :  { %14638 = vst [vmem:[#allocation13_spill] sm:$0xff] %v9492_v1  ;;  %v9494_v12 = vpop.permute.xlu0 %2064  ;;  %v9922_v1 = vld [vmem:[#allocation2 + $0xc9] sm:$0xff] }
 0x267   :  { %14639 = vst [vmem:[#allocation12_spill] sm:$0xff] %v9494_v12  ;;  %2310 = vrot.lane.b32.xlu1 %v1528_v8, %s7748_s15  ;;  %v1550_v8 = vld [vmem:[#allocation2 + $0x1d2] sm:$0xff]  ;;  %v9888_v12 = vld [vmem:[#allocation2 + $0xa9] sm:$0xff] }
 0x268   :  { %2316 = vrot.lane.b32.xlu0 %v1531_v60, %s7748_s15  ;;  %v1553_v60 = vld [vmem:[#allocation2 + $0x1fa] sm:$0xff] }
 0x269   :  { %v9498_v5 = vpop.permute.xlu1 %2062 }
 0x26a   :  { %14640 = vst [vmem:[#allocation15_spill] sm:$0xff] %v9498_v5  ;;  %v9500_v0 = vpop.permute.xlu0 %2068 }
 0x26b   :  { %14641 = vst [vmem:[#allocation14_spill] sm:$0xff] %v9500_v0  ;;  %2314 = vrot.lane.b32.xlu1 %v1530_v57, %s7748_s15  ;;  %v9876_v0 = vld [vmem:[#allocation2 + $0x91] sm:$0xff] }
 0x26c   :  { %2320 = vrot.lane.b32.xlu0 %v1533_v56, %s7748_s15 }
 0x26d   :  { %v9504_v34 = vpop.permute.xlu1 %2066 }
 0x26e   :  { %14642 = vst [vmem:[#allocation18_spill] sm:$0xff] %v9504_v34  ;;  %v9506_v28 = vpop.permute.xlu0 %2072 }
 0x26f   :  { %14643 = vst [vmem:[#allocation17_spill] sm:$0xff] %v9506_v28  ;;  %2318 = vrot.lane.b32.xlu1 %v1532_v48, %s7748_s15  ;;  %v1552_v48 = vld [vmem:[#allocation2 + $0x1ea] sm:$0xff]  ;;  %v9864_v28 = vld [vmem:[#allocation2 + $0x79] sm:$0xff] }
 0x270   :  { %2324 = vrot.lane.b32.xlu0 %v1535_v13, %s7748_s15  ;;  %v1555_v13 = vld [vmem:[#allocation2 + $0x212] sm:$0xff] }
 0x271   :  { %v9510_v9 = vpop.permute.xlu1 %2070 }
 0x272   :  { %14644 = vst [vmem:[#allocation22_spill] sm:$0xff] %v9510_v9  ;;  %v9512_v58 = vpop.permute.xlu0 %2076 }
 0x273   :  { %14645 = vst [vmem:[#allocation21_spill] sm:$0xff] %v9512_v58  ;;  %2322 = vrot.lane.b32.xlu1 %v1534_v14, %s7748_s15 }
 0x274   :  { %2328 = vrot.lane.b32.xlu0 %v1537_v25, %s7748_s15 }
 0x275   :  { %v9516_v38 = vpop.permute.xlu1 %2074 }
 0x276   :  { %14646 = vst [vmem:[#allocation28_spill] sm:$0xff] %v9516_v38  ;;  %v9518_v33 = vpop.permute.xlu0 %2080 }
 0x277   :  { %14647 = vst [vmem:[#allocation29_spill] sm:$0xff] %v9518_v33  ;;  %2326 = vrot.lane.b32.xlu1 %v1536_v53, %s7748_s15  ;;  %v1554_v53 = vld [vmem:[#allocation2 + $0x202] sm:$0xff]  ;;  %v1643_v33 = vld [vmem:[#allocation2 + $0x19] sm:$0xff] }
 0x278   :  { %2332 = vrot.lane.b32.xlu0 %v1539_v47, %s7748_s15  ;;  %v1557_v47 = vld [vmem:[#allocation2 + $0x22a] sm:$0xff] }
 0x279   :  { %v9522_v62 = vpop.permute.xlu1 %2078 }
 0x27a   :  { %14648 = vst [vmem:[#allocation30_spill] sm:$0xff] %v9522_v62  ;;  %v9524_v49 = vpop.permute.xlu0 %2084  ;;  %v9832_v62 = vld [vmem:[#allocation2 + $0x31] sm:$0xff] }
 0x27b   :  { %14649 = vst [vmem:[#allocation31_spill] sm:$0xff] %v9524_v49  ;;  %2330 = vrot.lane.b32.xlu1 %v1538_v61, %s7748_s15  ;;  %v1415_v49 = vld [vmem:[#allocation2 + $0x150] sm:$0xff] }
 0x27c   :  { %2336 = vrot.lane.b32.xlu0 %v1541_v51, %s7748_s15 }
 0x27d   :  { %v9528_v3 = vpop.permute.xlu1 %2082 }
 0x27e   :  { %14650 = vst [vmem:[#allocation32_spill] sm:$0xff] %v9528_v3  ;;  %v9530_v42 = vpop.permute.xlu0 %2088 }
 0x27f   :  { %14651 = vst [vmem:[#allocation33_spill] sm:$0xff] %v9530_v42  ;;  %2334 = vrot.lane.b32.xlu1 %v1540_v55, %s7748_s15  ;;  %v1556_v55 = vld [vmem:[#allocation2 + $0x21a] sm:$0xff] }
 0x280   :  { %2340 = vrot.lane.b32.xlu0 %v1543_v44, %s7748_s15  ;;  %v1559_v44 = vld [vmem:[#allocation2 + $0x242] sm:$0xff]  ;;  %v1413_v42 = vld [vmem:[#allocation2 + $0x138] sm:$0xff] }
 0x281   :  { %v9534_v54 = vpop.permute.xlu1 %2086 }
 0x282   :  { %14652 = vst [vmem:[#allocation34_spill] sm:$0xff] %v9534_v54  ;;  %v9536_v24 = vpop.permute.xlu0 %2096 }
 0x283   :  { %14653 = vst [vmem:[#allocation35_spill] sm:$0xff] %v9536_v24  ;;  %2338 = vrot.lane.b32.xlu1 %v1542_v40, %s7748_s15  ;;  %v1407_v24 = vld [vmem:[#allocation2 + $0xf0] sm:$0xff] }
 0x284   :  { %2344 = vrot.lane.b32.xlu0 %v1545_v39, %s7748_s15 }
 0x285   :  { %v9540_v10 = vpop.permute.xlu1 %2090 }
 0x286   :  { %14654 = vst [vmem:[#allocation36_spill] sm:$0xff] %v9540_v10  ;;  %v9542_v7 = vpop.permute.xlu0 %2100 }
 0x287   :  { %14655 = vst [vmem:[#allocation37_spill] sm:$0xff] %v9542_v7  ;;  %2342 = vrot.lane.b32.xlu1 %v1544_v32, %s7748_s15  ;;  %v1558_v32 = vld [vmem:[#allocation2 + $0x232] sm:$0xff] }
 0x288   :  { %2352 = vrot.lane.b32.xlu0 %v1549_v29, %s7748_s15  ;;  %v1561_v29 = vld [vmem:[#allocation2 + $0x25a] sm:$0xff] }
 0x289   :  { %v9546_v59 = vpop.permute.xlu1 %2098  ;;  %v1405_v7 = vld [vmem:[#allocation2 + $0xd8] sm:$0xff] }
 0x28a   :  { %14656 = vst [vmem:[#allocation38_spill] sm:$0xff] %v9546_v59  ;;  %v9548_v50 = vpop.permute.xlu0 %2104 }
 0x28b   :  { %14657 = vst [vmem:[#allocation39_spill] sm:$0xff] %v9548_v50  ;;  %2346 = vrot.lane.b32.xlu1 %v1546_v19, %s7748_s15  ;;  %v1403_v50 = vld [vmem:[#allocation2 + $0xc0] sm:$0xff] }
 0x28c   :  { %2356 = vrot.lane.b32.xlu0 %v1551_v30, %s7748_s15 }
 0x28d   :  { %v9552_v22 = vpop.permute.xlu1 %2102 }
 0x28e   :  { %14658 = vst [vmem:[#allocation40_spill] sm:$0xff] %v9552_v22  ;;  %v9554_v31 = vpop.permute.xlu0 %2108 }
 0x28f   :  { %14659 = vst [vmem:[#allocation41_spill] sm:$0xff] %v9554_v31  ;;  %2354 = vrot.lane.b32.xlu1 %v1550_v8, %s7748_s15  ;;  %v1560_v8 = vld [vmem:[#allocation2 + $0x24a] sm:$0xff] }
 0x290   :  { %2360 = vrot.lane.b32.xlu0 %v1553_v60, %s7748_s15  ;;  %v1563_v60 = vld [vmem:[#allocation2 + $0x272] sm:$0xff] }
 0x291   :  { %v9558_v57 = vpop.permute.xlu1 %2106 }
 0x292   :  { %14660 = vst [vmem:[#allocation42_spill] sm:$0xff] %v9558_v57  ;;  %v9560_v56 = vpop.permute.xlu0 %2112 }
 0x293   :  { %14661 = vst [vmem:[#allocation43_spill] sm:$0xff] %v9560_v56  ;;  %2358 = vrot.lane.b32.xlu1 %v1552_v48, %s7748_s15  ;;  %v1401_v56 = vld [vmem:[#allocation2 + $0xa8] sm:$0xff] }
 0x294   :  { %2364 = vrot.lane.b32.xlu0 %v1555_v13, %s7748_s15 }
 0x295   :  { %v9564_v14 = vpop.permute.xlu1 %2110 }
 0x296   :  { %14662 = vst [vmem:[#allocation44_spill] sm:$0xff] %v9564_v14  ;;  %v9566_v25 = vpop.permute.xlu0 %2116 }
 0x297   :  { %14663 = vst [vmem:[#allocation45_spill] sm:$0xff] %v9566_v25  ;;  %2362 = vrot.lane.b32.xlu1 %v1554_v53, %s7748_s15  ;;  %v1562_v53 = vld [vmem:[#allocation2 + $0x262] sm:$0xff]  ;;  %v1399_v25 = vld [vmem:[#allocation2 + $0x90] sm:$0xff] }
 0x298   :  { %2368 = vrot.lane.b32.xlu0 %v1557_v47, %s7748_s15  ;;  %v1565_v47 = vld [vmem:[#allocation2 + $0x28a] sm:$0xff] }
 0x299   :  { %v9570_v61 = vpop.permute.xlu1 %2114 }
 0x29a   :  { %14664 = vst [vmem:[#allocation46_spill] sm:$0xff] %v9570_v61  ;;  %v9572_v51 = vpop.permute.xlu0 %2120  ;;  %v1397_v61 = vld [vmem:[#allocation2 + $0x78] sm:$0xff] }
 0x29b   :  { %14665 = vst [vmem:[#allocation47_spill] sm:$0xff] %v9572_v51  ;;  %2366 = vrot.lane.b32.xlu1 %v1556_v55, %s7748_s15 }
 0x29c   :  { %2372 = vrot.lane.b32.xlu0 %v1559_v44, %s7748_s15 }
 0x29d   :  { %v9576_v40 = vpop.permute.xlu1 %2118 }
 0x29e   :  { %14666 = vst [vmem:[#allocation48_spill] sm:$0xff] %v9576_v40  ;;  %v9578_v39 = vpop.permute.xlu0 %2124 }
 0x29f   :  { %14667 = vst [vmem:[#allocation49_spill] sm:$0xff] %v9578_v39  ;;  %2370 = vrot.lane.b32.xlu1 %v1558_v32, %s7748_s15  ;;  %v1564_v32 = vld [vmem:[#allocation2 + $0x27a] sm:$0xff] }
 0x2a0   :  { %2376 = vrot.lane.b32.xlu0 %v1561_v29, %s7748_s15  ;;  %v1567_v29 = vld [vmem:[#allocation2 + $0x2a2] sm:$0xff] }
 0x2a1   :  { %v9582_v19 = vpop.permute.xlu1 %2122  ;;  %v1395_v39 = vld [vmem:[#allocation2 + $0x60] sm:$0xff] }
 0x2a2   :  { %14668 = vst [vmem:[#allocation50_spill] sm:$0xff] %v9582_v19  ;;  %v9584_v30 = vpop.permute.xlu0 %2128  ;;  %v1391_v19 = vld [vmem:[#allocation2 + $0x30] sm:$0xff] }
 0x2a3   :  { %14669 = vst [vmem:[#allocation51_spill] sm:$0xff] %v9584_v30  ;;  %2374 = vrot.lane.b32.xlu1 %v1560_v8, %s7748_s15  ;;  %v1393_v30 = vld [vmem:[#allocation2 + $0x48] sm:$0xff] }
 0x2a4   :  { %2380 = vrot.lane.b32.xlu0 %v1563_v60, %s7748_s15 }
 0x2a5   :  { %v9588_v48 = vpop.permute.xlu1 %2126 }
 0x2a6   :  { %14670 = vst [vmem:[#allocation52_spill] sm:$0xff] %v9588_v48  ;;  %v9590_v13 = vpop.permute.xlu0 %2132  ;;  %v1569_v48 = vld [vmem:[#allocation2 + $0x2ba] sm:$0xff] }
 0x2a7   :  { %14671 = vst [vmem:[#allocation53_spill] sm:$0xff] %v9590_v13  ;;  %2378 = vrot.lane.b32.xlu1 %v1562_v53, %s7748_s15  ;;  %v1566_v13 = vld [vmem:[#allocation2 + $0x292] sm:$0xff] }
 0x2a8   :  { %2384 = vrot.lane.b32.xlu0 %v1565_v47, %s7748_s15 }
 0x2a9   :  { %v9594_v55 = vpop.permute.xlu1 %2130 }
 0x2aa   :  { %14672 = vst [vmem:[#allocation54_spill] sm:$0xff] %v9594_v55  ;;  %v9596_v44 = vpop.permute.xlu0 %2136  ;;  %v1568_v55 = vld [vmem:[#allocation2 + $0x2aa] sm:$0xff] }
 0x2ab   :  { %14673 = vst [vmem:[#allocation55_spill] sm:$0xff] %v9596_v44  ;;  %2382 = vrot.lane.b32.xlu1 %v1564_v32, %s7748_s15  ;;  %v1571_v44 = vld [vmem:[#allocation2 + $0x2d2] sm:$0xff] }
 0x2ac   :  { %2388 = vrot.lane.b32.xlu0 %v1567_v29, %s7748_s15 }
 0x2ad   :  { %v9600_v8 = vpop.permute.xlu1 %2134 }
 0x2ae   :  { %14674 = vst [vmem:[#allocation56_spill] sm:$0xff] %v9600_v8  ;;  %v9602_v60 = vpop.permute.xlu0 %2140  ;;  %v1573_v8 = vld [vmem:[#allocation2 + $0x2ea] sm:$0xff] }
 0x2af   :  { %14675 = vst [vmem:[#allocation57_spill] sm:$0xff] %v9602_v60  ;;  %2386 = vrot.lane.b32.xlu1 %v1566_v13, %s7748_s15  ;;  %v1570_v60 = vld [vmem:[#allocation2 + $0x2c2] sm:$0xff] }
 0x2b0   :  { %2392 = vrot.lane.b32.xlu0 %v1569_v48, %s7748_s15 }
 0x2b1   :  { %v9606_v53 = vpop.permute.xlu1 %2138 }
 0x2b2   :  { %14676 = vst [vmem:[#allocation58_spill] sm:$0xff] %v9606_v53  ;;  %v9608_v47 = vpop.permute.xlu0 %2144  ;;  %v1575_v53 = vld [vmem:[#allocation2 + $0x302] sm:$0xff] }
 0x2b3   :  { %14677 = vst [vmem:[#allocation59_spill] sm:$0xff] %v9608_v47  ;;  %2390 = vrot.lane.b32.xlu1 %v1568_v55, %s7748_s15  ;;  %v1572_v47 = vld [vmem:[#allocation2 + $0x2da] sm:$0xff] }
 0x2b4   :  { %2396 = vrot.lane.b32.xlu0 %v1571_v44, %s7748_s15 }
 0x2b5   :  { %v9612_v32 = vpop.permute.xlu1 %2142 }
 0x2b6   :  { %14678 = vst [vmem:[#allocation60_spill] sm:$0xff] %v9612_v32  ;;  %v9614_v29 = vpop.permute.xlu0 %2148  ;;  %v1577_v32 = vld [vmem:[#allocation2 + $0x31a] sm:$0xff] }
 0x2b7   :  { %14679 = vst [vmem:[#allocation61_spill] sm:$0xff] %v9614_v29  ;;  %2394 = vrot.lane.b32.xlu1 %v1570_v60, %s7748_s15  ;;  %v1574_v29 = vld [vmem:[#allocation2 + $0x2f2] sm:$0xff] }
 0x2b8   :  { %2400 = vrot.lane.b32.xlu0 %v1573_v8, %s7748_s15 }
 0x2b9   :  { %v9618_v48 = vpop.permute.xlu1 %2146 }
 0x2ba   :  { %14680 = vst [vmem:[#allocation62_spill] sm:$0xff] %v9618_v48  ;;  %v9620_v13 = vpop.permute.xlu0 %2152  ;;  %v1389_v48 = vld [vmem:[#allocation2 + $0x18] sm:$0xff] }
 0x2bb   :  { %14681 = vst [vmem:[#allocation63_spill] sm:$0xff] %v9620_v13  ;;  %2398 = vrot.lane.b32.xlu1 %v1572_v47, %s7748_s15  ;;  %v1576_v13 = vld [vmem:[#allocation2 + $0x30a] sm:$0xff] }
 0x2bc   :  { %2404 = vrot.lane.b32.xlu0 %v1575_v53, %s7748_s15 }
 0x2bd   :  { %v9624_v55 = vpop.permute.xlu1 %2150 }
 0x2be   :  { %14682 = vst [vmem:[#allocation64_spill] sm:$0xff] %v9624_v55  ;;  %v9626_v44 = vpop.permute.xlu0 %2288  ;;  %v1578_v55 = vld [vmem:[#allocation2 + $0x322] sm:$0xff] }
 0x2bf   :  { %2402 = vrot.lane.b32.xlu1 %v1574_v29, %s7748_s15  ;;  %v1390_v29 = vld [vmem:[#allocation2 + $0x20] sm:$0xff] }
 0x2c0   :  { %2408 = vrot.lane.b32.xlu0 %v1577_v32, %s7748_s15 }
 0x2c1   :  { %v9630_v8 = vpop.permute.xlu1 %2154 }
 0x2c2   :  { %14683 = vst [vmem:[#allocation65_spill] sm:$0xff] %v9630_v8  ;;  %v9632_v60 = vpop.permute.xlu0 %2292 }
 0x2c3   :  { %14684 = vst [vmem:[#allocation66_spill] sm:$0xff] %v9632_v60  ;;  %2406 = vrot.lane.b32.xlu1 %v1576_v13, %s7748_s15  ;;  %v1392_v13 = vld [vmem:[#allocation2 + $0x38] sm:$0xff]  ;;  %v10234_v60 = vld [vmem:[#allocation2 + $0x142] sm:$0xff] }
 0x2c4   :  { %2540 = vrot.lane.b32.xlu0 %v1389_v48, %s7749_s3  ;;  %14834 = vst [vmem:[#allocation216_spill] sm:$0xff] %v10234_v60 }
 0x2c5   :  { %v9636_v53 = vpop.permute.xlu1 %2290 }
 0x2c6   :  { %v9638_v47 = vpop.permute.xlu0 %2296 }
 0x2c7   :  { %14685 = vst [vmem:[#allocation67_spill] sm:$0xff] %v9638_v47  ;;  %2410 = vrot.lane.b32.xlu1 %v1578_v55, %s7748_s15  ;;  %v1394_v55 = vld [vmem:[#allocation2 + $0x50] sm:$0xff]  ;;  %v10186_v47 = vld [vmem:[#allocation2 + $0xfa] sm:$0xff] }
 0x2c8   :  { %2544 = vrot.lane.b32.xlu0 %v1391_v19, %s7749_s3 }
 0x2c9   :  { %v9642_v32 = vpop.permute.xlu1 %2294 }
 0x2ca   :  { %14686 = vst [vmem:[#allocation68_spill] sm:$0xff] %v9642_v32  ;;  %v9644_v8 = vpop.permute.xlu0 %2300  ;;  %v10216_v32 = vld [vmem:[#allocation2 + $0x12a] sm:$0xff] }
 0x2cb   :  { %14687 = vst [vmem:[#allocation69_spill] sm:$0xff] %v9644_v8  ;;  %2542 = vrot.lane.b32.xlu1 %v1390_v29, %s7749_s3  ;;  %v1396_v29 = vld [vmem:[#allocation2 + $0x68] sm:$0xff]  ;;  %v10138_v8 = vld [vmem:[#allocation2 + $0x9a] sm:$0xff] }
 0x2cc   :  { %2548 = vrot.lane.b32.xlu0 %v1393_v30, %s7749_s3 }
 0x2cd   :  { %v9648_v48 = vpop.permute.xlu1 %2298 }
 0x2ce   :  { %14688 = vst [vmem:[#allocation70_spill] sm:$0xff] %v9648_v48  ;;  %v9650_v40 = vpop.permute.xlu0 %2304  ;;  %v10162_v48 = vld [vmem:[#allocation2 + $0xca] sm:$0xff] }
 0x2cf   :  { %14689 = vst [vmem:[#allocation71_spill] sm:$0xff] %v9650_v40  ;;  %2546 = vrot.lane.b32.xlu1 %v1392_v13, %s7749_s3  ;;  %v1398_v13 = vld [vmem:[#allocation2 + $0x80] sm:$0xff] }
 0x2d0   :  { %2552 = vrot.lane.b32.xlu0 %v1395_v39, %s7749_s3  ;;  %v10092_v40 = vld [vmem:[#allocation2 + $0x62] sm:$0xff] }
 0x2d1   :  { %v9654_v19 = vpop.permute.xlu1 %2302 }
 0x2d2   :  { %14690 = vst [vmem:[#allocation72_spill] sm:$0xff] %v9654_v19  ;;  %v9656_v51 = vpop.permute.xlu0 %2308  ;;  %v10114_v19 = vld [vmem:[#allocation2 + $0x6a] sm:$0xff] }
 0x2d3   :  { %14691 = vst [vmem:[#allocation73_spill] sm:$0xff] %v9656_v51  ;;  %2550 = vrot.lane.b32.xlu1 %v1394_v55, %s7749_s3  ;;  %v1400_v55 = vld [vmem:[#allocation2 + $0x98] sm:$0xff] }
 0x2d4   :  { %2556 = vrot.lane.b32.xlu0 %v1397_v61, %s7749_s3  ;;  %v1705_v51 = vld [vmem:[#allocation2 + $0x331] sm:$0xff] }
 0x2d5   :  { %v9660_v30 = vpop.permute.xlu1 %2306 }
 0x2d6   :  { %14692 = vst [vmem:[#allocation74_spill] sm:$0xff] %v9660_v30  ;;  %v9662_v14 = vpop.permute.xlu0 %2312  ;;  %v10072_v30 = vld [vmem:[#allocation2 + $0x32] sm:$0xff] }
 0x2d7   :  { %14693 = vst [vmem:[#allocation75_spill] sm:$0xff] %v9662_v14  ;;  %2554 = vrot.lane.b32.xlu1 %v1396_v29, %s7749_s3  ;;  %v1402_v29 = vld [vmem:[#allocation2 + $0xb0] sm:$0xff]  ;;  %v9931_v14 = vld [vmem:[#allocation2 + $0xe1] sm:$0xff] }
 0x2d8   :  { %2560 = vrot.lane.b32.xlu0 %v1399_v25, %s7749_s3 }
 0x2d9   :  { %v9666_v39 = vpop.permute.xlu1 %2310 }
 0x2da   :  { %14694 = vst [vmem:[#allocation76_spill] sm:$0xff] %v9666_v39  ;;  %v9668_v57 = vpop.permute.xlu0 %2316  ;;  %v1665_v39 = vld [vmem:[#allocation2 + $0x121] sm:$0xff] }
 0x2db   :  { %14695 = vst [vmem:[#allocation77_spill] sm:$0xff] %v9668_v57  ;;  %2558 = vrot.lane.b32.xlu1 %v1398_v13, %s7749_s3  ;;  %v1404_v13 = vld [vmem:[#allocation2 + $0xc8] sm:$0xff] }
 0x2dc   :  { %2564 = vrot.lane.b32.xlu0 %v1401_v56, %s7749_s3  ;;  %v9900_v57 = vld [vmem:[#allocation2 + $0xc1] sm:$0xff] }
 0x2dd   :  { %v9672_v61 = vpop.permute.xlu1 %2314 }
 0x2de   :  { %14696 = vst [vmem:[#allocation78_spill] sm:$0xff] %v9672_v61  ;;  %v9674_v31 = vpop.permute.xlu0 %2320  ;;  %v9912_v61 = vld [vmem:[#allocation2 + $0xd9] sm:$0xff] }
 0x2df   :  { %14697 = vst [vmem:[#allocation79_spill] sm:$0xff] %v9674_v31  ;;  %2562 = vrot.lane.b32.xlu1 %v1400_v55, %s7749_s3  ;;  %v1406_v55 = vld [vmem:[#allocation2 + $0xe0] sm:$0xff] }
 0x2e0   :  { %2568 = vrot.lane.b32.xlu0 %v1403_v50, %s7749_s3  ;;  %v9886_v31 = vld [vmem:[#allocation2 + $0x81] sm:$0xff] }
 0x2e1   :  { %v9678_v25 = vpop.permute.xlu1 %2318 }
 0x2e2   :  { %14698 = vst [vmem:[#allocation80_spill] sm:$0xff] %v9678_v25  ;;  %v9680_v22 = vpop.permute.xlu0 %2324 }
 0x2e3   :  { %14699 = vst [vmem:[#allocation81_spill] sm:$0xff] %v9680_v22  ;;  %2566 = vrot.lane.b32.xlu1 %v1402_v29, %s7749_s3  ;;  %v1408_v29 = vld [vmem:[#allocation2 + $0xf8] sm:$0xff]  ;;  %v9874_v22 = vld [vmem:[#allocation2 + $0x69] sm:$0xff] }
 0x2e4   :  { %2572 = vrot.lane.b32.xlu0 %v1405_v7, %s7749_s3 }
 0x2e5   :  { %v9684_v56 = vpop.permute.xlu1 %2322 }
 0x2e6   :  { %14700 = vst [vmem:[#allocation82_spill] sm:$0xff] %v9684_v56  ;;  %v9686_v59 = vpop.permute.xlu0 %2328 }
 0x2e7   :  { %14701 = vst [vmem:[#allocation83_spill] sm:$0xff] %v9686_v59  ;;  %2570 = vrot.lane.b32.xlu1 %v1404_v13, %s7749_s3  ;;  %v1410_v13 = vld [vmem:[#allocation2 + $0x110] sm:$0xff] }
 0x2e8   :  { %2576 = vrot.lane.b32.xlu0 %v1407_v24, %s7749_s3  ;;  %v9862_v59 = vld [vmem:[#allocation2 + $0x51] sm:$0xff] }
 0x2e9   :  { %v9690_v50 = vpop.permute.xlu1 %2326 }
 0x2ea   :  { %14702 = vst [vmem:[#allocation84_spill] sm:$0xff] %v9690_v50  ;;  %v9692_v36 = vpop.permute.xlu0 %2332 }
 0x2eb   :  { %14703 = vst [vmem:[#allocation85_spill] sm:$0xff] %v9692_v36  ;;  %2574 = vrot.lane.b32.xlu1 %v1406_v55, %s7749_s3  ;;  %v1412_v55 = vld [vmem:[#allocation2 + $0x128] sm:$0xff] }
 0x2ec   :  { %2580 = vrot.lane.b32.xlu0 %v1409_v2, %s7749_s3  ;;  %v9841_v36 = vld [vmem:[#allocation2 + $0x49] sm:$0xff] }
 0x2ed   :  { %v9696_v7 = vpop.permute.xlu1 %2330 }
 0x2ee   :  { %14704 = vst [vmem:[#allocation86_spill] sm:$0xff] %v9696_v7  ;;  %v9698_v63 = vpop.permute.xlu0 %2336  ;;  %v9852_v7 = vld [vmem:[#allocation2 + $0x61] sm:$0xff] }
 0x2ef   :  { %14705 = vst [vmem:[#allocation87_spill] sm:$0xff] %v9698_v63  ;;  %2578 = vrot.lane.b32.xlu1 %v1408_v29, %s7749_s3  ;;  %v1414_v29 = vld [vmem:[#allocation2 + $0x140] sm:$0xff]  ;;  %v1641_v63 = vld [vmem:[#allocation2 + $0x330] sm:$0xff] }
 0x2f0   :  { %2584 = vrot.lane.b32.xlu0 %v1411_v6, %s7749_s3 }
 0x2f1   :  { %v9702_v24 = vpop.permute.xlu1 %2334 }
 0x2f2   :  { %14706 = vst [vmem:[#allocation88_spill] sm:$0xff] %v9702_v24  ;;  %v9704_v10 = vpop.permute.xlu0 %2340  ;;  %v1642_v24 = vld [vmem:[#allocation2 + $0x338] sm:$0xff] }
 0x2f3   :  { %14707 = vst [vmem:[#allocation89_spill] sm:$0xff] %v9704_v10  ;;  %2582 = vrot.lane.b32.xlu1 %v1410_v13, %s7749_s3  ;;  %v1417_v10 = vld [vmem:[#allocation2 + $0x168] sm:$0xff]  ;;  %v1416_v13 = vld [vmem:[#allocation2 + $0x158] sm:$0xff] }
 0x2f4   :  { %2588 = vrot.lane.b32.xlu0 %v1413_v42, %s7749_s3 }
 0x2f5   :  { %v9708_v2 = vpop.permute.xlu1 %2338 }
 0x2f6   :  { %14708 = vst [vmem:[#allocation90_spill] sm:$0xff] %v9708_v2  ;;  %v9710_v54 = vpop.permute.xlu0 %2344 }
 0x2f7   :  { %14709 = vst [vmem:[#allocation91_spill] sm:$0xff] %v9710_v54  ;;  %2586 = vrot.lane.b32.xlu1 %v1412_v55, %s7749_s3  ;;  %v1609_v54 = vld [vmem:[#allocation2 + $0x180] sm:$0xff]  ;;  %v1418_v55 = vld [vmem:[#allocation2 + $0x170] sm:$0xff] }
 0x2f8   :  { %2592 = vrot.lane.b32.xlu0 %v1415_v49, %s7749_s3 }
 0x2f9   :  { %v9714_v6 = vpop.permute.xlu1 %2342 }
 0x2fa   :  { %14710 = vst [vmem:[#allocation92_spill] sm:$0xff] %v9714_v6  ;;  %v9716_v3 = vpop.permute.xlu0 %2352 }
 0x2fb   :  { %14711 = vst [vmem:[#allocation93_spill] sm:$0xff] %v9716_v3  ;;  %2590 = vrot.lane.b32.xlu1 %v1414_v29, %s7749_s3  ;;  %v1421_v3 = vld [vmem:[#allocation2 + $0x1c8] sm:$0xff] }
 0x2fc   :  { %2596 = vrot.lane.b32.xlu0 %v1417_v10, %s7749_s3 }
 0x2fd   :  { %v9720_v42 = vpop.permute.xlu1 %2346 }
 0x2fe   :  { %14712 = vst [vmem:[#allocation94_spill] sm:$0xff] %v9720_v42  ;;  %v9722_v2 = vpop.permute.xlu0 %2356  ;;  %v1423_v42 = vld [vmem:[#allocation2 + $0x1e0] sm:$0xff] }
 0x2ff   :  { %14713 = vst [vmem:[#allocation95_spill] sm:$0xff] %v9722_v2  ;;  %2594 = vrot.lane.b32.xlu1 %v1416_v13, %s7749_s3  ;;  %v1610_v2 = vld [vmem:[#allocation2 + $0x188] sm:$0xff]  ;;  %v1422_v13 = vld [vmem:[#allocation2 + $0x1d0] sm:$0xff] }
 0x300   :  { %2600 = vrot.lane.b32.xlu0 %v1609_v54, %s7749_s3 }
 0x301   :  { %v9726_v49 = vpop.permute.xlu1 %2354 }
 0x302   :  { %14714 = vst [vmem:[#allocation96_spill] sm:$0xff] %v9726_v49  ;;  %v9728_v6 = vpop.permute.xlu0 %2360 }
 0x303   :  { %14715 = vst [vmem:[#allocation97_spill] sm:$0xff] %v9728_v6  ;;  %2598 = vrot.lane.b32.xlu1 %v1418_v55, %s7749_s3  ;;  %v1425_v6 = vld [vmem:[#allocation2 + $0x1f8] sm:$0xff]  ;;  %v1424_v55 = vld [vmem:[#allocation2 + $0x1e8] sm:$0xff] }
 0x304   :  { %2604 = vrot.lane.b32.xlu0 %v1421_v3, %s7749_s3 }
 0x305   :  { %v9732_v10 = vpop.permute.xlu1 %2358 }
 0x306   :  { %14716 = vst [vmem:[#allocation98_spill] sm:$0xff] %v9732_v10  ;;  %v9734_v29 = vpop.permute.xlu0 %2364  ;;  %v1427_v10 = vld [vmem:[#allocation2 + $0x210] sm:$0xff] }
 0x307   :  { %14717 = vst [vmem:[#allocation99_spill] sm:$0xff] %v9734_v29  ;;  %2602 = vrot.lane.b32.xlu1 %v1610_v2, %s7749_s3 }
 0x308   :  { %2608 = vrot.lane.b32.xlu0 %v1423_v42, %s7749_s3  ;;  %v1426_v42 = vld [vmem:[#allocation2 + $0x200] sm:$0xff] }
 0x309   :  { %v9738_v54 = vpop.permute.xlu1 %2362 }
 0x30a   :  { %14718 = vst [vmem:[#allocation100_spill] sm:$0xff] %v9738_v54  ;;  %v9740_v49 = vpop.permute.xlu0 %2368 }
 0x30b   :  { %14719 = vst [vmem:[#allocation101_spill] sm:$0xff] %v9740_v49  ;;  %2606 = vrot.lane.b32.xlu1 %v1422_v13, %s7749_s3  ;;  %v1429_v49 = vld [vmem:[#allocation2 + $0x228] sm:$0xff]  ;;  %v1428_v13 = vld [vmem:[#allocation2 + $0x218] sm:$0xff] }
 0x30c   :  { %2612 = vrot.lane.b32.xlu0 %v1425_v6, %s7749_s3 }
 0x30d   :  { %v9744_v3 = vpop.permute.xlu1 %2366 }
 0x30e   :  { %14720 = vst [vmem:[#allocation102_spill] sm:$0xff] %v9744_v3  ;;  %v9746_v29 = vpop.permute.xlu0 %2372 }
 0x30f   :  { %14721 = vst [vmem:[#allocation103_spill] sm:$0xff] %v9746_v29  ;;  %2610 = vrot.lane.b32.xlu1 %v1424_v55, %s7749_s3  ;;  %v1431_v29 = vld [vmem:[#allocation2 + $0x240] sm:$0xff]  ;;  %v1430_v55 = vld [vmem:[#allocation2 + $0x230] sm:$0xff] }
 0x310   :  { %2616 = vrot.lane.b32.xlu0 %v1427_v10, %s7749_s3 }
 0x311   :  { %v9750_v2 = vpop.permute.xlu1 %2370 }
 0x312   :  { %14722 = vst [vmem:[#allocation104_spill] sm:$0xff] %v9750_v2  ;;  %v9752_v54 = vpop.permute.xlu0 %2376 }
 0x313   :  { %14723 = vst [vmem:[#allocation105_spill] sm:$0xff] %v9752_v54  ;;  %2614 = vrot.lane.b32.xlu1 %v1426_v42, %s7749_s3  ;;  %v1433_v54 = vld [vmem:[#allocation2 + $0x258] sm:$0xff]  ;;  %v1432_v42 = vld [vmem:[#allocation2 + $0x248] sm:$0xff] }
 0x314   :  { %2620 = vrot.lane.b32.xlu0 %v1429_v49, %s7749_s3 }
 0x315   :  { %v9756_v6 = vpop.permute.xlu1 %2374 }
 0x316   :  { %14724 = vst [vmem:[#allocation106_spill] sm:$0xff] %v9756_v6  ;;  %v9758_v3 = vpop.permute.xlu0 %2380 }
 0x317   :  { %14725 = vst [vmem:[#allocation107_spill] sm:$0xff] %v9758_v3  ;;  %2618 = vrot.lane.b32.xlu1 %v1428_v13, %s7749_s3  ;;  %v1435_v3 = vld [vmem:[#allocation2 + $0x270] sm:$0xff]  ;;  %v1434_v13 = vld [vmem:[#allocation2 + $0x260] sm:$0xff] }
 0x318   :  { %2624 = vrot.lane.b32.xlu0 %v1431_v29, %s7749_s3 }
 0x319   :  { %v9762_v10 = vpop.permute.xlu1 %2378 }
 0x31a   :  { %14726 = vst [vmem:[#allocation108_spill] sm:$0xff] %v9762_v10  ;;  %v9764_v2 = vpop.permute.xlu0 %2384 }
 0x31b   :  { %14727 = vst [vmem:[#allocation109_spill] sm:$0xff] %v9764_v2  ;;  %2622 = vrot.lane.b32.xlu1 %v1430_v55, %s7749_s3  ;;  %v1437_v2 = vld [vmem:[#allocation2 + $0x288] sm:$0xff]  ;;  %v1436_v55 = vld [vmem:[#allocation2 + $0x278] sm:$0xff] }
 0x31c   :  { %2628 = vrot.lane.b32.xlu0 %v1433_v54, %s7749_s3 }
 0x31d   :  { %v9768_v49 = vpop.permute.xlu1 %2382 }
 0x31e   :  { %14728 = vst [vmem:[#allocation110_spill] sm:$0xff] %v9768_v49  ;;  %v9770_v6 = vpop.permute.xlu0 %2388 }
 0x31f   :  { %14729 = vst [vmem:[#allocation111_spill] sm:$0xff] %v9770_v6  ;;  %2626 = vrot.lane.b32.xlu1 %v1432_v42, %s7749_s3  ;;  %v1439_v6 = vld [vmem:[#allocation2 + $0x2a0] sm:$0xff]  ;;  %v1438_v42 = vld [vmem:[#allocation2 + $0x290] sm:$0xff] }
 0x320   :  { %2632 = vrot.lane.b32.xlu0 %v1435_v3, %s7749_s3 }
 0x321   :  { %v9774_v29 = vpop.permute.xlu1 %2386 }
 0x322   :  { %14730 = vst [vmem:[#allocation112_spill] sm:$0xff] %v9774_v29  ;;  %v9776_v10 = vpop.permute.xlu0 %2392 }
 0x323   :  { %14731 = vst [vmem:[#allocation113_spill] sm:$0xff] %v9776_v10  ;;  %2630 = vrot.lane.b32.xlu1 %v1434_v13, %s7749_s3  ;;  %v1441_v10 = vld [vmem:[#allocation2 + $0x2b8] sm:$0xff]  ;;  %v1440_v13 = vld [vmem:[#allocation2 + $0x2a8] sm:$0xff] }
 0x324   :  { %2636 = vrot.lane.b32.xlu0 %v1437_v2, %s7749_s3 }
 0x325   :  { %v9780_v54 = vpop.permute.xlu1 %2390 }
 0x326   :  { %14732 = vst [vmem:[#allocation114_spill] sm:$0xff] %v9780_v54  ;;  %v9782_v49 = vpop.permute.xlu0 %2396 }
 0x327   :  { %14733 = vst [vmem:[#allocation115_spill] sm:$0xff] %v9782_v49  ;;  %2634 = vrot.lane.b32.xlu1 %v1436_v55, %s7749_s3  ;;  %v1443_v49 = vld [vmem:[#allocation2 + $0x2d0] sm:$0xff]  ;;  %v1442_v55 = vld [vmem:[#allocation2 + $0x2c0] sm:$0xff] }
 0x328   :  { %2640 = vrot.lane.b32.xlu0 %v1439_v6, %s7749_s3 }
 0x329   :  { %v9786_v3 = vpop.permute.xlu1 %2394 }
 0x32a   :  { %14734 = vst [vmem:[#allocation116_spill] sm:$0xff] %v9786_v3  ;;  %v9788_v29 = vpop.permute.xlu0 %2400 }
 0x32b   :  { %14735 = vst [vmem:[#allocation117_spill] sm:$0xff] %v9788_v29  ;;  %2638 = vrot.lane.b32.xlu1 %v1438_v42, %s7749_s3  ;;  %v1445_v29 = vld [vmem:[#allocation2 + $0x2e8] sm:$0xff]  ;;  %v1444_v42 = vld [vmem:[#allocation2 + $0x2d8] sm:$0xff] }
 0x32c   :  { %2644 = vrot.lane.b32.xlu0 %v1441_v10, %s7749_s3 }
 0x32d   :  { %v9792_v2 = vpop.permute.xlu1 %2398 }
 0x32e   :  { %14736 = vst [vmem:[#allocation118_spill] sm:$0xff] %v9792_v2  ;;  %v9794_v54 = vpop.permute.xlu0 %2404 }
 0x32f   :  { %14737 = vst [vmem:[#allocation119_spill] sm:$0xff] %v9794_v54  ;;  %2642 = vrot.lane.b32.xlu1 %v1440_v13, %s7749_s3  ;;  %v1447_v54 = vld [vmem:[#allocation2 + $0x300] sm:$0xff]  ;;  %v1446_v13 = vld [vmem:[#allocation2 + $0x2f0] sm:$0xff] }
 0x330   :  { %2648 = vrot.lane.b32.xlu0 %v1443_v49, %s7749_s3 }
 0x331   :  { %v9798_v6 = vpop.permute.xlu1 %2402 }
 0x332   :  { %14738 = vst [vmem:[#allocation120_spill] sm:$0xff] %v9798_v6  ;;  %v9800_v3 = vpop.permute.xlu0 %2408 }
 0x333   :  { %14739 = vst [vmem:[#allocation121_spill] sm:$0xff] %v9800_v3  ;;  %2646 = vrot.lane.b32.xlu1 %v1442_v55, %s7749_s3  ;;  %v1449_v3 = vld [vmem:[#allocation2 + $0x318] sm:$0xff]  ;;  %v1448_v55 = vld [vmem:[#allocation2 + $0x308] sm:$0xff] }
 0x334   :  { %2652 = vrot.lane.b32.xlu0 %v1445_v29, %s7749_s3 }
 0x335   :  { %v9804_v10 = vpop.permute.xlu1 %2406 }
 0x336   :  { %14740 = vst [vmem:[#allocation122_spill] sm:$0xff] %v9804_v10  ;;  %v9806_v2 = vpop.permute.xlu0 %2540 }
 0x337   :  { %2650 = vrot.lane.b32.xlu1 %v1444_v42, %s7749_s3  ;;  %v1450_v42 = vld [vmem:[#allocation2 + $0x320] sm:$0xff] }
 0x338   :  { %2656 = vrot.lane.b32.xlu0 %v1447_v54, %s7749_s3 }
 0x339   :  { %v9810_v49 = vpop.permute.xlu1 %2410 }
 0x33a   :  { %14741 = vst [vmem:[#allocation123_spill] sm:$0xff] %v9810_v49  ;;  %v9812_v6 = vpop.permute.xlu0 %2544 }
 0x33b   :  { %2654 = vrot.lane.b32.xlu1 %v1446_v13, %s7749_s3 }
 0x33c   :  { %2660 = vrot.lane.b32.xlu0 %v1449_v3, %s7749_s3 }
 0x33d   :  { %v9816_v29 = vpop.permute.xlu1 %2542 }
 0x33e   :  { %v9818_v10 = vpop.permute.xlu0 %2548 }
 0x33f   :  { %14742 = vst [vmem:[#allocation124_spill] sm:$0xff] %v9818_v10  ;;  %2658 = vrot.lane.b32.xlu1 %v1448_v55, %s7749_s3 }
 0x340   :  { %2664 = vrot.lane.b32.xlu0 %v1641_v63, %s7749_s3 }
 0x341   :  { %v9822_v54 = vpop.permute.xlu1 %2546 }
 0x342   :  { %v9824_v49 = vpop.permute.xlu0 %2552 }
 0x343   :  { %14743 = vst [vmem:[#allocation125_spill] sm:$0xff] %v9824_v49  ;;  %2662 = vrot.lane.b32.xlu1 %v1450_v42, %s7749_s3  ;;  %v1644_v42 = vld [vmem:[#allocation2 + $0x21] sm:$0xff]  ;;  %v10176_v49 = vld [vmem:[#allocation2 + $0x10a] sm:$0xff] }
 0x344   :  { %2796 = vrot.lane.b32.xlu0 %v1643_v33, %s7750_s4 }
 0x345   :  { %v9828_v3 = vpop.permute.xlu1 %2550 }
 0x346   :  { %14744 = vst [vmem:[#allocation126_spill] sm:$0xff] %v9828_v3  ;;  %v9830_v13 = vpop.permute.xlu0 %2556  ;;  %v10200_v3 = vld [vmem:[#allocation2 + $0x13a] sm:$0xff] }
 0x347   :  { %14745 = vst [vmem:[#allocation127_spill] sm:$0xff] %v9830_v13  ;;  %2666 = vrot.lane.b32.xlu1 %v1642_v24, %s7749_s3  ;;  %v9850_v24 = vld [vmem:[#allocation2 + $0x39] sm:$0xff]  ;;  %v10128_v13 = vld [vmem:[#allocation2 + $0xaa] sm:$0xff]  ;;  %14828 = vst [vmem:[#allocation210_spill] sm:$0xff] %v10200_v3 }
 0x348   :  { %2800 = vrot.lane.b32.xlu0 %v9832_v62, %s7750_s4 }
 0x349   :  { %v9837_v63 = vpop.permute.xlu1 %2554 }
 0x34a   :  { %14746 = vst [vmem:[#allocation128_spill] sm:$0xff] %v9837_v63  ;;  %v9839_v55 = vpop.permute.xlu0 %2560  ;;  %v10152_v63 = vld [vmem:[#allocation2 + $0xda] sm:$0xff] }
 0x34b   :  { %14747 = vst [vmem:[#allocation129_spill] sm:$0xff] %v9839_v55  ;;  %2798 = vrot.lane.b32.xlu1 %v1644_v42, %s7750_s4 }
 0x34c   :  { %2804 = vrot.lane.b32.xlu0 %v9841_v36, %s7750_s4 }
 0x34d   :  { %v9846_v33 = vpop.permute.xlu1 %2558 }
 0x34e   :  { %14748 = vst [vmem:[#allocation130_spill] sm:$0xff] %v9846_v33  ;;  %v9848_v58 = vpop.permute.xlu0 %2564  ;;  %v10104_v33 = vld [vmem:[#allocation2 + $0x7a] sm:$0xff] }
 0x34f   :  { %14749 = vst [vmem:[#allocation131_spill] sm:$0xff] %v9848_v58  ;;  %2802 = vrot.lane.b32.xlu1 %v9850_v24, %s7750_s4  ;;  %v1669_v58 = vld [vmem:[#allocation2 + $0x151] sm:$0xff] }
 0x350   :  { %2808 = vrot.lane.b32.xlu0 %v9852_v7, %s7750_s4 }
 0x351   :  { %v9858_v38 = vpop.permute.xlu1 %2562 }
 0x352   :  { %14750 = vst [vmem:[#allocation132_spill] sm:$0xff] %v9858_v38  ;;  %v9860_v42 = vpop.permute.xlu0 %2568  ;;  %v1706_v38 = vld [vmem:[#allocation2 + $0x339] sm:$0xff] }
 0x353   :  { %14751 = vst [vmem:[#allocation133_spill] sm:$0xff] %v9860_v42  ;;  %2806 = vrot.lane.b32.xlu1 %v9862_v59, %s7750_s4  ;;  %v1661_v42 = vld [vmem:[#allocation2 + $0xf1] sm:$0xff] }
 0x354   :  { %2812 = vrot.lane.b32.xlu0 %v9864_v28, %s7750_s4 }
 0x355   :  { %v9870_v50 = vpop.permute.xlu1 %2566 }
 0x356   :  { %14752 = vst [vmem:[#allocation134_spill] sm:$0xff] %v9870_v50  ;;  %v9872_v9 = vpop.permute.xlu0 %2572  ;;  %v1662_v50 = vld [vmem:[#allocation2 + $0xf9] sm:$0xff] }
 0x357   :  { %14753 = vst [vmem:[#allocation135_spill] sm:$0xff] %v9872_v9  ;;  %2810 = vrot.lane.b32.xlu1 %v9874_v22, %s7750_s4  ;;  %v9898_v9 = vld [vmem:[#allocation2 + $0x99] sm:$0xff] }
 0x358   :  { %2816 = vrot.lane.b32.xlu0 %v9876_v0, %s7750_s4 }
 0x359   :  { %v9882_v56 = vpop.permute.xlu1 %2570 }
 0x35a   :  { %14754 = vst [vmem:[#allocation136_spill] sm:$0xff] %v9882_v56  ;;  %v9884_v34 = vpop.permute.xlu0 %2576  ;;  %v9910_v56 = vld [vmem:[#allocation2 + $0xb1] sm:$0xff] }
 0x35b   :  { %14755 = vst [vmem:[#allocation137_spill] sm:$0xff] %v9884_v34  ;;  %2814 = vrot.lane.b32.xlu1 %v9886_v31, %s7750_s4 }
 0x35c   :  { %2820 = vrot.lane.b32.xlu0 %v9888_v12, %s7750_s4 }
 0x35d   :  { %v9894_v25 = vpop.permute.xlu1 %2574 }
 0x35e   :  { %14756 = vst [vmem:[#allocation138_spill] sm:$0xff] %v9894_v25  ;;  %v9896_v5 = vpop.permute.xlu0 %2580 }
 0x35f   :  { %14757 = vst [vmem:[#allocation139_spill] sm:$0xff] %v9896_v5  ;;  %2818 = vrot.lane.b32.xlu1 %v9898_v9, %s7750_s4 }
 0x360   :  { %2824 = vrot.lane.b32.xlu0 %v9900_v57, %s7750_s4 }
 0x361   :  { %v9906_v34 = vpop.permute.xlu1 %2578 }
 0x362   :  { %14758 = vst [vmem:[#allocation140_spill] sm:$0xff] %v9906_v34  ;;  %v9908_v37 = vpop.permute.xlu0 %2584 }
 0x363   :  { %14759 = vst [vmem:[#allocation141_spill] sm:$0xff] %v9908_v37  ;;  %2822 = vrot.lane.b32.xlu1 %v9910_v56, %s7750_s4 }
 0x364   :  { %2828 = vrot.lane.b32.xlu0 %v9912_v61, %s7750_s4 }
 0x365   :  { %v9918_v5 = vpop.permute.xlu1 %2582 }
 0x366   :  { %14760 = vst [vmem:[#allocation142_spill] sm:$0xff] %v9918_v5  ;;  %v9920_v25 = vpop.permute.xlu0 %2588 }
 0x367   :  { %14761 = vst [vmem:[#allocation143_spill] sm:$0xff] %v9920_v25  ;;  %2826 = vrot.lane.b32.xlu1 %v9922_v1, %s7750_s4 }
 0x368   :  { %2832 = vrot.lane.b32.xlu0 %v1661_v42, %s7750_s4 }
 0x369   :  { %v9927_v37 = vpop.permute.xlu1 %2586 }
 0x36a   :  { %14762 = vst [vmem:[#allocation144_spill] sm:$0xff] %v9927_v37  ;;  %v9929_v34 = vpop.permute.xlu0 %2592  ;;  %v1664_v37 = vld [vmem:[#allocation2 + $0x111] sm:$0xff] }
 0x36b   :  { %14763 = vst [vmem:[#allocation145_spill] sm:$0xff] %v9929_v34  ;;  %2830 = vrot.lane.b32.xlu1 %v9931_v14, %s7750_s4 }
 0x36c   :  { %2836 = vrot.lane.b32.xlu0 %v1663_v17, %s7750_s4 }
 0x36d   :  { %v9936_v25 = vpop.permute.xlu1 %2590 }
 0x36e   :  { %14764 = vst [vmem:[#allocation146_spill] sm:$0xff] %v9936_v25  ;;  %v9938_v5 = vpop.permute.xlu0 %2596 }
 0x36f   :  { %14765 = vst [vmem:[#allocation147_spill] sm:$0xff] %v9938_v5  ;;  %2834 = vrot.lane.b32.xlu1 %v1662_v50, %s7750_s4  ;;  %v1666_v5 = vld [vmem:[#allocation2 + $0x129] sm:$0xff] }
 0x370   :  { %2840 = vrot.lane.b32.xlu0 %v1665_v39, %s7750_s4 }
 0x371   :  { %v9942_v42 = vpop.permute.xlu1 %2594 }
 0x372   :  { %14766 = vst [vmem:[#allocation148_spill] sm:$0xff] %v9942_v42  ;;  %v9944_v34 = vpop.permute.xlu0 %2600  ;;  %v1671_v42 = vld [vmem:[#allocation2 + $0x169] sm:$0xff] }
 0x373   :  { %14767 = vst [vmem:[#allocation149_spill] sm:$0xff] %v9944_v34  ;;  %2838 = vrot.lane.b32.xlu1 %v1664_v37, %s7750_s4  ;;  %v1668_v34 = vld [vmem:[#allocation2 + $0x141] sm:$0xff] }
 0x374   :  { %2844 = vrot.lane.b32.xlu0 %v1667_v27, %s7750_s4 }
 0x375   :  { %v9948_v17 = vpop.permute.xlu1 %2598 }
 0x376   :  { %14768 = vst [vmem:[#allocation150_spill] sm:$0xff] %v9948_v17  ;;  %v9950_v25 = vpop.permute.xlu0 %2604  ;;  %v1673_v17 = vld [vmem:[#allocation2 + $0x181] sm:$0xff] }
 0x377   :  { %14769 = vst [vmem:[#allocation151_spill] sm:$0xff] %v9950_v25  ;;  %2842 = vrot.lane.b32.xlu1 %v1666_v5, %s7750_s4  ;;  %v1670_v25 = vld [vmem:[#allocation2 + $0x159] sm:$0xff] }
 0x378   :  { %2848 = vrot.lane.b32.xlu0 %v1669_v58, %s7750_s4 }
 0x379   :  { %v9954_v39 = vpop.permute.xlu1 %2602 }
 0x37a   :  { %14770 = vst [vmem:[#allocation152_spill] sm:$0xff] %v9954_v39  ;;  %v9956_v50 = vpop.permute.xlu0 %2608  ;;  %v1675_v39 = vld [vmem:[#allocation2 + $0x1c9] sm:$0xff] }
 0x37b   :  { %14771 = vst [vmem:[#allocation153_spill] sm:$0xff] %v9956_v50  ;;  %2846 = vrot.lane.b32.xlu1 %v1668_v34, %s7750_s4  ;;  %v1672_v50 = vld [vmem:[#allocation2 + $0x171] sm:$0xff] }
 0x37c   :  { %2852 = vrot.lane.b32.xlu0 %v1671_v42, %s7750_s4 }
 0x37d   :  { %v9960_v27 = vpop.permute.xlu1 %2606 }
 0x37e   :  { %14772 = vst [vmem:[#allocation154_spill] sm:$0xff] %v9960_v27  ;;  %v9962_v37 = vpop.permute.xlu0 %2612  ;;  %v1677_v27 = vld [vmem:[#allocation2 + $0x1e1] sm:$0xff] }
 0x37f   :  { %14773 = vst [vmem:[#allocation155_spill] sm:$0xff] %v9962_v37  ;;  %2850 = vrot.lane.b32.xlu1 %v1670_v25, %s7750_s4  ;;  %v1674_v37 = vld [vmem:[#allocation2 + $0x189] sm:$0xff] }
 0x380   :  { %2856 = vrot.lane.b32.xlu0 %v1673_v17, %s7750_s4 }
 0x381   :  { %v9966_v5 = vpop.permute.xlu1 %2610 }
 0x382   :  { %14774 = vst [vmem:[#allocation156_spill] sm:$0xff] %v9966_v5  ;;  %v9968_v58 = vpop.permute.xlu0 %2616  ;;  %v1679_v5 = vld [vmem:[#allocation2 + $0x1f9] sm:$0xff] }
 0x383   :  { %14775 = vst [vmem:[#allocation157_spill] sm:$0xff] %v9968_v58  ;;  %2854 = vrot.lane.b32.xlu1 %v1672_v50, %s7750_s4  ;;  %v1676_v58 = vld [vmem:[#allocation2 + $0x1d1] sm:$0xff] }
 0x384   :  { %2860 = vrot.lane.b32.xlu0 %v1675_v39, %s7750_s4 }
 0x385   :  { %v9972_v34 = vpop.permute.xlu1 %2614 }
 0x386   :  { %14776 = vst [vmem:[#allocation158_spill] sm:$0xff] %v9972_v34  ;;  %v9974_v42 = vpop.permute.xlu0 %2620  ;;  %v1681_v34 = vld [vmem:[#allocation2 + $0x211] sm:$0xff] }
 0x387   :  { %14777 = vst [vmem:[#allocation159_spill] sm:$0xff] %v9974_v42  ;;  %2858 = vrot.lane.b32.xlu1 %v1674_v37, %s7750_s4  ;;  %v1678_v42 = vld [vmem:[#allocation2 + $0x1e9] sm:$0xff] }
 0x388   :  { %2864 = vrot.lane.b32.xlu0 %v1677_v27, %s7750_s4 }
 0x389   :  { %v9978_v25 = vpop.permute.xlu1 %2618 }
 0x38a   :  { %14778 = vst [vmem:[#allocation160_spill] sm:$0xff] %v9978_v25  ;;  %v9980_v17 = vpop.permute.xlu0 %2624  ;;  %v1683_v25 = vld [vmem:[#allocation2 + $0x229] sm:$0xff] }
 0x38b   :  { %14779 = vst [vmem:[#allocation161_spill] sm:$0xff] %v9980_v17  ;;  %2862 = vrot.lane.b32.xlu1 %v1676_v58, %s7750_s4  ;;  %v1680_v17 = vld [vmem:[#allocation2 + $0x201] sm:$0xff] }
 0x38c   :  { %2868 = vrot.lane.b32.xlu0 %v1679_v5, %s7750_s4 }
 0x38d   :  { %v9984_v39 = vpop.permute.xlu1 %2622 }
 0x38e   :  { %14780 = vst [vmem:[#allocation162_spill] sm:$0xff] %v9984_v39  ;;  %v9986_v50 = vpop.permute.xlu0 %2628  ;;  %v1685_v39 = vld [vmem:[#allocation2 + $0x241] sm:$0xff] }
 0x38f   :  { %14781 = vst [vmem:[#allocation163_spill] sm:$0xff] %v9986_v50  ;;  %2866 = vrot.lane.b32.xlu1 %v1678_v42, %s7750_s4  ;;  %v1682_v50 = vld [vmem:[#allocation2 + $0x219] sm:$0xff] }
 0x390   :  { %2872 = vrot.lane.b32.xlu0 %v1681_v34, %s7750_s4 }
 0x391   :  { %v9990_v27 = vpop.permute.xlu1 %2626 }
 0x392   :  { %14782 = vst [vmem:[#allocation164_spill] sm:$0xff] %v9990_v27  ;;  %v9992_v37 = vpop.permute.xlu0 %2632  ;;  %v1687_v27 = vld [vmem:[#allocation2 + $0x259] sm:$0xff] }
 0x393   :  { %14783 = vst [vmem:[#allocation165_spill] sm:$0xff] %v9992_v37  ;;  %2870 = vrot.lane.b32.xlu1 %v1680_v17, %s7750_s4  ;;  %v1684_v37 = vld [vmem:[#allocation2 + $0x231] sm:$0xff] }
 0x394   :  { %2876 = vrot.lane.b32.xlu0 %v1683_v25, %s7750_s4 }
 0x395   :  { %v9996_v5 = vpop.permute.xlu1 %2630 }
 0x396   :  { %14784 = vst [vmem:[#allocation166_spill] sm:$0xff] %v9996_v5  ;;  %v9998_v58 = vpop.permute.xlu0 %2636  ;;  %v1686_v5 = vld [vmem:[#allocation2 + $0x249] sm:$0xff] }
 0x397   :  { %14785 = vst [vmem:[#allocation167_spill] sm:$0xff] %v9998_v58  ;;  %2874 = vrot.lane.b32.xlu1 %v1682_v50, %s7750_s4  ;;  %v1689_v58 = vld [vmem:[#allocation2 + $0x271] sm:$0xff] }
 0x398   :  { %2880 = vrot.lane.b32.xlu0 %v1685_v39, %s7750_s4 }
 0x399   :  { %v10002_v34 = vpop.permute.xlu1 %2634 }
 0x39a   :  { %14786 = vst [vmem:[#allocation168_spill] sm:$0xff] %v10002_v34  ;;  %v10004_v42 = vpop.permute.xlu0 %2640  ;;  %v1691_v34 = vld [vmem:[#allocation2 + $0x289] sm:$0xff] }
 0x39b   :  { %14787 = vst [vmem:[#allocation169_spill] sm:$0xff] %v10004_v42  ;;  %2878 = vrot.lane.b32.xlu1 %v1684_v37, %s7750_s4  ;;  %v1688_v42 = vld [vmem:[#allocation2 + $0x261] sm:$0xff] }
 0x39c   :  { %2884 = vrot.lane.b32.xlu0 %v1687_v27, %s7750_s4 }
 0x39d   :  { %v10008_v25 = vpop.permute.xlu1 %2638 }
 0x39e   :  { %14788 = vst [vmem:[#allocation170_spill] sm:$0xff] %v10008_v25  ;;  %v10010_v17 = vpop.permute.xlu0 %2644  ;;  %v1693_v25 = vld [vmem:[#allocation2 + $0x2a1] sm:$0xff] }
 0x39f   :  { %14789 = vst [vmem:[#allocation171_spill] sm:$0xff] %v10010_v17  ;;  %2882 = vrot.lane.b32.xlu1 %v1686_v5, %s7750_s4  ;;  %v1690_v17 = vld [vmem:[#allocation2 + $0x279] sm:$0xff] }
 0x3a0   :  { %2888 = vrot.lane.b32.xlu0 %v1689_v58, %s7750_s4 }
 0x3a1   :  { %v10014_v39 = vpop.permute.xlu1 %2642 }
 0x3a2   :  { %14790 = vst [vmem:[#allocation172_spill] sm:$0xff] %v10014_v39  ;;  %v10016_v50 = vpop.permute.xlu0 %2648  ;;  %v1695_v39 = vld [vmem:[#allocation2 + $0x2b9] sm:$0xff] }
 0x3a3   :  { %14791 = vst [vmem:[#allocation173_spill] sm:$0xff] %v10016_v50  ;;  %2886 = vrot.lane.b32.xlu1 %v1688_v42, %s7750_s4  ;;  %v1692_v50 = vld [vmem:[#allocation2 + $0x291] sm:$0xff] }
 0x3a4   :  { %2892 = vrot.lane.b32.xlu0 %v1691_v34, %s7750_s4 }
 0x3a5   :  { %v10020_v27 = vpop.permute.xlu1 %2646 }
 0x3a6   :  { %14792 = vst [vmem:[#allocation174_spill] sm:$0xff] %v10020_v27  ;;  %v10022_v37 = vpop.permute.xlu0 %2652  ;;  %v1697_v27 = vld [vmem:[#allocation2 + $0x2d1] sm:$0xff] }
 0x3a7   :  { %14793 = vst [vmem:[#allocation175_spill] sm:$0xff] %v10022_v37  ;;  %2890 = vrot.lane.b32.xlu1 %v1690_v17, %s7750_s4  ;;  %v1694_v37 = vld [vmem:[#allocation2 + $0x2a9] sm:$0xff] }
 0x3a8   :  { %2896 = vrot.lane.b32.xlu0 %v1693_v25, %s7750_s4 }
 0x3a9   :  { %v10026_v5 = vpop.permute.xlu1 %2650 }
 0x3aa   :  { %14794 = vst [vmem:[#allocation176_spill] sm:$0xff] %v10026_v5  ;;  %v10028_v58 = vpop.permute.xlu0 %2656  ;;  %v1699_v5 = vld [vmem:[#allocation2 + $0x2e9] sm:$0xff] }
 0x3ab   :  { %14795 = vst [vmem:[#allocation177_spill] sm:$0xff] %v10028_v58  ;;  %2894 = vrot.lane.b32.xlu1 %v1692_v50, %s7750_s4  ;;  %v1696_v58 = vld [vmem:[#allocation2 + $0x2c1] sm:$0xff] }
 0x3ac   :  { %2900 = vrot.lane.b32.xlu0 %v1695_v39, %s7750_s4 }
 0x3ad   :  { %v10032_v34 = vpop.permute.xlu1 %2654 }
 0x3ae   :  { %14796 = vst [vmem:[#allocation178_spill] sm:$0xff] %v10032_v34  ;;  %v10034_v42 = vpop.permute.xlu0 %2660  ;;  %v1701_v34 = vld [vmem:[#allocation2 + $0x301] sm:$0xff] }
 0x3af   :  { %14797 = vst [vmem:[#allocation179_spill] sm:$0xff] %v10034_v42  ;;  %2898 = vrot.lane.b32.xlu1 %v1694_v37, %s7750_s4  ;;  %v1698_v42 = vld [vmem:[#allocation2 + $0x2d9] sm:$0xff] }
 0x3b0   :  { %2904 = vrot.lane.b32.xlu0 %v1697_v27, %s7750_s4 }
 0x3b1   :  { %v10038_v25 = vpop.permute.xlu1 %2658 }
 0x3b2   :  { %14798 = vst [vmem:[#allocation180_spill] sm:$0xff] %v10038_v25  ;;  %v10040_v17 = vpop.permute.xlu0 %2664  ;;  %v1703_v25 = vld [vmem:[#allocation2 + $0x319] sm:$0xff] }
 0x3b3   :  { %14799 = vst [vmem:[#allocation181_spill] sm:$0xff] %v10040_v17  ;;  %2902 = vrot.lane.b32.xlu1 %v1696_v58, %s7750_s4  ;;  %v1700_v17 = vld [vmem:[#allocation2 + $0x2f1] sm:$0xff] }
 0x3b4   :  { %2908 = vrot.lane.b32.xlu0 %v1699_v5, %s7750_s4 }
 0x3b5   :  { %v10044_v39 = vpop.permute.xlu1 %2662 }
 0x3b6   :  { %14800 = vst [vmem:[#allocation182_spill] sm:$0xff] %v10044_v39  ;;  %v10046_v50 = vpop.permute.xlu0 %2796  ;;  %v1702_v39 = vld [vmem:[#allocation2 + $0x309] sm:$0xff] }
 0x3b7   :  { %2906 = vrot.lane.b32.xlu1 %v1698_v42, %s7750_s4 }
 0x3b8   :  { %2912 = vrot.lane.b32.xlu0 %v1701_v34, %s7750_s4 }
 0x3b9   :  { %v10050_v27 = vpop.permute.xlu1 %2666 }
 0x3ba   :  { %14801 = vst [vmem:[#allocation183_spill] sm:$0xff] %v10050_v27  ;;  %v10052_v37 = vpop.permute.xlu0 %2800  ;;  %v1704_v27 = vld [vmem:[#allocation2 + $0x321] sm:$0xff] }
 0x3bb   :  { %2910 = vrot.lane.b32.xlu1 %v1700_v17, %s7750_s4 }
 0x3bc   :  { %2916 = vrot.lane.b32.xlu0 %v1703_v25, %s7750_s4 }
 0x3bd   :  { %v10056_v5 = vpop.permute.xlu1 %2798 }
 0x3be   :  { %v10058_v58 = vpop.permute.xlu0 %2804 }
 0x3bf   :  { %14802 = vst [vmem:[#allocation184_spill] sm:$0xff] %v10058_v58  ;;  %2914 = vrot.lane.b32.xlu1 %v1702_v39, %s7750_s4  ;;  %v10218_v58 = vld [vmem:[#allocation2 + $0x152] sm:$0xff] }
 0x3c0   :  { %2920 = vrot.lane.b32.xlu0 %v1705_v51, %s7750_s4  ;;  %14831 = vst [vmem:[#allocation213_spill] sm:$0xff] %v10218_v58 }
 0x3c1   :  { %v10062_v34 = vpop.permute.xlu1 %2802 }
 0x3c2   :  { %v10064_v42 = vpop.permute.xlu0 %2808 }
 0x3c3   :  { %14803 = vst [vmem:[#allocation185_spill] sm:$0xff] %v10064_v42  ;;  %2918 = vrot.lane.b32.xlu1 %v1704_v27, %s7750_s4  ;;  %v1708_v27 = vld [vmem:[#allocation2 + $0x22] sm:$0xff] }
 0x3c4   :  { %3052 = vrot.lane.b32.xlu0 %v1707_v43, %s7751_s20  ;;  %v10174_v42 = vld [vmem:[#allocation2 + $0xe2] sm:$0xff] }
 0x3c5   :  { %v10068_v25 = vpop.permute.xlu1 %2806 }
 0x3c6   :  { %14804 = vst [vmem:[#allocation186_spill] sm:$0xff] %v10068_v25  ;;  %v10070_v17 = vpop.permute.xlu0 %2812  ;;  %v10198_v25 = vld [vmem:[#allocation2 + $0x112] sm:$0xff] }
 0x3c7   :  { %14805 = vst [vmem:[#allocation187_spill] sm:$0xff] %v10070_v17  ;;  %2922 = vrot.lane.b32.xlu1 %v1706_v38, %s7750_s4  ;;  %v10090_v38 = vld [vmem:[#allocation2 + $0x3a] sm:$0xff]  ;;  %v10126_v17 = vld [vmem:[#allocation2 + $0x82] sm:$0xff] }
 0x3c8   :  { %3056 = vrot.lane.b32.xlu0 %v10072_v30, %s7751_s20 }
 0x3c9   :  { %v10077_v51 = vpop.permute.xlu1 %2810 }
 0x3ca   :  { %14806 = vst [vmem:[#allocation188_spill] sm:$0xff] %v10077_v51  ;;  %v10079_v39 = vpop.permute.xlu0 %2816  ;;  %v10150_v51 = vld [vmem:[#allocation2 + $0xb2] sm:$0xff] }
 0x3cb   :  { %14807 = vst [vmem:[#allocation189_spill] sm:$0xff] %v10079_v39  ;;  %3054 = vrot.lane.b32.xlu1 %v1708_v27, %s7751_s20 }
 0x3cc   :  { %3060 = vrot.lane.b32.xlu0 %v10081_v41, %s7751_s20 }
 0x3cd   :  { %v10086_v43 = vpop.permute.xlu1 %2814 }
 0x3ce   :  { %14808 = vst [vmem:[#allocation190_spill] sm:$0xff] %v10086_v43  ;;  %v10088_v55 = vpop.permute.xlu0 %2820 }
 0x3cf   :  { %14809 = vst [vmem:[#allocation191_spill] sm:$0xff] %v10088_v55  ;;  %3058 = vrot.lane.b32.xlu1 %v10090_v38, %s7751_s20 }
 0x3d0   :  { %3064 = vrot.lane.b32.xlu0 %v10092_v40, %s7751_s20 }
 0x3d1   :  { %v10098_v39 = vpop.permute.xlu1 %2818 }
 0x3d2   :  { %14810 = vst [vmem:[#allocation192_spill] sm:$0xff] %v10098_v39  ;;  %v10100_v27 = vpop.permute.xlu0 %2824 }
 0x3d3   :  { %14811 = vst [vmem:[#allocation193_spill] sm:$0xff] %v10100_v27  ;;  %3062 = vrot.lane.b32.xlu1 %v10102_v18, %s7751_s20 }
 0x3d4   :  { %3068 = vrot.lane.b32.xlu0 %v10104_v33, %s7751_s20 }
 0x3d5   :  { %v10110_v55 = vpop.permute.xlu1 %2822 }
 0x3d6   :  { %14812 = vst [vmem:[#allocation194_spill] sm:$0xff] %v10110_v55  ;;  %v10112_v43 = vpop.permute.xlu0 %2828 }
 0x3d7   :  { %14813 = vst [vmem:[#allocation195_spill] sm:$0xff] %v10112_v43  ;;  %3066 = vrot.lane.b32.xlu1 %v10114_v19, %s7751_s20 }
 0x3d8   :  { %3072 = vrot.lane.b32.xlu0 %v10116_v45, %s7751_s20 }
 0x3d9   :  { %v10122_v27 = vpop.permute.xlu1 %2826 }
 0x3da   :  { %14814 = vst [vmem:[#allocation196_spill] sm:$0xff] %v10122_v27  ;;  %v10124_v39 = vpop.permute.xlu0 %2832 }
 0x3db   :  { %14815 = vst [vmem:[#allocation197_spill] sm:$0xff] %v10124_v39  ;;  %3070 = vrot.lane.b32.xlu1 %v10126_v17, %s7751_s20 }
 0x3dc   :  { %3076 = vrot.lane.b32.xlu0 %v10128_v13, %s7751_s20 }
 0x3dd   :  { %v10134_v43 = vpop.permute.xlu1 %2830 }
 0x3de   :  { %14816 = vst [vmem:[#allocation198_spill] sm:$0xff] %v10134_v43  ;;  %v10136_v55 = vpop.permute.xlu0 %2836 }
 0x3df   :  { %14817 = vst [vmem:[#allocation199_spill] sm:$0xff] %v10136_v55  ;;  %3074 = vrot.lane.b32.xlu1 %v10138_v8, %s7751_s20 }
 0x3e0   :  { %3080 = vrot.lane.b32.xlu0 %v10140_v4, %s7751_s20 }
 0x3e1   :  { %v10146_v39 = vpop.permute.xlu1 %2834 }
 0x3e2   :  { %14818 = vst [vmem:[#allocation200_spill] sm:$0xff] %v10146_v39  ;;  %v10148_v27 = vpop.permute.xlu0 %2840 }
 0x3e3   :  { %14819 = vst [vmem:[#allocation201_spill] sm:$0xff] %v10148_v27  ;;  %3078 = vrot.lane.b32.xlu1 %v10150_v51, %s7751_s20 }
 0x3e4   :  { %3084 = vrot.lane.b32.xlu0 %v10152_v63, %s7751_s20 }
 0x3e5   :  { %v10158_v55 = vpop.permute.xlu1 %2838 }
 0x3e6   :  { %14820 = vst [vmem:[#allocation202_spill] sm:$0xff] %v10158_v55  ;;  %v10160_v43 = vpop.permute.xlu0 %2844 }
 0x3e7   :  { %14821 = vst [vmem:[#allocation203_spill] sm:$0xff] %v10160_v43  ;;  %3082 = vrot.lane.b32.xlu1 %v10162_v48, %s7751_s20 }
 0x3e8   :  { %3088 = vrot.lane.b32.xlu0 %v10164_v20, %s7751_s20 }
 0x3e9   :  { %v10170_v27 = vpop.permute.xlu1 %2842 }
 0x3ea   :  { %14822 = vst [vmem:[#allocation204_spill] sm:$0xff] %v10170_v27  ;;  %v10172_v39 = vpop.permute.xlu0 %2848 }
 0x3eb   :  { %14823 = vst [vmem:[#allocation205_spill] sm:$0xff] %v10172_v39  ;;  %3086 = vrot.lane.b32.xlu1 %v10174_v42, %s7751_s20 }
 0x3ec   :  { %3092 = vrot.lane.b32.xlu0 %v10176_v49, %s7751_s20 }
 0x3ed   :  { %v10182_v43 = vpop.permute.xlu1 %2846 }
 0x3ee   :  { %14824 = vst [vmem:[#allocation206_spill] sm:$0xff] %v10182_v43  ;;  %v10184_v55 = vpop.permute.xlu0 %2852  ;;  %v4531_v43 = vld [vmem:[%s14438_s5] sm:$0xff] }
 0x3ef   :  { %14825 = vst [vmem:[#allocation207_spill] sm:$0xff] %v10184_v55  ;;  %3090 = vrot.lane.b32.xlu1 %v10186_v47, %s7751_s20 }
 0x3f0   :  { %3096 = vrot.lane.b32.xlu0 %v10188_v52, %s7751_s20 }
 0x3f1   :  { %v10194_v39 = vpop.permute.xlu1 %2850 }
 0x3f2   :  { %14826 = vst [vmem:[#allocation208_spill] sm:$0xff] %v10194_v39  ;;  %v10196_v27 = vpop.permute.xlu0 %2856 }
 0x3f3   :  { %14827 = vst [vmem:[#allocation209_spill] sm:$0xff] %v10196_v27  ;;  %3094 = vrot.lane.b32.xlu1 %v10198_v25, %s7751_s20  ;;  %v4532_v27 = vld [vmem:[%s14438_s5 + $0x8] sm:$0xff] }
 0x3f4   :  { %3100 = vrot.lane.b32.xlu0 %v10200_v3, %s7751_s20  ;;  %v7649_v46 = vpack.c.bf16 %v4532_v27, %v4531_v43  ;;  %v10236_v3 = vld [vmem:[#allocation2 + $0x16a] sm:$0xff] }
 0x3f5   :  { %v10206_v55 = vpop.permute.xlu1 %2854  ;;  %14835 = vst [vmem:[#allocation217_spill] sm:$0xff] %v10236_v3 }
 0x3f6   :  { %14829 = vst [vmem:[#allocation211_spill] sm:$0xff] %v10206_v55  ;;  %v10214_v39 = vpop.permute.xlu0 %2860  ;;  %7650 = vmatprep.subr.bf16.mxu1 %v7649_v46  ;;  %v4533_v55 = vld [vmem:[%s14438_s5 + $0x10] sm:$0xff] }
 0x3f7   :  { %14830 = vst [vmem:[#allocation212_spill] sm:$0xff] %v10214_v39  ;;  %3098 = vrot.lane.b32.xlu1 %v10216_v32, %s7751_s20  ;;  %v4534_v39 = vld [vmem:[%s14438_s5 + $0x18] sm:$0xff]  ;;  %7652 = vmatpush3.bf16.msra.mxu1 %v7649_v46  ;;  %v4536_v46 = vld [vmem:[%s14438_s5 + $0x28] sm:$0xff] }
 0x3f8   :  { %3104 = vrot.lane.b32.xlu0 %v10218_v58, %s7751_s20  ;;  %v7653_v43 = vpack.c.bf16 %v4534_v39, %v4533_v55  ;;  %v4535_v58 = vld [vmem:[%s14438_s5 + $0x20] sm:$0xff] }
 0x3f9   :  { %v10230_v10 = vpop.permute.xlu1 %2858  ;;  %v7657_v39 = vpack.c.bf16 %v4536_v46, %v4535_v58  ;;  %v4538_v58 = vld [vmem:[%s14438_s5 + $0x38] sm:$0xff] }
 0x3fa   :  { %14832 = vst [vmem:[#allocation214_spill] sm:$0xff] %v10230_v10  ;;  %v10232_v27 = vpop.permute.xlu0 %2864  ;;  %7654 = vmatprep.subr.bf16.mxu1 %v7653_v43  ;;  %v10252_v10 = vld [vmem:[#allocation2 + $0x15a] sm:$0xff] }
 0x3fb   :  { %14833 = vst [vmem:[#allocation215_spill] sm:$0xff] %v10232_v27  ;;  %3102 = vrot.lane.b32.xlu1 %v10234_v60, %s7751_s20  ;;  %7656 = vmatpush3.bf16.msra.mxu1 %v7653_v43  ;;  %14838 = vst [vmem:[#allocation220_spill] sm:$0xff] %v10252_v10  ;;  %v10254_v60 = vld [vmem:[#allocation2 + $0x182] sm:$0xff] }
 0x3fc   :  { %3108 = vrot.lane.b32.xlu0 %v10236_v3, %s7751_s20  ;;  %14839 = vst [vmem:[#allocation221_spill] sm:$0xff] %v10254_v60  ;;  %7658 = vmatprep.subr.bf16.mxu1 %v7657_v39  ;;  %v4537_v3 = vld [vmem:[%s14438_s5 + $0x30] sm:$0xff] }
 0x3fd   :  { %v10248_v55 = vpop.permute.xlu1 %2862  ;;  %v7661_v46 = vpack.c.bf16 %v4538_v58, %v4537_v3 }
 0x3fe   :  { %14836 = vst [vmem:[#allocation218_spill] sm:$0xff] %v10248_v55  ;;  %v10250_v27 = vpop.permute.xlu0 %2868  ;;  %v10270_v55 = vld [vmem:[#allocation2 + $0x172] sm:$0xff] }
 0x3ff   :  { %14837 = vst [vmem:[#allocation219_spill] sm:$0xff] %v10250_v27  ;;  %3106 = vrot.lane.b32.xlu1 %v10252_v10, %s7751_s20  ;;  %7660 = vmatpush3.bf16.msra.mxu1 %v7657_v39  ;;  %v1772_v10 = vld [vmem:[#allocation2 + $0x30] sm:$0xff] }
 0x400   :  { %3112 = vrot.lane.b32.xlu0 %v10254_v60, %s7751_s20  ;;  %7662 = vmatprep.subr.bf16.mxu1 %v7661_v46  ;;  %v4539_v60 = vld [vmem:[%s14438_s5 + $0x40] sm:$0xff]  ;;  %v10282_v39 = vld [vmem:[#allocation2 + $0x18a] sm:$0xff]  ;;  %s7754_s5 = smov 64  }
 0x401   :  { %v10266_v43 = vpop.permute.xlu1 %2866 }
 0x402   :  { %v10268_v27 = vpop.permute.xlu0 %2872 }
 0x403   :  { %14840 = vst [vmem:[#allocation222_spill] sm:$0xff] %v10268_v27  ;;  %3110 = vrot.lane.b32.xlu1 %v10270_v55, %s7751_s20  ;;  %7664 = vmatpush3.bf16.msra.mxu1 %v7661_v46  ;;  %v1773_v27 = vld [vmem:[#allocation2 + $0x38] sm:$0xff] }
 0x404   :  { %3308 = vrot.lane.b32.xlu0 %v1772_v10, %s7752_s16  ;;  %7445 = vmatprep.subr.mxu1 %v4539_v60 }
 0x405   :  { %v10278_v16 = vpop.permute.xlu1 %2870 }
 0x406   :  { %14841 = vst [vmem:[#allocation223_spill] sm:$0xff] %v10278_v16  ;;  %v10280_v3 = vpop.permute.xlu0 %2876  ;;  %v1774_v16 = vld [vmem:[#allocation2 + $0x48] sm:$0xff] }
 0x407   :  { %14842 = vst [vmem:[#allocation224_spill] sm:$0xff] %v10280_v3  ;;  %3114 = vrot.lane.b32.xlu1 %v10282_v39, %s7751_s20  ;;  %7446 = vmatpush3.msra.mxu1 %v4539_v60 }
 0x408   :  { %3564 = vrot.lane.b32.xlu0 %v9832_v62, %s7753_s19 }
 0x409   :  { %v10288_v10 = vpop.permute.xlu1 %2874 }
 0x40a   :  { %14843 = vst [vmem:[#allocation225_spill] sm:$0xff] %v10288_v10  ;;  %v10290_v58 = vpop.permute.xlu0 %2880  ;;  %v1856_v10 = vld [vmem:[#allocation2 + $0x121] sm:$0xff] }
 0x40b   :  { %14844 = vst [vmem:[#allocation226_spill] sm:$0xff] %v10290_v58  ;;  %3310 = vrot.lane.b32.xlu1 %v1773_v27, %s7752_s16  ;;  %v1855_v58 = vld [vmem:[#allocation2 + $0x111] sm:$0xff] }
 0x40c   :  { %3820 = vrot.lane.b32.xlu0 %v10072_v30, %s7754_s5 }
 0x40d   :  { %v10295_v46 = vpop.permute.xlu1 %2878 }
 0x40e   :  { %14845 = vst [vmem:[#allocation227_spill] sm:$0xff] %v10295_v46  ;;  %v10297_v3 = vpop.permute.xlu0 %2884  ;;  %v1792_v46 = vld [vmem:[#allocation2 + $0x120] sm:$0xff] }
 0x40f   :  { %14846 = vst [vmem:[#allocation228_spill] sm:$0xff] %v10297_v3  ;;  %3566 = vrot.lane.b32.xlu1 %v9850_v24, %s7753_s19  ;;  %v1775_v3 = vld [vmem:[#allocation2 + $0x50] sm:$0xff] }
 0x410   :  { %3312 = vrot.lane.b32.xlu0 %v1774_v16, %s7752_s16 }
 0x411   :  { %v10302_v62 = vpop.permute.xlu1 %2882 }
 0x412   :  { %14847 = vst [vmem:[#allocation229_spill] sm:$0xff] %v10302_v62  ;;  %v10304_v60 = vpop.permute.xlu0 %2888  ;;  %v1791_v62 = vld [vmem:[#allocation2 + $0x110] sm:$0xff] }
 0x413   :  { %14848 = vst [vmem:[#allocation230_spill] sm:$0xff] %v10304_v60  ;;  %3822 = vrot.lane.b32.xlu1 %v10090_v38, %s7754_s5  ;;  %v1776_v60 = vld [vmem:[#allocation2 + $0x60] sm:$0xff] }
 0x414   :  { %3568 = vrot.lane.b32.xlu0 %v9841_v36, %s7753_s19 }
 0x415   :  { %v10310_v30 = vpop.permute.xlu1 %2886 }
 0x416   :  { %14849 = vst [vmem:[#allocation231_spill] sm:$0xff] %v10310_v30  ;;  %v10312_v27 = vpop.permute.xlu0 %2892  ;;  %v1854_v30 = vld [vmem:[#allocation2 + $0x109] sm:$0xff] }
 0x417   :  { %14850 = vst [vmem:[#allocation232_spill] sm:$0xff] %v10312_v27  ;;  %3314 = vrot.lane.b32.xlu1 %v1775_v3, %s7752_s16  ;;  %v1790_v27 = vld [vmem:[#allocation2 + $0x108] sm:$0xff] }
 0x418   :  { %3824 = vrot.lane.b32.xlu0 %v10081_v41, %s7754_s5 }
 0x419   :  { %v10317_v16 = vpop.permute.xlu1 %2890 }
 0x41a   :  { %14851 = vst [vmem:[#allocation233_spill] sm:$0xff] %v10317_v16  ;;  %v10319_v24 = vpop.permute.xlu0 %2896  ;;  %v1387_v16 = vld [vmem:[#allocation2] sm:$0xff] }
 0x41b   :  { %14852 = vst [vmem:[#allocation234_spill] sm:$0xff] %v10319_v24  ;;  %3570 = vrot.lane.b32.xlu1 %v9862_v59, %s7753_s19  ;;  %v1777_v24 = vld [vmem:[#allocation2 + $0x68] sm:$0xff] }
 0x41c   :  { %3316 = vrot.lane.b32.xlu0 %v1776_v60, %s7752_s16 }
 0x41d   :  { %v10324_v36 = vpop.permute.xlu1 %2894 }
 0x41e   :  { %14853 = vst [vmem:[#allocation235_spill] sm:$0xff] %v10324_v36  ;;  %v10326_v38 = vpop.permute.xlu0 %2900  ;;  %v1853_v36 = vld [vmem:[#allocation2 + $0xf9] sm:$0xff] }
 0x41f   :  { %14854 = vst [vmem:[#allocation236_spill] sm:$0xff] %v10326_v38  ;;  %3826 = vrot.lane.b32.xlu1 %v10102_v18, %s7754_s5  ;;  %v1778_v38 = vld [vmem:[#allocation2 + $0x78] sm:$0xff] }
 0x420   :  { %3572 = vrot.lane.b32.xlu0 %v9852_v7, %s7753_s19 }
 0x421   :  { %v10332_v41 = vpop.permute.xlu1 %2898 }
 0x422   :  { %14855 = vst [vmem:[#allocation237_spill] sm:$0xff] %v10332_v41  ;;  %v10334_v3 = vpop.permute.xlu0 %2904  ;;  %v1789_v41 = vld [vmem:[#allocation2 + $0xf8] sm:$0xff] }
 0x423   :  { %14856 = vst [vmem:[#allocation238_spill] sm:$0xff] %v10334_v3  ;;  %3318 = vrot.lane.b32.xlu1 %v1777_v24, %s7752_s16  ;;  %v1788_v3 = vld [vmem:[#allocation2 + $0xf0] sm:$0xff] }
 0x424   :  { %3828 = vrot.lane.b32.xlu0 %v10092_v40, %s7754_s5 }
 0x425   :  { %v10339_v59 = vpop.permute.xlu1 %2902 }
 0x426   :  { %14857 = vst [vmem:[#allocation239_spill] sm:$0xff] %v10339_v59  ;;  %v10341_v60 = vpop.permute.xlu0 %2908  ;;  %v1852_v59 = vld [vmem:[#allocation2 + $0xf1] sm:$0xff] }
 0x427   :  { %14858 = vst [vmem:[#allocation240_spill] sm:$0xff] %v10341_v60  ;;  %3574 = vrot.lane.b32.xlu1 %v9874_v22, %s7753_s19  ;;  %v1779_v60 = vld [vmem:[#allocation2 + $0x80] sm:$0xff] }
 0x428   :  { %3320 = vrot.lane.b32.xlu0 %v1778_v38, %s7752_s16 }
 0x429   :  { %v10346_v18 = vpop.permute.xlu1 %2906 }
 0x42a   :  { %14859 = vst [vmem:[#allocation241_spill] sm:$0xff] %v10346_v18  ;;  %v10348_v7 = vpop.permute.xlu0 %2912  ;;  %v1787_v18 = vld [vmem:[#allocation2 + $0xe0] sm:$0xff] }
 0x42b   :  { %14860 = vst [vmem:[#allocation242_spill] sm:$0xff] %v10348_v7  ;;  %3830 = vrot.lane.b32.xlu1 %v10114_v19, %s7754_s5  ;;  %v1780_v7 = vld [vmem:[#allocation2 + $0x90] sm:$0xff] }
 0x42c   :  { %3576 = vrot.lane.b32.xlu0 %v9864_v28, %s7753_s19 }
 0x42d   :  { %v10354_v40 = vpop.permute.xlu1 %2910 }
 0x42e   :  { %14861 = vst [vmem:[#allocation243_spill] sm:$0xff] %v10354_v40  ;;  %v10356_v24 = vpop.permute.xlu0 %2916  ;;  %v1786_v40 = vld [vmem:[#allocation2 + $0xd8] sm:$0xff] }
 0x42f   :  { %14862 = vst [vmem:[#allocation244_spill] sm:$0xff] %v10356_v24  ;;  %3322 = vrot.lane.b32.xlu1 %v1779_v60, %s7752_s16  ;;  %v1784_v24 = vld [vmem:[#allocation2 + $0xc0] sm:$0xff] }
 0x430   :  { %3832 = vrot.lane.b32.xlu0 %v10104_v33, %s7754_s5 }
 0x431   :  { %v10361_v22 = vpop.permute.xlu1 %2914 }
 0x432   :  { %14863 = vst [vmem:[#allocation245_spill] sm:$0xff] %v10361_v22  ;;  %v10363_v38 = vpop.permute.xlu0 %2920  ;;  %v1785_v22 = vld [vmem:[#allocation2 + $0xc8] sm:$0xff] }
 0x433   :  { %14864 = vst [vmem:[#allocation246_spill] sm:$0xff] %v10363_v38  ;;  %3578 = vrot.lane.b32.xlu1 %v9886_v31, %s7753_s19  ;;  %v1781_v38 = vld [vmem:[#allocation2 + $0x98] sm:$0xff] }
 0x434   :  { %3324 = vrot.lane.b32.xlu0 %v1780_v7, %s7752_s16 }
 0x435   :  { %v10368_v28 = vpop.permute.xlu1 %2918 }
 0x436   :  { %14865 = vst [vmem:[#allocation247_spill] sm:$0xff] %v10368_v28  ;;  %v10370_v19 = vpop.permute.xlu0 %3052  ;;  %v1782_v28 = vld [vmem:[#allocation2 + $0xa8] sm:$0xff] }
 0x437   :  { %3834 = vrot.lane.b32.xlu1 %v10126_v17, %s7754_s5 }
 0x438   :  { %3580 = vrot.lane.b32.xlu0 %v9876_v0, %s7753_s19 }
 0x439   :  { %v10376_v33 = vpop.permute.xlu1 %2922 }
 0x43a   :  { %14866 = vst [vmem:[#allocation248_spill] sm:$0xff] %v10376_v33  ;;  %v10378_v60 = vpop.permute.xlu0 %3056  ;;  %v1783_v33 = vld [vmem:[#allocation2 + $0xb0] sm:$0xff] }
 0x43b   :  { %3326 = vrot.lane.b32.xlu1 %v1781_v38, %s7752_s16 }
 0x43c   :  { %3836 = vrot.lane.b32.xlu0 %v10116_v45, %s7754_s5 }
 0x43d   :  { %v10383_v31 = vpop.permute.xlu1 %3054 }
 0x43e   :  { %v10385_v7 = vpop.permute.xlu0 %3060 }
 0x43f   :  { %3582 = vrot.lane.b32.xlu1 %v9898_v9, %s7753_s19 }
 0x440   :  { %3328 = vrot.lane.b32.xlu0 %v1782_v28, %s7752_s16 }
 0x441   :  { %v10390_v0 = vpop.permute.xlu1 %3058 }
 0x442   :  { %v10392_v17 = vpop.permute.xlu0 %3064 }
 0x443   :  { %3838 = vrot.lane.b32.xlu1 %v10138_v8, %s7754_s5 }
 0x444   :  { %3584 = vrot.lane.b32.xlu0 %v9888_v12, %s7753_s19 }
 0x445   :  { %v10398_v45 = vpop.permute.xlu1 %3062 }
 0x446   :  { %v10400_v38 = vpop.permute.xlu0 %3068 }
 0x447   :  { %3330 = vrot.lane.b32.xlu1 %v1783_v33, %s7752_s16 }
 0x448   :  { %3840 = vrot.lane.b32.xlu0 %v10128_v13, %s7754_s5 }
 0x449   :  { %v10405_v9 = vpop.permute.xlu1 %3066 }
 0x44a   :  { %v10407_v28 = vpop.permute.xlu0 %3072 }
 0x44b   :  { %3586 = vrot.lane.b32.xlu1 %v9910_v56, %s7753_s19 }
 0x44c   :  { %3332 = vrot.lane.b32.xlu0 %v1784_v24, %s7752_s16 }
 0x44d   :  { %v10412_v12 = vpop.permute.xlu1 %3070 }
 0x44e   :  { %v10414_v8 = vpop.permute.xlu0 %3076 }
 0x44f   :  { %3842 = vrot.lane.b32.xlu1 %v10150_v51, %s7754_s5 }
 0x450   :  { %3588 = vrot.lane.b32.xlu0 %v9900_v57, %s7753_s19 }
 0x451   :  { %v10420_v13 = vpop.permute.xlu1 %3074 }
 0x452   :  { %v10422_v33 = vpop.permute.xlu0 %3080 }
 0x453   :  { %3334 = vrot.lane.b32.xlu1 %v1785_v22, %s7752_s16 }
 0x454   :  { %3844 = vrot.lane.b32.xlu0 %v10140_v4, %s7754_s5 }
 0x455   :  { %v10427_v56 = vpop.permute.xlu1 %3078 }
 0x456   :  { %v10429_v24 = vpop.permute.xlu0 %3084 }
 0x457   :  { %3590 = vrot.lane.b32.xlu1 %v9922_v1, %s7753_s19 }
 0x458   :  { %3336 = vrot.lane.b32.xlu0 %v1786_v40, %s7752_s16 }
 0x459   :  { %v10434_v57 = vpop.permute.xlu1 %3082 }
 0x45a   :  { %v10436_v51 = vpop.permute.xlu0 %3088 }
 0x45b   :  { %3846 = vrot.lane.b32.xlu1 %v10162_v48, %s7754_s5 }
 0x45c   :  { %3592 = vrot.lane.b32.xlu0 %v9912_v61, %s7753_s19 }
 0x45d   :  { %v10442_v4 = vpop.permute.xlu1 %3086 }
 0x45e   :  { %v10444_v22 = vpop.permute.xlu0 %3092 }
 0x45f   :  { %3338 = vrot.lane.b32.xlu1 %v1787_v18, %s7752_s16 }
 0x460   :  { %3848 = vrot.lane.b32.xlu0 %v10152_v63, %s7754_s5 }
 0x461   :  { %v10449_v1 = vpop.permute.xlu1 %3090 }
 0x462   :  { %v10451_v40 = vpop.permute.xlu0 %3096 }
 0x463   :  { %3594 = vrot.lane.b32.xlu1 %v9931_v14, %s7753_s19 }
 0x464   :  { %3340 = vrot.lane.b32.xlu0 %v1788_v3, %s7752_s16 }
 0x465   :  { %v10456_v48 = vpop.permute.xlu1 %3094 }
 0x466   :  { %v10458_v61 = vpop.permute.xlu0 %3100 }
 0x467   :  { %3850 = vrot.lane.b32.xlu1 %v10174_v42, %s7754_s5 }
 0x468   :  { %3596 = vrot.lane.b32.xlu0 %v1852_v59, %s7753_s19 }
 0x469   :  { %v10463_v63 = vpop.permute.xlu1 %3098 }
 0x46a   :  { %v10465_v18 = vpop.permute.xlu0 %3104 }
 0x46b   :  { %3342 = vrot.lane.b32.xlu1 %v1789_v41, %s7752_s16  ;;  %v4012_v41 = vsel %vm691_vm2, %v1387_v16, %v9420_v11 }
 0x46c   :  { %3852 = vrot.lane.b32.xlu0 %v10164_v20, %s7754_s5 }
 0x46d   :  { %v10470_v14 = vpop.permute.xlu1 %3102 }
 0x46e   :  { %v10472_v3 = vpop.permute.xlu0 %3108 }
 0x46f   :  { %3598 = vrot.lane.b32.xlu1 %v1853_v36, %s7753_s19 }
 0x470   :  { %3344 = vrot.lane.b32.xlu0 %v1790_v27, %s7752_s16  ;;  %v1388_v27 = vld [vmem:[#allocation2 + $0x8] sm:$0xff] }
 0x471   :  { %v10476_v42 = vpop.permute.xlu1 %3106 }
 0x472   :  { %v10478_v59 = vpop.permute.xlu0 %3112 }
 0x473   :  { %3854 = vrot.lane.b32.xlu1 %v10186_v47, %s7754_s5  ;;  %v4077_v47 = vsel %vm4076_vm5, %v4012_v41, %v9439_v15 }
 0x474   :  { %3600 = vrot.lane.b32.xlu0 %v1854_v30, %s7753_s19  ;;  %v4142_v11 = vsel %vm4141_vm6, %v4077_v47, %v9806_v2 }
 0x475   :  { %v10483_v20 = vpop.permute.xlu1 %3110 }
 0x476   :  { %v3309_v36 = vpop.permute.xlu0 %3308 }
 0x477   :  { %3346 = vrot.lane.b32.xlu1 %v1791_v62, %s7752_s16  ;;  %v4207_v62 = vsel %vm4206_vm7, %v4142_v11, %v10046_v50 }
 0x478   :  { %3856 = vrot.lane.b32.xlu0 %v10176_v49, %s7754_s5  ;;  %v4272_v15 = vsel %vm4271_vm8, %v4207_v62, %v10370_v19  ;;  %v4013_v49 = vsel %vm691_vm2, %v1388_v27, %v9426_v21  ;;  %v1793_v27 = vld [vmem:[#allocation2 + $0x128] sm:$0xff] }
 0x479   :  { %v10492_v30 = vpop.permute.xlu1 %3114  ;;  %v4337_v2 = vsel %vm4336_vm9, %v4272_v15, %v3309_v36 }
 0x47a   :  { %v3565_v16 = vpop.permute.xlu0 %3564 }
 0x47b   :  { %3602 = vrot.lane.b32.xlu1 %v1855_v58, %s7753_s19  ;;  %v4402_v47 = vsel %vm4401_vm10, %v4337_v2, %v3565_v16  ;;  %v4078_v58 = vsel %vm4076_vm5, %v4013_v49, %v9436_v23  ;;  %v1857_v2 = vld [vmem:[#allocation2 + $0x129] sm:$0xff] }
 0x47c   :  { %3348 = vrot.lane.b32.xlu0 %v1792_v46, %s7752_s16  ;;  %v4143_v21 = vsel %vm4141_vm6, %v4078_v58, %v9816_v29 }
 0x47d   :  { %v3311_v41 = vpop.permute.xlu1 %3310  ;;  %v4208_v19 = vsel %vm4206_vm7, %v4143_v21, %v10056_v5  ;;  %v1858_v21 = vld [vmem:[#allocation2 + $0x139] sm:$0xff] }
 0x47e   :  { %v3821_v50 = vpop.permute.xlu0 %3820  ;;  %v4273_v16 = vsel %vm4271_vm8, %v4208_v19, %v10383_v31 }
 0x47f   :  { %v4467_v11 = vsel %vm4466_vm11, %v4402_v47, %v3821_v50  ;;  %3858 = vrot.lane.b32.xlu1 %v10198_v25, %s7754_s5  ;;  %v7686_v25 = vld [vmem:[#allocation2 + $0x18] sm:$0xff] }
 0x480   :  { %3604 = vrot.lane.b32.xlu0 %v1856_v10, %s7753_s19  ;;  %7447 = vmatprep.mubr.msk.f32.mxu1 %vm4540_vm12, %v4467_v11  ;;  %v4014_v23 = vsel %vm691_vm2, %v7686_v25, %v9450_v26  ;;  %v4338_v10 = vsel %vm4336_vm9, %v4273_v16, %v3311_v41  ;;  %v1794_v41 = vld [vmem:[#allocation2 + $0x138] sm:$0xff]  ;;  %v7687_v11 = vld [vmem:[#allocation2 + $0x20] sm:$0xff] }
 0x481   :  { %v3567_v46 = vpop.permute.xlu1 %3566  ;;  %v4079_v29 = vsel %vm4076_vm5, %v4014_v23, %v9626_v44 }
 0x482   :  { %v3313_v36 = vpop.permute.xlu0 %3312  ;;  %v4403_v5 = vsel %vm4401_vm10, %v4338_v10, %v3567_v46  ;;  %v4144_v31 = vsel %vm4141_vm6, %v4079_v29, %v9812_v6  ;;  %v14868_v10 = vld [vmem:[#allocation210_spill] sm:$0xff] }
 0x483   :  { %3350 = vrot.lane.b32.xlu1 %v1793_v27, %s7752_s16  ;;  %v4209_v26 = vsel %vm4206_vm7, %v4144_v31, %v10052_v37  ;;  %v4015_v37 = vsel %vm691_vm2, %v7687_v11, %v9456_v35  ;;  %v1795_v27 = vld [vmem:[#allocation2 + $0x140] sm:$0xff]  ;;  %v7689_v11 = vld [vmem:[#allocation2 + $0x38] sm:$0xff] }
 0x484   :  { %3860 = vrot.lane.b32.xlu0 %v10188_v52, %s7754_s5  ;;  %v4274_v52 = vsel %vm4271_vm8, %v4209_v26, %v10378_v60  ;;  %v4080_v60 = vsel %vm4076_vm5, %v4015_v37, %v9636_v53  ;;  %v14867_v53 = vld [vmem:[#allocation19_spill] sm:$0xff] }
 0x485   :  { %v3823_v62 = vpop.permute.xlu1 %3822  ;;  %v4339_v44 = vsel %vm4336_vm9, %v4274_v52, %v3313_v36  ;;  %v4145_v46 = vsel %vm4141_vm6, %v4080_v60, %v9822_v54  ;;  %v14869_v54 = vld [vmem:[#allocation66_spill] sm:$0xff]  ;;  %v14872_v37 = vld [vmem:[#allocation23_spill] sm:$0xff] }
 0x486   :  { %v3569_v15 = vpop.permute.xlu0 %3568  ;;  %v4468_v49 = vsel %vm4466_vm11, %v4403_v5, %v3823_v62  ;;  %v4210_v35 = vsel %vm4206_vm7, %v4145_v46, %v10062_v34  ;;  %v14870_v62 = vld [vmem:[#allocation124_spill] sm:$0xff]  ;;  %v1860_v60 = vld [vmem:[#allocation2 + $0x151] sm:$0xff] }
 0x487   :  { %3606 = vrot.lane.b32.xlu1 %v1857_v2, %s7753_s19  ;;  %7448 = vmatmul.mubr.msk.f32.vlgmr.msra.gmra.mrb[32].mxu1 %vm4540_vm12, %v4468_v49  ;;  %v4404_v47 = vsel %vm4401_vm10, %v4339_v44, %v3569_v15  ;;  %v4275_v16 = vsel %vm4271_vm8, %v4210_v35, %v10390_v0  ;;  %v1859_v49 = vld [vmem:[#allocation2 + $0x141] sm:$0xff] }
 0x488   :  { %3352 = vrot.lane.b32.xlu0 %v1794_v41, %s7752_s16  ;;  %v14871_v2 = vld [vmem:[#allocation184_spill] sm:$0xff]  ;;  %v1796_v41 = vld [vmem:[#allocation2 + $0x150] sm:$0xff]  ;;  %v5663_v35 = vld [vmem:[%s14439_s8] sm:$0xf] }
 0x489   :  { %v3315_v6 = vpop.permute.xlu1 %3314  ;;  %v14873_v46 = vld [vmem:[#allocation216_spill] sm:$0xff]  ;;  %7543 = vmatprep.subr.msk.mxu0 %vm300_vm1, %v5663_v35 }
 0x48a   :  { %v3825_v50 = vpop.permute.xlu0 %3824  ;;  %v4340_v23 = vsel %vm4336_vm9, %v4275_v16, %v3315_v6  ;;  %v14875_v16 = vld [vmem:[#allocation126_spill] sm:$0xff]  ;;  %7544 = vmatpush3.msk.msra.mxu0 %vm300_vm1, %v5663_v35 }
 0x48b   :  { %v4469_v58 = vsel %vm4466_vm11, %v4404_v47, %v3825_v50  ;;  %3862 = vrot.lane.b32.xlu1 %v10216_v32, %s7754_s5  ;;  %v7688_v32 = vld [vmem:[#allocation2 + $0x30] sm:$0xff] }
 0x48c   :  { %3608 = vrot.lane.b32.xlu0 %v1858_v21, %s7753_s19  ;;  %7450 = vmatprep.mubr.msk.f32.mxu1 %vm4540_vm12, %v4469_v58  ;;  %v4016_v25 = vsel %vm691_vm2, %v7688_v32, %v14867_v53  ;;  %v4017_v58 = vsel %vm691_vm2, %v7689_v11, %v14872_v37  ;;  %v14881_v11 = vld [vmem:[#allocation185_spill] sm:$0xff] }
 0x48d   :  { %v3571_v19 = vpop.permute.xlu1 %3570  ;;  %v4081_v29 = vsel %vm4076_vm5, %v4016_v25, %v14869_v54  ;;  %v14876_v25 = vld [vmem:[#allocation186_spill] sm:$0xff] }
 0x48e   :  { %v3317_v36 = vpop.permute.xlu0 %3316  ;;  %v4405_v34 = vsel %vm4401_vm10, %v4340_v23, %v3571_v19  ;;  %v4146_v0 = vsel %vm4141_vm6, %v4081_v29, %v14870_v62  ;;  %v1797_v54 = vld [vmem:[#allocation2 + $0x158] sm:$0xff]  ;;  %v14877_v62 = vld [vmem:[#allocation24_spill] sm:$0xff] }
 0x48f   :  { %3354 = vrot.lane.b32.xlu1 %v1795_v27, %s7752_s16  ;;  %v4211_v26 = vsel %vm4206_vm7, %v4146_v0, %v14871_v2  ;;  %v5600_v27 = vld [vmem:[%s14440_s1 + $0x8] sm:$0xff] }
 0x490   :  { %3864 = vrot.lane.b32.xlu0 %v14868_v10, %s7754_s5  ;;  %v4276_v52 = vsel %vm4271_vm8, %v4211_v26, %v10385_v7  ;;  %v14874_v7 = vld [vmem:[#allocation68_spill] sm:$0xff] }
 0x491   :  { %v3827_v5 = vpop.permute.xlu1 %3826  ;;  %v4341_v44 = vsel %vm4336_vm9, %v4276_v52, %v3317_v36  ;;  %v4082_v19 = vsel %vm4076_vm5, %v4017_v58, %v14874_v7  ;;  %v5599_v36 = vld [vmem:[%s14440_s1] sm:$0xff]  ;;  %v14880_v52 = vld [vmem:[#allocation125_spill] sm:$0xff]  ;;  %v1798_v58 = vld [vmem:[#allocation2 + $0x168] sm:$0xff] }
 0x492   :  { %v3573_v31 = vpop.permute.xlu0 %3572  ;;  %v4470_v15 = vsel %vm4466_vm11, %v4405_v34, %v3827_v5  ;;  %v4147_v32 = vsel %vm4141_vm6, %v4082_v19, %v14875_v16  ;;  %7545 = vmatprep.mubr.msk.f32.mxu0 %vm5664_vm13, %v5599_v36  ;;  %v5601_v34 = vld [vmem:[%s14440_s1 + $0x10] sm:$0xff]  ;;  %v7690_v5 = vld [vmem:[#allocation2 + $0x48] sm:$0xff] }
 0x493   :  { %3610 = vrot.lane.b32.xlu1 %v1859_v49, %s7753_s19  ;;  %7451 = vmatmul.mubr.msk.f32.gmra.mrb[34].mxu1 %vm4540_vm12, %v4470_v15  ;;  %v4406_v47 = vsel %vm4401_vm10, %v4341_v44, %v3573_v31  ;;  %v4212_v23 = vsel %vm4206_vm7, %v4147_v32, %v14876_v25  ;;  %v4018_v0 = vsel %vm691_vm2, %v7690_v5, %v14877_v62  ;;  %v14878_v15 = vld [vmem:[#allocation213_spill] sm:$0xff]  ;;  %v5604_v36 = vld [vmem:[%s14440_s1 + $0x28] sm:$0xff] }
 0x494   :  { %3356 = vrot.lane.b32.xlu0 %v1796_v41, %s7752_s16  ;;  %v4277_v29 = vsel %vm4271_vm8, %v4212_v23, %v10398_v45  ;;  %7546 = vmatmul.mubr.msk.f32.vlgmr.msra.gmra.mrb[32].mxu0 %vm5664_vm13, %v5600_v27  ;;  %v14879_v45 = vld [vmem:[#allocation67_spill] sm:$0xff]  ;;  %v5602_v41 = vld [vmem:[%s14440_s1 + $0x18] sm:$0xff]  ;;  %v7691_v27 = vld [vmem:[#allocation2 + $0x50] sm:$0xff] }
 0x495   :  { %v3319_v6 = vpop.permute.xlu1 %3318  ;;  %7548 = vmatprep.mubr.msk.f32.mxu0 %vm5664_vm13, %v5601_v34  ;;  %v4083_v49 = vsel %vm4076_vm5, %v4018_v0, %v14879_v45  ;;  %v14882_v16 = vld [vmem:[#allocation5_spill] sm:$0xff]  ;;  %v14883_v25 = vld [vmem:[#allocation220_spill] sm:$0xff]  ;;  %v5606_v45 = vld [vmem:[%s14440_s1 + $0x38] sm:$0xff] }
 0x496   :  { %v3829_v50 = vpop.permute.xlu0 %3828  ;;  %v4342_v31 = vsel %vm4336_vm9, %v4277_v29, %v3319_v6  ;;  %v4148_v44 = vsel %vm4141_vm6, %v4083_v49, %v14880_v52  ;;  %v5605_v23 = vld [vmem:[%s14440_s1 + $0x30] sm:$0xff]  ;;  %v14885_v29 = vld [vmem:[#allocation128_spill] sm:$0xff] }
 0x497   :  { %v4471_v21 = vsel %vm4466_vm11, %v4406_v47, %v3829_v50  ;;  %3866 = vrot.lane.b32.xlu1 %v14873_v46, %s7754_s5  ;;  %v1861_v50 = vld [vmem:[#allocation2 + $0x159] sm:$0xff]  ;;  %v4213_v37 = vsel %vm4206_vm7, %v4148_v44, %v14881_v11  ;;  %v14886_v62 = vld [vmem:[#allocation188_spill] sm:$0xff] }
 0x498   :  { %3612 = vrot.lane.b32.xlu0 %v1860_v60, %s7753_s19  ;;  %7453 = vmatprep.mubr.msk.f32.mxu1 %vm4540_vm12, %v4471_v21  ;;  %v5603_v21 = vld [vmem:[%s14440_s1 + $0x20] sm:$0xff]  ;;  %v4278_v60 = vsel %vm4271_vm8, %v4213_v37, %v10392_v17  ;;  %v4019_v17 = vsel %vm691_vm2, %v7691_v27, %v14882_v16  ;;  %v5609_v27 = vld [vmem:[%s14440_s1 + $0x50] sm:$0xff] }
 0x499   :  { %v3575_v53 = vpop.permute.xlu1 %3574  ;;  %7549 = vmatmul.mubr.msk.f32.gmra.mrb[34].mxu0 %vm5664_vm13, %v5602_v41  ;;  %v14887_v41 = vld [vmem:[#allocation26_spill] sm:$0xff]  ;;  %v14890_v37 = vld [vmem:[#allocation127_spill] sm:$0xff] }
 0x49a   :  { %v3321_v10 = vpop.permute.xlu0 %3320  ;;  %v4407_v2 = vsel %vm4401_vm10, %v4342_v31, %v3575_v53  ;;  %7551 = vmatprep.mubr.msk.f32.mxu0 %vm5664_vm13, %v5603_v21  ;;  %v1862_v53 = vld [vmem:[#allocation2 + $0x169] sm:$0xff] }
 0x49b   :  { %3358 = vrot.lane.b32.xlu1 %v1797_v54, %s7752_s16  ;;  %v4343_v46 = vsel %vm4336_vm9, %v4278_v60, %v3321_v10  ;;  %v14884_v10 = vld [vmem:[#allocation70_spill] sm:$0xff] }
 0x49c   :  { %3868 = vrot.lane.b32.xlu0 %v14878_v15, %s7754_s5  ;;  %v4084_v54 = vsel %vm4076_vm5, %v4019_v17, %v14884_v10  ;;  %v1799_v15 = vld [vmem:[#allocation2 + $0x170] sm:$0xff]  ;;  %v7693_v10 = vld [vmem:[#allocation2 + $0x68] sm:$0xff] }
 0x49d   :  { %v3831_v26 = vpop.permute.xlu1 %3830  ;;  %v4149_v34 = vsel %vm4141_vm6, %v4084_v54, %v14885_v29  ;;  %7552 = vmatmul.mubr.msk.f32.gmra.mrb[36].mxu0 %vm5664_vm13, %v5604_v36  ;;  %v1800_v36 = vld [vmem:[#allocation2 + $0x180] sm:$0xff] }
 0x49e   :  { %v3577_v47 = vpop.permute.xlu0 %3576  ;;  %v4472_v6 = vsel %vm4466_vm11, %v4407_v2, %v3831_v26  ;;  %v4214_v0 = vsel %vm4206_vm7, %v4149_v34, %v14886_v62  ;;  %7554 = vmatprep.mubr.msk.f32.mxu0 %vm5664_vm13, %v5605_v23  ;;  %v5607_v2 = vld [vmem:[%s14440_s1 + $0x40] sm:$0xff]  ;;  %v5610_v23 = vld [vmem:[%s14440_s1 + $0x58] sm:$0xff]  ;;  %v14893_v62 = vld [vmem:[#allocation72_spill] sm:$0xff] }
 0x49f   :  { %3614 = vrot.lane.b32.xlu1 %v1861_v50, %s7753_s19  ;;  %7454 = vmatmul.mubr.msk.f32.gmra.mrb[36].mxu1 %vm4540_vm12, %v4472_v6  ;;  %v4408_v19 = vsel %vm4401_vm10, %v4343_v46, %v3577_v47  ;;  %v4279_v49 = vsel %vm4271_vm8, %v4214_v0, %v10405_v9  ;;  %v7692_v26 = vld [vmem:[#allocation2 + $0x60] sm:$0xff]  ;;  %v14888_v47 = vld [vmem:[#allocation217_spill] sm:$0xff] }
 0x4a0   :  { %3360 = vrot.lane.b32.xlu0 %v1798_v58, %s7752_s16  ;;  %v4020_v52 = vsel %vm691_vm2, %v7692_v26, %v14887_v41  ;;  %v14889_v6 = vld [vmem:[#allocation69_spill] sm:$0xff]  ;;  %v14892_v54 = vld [vmem:[#allocation7_spill] sm:$0xff]  ;;  %v1801_v26 = vld [vmem:[#allocation2 + $0x188] sm:$0xff] }
 0x4a1   :  { %v3323_v7 = vpop.permute.xlu1 %3322  ;;  %v4085_v50 = vsel %vm4076_vm5, %v4020_v52, %v14889_v6  ;;  %7555 = vmatmul.mubr.msk.f32.gmra.mrb[38].mxu0 %vm5664_vm13, %v5606_v45  ;;  %v1863_v46 = vld [vmem:[#allocation2 + $0x171] sm:$0xff]  ;;  %v1864_v34 = vld [vmem:[#allocation2 + $0x181] sm:$0xff] }
 0x4a2   :  { %v3833_v35 = vpop.permute.xlu0 %3832  ;;  %v4344_v44 = vsel %vm4336_vm9, %v4279_v49, %v3323_v7  ;;  %v4150_v58 = vsel %vm4141_vm6, %v4085_v50, %v14890_v37  ;;  %7557 = vmatprep.mubr.msk.f32.mxu0 %vm5664_vm13, %v5607_v2  ;;  %v5608_v7 = vld [vmem:[%s14440_s1 + $0x48] sm:$0xff]  ;;  %v14895_v49 = vld [vmem:[#allocation190_spill] sm:$0xff]  ;;  %v14898_v37 = vld [vmem:[#allocation71_spill] sm:$0xff] }
 0x4a3   :  { %v4473_v32 = vsel %vm4466_vm11, %v4408_v19, %v3833_v35  ;;  %3870 = vrot.lane.b32.xlu1 %v14883_v25, %s7754_s5  ;;  %v14891_v19 = vld [vmem:[#allocation187_spill] sm:$0xff]  ;;  %v5612_v41 = vld [vmem:[%s14440_s1 + $0x68] sm:$0xff] }
 0x4a4   :  { %3616 = vrot.lane.b32.xlu0 %v1862_v53, %s7753_s19  ;;  %7456 = vmatprep.mubr.msk.f32.mxu1 %vm4540_vm12, %v4473_v32  ;;  %v4215_v35 = vsel %vm4206_vm7, %v4150_v58, %v14891_v19  ;;  %v14896_v6 = vld [vmem:[#allocation4_spill] sm:$0xff] }
 0x4a5   :  { %v3579_v5 = vpop.permute.xlu1 %3578  ;;  %v4280_v16 = vsel %vm4271_vm8, %v4215_v35, %v10400_v38  ;;  %7558 = vmatmul.mubr.msk.f32.gmra.mrb[40].mxu0 %vm5664_vm13, %v5608_v7  ;;  %v4021_v38 = vsel %vm691_vm2, %v7693_v10, %v14892_v54  ;;  %v1866_v10 = vld [vmem:[#allocation2 + $0x199] sm:$0xff] }
 0x4a6   :  { %v3325_v31 = vpop.permute.xlu0 %3324  ;;  %v4409_v9 = vsel %vm4401_vm10, %v4344_v44, %v3579_v5  ;;  %7560 = vmatprep.mubr.msk.f32.mxu0 %vm5664_vm13, %v5609_v27  ;;  %v5611_v5 = vld [vmem:[%s14440_s1 + $0x60] sm:$0xff]  ;;  %v4086_v0 = vsel %vm4076_vm5, %v4021_v38, %v14893_v62  ;;  %v5613_v44 = vld [vmem:[%s14440_s1 + $0x70] sm:$0xff]  ;;  %v5614_v27 = vld [vmem:[%s14440_s1 + $0x78] sm:$0xff] }
 0x4a7   :  { %3362 = vrot.lane.b32.xlu1 %v1799_v15, %s7752_s16  ;;  %v4345_v17 = vsel %vm4336_vm9, %v4280_v16, %v3325_v31  ;;  %v14894_v31 = vld [vmem:[#allocation130_spill] sm:$0xff]  ;;  %v14900_v16 = vld [vmem:[#allocation189_spill] sm:$0xff] }
 0x4a8   :  { %3872 = vrot.lane.b32.xlu0 %v14888_v47, %s7754_s5  ;;  %v4151_v15 = vsel %vm4141_vm6, %v4086_v0, %v14894_v31  ;;  %v7694_v47 = vld [vmem:[#allocation2 + $0x78] sm:$0xff]  ;;  %v5617_v0 = vld [vmem:[%s14440_s1 + $0x90] sm:$0xff] }
 0x4a9   :  { %v3835_v11 = vpop.permute.xlu1 %3834  ;;  %7561 = vmatmul.mubr.msk.f32.gmra.mrb[42].mxu0 %vm5664_vm13, %v5610_v23  ;;  %v4022_v50 = vsel %vm691_vm2, %v7694_v47, %v14896_v6  ;;  %v14902_v31 = vld [vmem:[#allocation74_spill] sm:$0xff]  ;;  %v5619_v6 = vld [vmem:[%s14440_s1 + $0xa0] sm:$0xff] }
 0x4aa   :  { %v3581_v21 = vpop.permute.xlu0 %3580  ;;  %v4474_v60 = vsel %vm4466_vm11, %v4409_v9, %v3835_v11  ;;  %7563 = vmatprep.mubr.msk.f32.mxu0 %vm5664_vm13, %v5611_v5  ;;  %v14897_v11 = vld [vmem:[#allocation221_spill] sm:$0xff]  ;;  %v4087_v58 = vsel %vm4076_vm5, %v4022_v50, %v14898_v37 }
 0x4ab   :  { %3618 = vrot.lane.b32.xlu1 %v1863_v46, %s7753_s19  ;;  %7457 = vmatmul.mubr.msk.f32.gmra.mrb[38].mxu1 %vm4540_vm12, %v4474_v60  ;;  %v4410_v53 = vsel %vm4401_vm10, %v4345_v17, %v3581_v21  ;;  %v1802_v60 = vld [vmem:[#allocation2 + $0x198] sm:$0xff]  ;;  %v14899_v46 = vld [vmem:[#allocation129_spill] sm:$0xff] }
 0x4ac   :  { %3364 = vrot.lane.b32.xlu0 %v1800_v36, %s7752_s16  ;;  %v4152_v7 = vsel %vm4141_vm6, %v4087_v58, %v14899_v46  ;;  %v1865_v36 = vld [vmem:[#allocation2 + $0x189] sm:$0xff]  ;;  %v1867_v58 = vld [vmem:[#allocation2 + $0x1a1] sm:$0xff] }
 0x4ad   :  { %v3327_v32 = vpop.permute.xlu1 %3326  ;;  %7564 = vmatmul.mubr.msk.f32.gmra.mrb[44].mxu0 %vm5664_vm13, %v5612_v41  ;;  %v4217_v17 = vsel %vm4206_vm7, %v4152_v7, %v14900_v16  ;;  %v14901_v5 = vld [vmem:[#allocation9_spill] sm:$0xff]  ;;  %v1931_v46 = vld [vmem:[#allocation2 + $0x1a2] sm:$0xff] }
 0x4ae   :  { %v3837_v25 = vpop.permute.xlu0 %3836  ;;  %7566 = vmatprep.mubr.msk.f32.mxu0 %vm5664_vm13, %v5613_v44  ;;  %v5618_v44 = vld [vmem:[%s14440_s1 + $0x98] sm:$0xff]  ;;  %v7696_v50 = vld [vmem:[#allocation2 + $0x90] sm:$0xff]  ;;  %v14907_v7 = vld [vmem:[#allocation131_spill] sm:$0xff] }
 0x4af   :  { %v4475_v29 = vsel %vm4466_vm11, %v4410_v53, %v3837_v25  ;;  %3874 = vrot.lane.b32.xlu1 %v10270_v55, %s7754_s5  ;;  %v4216_v55 = vsel %vm4206_vm7, %v4151_v15, %v14895_v49  ;;  %v4282_v53 = vsel %vm4271_vm8, %v4217_v17, %v10407_v28  ;;  %v14903_v49 = vld [vmem:[#allocation132_spill] sm:$0xff]  ;;  %v14908_v16 = vld [vmem:[#allocation191_spill] sm:$0xff] }
 0x4b0   :  { %3620 = vrot.lane.b32.xlu0 %v1864_v34, %s7753_s19  ;;  %7459 = vmatprep.mubr.msk.f32.mxu1 %vm4540_vm12, %v4475_v29  ;;  %v4281_v52 = vsel %vm4271_vm8, %v4216_v55, %v10412_v12  ;;  %v5616_v29 = vld [vmem:[%s14440_s1 + $0x88] sm:$0xff]  ;;  %v7695_v34 = vld [vmem:[#allocation2 + $0x80] sm:$0xff] }
 0x4b1   :  { %v3583_v45 = vpop.permute.xlu1 %3582  ;;  %v4346_v9 = vsel %vm4336_vm9, %v4281_v52, %v3327_v32  ;;  %v5615_v32 = vld [vmem:[%s14440_s1 + $0x80] sm:$0xff]  ;;  %7567 = vmatmul.mubr.msk.f32.gmra.mrb[46].mxu0 %vm5664_vm13, %v5614_v27  ;;  %v4023_v28 = vsel %vm691_vm2, %v7695_v34, %v14901_v5  ;;  %v5620_v27 = vld [vmem:[%s14440_s1 + $0xa8] sm:$0xff]  ;;  %v7697_v34 = vld [vmem:[#allocation2 + $0x98] sm:$0xff] }
 0x4b2   :  { %v3329_v2 = vpop.permute.xlu0 %3328  ;;  %v4411_v12 = vsel %vm4401_vm10, %v4346_v9, %v3583_v45  ;;  %7569 = vmatprep.mubr.msk.f32.mxu0 %vm5664_vm13, %v5615_v32  ;;  %v4088_v15 = vsel %vm4076_vm5, %v4023_v28, %v14902_v31  ;;  %v1803_v45 = vld [vmem:[#allocation2 + $0x1a0] sm:$0xff]  ;;  %v14905_v9 = vld [vmem:[#allocation6_spill] sm:$0xff]  ;;  %v5621_v32 = vld [vmem:[%s14440_s1 + $0xb0] sm:$0xff] }
 0x4b3   :  { %3366 = vrot.lane.b32.xlu1 %v1801_v26, %s7752_s16  ;;  %v4347_v25 = vsel %vm4336_vm9, %v4282_v53, %v3329_v2  ;;  %v4153_v55 = vsel %vm4141_vm6, %v4088_v15, %v14903_v49  ;;  %v1930_v26 = vld [vmem:[#allocation2 + $0x19a] sm:$0xff]  ;;  %v14910_v31 = vld [vmem:[#allocation76_spill] sm:$0xff] }
 0x4b4   :  { %3876 = vrot.lane.b32.xlu0 %v14897_v11, %s7754_s5  ;;  %v4024_v11 = vsel %vm691_vm2, %v7696_v50, %v14905_v9  ;;  %v14909_v5 = vld [vmem:[#allocation11_spill] sm:$0xff]  ;;  %v7698_v50 = vld [vmem:[#allocation2 + $0xa8] sm:$0xff] }
 0x4b5   :  { %v3839_v21 = vpop.permute.xlu1 %3838  ;;  %7570 = vmatmul.mubr.msk.f32.gmra.mrb[48].mxu0 %vm5664_vm13, %v5616_v29  ;;  %v5622_v29 = vld [vmem:[%s14440_s1 + $0xb8] sm:$0xff]  ;;  %v14913_v9 = vld [vmem:[#allocation8_spill] sm:$0xff] }
 0x4b6   :  { %v3585_v19 = vpop.permute.xlu0 %3584  ;;  %v4476_v35 = vsel %vm4466_vm11, %v4411_v12, %v3839_v21  ;;  %7572 = vmatprep.mubr.msk.f32.mxu0 %vm5664_vm13, %v5617_v0  ;;  %v14906_v12 = vld [vmem:[#allocation73_spill] sm:$0xff]  ;;  %v5623_v0 = vld [vmem:[%s14440_s1 + $0xc0] sm:$0xff] }
 0x4b7   :  { %3622 = vrot.lane.b32.xlu1 %v1865_v36, %s7753_s19  ;;  %7460 = vmatmul.mubr.msk.f32.gmra.mrb[40].mxu1 %vm4540_vm12, %v4476_v35  ;;  %v4412_v54 = vsel %vm4401_vm10, %v4347_v25, %v3585_v19  ;;  %v4089_v21 = vsel %vm4076_vm5, %v4024_v11, %v14906_v12  ;;  %v4026_v11 = vsel %vm691_vm2, %v7698_v50, %v14913_v9  ;;  %v14922_v9 = vld [vmem:[#allocation77_spill] sm:$0xff] }
 0x4b8   :  { %3368 = vrot.lane.b32.xlu0 %v1802_v60, %s7752_s16  ;;  %v4154_v19 = vsel %vm4141_vm6, %v4089_v21, %v14907_v7 }
 0x4b9   :  { %v3331_v23 = vpop.permute.xlu1 %3330  ;;  %7573 = vmatmul.mubr.msk.f32.gmra.mrb[50].mxu0 %vm5664_vm13, %v5618_v44  ;;  %v4219_v17 = vsel %vm4206_vm7, %v4154_v19, %v14908_v16  ;;  %v1805_v19 = vld [vmem:[#allocation2 + $0x1e8] sm:$0xff] }
 0x4ba   :  { %v3841_v38 = vpop.permute.xlu0 %3840  ;;  %7575 = vmatprep.mubr.msk.f32.mxu0 %vm5664_vm13, %v5619_v6  ;;  %v4284_v53 = vsel %vm4271_vm8, %v4219_v17, %v10414_v8  ;;  %v4025_v8 = vsel %vm691_vm2, %v7697_v34, %v14909_v5  ;;  %v5625_v6 = vld [vmem:[%s14440_s1 + $0xd0] sm:$0xff]  ;;  %v1932_v16 = vld [vmem:[#allocation2 + $0x1e2] sm:$0xff] }
 0x4bb   :  { %v4477_v62 = vsel %vm4466_vm11, %v4412_v54, %v3841_v38  ;;  %3878 = vrot.lane.b32.xlu1 %v10282_v39, %s7754_s5  ;;  %v14904_v39 = vld [vmem:[#allocation192_spill] sm:$0xff]  ;;  %v4090_v15 = vsel %vm4076_vm5, %v4025_v8, %v14910_v31  ;;  %v5627_v17 = vld [vmem:[%s14440_s1 + $0xe0] sm:$0xff]  ;;  %v14917_v34 = vld [vmem:[#allocation13_spill] sm:$0xff] }
 0x4bc   :  { %3624 = vrot.lane.b32.xlu0 %v1866_v10, %s7753_s19  ;;  %7462 = vmatprep.mubr.msk.f32.mxu1 %vm4540_vm12, %v4477_v62  ;;  %v4218_v41 = vsel %vm4206_vm7, %v4153_v55, %v14904_v39  ;;  %v1739_v38 = vld [vmem:[#allocation2 + $0x1ca] sm:$0xff]  ;;  %v1804_v62 = vld [vmem:[#allocation2 + $0x1e0] sm:$0xff] }
 0x4bd   :  { %v3587_v2 = vpop.permute.xlu1 %3586  ;;  %v4283_v47 = vsel %vm4271_vm8, %v4218_v41, %v10420_v13  ;;  %7576 = vmatmul.mubr.msk.f32.gmra.mrb[52].mxu0 %vm5664_vm13, %v5620_v27  ;;  %v1740_v41 = vld [vmem:[#allocation2 + $0x1d2] sm:$0xff]  ;;  %v1933_v8 = vld [vmem:[#allocation2 + $0x1ea] sm:$0xff] }
 0x4be   :  { %v3333_v52 = vpop.permute.xlu0 %3332  ;;  %v4348_v37 = vsel %vm4336_vm9, %v4283_v47, %v3331_v23  ;;  %7578 = vmatprep.mubr.msk.f32.mxu0 %vm5664_vm13, %v5621_v32  ;;  %v1868_v47 = vld [vmem:[#allocation2 + $0x1e1] sm:$0xff] }
 0x4bf   :  { %3370 = vrot.lane.b32.xlu1 %v1803_v45, %s7752_s16  ;;  %v4413_v13 = vsel %vm4401_vm10, %v4348_v37, %v3587_v2  ;;  %v4349_v25 = vsel %vm4336_vm9, %v4284_v53, %v3333_v52  ;;  %v14911_v45 = vld [vmem:[#allocation134_spill] sm:$0xff]  ;;  %v5624_v52 = vld [vmem:[%s14440_s1 + $0xc8] sm:$0xff] }
 0x4c0   :  { %3880 = vrot.lane.b32.xlu0 %v1930_v26, %s7754_s5  ;;  %v4155_v49 = vsel %vm4141_vm6, %v4090_v15, %v14911_v45  ;;  %v14912_v2 = vld [vmem:[#allocation194_spill] sm:$0xff]  ;;  %v14919_v31 = vld [vmem:[#allocation136_spill] sm:$0xff] }
 0x4c1   :  { %v3843_v60 = vpop.permute.xlu1 %3842  ;;  %7579 = vmatmul.mubr.msk.f32.gmra.mrb[54].mxu0 %vm5664_vm13, %v5622_v29  ;;  %v4220_v26 = vsel %vm4206_vm7, %v4155_v49, %v14912_v2  ;;  %v7699_v29 = vld [vmem:[#allocation2 + $0xb0] sm:$0xff]  ;;  %v14920_v49 = vld [vmem:[#allocation196_spill] sm:$0xff] }
 0x4c2   :  { %v3589_v35 = vpop.permute.xlu0 %3588  ;;  %v4478_v36 = vsel %vm4466_vm11, %v4413_v13, %v3843_v60  ;;  %7581 = vmatprep.mubr.msk.f32.mxu0 %vm5664_vm13, %v5623_v0  ;;  %v4285_v44 = vsel %vm4271_vm8, %v4220_v26, %v10427_v56  ;;  %v14915_v13 = vld [vmem:[#allocation133_spill] sm:$0xff]  ;;  %v5630_v26 = vld [vmem:[%s14440_s1 + $0xf8] sm:$0xff] }
 0x4c3   :  { %3626 = vrot.lane.b32.xlu1 %v1867_v58, %s7753_s19  ;;  %7463 = vmatmul.mubr.msk.f32.gmra.mrb[42].mxu1 %vm4540_vm12, %v4478_v36  ;;  %v4414_v10 = vsel %vm4401_vm10, %v4349_v25, %v3589_v35  ;;  %v14914_v58 = vld [vmem:[#allocation75_spill] sm:$0xff]  ;;  %v5626_v35 = vld [vmem:[%s14440_s1 + $0xd8] sm:$0xff]  ;;  %v14916_v36 = vld [vmem:[#allocation193_spill] sm:$0xff] }
 0x4c4   :  { %3882 = vrot.lane.b32.xlu0 %v1931_v46, %s7754_s5  ;;  %v4091_v12 = vsel %vm4076_vm5, %v4026_v11, %v14914_v58  ;;  %v14923_v58 = vld [vmem:[#allocation135_spill] sm:$0xff] }
 0x4c5   :  { %v3335_v23 = vpop.permute.xlu1 %3334  ;;  %7582 = vmatmul.mubr.msk.f32.gmra.mrb[56].mxu0 %vm5664_vm13, %v5624_v52  ;;  %v4156_v60 = vsel %vm4141_vm6, %v4091_v12, %v14915_v13  ;;  %v5631_v52 = vld [vmem:[%s14440_s1 + $0x100] sm:$0xff]  ;;  %v5632_v13 = vld [vmem:[%s14440_s1 + $0x108] sm:$0xff] }
 0x4c6   :  { %v3845_v54 = vpop.permute.xlu0 %3844  ;;  %v4350_v37 = vsel %vm4336_vm9, %v4285_v44, %v3335_v23  ;;  %7584 = vmatprep.mubr.msk.f32.mxu0 %vm5664_vm13, %v5625_v6  ;;  %v4221_v27 = vsel %vm4206_vm7, %v4156_v60, %v14916_v36  ;;  %v7700_v44 = vld [vmem:[#allocation2 + $0xc0] sm:$0xff] }
 0x4c7   :  { %v4479_v28 = vsel %vm4466_vm11, %v4414_v10, %v3845_v54  ;;  %3116 = vrot.lane.b32.xlu1 %v1739_v38, %s7751_s20  ;;  %v4286_v32 = vsel %vm4271_vm8, %v4221_v27, %v10422_v33  ;;  %v1869_v54 = vld [vmem:[#allocation2 + $0x1e9] sm:$0xff]  ;;  %v4027_v33 = vsel %vm691_vm2, %v7699_v29, %v14917_v34  ;;  %v14924_v60 = vld [vmem:[#allocation195_spill] sm:$0xff] }
 0x4c8   :  { %3372 = vrot.lane.b32.xlu0 %v1804_v62, %s7752_s16  ;;  %7465 = vmatprep.mubr.msk.f32.mxu1 %vm4540_vm12, %v4479_v28  ;;  %v5628_v38 = vld [vmem:[%s14440_s1 + $0xe8] sm:$0xff]  ;;  %v5629_v28 = vld [vmem:[%s14440_s1 + $0xf0] sm:$0xff]  ;;  %v14918_v62 = vld [vmem:[#allocation78_spill] sm:$0xff] }
 0x4c9   :  { %v3591_v55 = vpop.permute.xlu1 %3590  ;;  %7585 = vmatmul.mubr.msk.f32.gmra.mrb[58].mxu0 %vm5664_vm13, %v5626_v35  ;;  %v4092_v0 = vsel %vm4076_vm5, %v4027_v33, %v14918_v62  ;;  %v5633_v27 = vld [vmem:[%s14440_s1 + $0x110] sm:$0xff]  ;;  %v14926_v29 = vld [vmem:[#allocation80_spill] sm:$0xff]  ;;  %v14927_v33 = vld [vmem:[#allocation138_spill] sm:$0xff] }
 0x4ca   :  { %v3337_v39 = vpop.permute.xlu0 %3336  ;;  %v4415_v56 = vsel %vm4401_vm10, %v4350_v37, %v3591_v55  ;;  %7587 = vmatprep.mubr.msk.f32.mxu0 %vm5664_vm13, %v5627_v17  ;;  %v4157_v15 = vsel %vm4141_vm6, %v4092_v0, %v14919_v31  ;;  %v1871_v31 = vld [vmem:[#allocation2 + $0x201] sm:$0xff] }
 0x4cb   :  { %3118 = vrot.lane.b32.xlu1 %v1740_v41, %s7751_s20  ;;  %v4351_v53 = vsel %vm4336_vm9, %v4286_v32, %v3337_v39  ;;  %v4222_v55 = vsel %vm4206_vm7, %v4157_v15, %v14920_v49  ;;  %v1806_v41 = vld [vmem:[#allocation2 + $0x1f8] sm:$0xff]  ;;  %v1807_v32 = vld [vmem:[#allocation2 + $0x200] sm:$0xff]  ;;  %v5636_v15 = vld [vmem:[%s14440_s1 + $0x128] sm:$0xff] }
 0x4cc   :  { %3628 = vrot.lane.b32.xlu0 %v1868_v47, %s7753_s19  ;;  %v4287_v39 = vsel %vm4271_vm8, %v4222_v55, %v10434_v57  ;;  %v14921_v47 = vld [vmem:[#allocation10_spill] sm:$0xff]  ;;  %v1935_v49 = vld [vmem:[#allocation2 + $0x202] sm:$0xff]  ;;  %v5637_v55 = vld [vmem:[%s14440_s1 + $0x130] sm:$0xff] }
 0x4cd   :  { %v3847_v21 = vpop.permute.xlu1 %3846  ;;  %7588 = vmatmul.mubr.msk.f32.gmra.mrb[60].mxu0 %vm5664_vm13, %v5628_v38  ;;  %v4028_v6 = vsel %vm691_vm2, %v7700_v44, %v14921_v47  ;;  %v5635_v38 = vld [vmem:[%s14440_s1 + $0x120] sm:$0xff] }
 0x4ce   :  { %v3593_v46 = vpop.permute.xlu0 %3592  ;;  %v4480_v7 = vsel %vm4466_vm11, %v4415_v56, %v3847_v21  ;;  %7590 = vmatprep.mubr.msk.f32.mxu0 %vm5664_vm13, %v5629_v28  ;;  %v4093_v11 = vsel %vm4076_vm5, %v4028_v6, %v14922_v9  ;;  %v14928_v28 = vld [vmem:[#allocation198_spill] sm:$0xff]  ;;  %v14931_v6 = vld [vmem:[#allocation137_spill] sm:$0xff] }
 0x4cf   :  { %3374 = vrot.lane.b32.xlu1 %v1805_v19, %s7752_s16  ;;  %7466 = vmatmul.mubr.msk.f32.gmra.mrb[44].mxu1 %vm4540_vm12, %v4480_v7  ;;  %v4416_v23 = vsel %vm4401_vm10, %v4351_v53, %v3593_v46  ;;  %v4158_v12 = vsel %vm4141_vm6, %v4093_v11, %v14923_v58  ;;  %v1870_v7 = vld [vmem:[#allocation2 + $0x1f9] sm:$0xff]  ;;  %v7701_v53 = vld [vmem:[#allocation2 + $0xc8] sm:$0xff] }
 0x4d0   :  { %3884 = vrot.lane.b32.xlu0 %v1932_v16, %s7754_s5  ;;  %v4223_v46 = vsel %vm4206_vm7, %v4158_v12, %v14924_v60  ;;  %v1808_v12 = vld [vmem:[#allocation2 + $0x210] sm:$0xff]  ;;  %v5639_v60 = vld [vmem:[%s14440_s1 + $0x140] sm:$0xff] }
 0x4d1   :  { %v3339_v25 = vpop.permute.xlu1 %3338  ;;  %7591 = vmatmul.mubr.msk.f32.gmra.mrb[62].mxu0 %vm5664_vm13, %v5630_v26  ;;  %v4288_v19 = vsel %vm4271_vm8, %v4223_v46, %v10429_v24  ;;  %v14929_v26 = vld [vmem:[#allocation12_spill] sm:$0xff] }
 0x4d2   :  { %v3849_v10 = vpop.permute.xlu0 %3848  ;;  %v4352_v50 = vsel %vm4336_vm9, %v4287_v39, %v3339_v25  ;;  %7593 = vmatprep.mubr.msk.f32.mxu0 %vm5664_vm13, %v5631_v52  ;;  %v14925_v25 = vld [vmem:[#allocation15_spill] sm:$0xff] }
 0x4d3   :  { %v4481_v5 = vsel %vm4466_vm11, %v4416_v23, %v3849_v10  ;;  %3630 = vrot.lane.b32.xlu1 %v1869_v54, %s7753_s19  ;;  %v4029_v24 = vsel %vm691_vm2, %v7701_v53, %v14925_v25  ;;  %v1934_v10 = vld [vmem:[#allocation2 + $0x1fa] sm:$0xff] }
 0x4d4   :  { %3886 = vrot.lane.b32.xlu0 %v1933_v8, %s7754_s5  ;;  %7468 = vmatprep.mubr.msk.f32.mxu1 %vm4540_vm12, %v4481_v5  ;;  %v5634_v54 = vld [vmem:[%s14440_s1 + $0x118] sm:$0xff]  ;;  %v4094_v34 = vsel %vm4076_vm5, %v4029_v24, %v14926_v29  ;;  %v14930_v52 = vld [vmem:[#allocation79_spill] sm:$0xff]  ;;  %v5640_v24 = vld [vmem:[%s14440_s1 + $0x148] sm:$0xff] }
 0x4d5   :  { %v3595_v45 = vpop.permute.xlu1 %3594  ;;  %7594 = vmatmul.mubr.msk.f32.gmra.mrb[64].mxu0 %vm5664_vm13, %v5632_v13  ;;  %v4159_v5 = vsel %vm4141_vm6, %v4094_v34, %v14927_v33  ;;  %v1809_v29 = vld [vmem:[#allocation2 + $0x218] sm:$0xff] }
 0x4d6   :  { %v3341_v2 = vpop.permute.xlu0 %3340  ;;  %v4417_v57 = vsel %vm4401_vm10, %v4352_v50, %v3595_v45  ;;  %7596 = vmatprep.mubr.msk.f32.mxu0 %vm5664_vm13, %v5633_v27  ;;  %v4224_v62 = vsel %vm4206_vm7, %v4159_v5, %v14928_v28  ;;  %v1872_v27 = vld [vmem:[#allocation2 + $0x211] sm:$0xff] }
 0x4d7   :  { %3120 = vrot.lane.b32.xlu1 %v1932_v16, %s7751_s20  ;;  %v4353_v35 = vsel %vm4336_vm9, %v4288_v19, %v3341_v2  ;;  %v4289_v45 = vsel %vm4271_vm8, %v4224_v62, %v10442_v4  ;;  %v7702_v2 = vld [vmem:[#allocation2 + $0xd8] sm:$0xff]  ;;  %v7703_v19 = vld [vmem:[#allocation2 + $0xe0] sm:$0xff] }
 0x4d8   :  { %3376 = vrot.lane.b32.xlu0 %v1806_v41, %s7752_s16  ;;  %v4030_v39 = vsel %vm691_vm2, %v7702_v2, %v14929_v26  ;;  %v1936_v33 = vld [vmem:[#allocation2 + $0x212] sm:$0xff] }
 0x4d9   :  { %v3851_v37 = vpop.permute.xlu1 %3850  ;;  %7597 = vmatmul.mubr.msk.f32.gmra.mrb[66].mxu0 %vm5664_vm13, %v5634_v54  ;;  %v4095_v44 = vsel %vm4076_vm5, %v4030_v39, %v14930_v52  ;;  %v5642_v5 = vld [vmem:[%s14440_s1 + $0x158] sm:$0xff]  ;;  %v14940_v52 = vld [vmem:[#allocation199_spill] sm:$0xff] }
 0x4da   :  { %v3597_v56 = vpop.permute.xlu0 %3596  ;;  %v4482_v21 = vsel %vm4466_vm11, %v4417_v57, %v3851_v37  ;;  %7599 = vmatprep.mubr.msk.f32.mxu0 %vm5664_vm13, %v5635_v38  ;;  %v4160_v50 = vsel %vm4141_vm6, %v4095_v44, %v14931_v6  ;;  %v5638_v57 = vld [vmem:[%s14440_s1 + $0x138] sm:$0xff]  ;;  %v14932_v37 = vld [vmem:[#allocation197_spill] sm:$0xff] }
 0x4db   :  { %3122 = vrot.lane.b32.xlu1 %v1933_v8, %s7751_s20  ;;  %7469 = vmatmul.mubr.msk.f32.gmra.mrb[46].mxu1 %vm4540_vm12, %v4482_v21  ;;  %v4418_v16 = vsel %vm4401_vm10, %v4353_v35, %v3597_v56  ;;  %v4225_v58 = vsel %vm4206_vm7, %v4160_v50, %v14932_v37  ;;  %v14933_v35 = vld [vmem:[#allocation18_spill] sm:$0xff] }
 0x4dc   :  { %3632 = vrot.lane.b32.xlu0 %v1870_v7, %s7753_s19  ;;  %v4290_v56 = vsel %vm4271_vm8, %v4225_v58, %v10436_v51  ;;  %v4031_v51 = vsel %vm691_vm2, %v7703_v19, %v14933_v35  ;;  %v14937_v28 = vld [vmem:[#allocation14_spill] sm:$0xff] }
 0x4dd   :  { %v3343_v36 = vpop.permute.xlu1 %3342  ;;  %7600 = vmatmul.mubr.msk.f32.gmra.mrb[68].mxu0 %vm5664_vm13, %v5636_v15  ;;  %v7705_v58 = vld [vmem:[#allocation2 + $0xf8] sm:$0xff] }
 0x4de   :  { %v3853_v17 = vpop.permute.xlu0 %3852  ;;  %v4354_v41 = vsel %vm4336_vm9, %v4289_v45, %v3343_v36  ;;  %7602 = vmatprep.mubr.msk.f32.mxu0 %vm5664_vm13, %v5637_v55  ;;  %v14939_v55 = vld [vmem:[#allocation139_spill] sm:$0xff]  ;;  %v14943_v19 = vld [vmem:[#allocation142_spill] sm:$0xff] }
 0x4df   :  { %v4483_v23 = vsel %vm4466_vm11, %v4418_v16, %v3853_v17  ;;  %3378 = vrot.lane.b32.xlu1 %v1807_v32, %s7752_s16  ;;  %v14934_v16 = vld [vmem:[#allocation82_spill] sm:$0xff]  ;;  %v14935_v32 = vld [vmem:[#allocation140_spill] sm:$0xff] }
 0x4e0   :  { %3888 = vrot.lane.b32.xlu0 %v1934_v10, %s7754_s5  ;;  %7471 = vmatprep.mubr.msk.f32.mxu1 %vm4540_vm12, %v4483_v23  ;;  %v4096_v17 = vsel %vm4076_vm5, %v4031_v51, %v14934_v16  ;;  %v5641_v23 = vld [vmem:[%s14440_s1 + $0x150] sm:$0xff] }
 0x4e1   :  { %v3599_v8 = vpop.permute.xlu1 %3598  ;;  %7603 = vmatmul.mubr.msk.f32.gmra.mrb[70].mxu0 %vm5664_vm13, %v5638_v57  ;;  %v4161_v53 = vsel %vm4141_vm6, %v4096_v17, %v14935_v32  ;;  %v1874_v32 = vld [vmem:[#allocation2 + $0x229] sm:$0xff] }
 0x4e2   :  { %v3345_v0 = vpop.permute.xlu0 %3344  ;;  %v4419_v4 = vsel %vm4401_vm10, %v4354_v41, %v3599_v8  ;;  %7605 = vmatprep.mubr.msk.f32.mxu0 %vm5664_vm13, %v5639_v60  ;;  %v7704_v8 = vld [vmem:[#allocation2 + $0xf0] sm:$0xff]  ;;  %v1873_v41 = vld [vmem:[#allocation2 + $0x219] sm:$0xff]  ;;  %v14942_v60 = vld [vmem:[#allocation84_spill] sm:$0xff] }
 0x4e3   :  { %3634 = vrot.lane.b32.xlu1 %v1871_v31, %s7753_s19  ;;  %v4355_v21 = vsel %vm4336_vm9, %v4290_v56, %v3345_v0  ;;  %v4032_v62 = vsel %vm691_vm2, %v7704_v8, %v14937_v28  ;;  %v14938_v31 = vld [vmem:[#allocation81_spill] sm:$0xff] }
 0x4e4   :  { %3890 = vrot.lane.b32.xlu0 %v1935_v49, %s7754_s5 }
 0x4e5   :  { %v3855_v47 = vpop.permute.xlu1 %3854  ;;  %7606 = vmatmul.mubr.msk.f32.gmra.mrb[72].mxu0 %vm5664_vm13, %v5640_v24  ;;  %v14945_v24 = vld [vmem:[#allocation17_spill] sm:$0xff] }
 0x4e6   :  { %v3601_v9 = vpop.permute.xlu0 %3600  ;;  %v4484_v11 = vsel %vm4466_vm11, %v4419_v4, %v3855_v47  ;;  %7608 = vmatprep.mubr.msk.f32.mxu0 %vm5664_vm13, %v5641_v23  ;;  %v1937_v4 = vld [vmem:[#allocation2 + $0x21a] sm:$0xff]  ;;  %v5644_v47 = vld [vmem:[%s14440_s1 + $0x168] sm:$0xff] }
 0x4e7   :  { %3124 = vrot.lane.b32.xlu1 %v1934_v10, %s7751_s20  ;;  %7472 = vmatmul.mubr.msk.f32.gmra.mrb[48].mxu1 %vm4540_vm12, %v4484_v11  ;;  %v4420_v46 = vsel %vm4401_vm10, %v4355_v21, %v3601_v9  ;;  %v14936_v10 = vld [vmem:[#allocation200_spill] sm:$0xff]  ;;  %v5645_v11 = vld [vmem:[%s14440_s1 + $0x170] sm:$0xff] }
 0x4e8   :  { %3380 = vrot.lane.b32.xlu0 %v1808_v12, %s7752_s16  ;;  %v4226_v54 = vsel %vm4206_vm7, %v4161_v53, %v14936_v10  ;;  %v14941_v12 = vld [vmem:[#allocation22_spill] sm:$0xff]  ;;  %v1810_v21 = vld [vmem:[#allocation2 + $0x228] sm:$0xff] }
 0x4e9   :  { %v3347_v13 = vpop.permute.xlu1 %3346  ;;  %v4291_v34 = vsel %vm4271_vm8, %v4226_v54, %v10449_v1  ;;  %v4097_v1 = vsel %vm4076_vm5, %v4032_v62, %v14938_v31  ;;  %7609 = vmatmul.mubr.msk.f32.gmra.mrb[74].mxu0 %vm5664_vm13, %v5642_v5  ;;  %v5648_v53 = vld [vmem:[%s14440_s1 + $0x188] sm:$0xff]  ;;  %v14946_v54 = vld [vmem:[#allocation83_spill] sm:$0xff]  ;;  %v1811_v62 = vld [vmem:[#allocation2 + $0x230] sm:$0xff] }
 0x4ea   :  { %v3857_v7 = vpop.permute.xlu0 %3856  ;;  %v4356_v0 = vsel %vm4336_vm9, %v4291_v34, %v3347_v13  ;;  %v4162_v2 = vsel %vm4141_vm6, %v4097_v1, %v14939_v55  ;;  %v5646_v13 = vld [vmem:[%s14440_s1 + $0x178] sm:$0xff]  ;;  %v5649_v34 = vld [vmem:[%s14440_s1 + $0x190] sm:$0xff] }
 0x4eb   :  { %v4485_v36 = vsel %vm4466_vm11, %v4420_v46, %v3857_v7  ;;  %3126 = vrot.lane.b32.xlu1 %v1935_v49, %s7751_s20  ;;  %v5643_v49 = vld [vmem:[%s14440_s1 + $0x160] sm:$0xff]  ;;  %v4227_v44 = vsel %vm4206_vm7, %v4162_v2, %v14940_v52  ;;  %v1938_v1 = vld [vmem:[#allocation2 + $0x22a] sm:$0xff] }
 0x4ec   :  { %3636 = vrot.lane.b32.xlu0 %v1872_v27, %s7753_s19  ;;  %7474 = vmatprep.mubr.msk.f32.mxu1 %vm4540_vm12, %v4485_v36  ;;  %v4292_v6 = vsel %vm4271_vm8, %v4227_v44, %v10444_v22  ;;  %v4033_v22 = vsel %vm691_vm2, %v7705_v58, %v14941_v12  ;;  %v5647_v7 = vld [vmem:[%s14440_s1 + $0x180] sm:$0xff]  ;;  %v14944_v36 = vld [vmem:[#allocation202_spill] sm:$0xff]  ;;  %v7707_v52 = vld [vmem:[#allocation2 + $0x110] sm:$0xff] }
 0x4ed   :  { %v3603_v25 = vpop.permute.xlu1 %3602  ;;  %7611 = vmatprep.mubr.msk.f32.mxu0 %vm5664_vm13, %v5643_v49  ;;  %v4098_v46 = vsel %vm4076_vm5, %v4033_v22, %v14942_v60  ;;  %v5651_v2 = vld [vmem:[%s14440_s1 + $0x1a0] sm:$0xff]  ;;  %v14949_v44 = vld [vmem:[#allocation28_spill] sm:$0xff]  ;;  %v5654_v60 = vld [vmem:[%s14440_s1 + $0x1b8] sm:$0xff] }
 0x4ee   :  { %v3349_v38 = vpop.permute.xlu0 %3348  ;;  %v4421_v15 = vsel %vm4401_vm10, %v4356_v0, %v3603_v25  ;;  %7612 = vmatmul.mubr.msk.f32.gmra.mrb[76].mxu0 %vm5664_vm13, %v5644_v47  ;;  %v4163_v35 = vsel %vm4141_vm6, %v4098_v46, %v14943_v19  ;;  %v7706_v25 = vld [vmem:[#allocation2 + $0x108] sm:$0xff]  ;;  %v14948_v0 = vld [vmem:[#allocation201_spill] sm:$0xff]  ;;  %v7708_v46 = vld [vmem:[#allocation2 + $0x120] sm:$0xff] }
 0x4ef   :  { %3382 = vrot.lane.b32.xlu1 %v1809_v29, %s7752_s16  ;;  %v4357_v50 = vsel %vm4336_vm9, %v4292_v6, %v3349_v38  ;;  %7614 = vmatprep.mubr.msk.f32.mxu0 %vm5664_vm13, %v5645_v11  ;;  %v4228_v27 = vsel %vm4206_vm7, %v4163_v35, %v14944_v36  ;;  %v4034_v23 = vsel %vm691_vm2, %v7706_v25, %v14945_v24  ;;  %v1939_v47 = vld [vmem:[#allocation2 + $0x232] sm:$0xff]  ;;  %v5652_v6 = vld [vmem:[%s14440_s1 + $0x1a8] sm:$0xff]  ;;  %v14956_v24 = vld [vmem:[#allocation203_spill] sm:$0xff] }
 0x4f0   :  { %3892 = vrot.lane.b32.xlu0 %v1936_v33, %s7754_s5  ;;  %v4293_v17 = vsel %vm4271_vm8, %v4228_v27, %v10456_v48  ;;  %v4099_v48 = vsel %vm4076_vm5, %v4034_v23, %v14946_v54  ;;  %v5653_v11 = vld [vmem:[%s14440_s1 + $0x1b0] sm:$0xff]  ;;  %v14952_v12 = vld [vmem:[#allocation204_spill] sm:$0xff] }
 0x4f1   :  { %v3859_v45 = vpop.permute.xlu1 %3858  ;;  %v5656_v54 = vld [vmem:[%s14440_s1 + $0x1c8] sm:$0xff] }
 0x4f2   :  { %v3605_v26 = vpop.permute.xlu0 %3604  ;;  %v4486_v39 = vsel %vm4466_vm11, %v4421_v15, %v3859_v45  ;;  %7615 = vmatmul.mubr.msk.f32.gmra.mrb[78].mxu0 %vm5664_vm13, %v5646_v13  ;;  %v5650_v15 = vld [vmem:[%s14440_s1 + $0x198] sm:$0xff]  ;;  %v1812_v13 = vld [vmem:[#allocation2 + $0x240] sm:$0xff] }
 0x4f3   :  { %3638 = vrot.lane.b32.xlu1 %v1873_v41, %s7753_s19  ;;  %7475 = vmatmul.mubr.msk.f32.gmra.mrb[50].mxu1 %vm4540_vm12, %v4486_v39  ;;  %v4422_v57 = vsel %vm4401_vm10, %v4357_v50, %v3605_v26  ;;  %v1875_v41 = vld [vmem:[#allocation2 + $0x231] sm:$0xff] }
 0x4f4   :  { %3894 = vrot.lane.b32.xlu0 %v1937_v4, %s7754_s5  ;;  %7617 = vmatprep.mubr.msk.f32.mxu0 %vm5664_vm13, %v5647_v7  ;;  %v14950_v50 = vld [vmem:[#allocation86_spill] sm:$0xff]  ;;  %v14953_v7 = vld [vmem:[#allocation21_spill] sm:$0xff] }
 0x4f5   :  { %v3351_v9 = vpop.permute.xlu1 %3350  ;;  %v4036_v19 = vsel %vm691_vm2, %v7708_v46, %v14953_v7  ;;  %v1814_v7 = vld [vmem:[#allocation2 + $0x258] sm:$0xff] }
 0x4f6   :  { %v3861_v37 = vpop.permute.xlu0 %3860  ;;  %v4358_v10 = vsel %vm4336_vm9, %v4293_v17, %v3351_v9  ;;  %7618 = vmatmul.mubr.msk.f32.gmra.mrb[80].mxu0 %vm5664_vm13, %v5648_v53  ;;  %v14955_v17 = vld [vmem:[#allocation143_spill] sm:$0xff] }
 0x4f7   :  { %v4487_v56 = vsel %vm4466_vm11, %v4422_v57, %v3861_v37  ;;  %3128 = vrot.lane.b32.xlu1 %v1936_v33, %s7751_s20  ;;  %v14947_v33 = vld [vmem:[#allocation141_spill] sm:$0xff]  ;;  %7620 = vmatprep.mubr.msk.f32.mxu0 %vm5664_vm13, %v5649_v34  ;;  %v14951_v57 = vld [vmem:[#allocation144_spill] sm:$0xff] }
 0x4f8   :  { %3384 = vrot.lane.b32.xlu0 %v1810_v21, %s7752_s16  ;;  %7477 = vmatprep.mubr.msk.f32.mxu1 %vm4540_vm12, %v4487_v56  ;;  %v4164_v5 = vsel %vm4141_vm6, %v4099_v48, %v14947_v33  ;;  %v5657_v34 = vld [vmem:[%s14440_s1 + $0x1d0] sm:$0xff] }
 0x4f9   :  { %v3607_v51 = vpop.permute.xlu1 %3606  ;;  %v4229_v31 = vsel %vm4206_vm7, %v4164_v5, %v14948_v0 }
 0x4fa   :  { %v3353_v16 = vpop.permute.xlu0 %3352  ;;  %v4423_v38 = vsel %vm4401_vm10, %v4358_v10, %v3607_v51  ;;  %v4294_v45 = vsel %vm4271_vm8, %v4229_v31, %v10451_v40  ;;  %7621 = vmatmul.mubr.msk.f32.gmra.mrb[82].mxu0 %vm5664_vm13, %v5650_v15  ;;  %v4035_v40 = vsel %vm691_vm2, %v7707_v52, %v14949_v44  ;;  %v14954_v51 = vld [vmem:[#allocation85_spill] sm:$0xff]  ;;  %v1876_v10 = vld [vmem:[#allocation2 + $0x241] sm:$0xff] }
 0x4fb   :  { %3130 = vrot.lane.b32.xlu1 %v1937_v4, %s7751_s20  ;;  %v4359_v49 = vsel %vm4336_vm9, %v4294_v45, %v3353_v16  ;;  %7623 = vmatprep.mubr.msk.f32.mxu0 %vm5664_vm13, %v5651_v2  ;;  %v4100_v9 = vsel %vm4076_vm5, %v4035_v40, %v14950_v50  ;;  %v5655_v16 = vld [vmem:[%s14440_s1 + $0x1c0] sm:$0xff]  ;;  %v14958_v15 = vld [vmem:[#allocation88_spill] sm:$0xff]  ;;  %v14961_v50 = vld [vmem:[#allocation29_spill] sm:$0xff] }
 0x4fc   :  { %3640 = vrot.lane.b32.xlu0 %v1874_v32, %s7753_s19  ;;  %v4165_v37 = vsel %vm4141_vm6, %v4100_v9, %v14951_v57  ;;  %v1940_v31 = vld [vmem:[#allocation2 + $0x242] sm:$0xff] }
 0x4fd   :  { %v3863_v29 = vpop.permute.xlu1 %3862  ;;  %v4230_v22 = vsel %vm4206_vm7, %v4165_v37, %v14952_v12  ;;  %v1877_v44 = vld [vmem:[#allocation2 + $0x249] sm:$0xff]  ;;  %v14962_v57 = vld [vmem:[#allocation87_spill] sm:$0xff] }
 0x4fe   :  { %v3609_v8 = vpop.permute.xlu0 %3608  ;;  %v4488_v28 = vsel %vm4466_vm11, %v4423_v38, %v3863_v29  ;;  %7624 = vmatmul.mubr.msk.f32.gmra.mrb[84].mxu0 %vm5664_vm13, %v5652_v6  ;;  %v4295_v21 = vsel %vm4271_vm8, %v4230_v22, %v10463_v63  ;;  %v4101_v63 = vsel %vm4076_vm5, %v4036_v19, %v14954_v51  ;;  %v7710_v6 = vld [vmem:[#allocation2 + $0x138] sm:$0xff]  ;;  %v5661_v12 = vld [vmem:[%s14440_s1 + $0x1f0] sm:$0xff] }
 0x4ff   :  { %3386 = vrot.lane.b32.xlu1 %v1811_v62, %s7752_s16  ;;  %7478 = vmatmul.mubr.msk.f32.gmra.mrb[52].mxu1 %vm4540_vm12, %v4488_v28  ;;  %v4424_v26 = vsel %vm4401_vm10, %v4359_v49, %v3609_v8  ;;  %v4166_v32 = vsel %vm4141_vm6, %v4101_v63, %v14955_v17  ;;  %v1813_v8 = vld [vmem:[#allocation2 + $0x248] sm:$0xff]  ;;  %v14957_v62 = vld [vmem:[#allocation30_spill] sm:$0xff]  ;;  %v5659_v49 = vld [vmem:[%s14440_s1 + $0x1e0] sm:$0xff]  ;;  %v4038_v9 = vsel %vm691_vm2, %v7710_v6, %v14961_v50 }
 0x500   :  { %3896 = vrot.lane.b32.xlu0 %v1938_v1, %s7754_s5  ;;  %7626 = vmatprep.mubr.msk.f32.mxu0 %vm5664_vm13, %v5653_v11  ;;  %v4231_v23 = vsel %vm4206_vm7, %v4166_v32, %v14956_v24  ;;  %v7709_v28 = vld [vmem:[#allocation2 + $0x128] sm:$0xff]  ;;  %v14963_v22 = vld [vmem:[#allocation145_spill] sm:$0xff]  ;;  %v5662_v19 = vld [vmem:[%s14440_s1 + $0x1f8] sm:$0xff] }
 0x501   :  { %v3355_v55 = vpop.permute.xlu1 %3354  ;;  %v4296_v48 = vsel %vm4271_vm8, %v4231_v23, %v10458_v61  ;;  %v4037_v61 = vsel %vm691_vm2, %v7709_v28, %v14957_v62  ;;  %v14965_v17 = vld [vmem:[#allocation32_spill] sm:$0xff]  ;;  %v14969_v28 = vld [vmem:[#allocation31_spill] sm:$0xff]  ;;  %v7713_v6 = vld [vmem:[#allocation2 + $0x158] sm:$0xff] }
 0x502   :  { %v3865_v39 = vpop.permute.xlu0 %3864  ;;  %v4360_v35 = vsel %vm4336_vm9, %v4295_v21, %v3355_v55  ;;  %7627 = vmatmul.mubr.msk.f32.gmra.mrb[86].mxu0 %vm5664_vm13, %v5654_v60  ;;  %v4102_v45 = vsel %vm4076_vm5, %v4037_v61, %v14958_v15  ;;  %v14959_v55 = vld [vmem:[#allocation146_spill] sm:$0xff]  ;;  %v14964_v60 = vld [vmem:[#allocation205_spill] sm:$0xff]  ;;  %v14967_v23 = vld [vmem:[#allocation148_spill] sm:$0xff] }
 0x503   :  { %v4489_v4 = vsel %vm4466_vm11, %v4424_v26, %v3865_v39  ;;  %3642 = vrot.lane.b32.xlu1 %v1875_v41, %s7753_s19  ;;  %7629 = vmatprep.mubr.msk.f32.mxu0 %vm5664_vm13, %v5655_v16  ;;  %v4167_v2 = vsel %vm4141_vm6, %v4102_v45, %v14959_v55  ;;  %v14960_v39 = vld [vmem:[#allocation206_spill] sm:$0xff]  ;;  %v7711_v16 = vld [vmem:[#allocation2 + $0x140] sm:$0xff] }
 0x504   :  { %3898 = vrot.lane.b32.xlu0 %v1939_v47, %s7754_s5  ;;  %7480 = vmatprep.mubr.msk.f32.mxu1 %vm4540_vm12, %v4489_v4  ;;  %v4232_v41 = vsel %vm4206_vm7, %v4167_v2, %v14960_v39  ;;  %v1941_v4 = vld [vmem:[#allocation2 + $0x24a] sm:$0xff]  ;;  %v4039_v32 = vsel %vm691_vm2, %v7711_v16, %v14965_v17  ;;  %v14971_v45 = vld [vmem:[#allocation147_spill] sm:$0xff]  ;;  %v14973_v50 = vld [vmem:[#allocation34_spill] sm:$0xff] }
 0x505   :  { %v3611_v58 = vpop.permute.xlu1 %3610  ;;  %v4297_v40 = vsel %vm4271_vm8, %v4232_v41, %v10470_v14  ;;  %v4103_v14 = vsel %vm4076_vm5, %v4038_v9, %v14962_v57  ;;  %v1879_v2 = vld [vmem:[#allocation2 + $0x261] sm:$0xff]  ;;  %v4041_v9 = vsel %vm691_vm2, %v7713_v6, %v14973_v50  ;;  %v1816_v57 = vld [vmem:[#allocation2 + $0x270] sm:$0xff] }
 0x506   :  { %v3357_v56 = vpop.permute.xlu0 %3356  ;;  %v4425_v36 = vsel %vm4401_vm10, %v4360_v35, %v3611_v58  ;;  %7630 = vmatmul.mubr.msk.f32.gmra.mrb[88].mxu0 %vm5664_vm13, %v5656_v54  ;;  %v1943_v41 = vld [vmem:[#allocation2 + $0x262] sm:$0xff]  ;;  %v14979_v16 = vld [vmem:[#allocation149_spill] sm:$0xff] }
 0x507   :  { %3132 = vrot.lane.b32.xlu1 %v1938_v1, %s7751_s20  ;;  %v4361_v38 = vsel %vm4336_vm9, %v4296_v48, %v3357_v56  ;;  %7632 = vmatprep.mubr.msk.f32.mxu0 %vm5664_vm13, %v5657_v34  ;;  %v5658_v1 = vld [vmem:[%s14440_s1 + $0x1d8] sm:$0xff]  ;;  %v4168_v56 = vsel %vm4141_vm6, %v4103_v14, %v14963_v22  ;;  %v14968_v48 = vld [vmem:[#allocation208_spill] sm:$0xff]  ;;  %v1815_v34 = vld [vmem:[#allocation2 + $0x260] sm:$0xff] }
 0x508   :  { %3388 = vrot.lane.b32.xlu0 %v1812_v13, %s7752_s16  ;;  %v4233_v46 = vsel %vm4206_vm7, %v4168_v56, %v14964_v60  ;;  %v14974_v14 = vld [vmem:[#allocation92_spill] sm:$0xff]  ;;  %v14976_v22 = vld [vmem:[#allocation211_spill] sm:$0xff]  ;;  %v1880_v60 = vld [vmem:[#allocation2 + $0x271] sm:$0xff] }
 0x509   :  { %v3867_v27 = vpop.permute.xlu1 %3866  ;;  %v4298_v35 = vsel %vm4271_vm8, %v4233_v46, %v10465_v18  ;;  %v14966_v18 = vld [vmem:[#allocation90_spill] sm:$0xff]  ;;  %v7714_v46 = vld [vmem:[#allocation2 + $0x168] sm:$0xff]  ;;  %v14987_v50 = vld [vmem:[#allocation151_spill] sm:$0xff] }
 0x50a   :  { %v3613_v53 = vpop.permute.xlu0 %3612  ;;  %v4490_v25 = vsel %vm4466_vm11, %v4425_v36, %v3867_v27  ;;  %7633 = vmatmul.mubr.msk.f32.gmra.mrb[90].mxu0 %vm5664_vm13, %v5658_v1  ;;  %v4104_v24 = vsel %vm4076_vm5, %v4039_v32, %v14966_v18  ;;  %v1882_v6 = vld [vmem:[#allocation2 + $0x289] sm:$0xff] }
 0x50b   :  { %3134 = vrot.lane.b32.xlu1 %v1939_v47, %s7751_s20  ;;  %7481 = vmatmul.mubr.msk.f32.gmra.mrb[54].mxu1 %vm4540_vm12, %v4490_v25  ;;  %v4426_v33 = vsel %vm4401_vm10, %v4361_v38, %v3613_v53  ;;  %v5660_v47 = vld [vmem:[%s14440_s1 + $0x1e8] sm:$0xff]  ;;  %v1878_v25 = vld [vmem:[#allocation2 + $0x259] sm:$0xff] }
 0x50c   :  { %3644 = vrot.lane.b32.xlu0 %v1876_v10, %s7753_s19  ;;  %7635 = vmatprep.mubr.msk.f32.mxu0 %vm5664_vm13, %v5659_v49  ;;  %v4169_v10 = vsel %vm4141_vm6, %v4104_v24, %v14967_v23  ;;  %v1944_v24 = vld [vmem:[#allocation2 + $0x272] sm:$0xff] }
 0x50d   :  { %v3359_v29 = vpop.permute.xlu1 %3358  ;;  %v4234_v38 = vsel %vm4206_vm7, %v4169_v10, %v14968_v48  ;;  %v7715_v23 = vld [vmem:[#allocation2 + $0x170] sm:$0xff]  ;;  %v14981_v10 = vld [vmem:[#allocation36_spill] sm:$0xff] }
 0x50e   :  { %v3869_v5 = vpop.permute.xlu0 %3868  ;;  %v4362_v11 = vsel %vm4336_vm9, %v4297_v40, %v3359_v29  ;;  %7636 = vmatmul.mubr.msk.f32.gmra.mrb[92].mxu0 %vm5664_vm13, %v5660_v47 }
 0x50f   :  { %v4491_v0 = vsel %vm4466_vm11, %v4426_v33, %v3869_v5  ;;  %3390 = vrot.lane.b32.xlu1 %v1813_v8, %s7752_s16  ;;  %7638 = vmatprep.mubr.msk.f32.mxu0 %vm5664_vm13, %v5661_v12  ;;  %v4299_v33 = vsel %vm4271_vm8, %v4234_v38, %v10476_v42  ;;  %v1942_v5 = vld [vmem:[#allocation2 + $0x25a] sm:$0xff]  ;;  %v7712_v8 = vld [vmem:[#allocation2 + $0x150] sm:$0xff] }
 0x510   :  { %3900 = vrot.lane.b32.xlu0 %v1940_v31, %s7754_s5  ;;  %7483 = vmatprep.mubr.msk.f32.mxu1 %vm4540_vm12, %v4491_v0  ;;  %v4040_v62 = vsel %vm691_vm2, %v7712_v8, %v14969_v28  ;;  %v14970_v0 = vld [vmem:[#allocation89_spill] sm:$0xff]  ;;  %v14982_v38 = vld [vmem:[#allocation94_spill] sm:$0xff] }
 0x511   :  { %v3615_v26 = vpop.permute.xlu1 %3614 }
 0x512   :  { %v3361_v52 = vpop.permute.xlu0 %3360  ;;  %v4427_v37 = vsel %vm4401_vm10, %v4362_v11, %v3615_v26  ;;  %7639 = vmatmul.mubr.msk.f32.gmra.mrb[94].mxu0 %vm5664_vm13, %v5662_v19  ;;  %v14972_v26 = vld [vmem:[#allocation207_spill] sm:$0xff] }
 0x513   :  { %3646 = vrot.lane.b32.xlu1 %v1877_v44, %s7753_s19  ;;  %v4363_v51 = vsel %vm4336_vm9, %v4298_v35, %v3361_v52 }
 0x514   :  { %3902 = vrot.lane.b32.xlu0 %v1941_v4, %s7754_s5 }
 0x515   :  { %v3871_v58 = vpop.permute.xlu1 %3870 }
 0x516   :  { %v3617_v21 = vpop.permute.xlu0 %3616  ;;  %v4492_v13 = vsel %vm4466_vm11, %v4427_v37, %v3871_v58  ;;  %v14975_v37 = vld [vmem:[#allocation150_spill] sm:$0xff] }
 0x517   :  { %3136 = vrot.lane.b32.xlu1 %v1940_v31, %s7751_s20  ;;  %7484 = vmatmul.mubr.msk.f32.gmra.mrb[56].mxu1 %vm4540_vm12, %v4492_v13  ;;  %v4428_v36 = vsel %vm4401_vm10, %v4363_v51, %v3617_v21  ;;  %v4105_v31 = vsel %vm4076_vm5, %v4040_v62, %v14970_v0  ;;  %v14978_v51 = vld [vmem:[#allocation91_spill] sm:$0xff]  ;;  %v14984_v0 = vld [vmem:[#allocation214_spill] sm:$0xff] }
 0x518   :  { %3392 = vrot.lane.b32.xlu0 %v1814_v7, %s7752_s16  ;;  %v4170_v42 = vsel %vm4141_vm6, %v4105_v31, %v14971_v45  ;;  %v14977_v7 = vld [vmem:[#allocation33_spill] sm:$0xff] }
 0x519   :  { %v3363_v63 = vpop.permute.xlu1 %3362  ;;  %v4235_v39 = vsel %vm4206_vm7, %v4170_v42, %v14972_v26  ;;  %v4042_v19 = vsel %vm691_vm2, %v7714_v46, %v14977_v7  ;;  %v1419_v45 = vld [vmem:[#allocation2 + $0x1b0] sm:$0xff]  ;;  %v1818_v26 = vld [vmem:[#allocation2 + $0x288] sm:$0xff]  ;;  %v14991_v7 = vld [vmem:[#allocation154_spill] sm:$0xff] }
 0x51a   :  { %v3873_v27 = vpop.permute.xlu0 %3872  ;;  %v4364_v61 = vsel %vm4336_vm9, %v4299_v33, %v3363_v63  ;;  %v4300_v52 = vsel %vm4271_vm8, %v4235_v39, %v10472_v3  ;;  %v4106_v3 = vsel %vm4076_vm5, %v4041_v9, %v14974_v14  ;;  %v4107_v63 = vsel %vm4076_vm5, %v4042_v19, %v14978_v51 }
 0x51b   :  { %v4493_v53 = vsel %vm4466_vm11, %v4428_v36, %v3873_v27  ;;  %3138 = vrot.lane.b32.xlu1 %v1941_v4, %s7751_s20  ;;  %v4171_v58 = vsel %vm4141_vm6, %v4106_v3, %v14975_v37  ;;  %v14989_v3 = vld [vmem:[#allocation25_spill] sm:$0xff] }
 0x51c   :  { %3648 = vrot.lane.b32.xlu0 %v1878_v25, %s7753_s19  ;;  %7486 = vmatprep.mubr.msk.f32.mxu1 %vm4540_vm12, %v4493_v53  ;;  %v4236_v56 = vsel %vm4206_vm7, %v4171_v58, %v14976_v22  ;;  %v1817_v53 = vld [vmem:[#allocation2 + $0x278] sm:$0xff]  ;;  %v14980_v25 = vld [vmem:[#allocation209_spill] sm:$0xff] }
 0x51d   :  { %v3619_v54 = vpop.permute.xlu1 %3618  ;;  %v4301_v13 = vsel %vm4271_vm8, %v4236_v56, %v10483_v20  ;;  %v4172_v20 = vsel %vm4141_vm6, %v4107_v63, %v14979_v16  ;;  %v1819_v22 = vld [vmem:[#allocation2 + $0x290] sm:$0xff] }
 0x51e   :  { %v3365_v29 = vpop.permute.xlu0 %3364  ;;  %v4429_v1 = vsel %vm4401_vm10, %v4364_v61, %v3619_v54  ;;  %v4237_v18 = vsel %vm4206_vm7, %v4172_v20, %v14980_v25  ;;  %v4043_v54 = vsel %vm691_vm2, %v7715_v23, %v14981_v10  ;;  %v1881_v61 = vld [vmem:[#allocation2 + $0x279] sm:$0xff]  ;;  %v1946_v56 = vld [vmem:[#allocation2 + $0x28a] sm:$0xff] }
 0x51f   :  { %3394 = vrot.lane.b32.xlu1 %v1815_v34, %s7752_s16  ;;  %v4365_v44 = vsel %vm4336_vm9, %v4300_v52, %v3365_v29  ;;  %v4302_v48 = vsel %vm4271_vm8, %v4237_v18, %v10478_v59  ;;  %v4108_v29 = vsel %vm4076_vm5, %v4043_v54, %v14982_v38  ;;  %v1883_v63 = vld [vmem:[#allocation2 + $0x291] sm:$0xff]  ;;  %v7716_v54 = vld [vmem:[#allocation2 + $0x1c8] sm:$0xff] }
 0x520   :  { %3904 = vrot.lane.b32.xlu0 %v1942_v5, %s7754_s5  ;;  %v1947_v20 = vld [vmem:[#allocation2 + $0x292] sm:$0xff] }
 0x521   :  { %v3875_v15 = vpop.permute.xlu1 %3874 }
 0x522   :  { %v3621_v49 = vpop.permute.xlu0 %3620  ;;  %v4494_v55 = vsel %vm4466_vm11, %v4429_v1, %v3875_v15  ;;  %v1945_v1 = vld [vmem:[#allocation2 + $0x27a] sm:$0xff] }
 0x523   :  { %3650 = vrot.lane.b32.xlu1 %v1879_v2, %s7753_s19  ;;  %7487 = vmatmul.mubr.msk.f32.gmra.mrb[58].mxu1 %vm4540_vm12, %v4494_v55  ;;  %v4430_v4 = vsel %vm4401_vm10, %v4365_v44, %v3621_v49 }
 0x524   :  { %3906 = vrot.lane.b32.xlu0 %v1943_v41, %s7754_s5 }
 0x525   :  { %v3367_v40 = vpop.permute.xlu1 %3366 }
 0x526   :  { %v3877_v47 = vpop.permute.xlu0 %3876  ;;  %v4366_v35 = vsel %vm4336_vm9, %v4301_v13, %v3367_v40  ;;  %v1420_v40 = vld [vmem:[#allocation2 + $0x1b8] sm:$0xff] }
 0x527   :  { %v4495_v11 = vsel %vm4466_vm11, %v4430_v4, %v3877_v47  ;;  %3140 = vrot.lane.b32.xlu1 %v1942_v5, %s7751_s20  ;;  %v14983_v5 = vld [vmem:[#allocation152_spill] sm:$0xff]  ;;  %v4045_v37 = vsel %vm691_vm2, %v1420_v40, %v14989_v3  ;;  %v1822_v3 = vld [vmem:[#allocation2 + $0x2b8] sm:$0xff] }
 0x528   :  { %3396 = vrot.lane.b32.xlu0 %v1816_v57, %s7752_s16  ;;  %7489 = vmatprep.mubr.msk.f32.mxu1 %vm4540_vm12, %v4495_v11  ;;  %v4173_v8 = vsel %vm4141_vm6, %v4108_v29, %v14983_v5  ;;  %v14986_v4 = vld [vmem:[#allocation16_spill] sm:$0xff] }
 0x529   :  { %v3623_v12 = vpop.permute.xlu1 %3622  ;;  %v4238_v31 = vsel %vm4206_vm7, %v4173_v8, %v14984_v0  ;;  %v14988_v11 = vld [vmem:[#allocation212_spill] sm:$0xff]  ;;  %v14995_v8 = vld [vmem:[#allocation153_spill] sm:$0xff] }
 0x52a   :  { %v3369_v21 = vpop.permute.xlu0 %3368  ;;  %v4431_v36 = vsel %vm4401_vm10, %v4366_v35, %v3623_v12  ;;  %v4303_v15 = vsel %vm4271_vm8, %v4238_v31, %v10492_v30  ;;  %v1884_v5 = vld [vmem:[#allocation2 + $0x2a1] sm:$0xff]  ;;  %v1885_v40 = vld [vmem:[#allocation2 + $0x2a9] sm:$0xff] }
 0x52b   :  { %3142 = vrot.lane.b32.xlu1 %v1943_v41, %s7751_s20  ;;  %v4367_v34 = vsel %vm4336_vm9, %v4302_v48, %v3369_v21  ;;  %v14985_v41 = vld [vmem:[#allocation3_spill] sm:$0xff]  ;;  %v14990_v21 = vld [vmem:[#allocation20_spill] sm:$0xff] }
 0x52c   :  { %3652 = vrot.lane.b32.xlu0 %v1880_v60, %s7753_s19  ;;  %v4044_v52 = vsel %vm691_vm2, %v1419_v45, %v14985_v41  ;;  %v4110_v13 = vsel %vm4076_vm5, %v4045_v37, %v14990_v21  ;;  %v14993_v48 = vld [vmem:[#allocation35_spill] sm:$0xff]  ;;  %v7717_v45 = vld [vmem:[#allocation2 + $0x1d0] sm:$0xff]  ;;  %v14999_v41 = vld [vmem:[#allocation156_spill] sm:$0xff] }
 0x52d   :  { %v3879_v27 = vpop.permute.xlu1 %3878  ;;  %v4109_v47 = vsel %vm4076_vm5, %v4044_v52, %v14986_v4  ;;  %v4175_v19 = vsel %vm4141_vm6, %v4110_v13, %v14991_v7  ;;  %v4046_v38 = vsel %vm691_vm2, %v7716_v54, %v14993_v48  ;;  %v15002_v13 = vld [vmem:[#allocation95_spill] sm:$0xff]  ;;  %v7719_v48 = vld [vmem:[#allocation2 + $0x1e8] sm:$0xff] }
 0x52e   :  { %v3625_v17 = vpop.permute.xlu0 %3624  ;;  %v4496_v32 = vsel %vm4466_vm11, %v4431_v36, %v3879_v27  ;;  %v4174_v9 = vsel %vm4141_vm6, %v4109_v47, %v14987_v50  ;;  %v14992_v36 = vld [vmem:[#allocation218_spill] sm:$0xff] }
 0x52f   :  { %3398 = vrot.lane.b32.xlu1 %v1817_v53, %s7752_s16  ;;  %7490 = vmatmul.mubr.msk.f32.gmra.mrb[60].mxu1 %vm4540_vm12, %v4496_v32  ;;  %v4432_v28 = vsel %vm4401_vm10, %v4367_v34, %v3625_v17  ;;  %v4239_v57 = vsel %vm4206_vm7, %v4174_v9, %v14988_v11  ;;  %v4240_v27 = vsel %vm4206_vm7, %v4175_v19, %v14992_v36  ;;  %v14994_v34 = vld [vmem:[#allocation93_spill] sm:$0xff]  ;;  %v1886_v19 = vld [vmem:[#allocation2 + $0x2b9] sm:$0xff] }
 0x530   :  { %3908 = vrot.lane.b32.xlu0 %v1944_v24, %s7754_s5  ;;  %v1950_v54 = vld [vmem:[#allocation2 + $0x2ba] sm:$0xff] }
 0x531   :  { %v3371_v33 = vpop.permute.xlu1 %3370 }
 0x532   :  { %v3881_v62 = vpop.permute.xlu0 %3880  ;;  %v4368_v42 = vsel %vm4336_vm9, %v4303_v15, %v3371_v33  ;;  %v4111_v33 = vsel %vm4076_vm5, %v4046_v38, %v14994_v34  ;;  %v1948_v15 = vld [vmem:[#allocation2 + $0x2a2] sm:$0xff]  ;;  %v15007_v34 = vld [vmem:[#allocation98_spill] sm:$0xff] }
 0x533   :  { %v4497_v59 = vsel %vm4466_vm11, %v4432_v28, %v3881_v62  ;;  %3654 = vrot.lane.b32.xlu1 %v1881_v61, %s7753_s19  ;;  %v4176_v28 = vsel %vm4141_vm6, %v4111_v33, %v14995_v8  ;;  %v14996_v62 = vld [vmem:[#allocation215_spill] sm:$0xff]  ;;  %v15006_v38 = vld [vmem:[#allocation40_spill] sm:$0xff] }
 0x534   :  { %3910 = vrot.lane.b32.xlu0 %v1945_v1, %s7754_s5  ;;  %7492 = vmatprep.mubr.msk.f32.mxu1 %vm4540_vm12, %v4497_v59  ;;  %v4241_v61 = vsel %vm4206_vm7, %v4176_v28, %v14996_v62  ;;  %v15008_v28 = vld [vmem:[#allocation158_spill] sm:$0xff] }
 0x535   :  { %v3627_v49 = vpop.permute.xlu1 %3626 }
 0x536   :  { %v3883_v55 = vpop.permute.xlu0 %3882  ;;  %v4433_v2 = vsel %vm4401_vm10, %v4368_v42, %v3627_v49  ;;  %v14997_v42 = vld [vmem:[#allocation38_spill] sm:$0xff] }
 0x537   :  { %3144 = vrot.lane.b32.xlu1 %v1944_v24, %s7751_s20  ;;  %v4498_v39 = vsel %vm4466_vm11, %v4433_v2, %v3883_v55  ;;  %v1820_v24 = vld [vmem:[#allocation2 + $0x2a0] sm:$0xff]  ;;  %v4047_v49 = vsel %vm691_vm2, %v7717_v45, %v14997_v42  ;;  %v14998_v55 = vld [vmem:[#allocation96_spill] sm:$0xff]  ;;  %v7721_v45 = vld [vmem:[#allocation2 + $0x210] sm:$0xff] }
 0x538   :  { %3400 = vrot.lane.b32.xlu0 %v1818_v26, %s7752_s16  ;;  %7493 = vmatmul.mubr.msk.f32.gmra.mrb[62].mxu1 %vm4540_vm12, %v4498_v39  ;;  %v4112_v2 = vsel %vm4076_vm5, %v4047_v49, %v14998_v55  ;;  %v15010_v42 = vld [vmem:[#allocation41_spill] sm:$0xff]  ;;  %v15011_v55 = vld [vmem:[#allocation223_spill] sm:$0xff] }
 0x539   :  { %v3117_v30 = vpop.permute.xlu1 %3116  ;;  %v4177_v52 = vsel %vm4141_vm6, %v4112_v2, %v14999_v41  ;;  %v4052_v49 = vsel %vm691_vm2, %v7721_v45, %v15010_v42  ;;  %v7722_v41 = vld [vmem:[#allocation2 + $0x228] sm:$0xff]  ;;  %v15027_v45 = vld [vmem:[#allocation54_spill] sm:$0xff] }
 0x53a   :  { %v3373_v44 = vpop.permute.xlu0 %3372  ;;  %v4304_v58 = vsel %vm4271_vm8, %v4239_v57, %v3117_v30  ;;  %v4242_v4 = vsel %vm4206_vm7, %v4177_v52, %v10266_v43  ;;  %v15012_v52 = vld [vmem:[#allocation43_spill] sm:$0xff] }
 0x53b   :  { %3146 = vrot.lane.b32.xlu1 %v1945_v1, %s7751_s20  ;;  %v4369_v60 = vsel %vm4336_vm9, %v4304_v58, %v3373_v44  ;;  %v1821_v1 = vld [vmem:[#allocation2 + $0x2a8] sm:$0xff]  ;;  %v7718_v58 = vld [vmem:[#allocation2 + $0x1e0] sm:$0xff] }
 0x53c   :  { %3656 = vrot.lane.b32.xlu0 %v1882_v6, %s7753_s19  ;;  %v1949_v6 = vld [vmem:[#allocation2 + $0x2aa] sm:$0xff] }
 0x53d   :  { %v3119_v14 = vpop.permute.xlu1 %3118 }
 0x53e   :  { %v3629_v12 = vpop.permute.xlu0 %3628  ;;  %v4305_v17 = vsel %vm4271_vm8, %v4240_v27, %v3119_v14 }
 0x53f   :  { %3402 = vrot.lane.b32.xlu1 %v1819_v22, %s7752_s16  ;;  %v4434_v35 = vsel %vm4401_vm10, %v4369_v60, %v3629_v12  ;;  %v15000_v12 = vld [vmem:[#allocation37_spill] sm:$0xff] }
 0x540   :  { %3912 = vrot.lane.b32.xlu0 %v1946_v56, %s7754_s5  ;;  %v4048_v22 = vsel %vm691_vm2, %v7718_v58, %v15000_v12 }
 0x541   :  { %v3375_v46 = vpop.permute.xlu1 %3374  ;;  %v4113_v60 = vsel %vm4076_vm5, %v4048_v22, %v15002_v13  ;;  %v7727_v22 = vld [vmem:[#allocation2 + $0x258] sm:$0xff] }
 0x542   :  { %v3885_v51 = vpop.permute.xlu0 %3884  ;;  %v4370_v32 = vsel %vm4336_vm9, %v4305_v17, %v3375_v46 }
 0x543   :  { %v4499_v16 = vsel %vm4466_vm11, %v4434_v35, %v3885_v51  ;;  %3658 = vrot.lane.b32.xlu1 %v1883_v63, %s7753_s19  ;;  %v15004_v51 = vld [vmem:[#allocation155_spill] sm:$0xff] }
 0x544   :  { %3914 = vrot.lane.b32.xlu0 %v1947_v20, %s7754_s5  ;;  %7495 = vmatprep.mubr.msk.f32.mxu1 %vm4540_vm12, %v4499_v16  ;;  %v4178_v63 = vsel %vm4141_vm6, %v4113_v60, %v15004_v51  ;;  %v15005_v16 = vld [vmem:[#allocation219_spill] sm:$0xff]  ;;  %v7728_v60 = vld [vmem:[#allocation2 + $0x270] sm:$0xff]  ;;  %v15019_v51 = vld [vmem:[#allocation48_spill] sm:$0xff] }
 0x545   :  { %v3631_v53 = vpop.permute.xlu1 %3630 }
 0x546   :  { %v3887_v25 = vpop.permute.xlu0 %3886  ;;  %v4435_v18 = vsel %vm4401_vm10, %v4370_v32, %v3631_v53 }
 0x547   :  { %3148 = vrot.lane.b32.xlu1 %v1946_v56, %s7751_s20  ;;  %v4500_v23 = vsel %vm4466_vm11, %v4435_v18, %v3887_v25 }
 0x548   :  { %3404 = vrot.lane.b32.xlu0 %v1820_v24, %s7752_s16  ;;  %7496 = vmatmul.mubr.msk.f32.gmra.mrb[64].mxu1 %vm4540_vm12, %v4500_v23  ;;  %v1823_v23 = vld [vmem:[#allocation2 + $0x2c0] sm:$0xff] }
 0x549   :  { %v3121_v10 = vpop.permute.xlu1 %3120 }
 0x54a   :  { %v3377_v29 = vpop.permute.xlu0 %3376  ;;  %v4306_v31 = vsel %vm4271_vm8, %v4241_v61, %v3121_v10 }
 0x54b   :  { %3150 = vrot.lane.b32.xlu1 %v1947_v20, %s7751_s20  ;;  %v4371_v26 = vsel %vm4336_vm9, %v4306_v31, %v3377_v29  ;;  %v4243_v20 = vsel %vm4206_vm7, %v4178_v63, %v15005_v16  ;;  %v4049_v29 = vsel %vm691_vm2, %v7719_v48, %v15006_v38  ;;  %v1887_v31 = vld [vmem:[#allocation2 + $0x2c1] sm:$0xff] }
 0x54c   :  { %3660 = vrot.lane.b32.xlu0 %v1884_v5, %s7753_s19  ;;  %v4114_v33 = vsel %vm4076_vm5, %v4049_v29, %v15007_v34  ;;  %v15023_v48 = vld [vmem:[#allocation52_spill] sm:$0xff]  ;;  %v1824_v29 = vld [vmem:[#allocation2 + $0x2d0] sm:$0xff] }
 0x54d   :  { %v3123_v0 = vpop.permute.xlu1 %3122  ;;  %v4179_v62 = vsel %vm4141_vm6, %v4114_v33, %v15008_v28 }
 0x54e   :  { %v3633_v59 = vpop.permute.xlu0 %3632  ;;  %v4307_v50 = vsel %vm4271_vm8, %v4242_v4, %v3123_v0  ;;  %v4244_v2 = vsel %vm4206_vm7, %v4179_v62, %v15011_v55  ;;  %v7736_v55 = vld [vmem:[#allocation2 + $0x2a8] sm:$0xff] }
 0x54f   :  { %3406 = vrot.lane.b32.xlu1 %v1821_v1, %s7752_s16  ;;  %v4436_v30 = vsel %vm4401_vm10, %v4371_v26, %v3633_v59  ;;  %v7720_v59 = vld [vmem:[#allocation2 + $0x1f8] sm:$0xff]  ;;  %v15009_v1 = vld [vmem:[#allocation39_spill] sm:$0xff] }
 0x550   :  { %3916 = vrot.lane.b32.xlu0 %v1948_v15, %s7754_s5 }
 0x551   :  { %v3379_v39 = vpop.permute.xlu1 %3378 }
 0x552   :  { %v3889_v44 = vpop.permute.xlu0 %3888  ;;  %v4372_v9 = vsel %vm4336_vm9, %v4307_v50, %v3379_v39  ;;  %v1951_v39 = vld [vmem:[#allocation2 + $0x2c2] sm:$0xff]  ;;  %v15014_v50 = vld [vmem:[#allocation45_spill] sm:$0xff] }
 0x553   :  { %v4501_v47 = vsel %vm4466_vm11, %v4436_v30, %v3889_v44  ;;  %3662 = vrot.lane.b32.xlu1 %v1885_v40, %s7753_s19  ;;  %v4054_v30 = vsel %vm691_vm2, %v7722_v41, %v15012_v52  ;;  %v7723_v44 = vld [vmem:[#allocation2 + $0x200] sm:$0xff]  ;;  %v15013_v40 = vld [vmem:[#allocation42_spill] sm:$0xff] }
 0x554   :  { %3918 = vrot.lane.b32.xlu0 %v1949_v6, %s7754_s5  ;;  %7498 = vmatprep.mubr.msk.f32.mxu1 %vm4540_vm12, %v4501_v47  ;;  %v4051_v4 = vsel %vm691_vm2, %v7723_v44, %v15013_v40  ;;  %v7737_v44 = vld [vmem:[#allocation2 + $0x2c0] sm:$0xff]  ;;  %v15029_v40 = vld [vmem:[#allocation58_spill] sm:$0xff] }
 0x555   :  { %v3635_v11 = vpop.permute.xlu1 %3634 }
 0x556   :  { %v3891_v57 = vpop.permute.xlu0 %3890  ;;  %v4437_v14 = vsel %vm4401_vm10, %v4372_v9, %v3635_v11  ;;  %v7725_v11 = vld [vmem:[#allocation2 + $0x218] sm:$0xff] }
 0x557   :  { %3152 = vrot.lane.b32.xlu1 %v1948_v15, %s7751_s20  ;;  %v4502_v43 = vsel %vm4466_vm11, %v4437_v14, %v3891_v57  ;;  %v4050_v15 = vsel %vm691_vm2, %v7720_v59, %v15009_v1  ;;  %v15015_v57 = vld [vmem:[#allocation44_spill] sm:$0xff]  ;;  %v7735_v1 = vld [vmem:[#allocation2 + $0x290] sm:$0xff] }
 0x558   :  { %3408 = vrot.lane.b32.xlu0 %v1822_v3, %s7752_s16  ;;  %7499 = vmatmul.mubr.msk.f32.gmra.mrb[66].mxu1 %vm4540_vm12, %v4502_v43  ;;  %v4053_v14 = vsel %vm691_vm2, %v7725_v11, %v15015_v57  ;;  %v7726_v3 = vld [vmem:[#allocation2 + $0x230] sm:$0xff]  ;;  %v15016_v43 = vld [vmem:[#allocation46_spill] sm:$0xff]  ;;  %v4063_v42 = vsel %vm691_vm2, %v7735_v1, %v15027_v45 }
 0x559   :  { %v3125_v37 = vpop.permute.xlu1 %3124  ;;  %v1952_v1 = vld [vmem:[#allocation2 + $0x2d2] sm:$0xff] }
 0x55a   :  { %v3381_v56 = vpop.permute.xlu0 %3380  ;;  %v11376_v21 = vpop.f32.mrb[32].mxu1  ;;  %v4308_v25 = vsel %vm4271_vm8, %v4243_v20, %v3125_v37  ;;  %v4055_v37 = vsel %vm691_vm2, %v7726_v3, %v15016_v43  ;;  %v7730_v20 = vld [vmem:[#allocation2 + $0x288] sm:$0xff]  ;;  %v15031_v43 = vld [vmem:[#allocation99_spill] sm:$0xff] }
 0x55b   :  { %15001 = vst [vmem:[#allocation19_spill] sm:$0xff] %v11376_v21  ;;  %v5121_v46 = vsel %vm691_vm2, %v11376_v21, 0.0  ;;  %v5254_v7 = vmul.f32 %v11376_v21, %v11376_v21  ;;  %v11384_v35 = vpop.f32.mrb[33].mxu1  ;;  %3154 = vrot.lane.b32.xlu1 %v1949_v6, %s7751_s20  ;;  %v4373_v5 = vsel %vm4336_vm9, %v4308_v25, %v3381_v56  ;;  %v7724_v6 = vld [vmem:[#allocation2 + $0x240] sm:$0xff] }
 0x55c   :  { %15003 = vst [vmem:[#allocation210_spill] sm:$0xff] %v11384_v35  ;;  %3664 = vrot.lane.b32.xlu0 %v1886_v19, %s7753_s19  ;;  %v5120_v36 = vsel %vm691_vm2, %v11384_v35, 0.0  ;;  %v5253_v27 = vmul.f32 %v11384_v35, %v11384_v35  ;;  %v4056_v9 = vsel %vm691_vm2, %v7724_v6, %v15014_v50  ;;  %v15017_v56 = vld [vmem:[#allocation47_spill] sm:$0xff]  ;;  %v7729_v19 = vld [vmem:[#allocation2 + $0x248] sm:$0xff]  ;;  %v15030_v6 = vld [vmem:[#allocation97_spill] sm:$0xff] }
 0x55d   :  { %v5318_v17 = vsel %vm691_vm2, %v5254_v7, 0.0  ;;  %v11397_v32 = vadd.f32 %v5121_v46, %v5120_v36  ;;  %v3127_v53 = vpop.permute.xlu1 %3126  ;;  %v4058_v13 = vsel %vm691_vm2, %v7727_v22, %v15017_v56  ;;  %v15018_v46 = vld [vmem:[#allocation49_spill] sm:$0xff]  ;;  %v4057_v63 = vsel %vm691_vm2, %v7729_v19, %v15019_v51  ;;  %v7731_v25 = vld [vmem:[#allocation2 + $0x260] sm:$0xff]  ;;  %v15034_v19 = vld [vmem:[#allocation102_spill] sm:$0xff] }
 0x55e   :  { %v5317_v18 = vsel %vm691_vm2, %v5253_v27, 0.0  ;;  %v3637_v24 = vpop.permute.xlu0 %3636  ;;  %v4309_v47 = vsel %vm4271_vm8, %v4244_v2, %v3127_v53  ;;  %v4060_v7 = vsel %vm691_vm2, %v7728_v60, %v15018_v46  ;;  %v15028_v2 = vld [vmem:[#allocation56_spill] sm:$0xff]  ;;  %v4115_v50 = vsel %vm4076_vm5, %v4050_v15, %v15030_v6  ;;  %v1888_v60 = vld [vmem:[#allocation2 + $0x2d1] sm:$0xff] }
 0x55f   :  { %v11401_v10 = vadd.f32 %v5318_v17, %v5317_v18  ;;  %3410 = vrot.lane.b32.xlu1 %v1823_v23, %s7752_s16  ;;  %v4438_v61 = vsel %vm4401_vm10, %v4373_v5, %v3637_v24  ;;  %v15021_v17 = vld [vmem:[#allocation51_spill] sm:$0xff]  ;;  %v15022_v18 = vld [vmem:[#allocation50_spill] sm:$0xff]  ;;  %v15033_v15 = vld [vmem:[#allocation101_spill] sm:$0xff]  ;;  %v11498_v51 = vsel %vm4076_vm5, %v4053_v14, %v15034_v19 }
 0x560   :  { %3920 = vrot.lane.b32.xlu0 %v1950_v54, %s7754_s5  ;;  %v4062_v53 = vsel %vm691_vm2, %v7730_v20, %v15021_v17  ;;  %v4059_v24 = vsel %vm691_vm2, %v7731_v25, %v15022_v18  ;;  %v7732_v23 = vld [vmem:[#allocation2 + $0x278] sm:$0xff]  ;;  %v7733_v5 = vld [vmem:[#allocation2 + $0x2a0] sm:$0xff]  ;;  %v11494_v46 = vsel %vm4076_vm5, %v4054_v30, %v15033_v15  ;;  %v15039_v18 = vld [vmem:[#allocation105_spill] sm:$0xff] }
 0x561   :  { %v3383_v8 = vpop.permute.xlu1 %3382  ;;  %v4061_v38 = vsel %vm691_vm2, %v7732_v23, %v15023_v48  ;;  %v15038_v30 = vld [vmem:[#allocation222_spill] sm:$0xff]  ;;  %v11516_v23 = vsel %vm4076_vm5, %v4058_v13, %v15039_v18  ;;  %v15040_v48 = vld [vmem:[#allocation107_spill] sm:$0xff] }
 0x562   :  { %v3893_v0 = vpop.permute.xlu0 %3892  ;;  %v4374_v58 = vsel %vm4336_vm9, %v4309_v47, %v3383_v8  ;;  %v15025_v8 = vld [vmem:[#allocation53_spill] sm:$0xff]  ;;  %v11477_v47 = vsel %vm691_vm2, %v7737_v44, %v15029_v40 }
 0x563   :  { %v4503_v26 = vsel %vm4466_vm11, %v4438_v61, %v3893_v0  ;;  %3666 = vrot.lane.b32.xlu1 %v1887_v31, %s7753_s19  ;;  %v4064_v28 = vsel %vm691_vm2, %v7733_v5, %v15025_v8  ;;  %v15026_v31 = vld [vmem:[#allocation55_spill] sm:$0xff]  ;;  %v1825_v8 = vld [vmem:[#allocation2 + $0x2d8] sm:$0xff] }
 0x564   :  { %3922 = vrot.lane.b32.xlu0 %v1951_v39, %s7754_s5  ;;  %7501 = vmatprep.mubr.msk.f32.mxu1 %vm4540_vm12, %v4503_v26  ;;  %v11472_v26 = vsel %vm691_vm2, %v7736_v55, %v15028_v2  ;;  %v15046_v55 = vld [vmem:[#allocation112_spill] sm:$0xff] }
 0x565   :  { %v3639_v12 = vpop.permute.xlu1 %3638  ;;  %v15047_v2 = vld [vmem:[#allocation160_spill] sm:$0xff] }
 0x566   :  { %v3895_v36 = vpop.permute.xlu0 %3894  ;;  %v4439_v27 = vsel %vm4401_vm10, %v4374_v58, %v3639_v12  ;;  %v11442_v16 = vpop.f32.mrb[34].mxu1  ;;  %v11486_v58 = vsel %vm4076_vm5, %v4052_v49, %v15031_v43 }
 0x567   :  { %15020 = vst [vmem:[#allocation66_spill] sm:$0xff] %v11442_v16  ;;  %3156 = vrot.lane.b32.xlu1 %v1950_v54, %s7751_s20  ;;  %v11451_v34 = vpop.f32.mrb[35].mxu1  ;;  %v4504_v33 = vsel %vm4466_vm11, %v4439_v27, %v3895_v36  ;;  %v5256_v62 = vmul.f32 %v11442_v16, %v11442_v16  ;;  %v7734_v54 = vld [vmem:[#allocation2 + $0x2b8] sm:$0xff]  ;;  %v5125_v11 = vsel %vm691_vm2, %v11442_v16, 0.0  ;;  %v15035_v36 = vld [vmem:[#allocation157_spill] sm:$0xff]  ;;  %v11544_v45 = vpop.f32.mrb[32].mxu0 }
 0x568   :  { %15024 = vst [vmem:[#allocation124_spill] sm:$0xff] %v11451_v34  ;;  %3412 = vrot.lane.b32.xlu0 %v1824_v29, %s7752_s16  ;;  %v5123_v61 = vsel %vm691_vm2, %v11451_v34, 0.0  ;;  %v5255_v0 = vmul.f32 %v11451_v34, %v11451_v34  ;;  %7502 = vmatmul.mubr.msk.f32.gmra.mrb[68].mxu1 %vm4540_vm12, %v4504_v33  ;;  %v11466_v59 = vsel %vm691_vm2, %v7734_v54, %v15026_v31  ;;  %v15041_v33 = vld [vmem:[#allocation106_spill] sm:$0xff]  ;;  %v15044_v54 = vld [vmem:[#allocation111_spill] sm:$0xff] }
 0x569   :  { %v5124_v41 = vadd.f32 %v5123_v61, %v11397_v32  ;;  %v3129_v52 = vpop.permute.xlu1 %3128  ;;  %v15032_v32 = vld [vmem:[#allocation100_spill] sm:$0xff]  ;;  %v4180_v49 = vsel %vm4141_vm6, %v4115_v50, %v15035_v36  ;;  %v5322_v27 = vsel %vm691_vm2, %v5256_v62, 0.0  ;;  %v11520_v29 = vsel %vm4076_vm5, %v4060_v7, %v15040_v48  ;;  %v15042_v62 = vld [vmem:[#allocation109_spill] sm:$0xff]  ;;  %v15045_v31 = vld [vmem:[#allocation110_spill] sm:$0xff] }
 0x56a   :  { %v5320_v57 = vsel %vm691_vm2, %v5255_v0, 0.0  ;;  %v3385_v3 = vpop.permute.xlu0 %3384  ;;  %v4116_v12 = vsel %vm4076_vm5, %v4051_v4, %v15032_v32  ;;  %v15036_v4 = vld [vmem:[#allocation103_spill] sm:$0xff]  ;;  %v4245_v17 = vsel %vm4206_vm7, %v4180_v49, %v15038_v30  ;;  %v11529_v61 = vsel %vm4076_vm5, %v4062_v53, %v15042_v62  ;;  %v15043_v0 = vld [vmem:[#allocation108_spill] sm:$0xff] }
 0x56b   :  { %v5126_v22 = vadd.f32 %v5125_v11, %v5124_v41  ;;  %v5321_v56 = vadd.f32 %v5320_v57, %v11401_v10  ;;  %3158 = vrot.lane.b32.xlu1 %v1951_v39, %s7751_s20  ;;  %v11506_v10 = vsel %vm4076_vm5, %v4056_v9, %v15036_v4  ;;  %v15037_v39 = vld [vmem:[#allocation104_spill] sm:$0xff]  ;;  %v11524_v9 = vsel %vm4076_vm5, %v4057_v63, %v15041_v33  ;;  %v11557_v41 = vpop.f32.mrb[33].mxu0  ;;  %v1953_v36 = vld [vmem:[#allocation2 + $0x2da] sm:$0xff] }
 0x56c   :  { %3668 = vrot.lane.b32.xlu0 %v1888_v60, %s7753_s19  ;;  %v11510_v20 = vsel %vm4076_vm5, %v4055_v37, %v15037_v39  ;;  %v4310_v37 = vsel %vm4271_vm8, %v4245_v17, %v3129_v52  ;;  %v11533_v13 = vsel %vm4076_vm5, %v4059_v24, %v15043_v0  ;;  %v11537_v7 = vsel %vm4076_vm5, %v4064_v28, %v15044_v54  ;;  %v15048_v52 = vld [vmem:[#allocation225_spill] sm:$0xff]  ;;  %v11579_v4 = vpop.f32.mrb[34].mxu0  ;;  %v1959_v34 = vld [vmem:[#allocation2 + $0x322] sm:$0xff] }
 0x56d   :  { %v5323_v14 = vadd.f32 %v5322_v27, %v5321_v56  ;;  %v3131_v25 = vpop.permute.xlu1 %3130  ;;  %v11541_v63 = vsel %vm4076_vm5, %v4061_v38, %v15045_v31  ;;  %v11548_v53 = vsel %vm4076_vm5, %v4063_v42, %v15046_v55  ;;  %v4181_v24 = vsel %vm4141_vm6, %v4116_v12, %v15047_v2  ;;  %v1889_v12 = vld [vmem:[#allocation2 + $0x2d9] sm:$0xff]  ;;  %v11589_v18 = vpop.f32.mrb[35].mxu0 }
 0x56e   :  { %v3641_v5 = vpop.permute.xlu0 %3640  ;;  %v6248_v28 = vsel %vm691_vm2, %v11544_v45, 0.0  ;;  %v6381_v38 = vmul.f32 %v11544_v45, %v11544_v45  ;;  %v4246_v44 = vsel %vm4206_vm7, %v4181_v24, %v15048_v52  ;;  %v4375_v40 = vsel %vm4336_vm9, %v4310_v37, %v3385_v3 }
 0x56f   :  { %3414 = vrot.lane.b32.xlu1 %v1825_v8, %s7752_s16  ;;  %v6247_v6 = vsel %vm691_vm2, %v11557_v41, 0.0  ;;  %v6380_v50 = vmul.f32 %v11557_v41, %v11557_v41  ;;  %v4440_v11 = vsel %vm4401_vm10, %v4375_v40, %v3641_v5  ;;  %v4311_v57 = vsel %vm4271_vm8, %v4246_v44, %v3131_v25 }
 0x570   :  { %3924 = vrot.lane.b32.xlu0 %v1952_v1, %s7754_s5  ;;  %v6445_v56 = vsel %vm691_vm2, %v6381_v38, 0.0  ;;  %v6249_v60 = vadd.f32 %v6248_v28, %v6247_v6  ;;  %v6252_v37 = vsel %vm691_vm2, %v11579_v4, 0.0  ;;  %v6383_v5 = vmul.f32 %v11579_v4, %v11579_v4  ;;  %v1826_v28 = vld [vmem:[#allocation2 + $0x2e8] sm:$0xff] }
 0x571   :  { %v3387_v42 = vpop.permute.xlu1 %3386  ;;  %v6444_v27 = vsel %vm691_vm2, %v6380_v50, 0.0  ;;  %v6250_v8 = vsel %vm691_vm2, %v11589_v18, 0.0  ;;  %v6382_v55 = vmul.f32 %v11589_v18, %v11589_v18  ;;  %v11611_v50 = vpop.f32.mrb[36].mxu0 }
 0x572   :  { %v3897_v43 = vpop.permute.xlu0 %3896  ;;  %v11568_v32 = vpop.f32.mrb[36].mxu1  ;;  %v4376_v15 = vsel %vm4336_vm9, %v4311_v57, %v3387_v42  ;;  %v6446_v25 = vadd.f32 %v6445_v56, %v6444_v27  ;;  %v6251_v31 = vadd.f32 %v6250_v8, %v6249_v60  ;;  %v6449_v40 = vsel %vm691_vm2, %v6383_v5, 0.0  ;;  %v15053_v56 = vld [vmem:[#allocation224_spill] sm:$0xff]  ;;  %v15054_v27 = vld [vmem:[#allocation162_spill] sm:$0xff] }
 0x573   :  { %15049 = vst [vmem:[#allocation184_spill] sm:$0xff] %v11568_v32  ;;  %v4505_v3 = vsel %vm4466_vm11, %v4440_v11, %v3897_v43  ;;  %v5129_v19 = vsel %vm691_vm2, %v11568_v32, 0.0  ;;  %3670 = vrot.lane.b32.xlu1 %v1889_v12, %s7753_s19  ;;  %v11576_v49 = vpop.f32.mrb[37].mxu1  ;;  %v5258_v39 = vmul.f32 %v11568_v32, %v11568_v32  ;;  %v6447_v6 = vsel %vm691_vm2, %v6382_v55, 0.0  ;;  %v11620_v12 = vpop.f32.mrb[37].mxu0  ;;  %v15056_v5 = vld [vmem:[#allocation164_spill] sm:$0xff] }
 0x574   :  { %15050 = vst [vmem:[#allocation23_spill] sm:$0xff] %v11576_v49  ;;  %3926 = vrot.lane.b32.xlu0 %v1953_v36, %s7754_s5  ;;  %v5127_v30 = vsel %vm691_vm2, %v11576_v49, 0.0  ;;  %v5257_v17 = vmul.f32 %v11576_v49, %v11576_v49  ;;  %7504 = vmatprep.mubr.msk.f32.mxu1 %vm4540_vm12, %v4505_v3  ;;  %v6253_v42 = vadd.f32 %v6252_v37, %v6251_v31 }
 0x575   :  { %v5128_v48 = vadd.f32 %v5127_v30, %v5126_v22  ;;  %v3643_v33 = vpop.permute.xlu1 %3642  ;;  %v15051_v22 = vld [vmem:[#allocation159_spill] sm:$0xff]  ;;  %v5326_v44 = vsel %vm691_vm2, %v5258_v39, 0.0  ;;  %v6448_v57 = vadd.f32 %v6447_v6, %v6446_v25  ;;  %v6385_v43 = vmul.f32 %v11611_v50, %v11611_v50 }
 0x576   :  { %v5324_v62 = vsel %vm691_vm2, %v5257_v17, 0.0  ;;  %v3899_v0 = vpop.permute.xlu0 %3898  ;;  %v4441_v54 = vsel %vm4401_vm10, %v4376_v15, %v3643_v33  ;;  %v4182_v2 = vsel %vm4141_vm6, %v11486_v58, %v15051_v22  ;;  %v15052_v58 = vld [vmem:[#allocation161_spill] sm:$0xff]  ;;  %v6256_v15 = vsel %vm691_vm2, %v11611_v50, 0.0  ;;  %v15055_v33 = vld [vmem:[#allocation163_spill] sm:$0xff] }
 0x577   :  { %v5325_v24 = vadd.f32 %v5324_v62, %v5323_v14  ;;  %3160 = vrot.lane.b32.xlu1 %v1952_v1, %s7751_s20  ;;  %v4506_v38 = vsel %vm4466_vm11, %v4441_v54, %v3899_v0  ;;  %v5130_v52 = vadd.f32 %v5129_v19, %v5128_v48  ;;  %v11616_v14 = vsel %vm4141_vm6, %v11494_v46, %v15052_v58  ;;  %v1890_v17 = vld [vmem:[#allocation2 + $0x2e9] sm:$0xff]  ;;  %v15057_v62 = vld [vmem:[#allocation227_spill] sm:$0xff] }
 0x578   :  { %3416 = vrot.lane.b32.xlu0 %v1826_v28, %s7752_s16  ;;  %7505 = vmatmul.mubr.msk.f32.gmra.mrb[70].mxu1 %vm4540_vm12, %v4506_v38  ;;  %v4247_v60 = vsel %vm4206_vm7, %v4182_v2, %v15053_v56  ;;  %v6254_v19 = vsel %vm691_vm2, %v11620_v12, 0.0  ;;  %v6384_v46 = vmul.f32 %v11620_v12, %v11620_v12  ;;  %v4183_v39 = vsel %vm4141_vm6, %v11498_v51, %v15054_v27  ;;  %v1827_v38 = vld [vmem:[#allocation2 + $0x2f0] sm:$0xff] }
 0x579   :  { %v3133_v1 = vpop.permute.xlu1 %3132  ;;  %v5327_v11 = vadd.f32 %v5326_v44, %v5325_v24  ;;  %v6450_v25 = vadd.f32 %v6449_v40, %v6448_v57  ;;  %v6255_v48 = vadd.f32 %v6254_v19, %v6253_v42  ;;  %v11638_v37 = vsel %vm4141_vm6, %v11506_v10, %v15055_v33 }
 0x57a   :  { %v3389_v3 = vpop.permute.xlu0 %3388  ;;  %v4312_v30 = vsel %vm4271_vm8, %v4247_v60, %v3133_v1  ;;  %v11643_v8 = vsel %vm4141_vm6, %v11510_v20, %v15056_v5  ;;  %v4248_v51 = vsel %vm4206_vm7, %v4183_v39, %v15057_v62  ;;  %v6451_v0 = vsel %vm691_vm2, %v6384_v46, 0.0  ;;  %v1891_v62 = vld [vmem:[#allocation2 + $0x2f1] sm:$0xff] }
 0x57b   :  { %3162 = vrot.lane.b32.xlu1 %v1953_v36, %s7751_s20  ;;  %v11649_v36 = vpop.f32.mrb[38].mxu0  ;;  %v6453_v31 = vsel %vm691_vm2, %v6385_v43, 0.0  ;;  %v6452_v55 = vadd.f32 %v6451_v0, %v6450_v25  ;;  %v6257_v20 = vadd.f32 %v6256_v15, %v6255_v48  ;;  %v4377_v24 = vsel %vm4336_vm9, %v4312_v30, %v3389_v3  ;;  %v1954_v43 = vld [vmem:[#allocation2 + $0x2ea] sm:$0xff] }
 0x57c   :  { %3672 = vrot.lane.b32.xlu0 %v1890_v17, %s7753_s19  ;;  %v6387_v10 = vmul.f32 %v11649_v36, %v11649_v36  ;;  %v11654_v22 = vpop.f32.mrb[39].mxu0  ;;  %v6260_v44 = vsel %vm691_vm2, %v11649_v36, 0.0 }
 0x57d   :  { %v3135_v54 = vpop.permute.xlu1 %3134  ;;  %v6258_v40 = vsel %vm691_vm2, %v11654_v22, 0.0  ;;  %v6386_v42 = vmul.f32 %v11654_v22, %v11654_v22  ;;  %v6454_v19 = vadd.f32 %v6453_v31, %v6452_v55  ;;  %v11679_v46 = vpop.f32.mrb[40].mxu0  ;;  %v1955_v55 = vld [vmem:[#allocation2 + $0x2f2] sm:$0xff] }
 0x57e   :  { %v3645_v2 = vpop.permute.xlu0 %3644  ;;  %v11657_v28 = vpop.f32.mrb[38].mxu1  ;;  %v4313_v58 = vsel %vm4271_vm8, %v4248_v51, %v3135_v54  ;;  %v6259_v15 = vadd.f32 %v6258_v40, %v6257_v20  ;;  %v6457_v17 = vsel %vm691_vm2, %v6387_v10, 0.0  ;;  %v6264_v0 = vsel %vm691_vm2, %v11679_v46, 0.0 }
 0x57f   :  { %15058 = vst [vmem:[#allocation216_spill] sm:$0xff] %v11657_v28  ;;  %v4442_v6 = vsel %vm4401_vm10, %v4377_v24, %v3645_v2  ;;  %v5133_v1 = vsel %vm691_vm2, %v11657_v28, 0.0  ;;  %v5260_v57 = vmul.f32 %v11657_v28, %v11657_v28  ;;  %3418 = vrot.lane.b32.xlu1 %v1827_v38, %s7752_s16  ;;  %v11672_v56 = vpop.f32.mrb[39].mxu1  ;;  %v6455_v25 = vsel %vm691_vm2, %v6386_v42, 0.0  ;;  %v11684_v48 = vpop.f32.mrb[41].mxu0 }
 0x580   :  { %15059 = vst [vmem:[#allocation68_spill] sm:$0xff] %v11672_v56  ;;  %3928 = vrot.lane.b32.xlu0 %v1954_v43, %s7754_s5  ;;  %v5131_v60 = vsel %vm691_vm2, %v11672_v56, 0.0  ;;  %v5259_v3 = vmul.f32 %v11672_v56, %v11672_v56  ;;  %v6456_v51 = vadd.f32 %v6455_v25, %v6454_v19  ;;  %v6389_v54 = vmul.f32 %v11679_v46, %v11679_v46  ;;  %v11700_v40 = vpop.f32.mrb[42].mxu0 }
 0x581   :  { %v5330_v27 = vsel %vm691_vm2, %v5260_v57, 0.0  ;;  %v5132_v39 = vadd.f32 %v5131_v60, %v5130_v52  ;;  %v3391_v30 = vpop.permute.xlu1 %3390  ;;  %v6261_v20 = vadd.f32 %v6260_v44, %v6259_v15  ;;  %v6262_v24 = vsel %vm691_vm2, %v11684_v48, 0.0  ;;  %v11705_v57 = vpop.f32.mrb[43].mxu0 }
 0x582   :  { %v5328_v33 = vsel %vm691_vm2, %v5259_v3, 0.0  ;;  %v3901_v5 = vpop.permute.xlu0 %3900  ;;  %v4378_v2 = vsel %vm4336_vm9, %v4313_v58, %v3391_v30  ;;  %v6388_v38 = vmul.f32 %v11684_v48, %v11684_v48  ;;  %v6391_v58 = vmul.f32 %v11700_v40, %v11700_v40 }
 0x583   :  { %v5329_v31 = vadd.f32 %v5328_v33, %v5327_v11  ;;  %v4507_v52 = vsel %vm4466_vm11, %v4442_v6, %v3901_v5  ;;  %3674 = vrot.lane.b32.xlu1 %v1891_v62, %s7753_s19  ;;  %v5134_v10 = vadd.f32 %v5133_v1, %v5132_v39  ;;  %v6458_v11 = vadd.f32 %v6457_v17, %v6456_v51  ;;  %v1828_v17 = vld [vmem:[#allocation2 + $0x300] sm:$0xff] }
 0x584   :  { %3930 = vrot.lane.b32.xlu0 %v1955_v55, %s7754_s5  ;;  %7507 = vmatprep.mubr.msk.f32.mxu1 %vm4540_vm12, %v4507_v52  ;;  %v6461_v1 = vsel %vm691_vm2, %v6389_v54, 0.0  ;;  %v6263_v44 = vadd.f32 %v6262_v24, %v6261_v20  ;;  %v6459_v15 = vsel %vm691_vm2, %v6388_v38, 0.0  ;;  %v6266_v19 = vsel %vm691_vm2, %v11705_v57, 0.0  ;;  %v15061_v62 = vld [vmem:[#allocation167_spill] sm:$0xff]  ;;  %v15062_v54 = vld [vmem:[#allocation166_spill] sm:$0xff]  ;;  %v15063_v52 = vld [vmem:[#allocation168_spill] sm:$0xff] }
 0x585   :  { %v3647_v42 = vpop.permute.xlu1 %3646  ;;  %v5331_v6 = vadd.f32 %v5330_v27, %v5329_v31  ;;  %v6390_v39 = vmul.f32 %v11705_v57, %v11705_v57  ;;  %v15060_v27 = vld [vmem:[#allocation165_spill] sm:$0xff]  ;;  %v6460_v33 = vadd.f32 %v6459_v15, %v6458_v11  ;;  %v11723_v51 = vsel %vm4141_vm6, %v11520_v29, %v15061_v62  ;;  %v15064_v29 = vld [vmem:[#allocation226_spill] sm:$0xff]  ;;  %v15065_v11 = vld [vmem:[#allocation228_spill] sm:$0xff] }
 0x586   :  { %v3903_v60 = vpop.permute.xlu0 %3902  ;;  %v4443_v3 = vsel %vm4401_vm10, %v4378_v2, %v3647_v42  ;;  %v11716_v30 = vsel %vm4141_vm6, %v11516_v23, %v15060_v27  ;;  %v6265_v5 = vadd.f32 %v6264_v0, %v6263_v44  ;;  %v11728_v31 = vsel %vm4141_vm6, %v11524_v9, %v15062_v54  ;;  %v11738_v0 = vpop.f32.mrb[44].mxu0 }
 0x587   :  { %3164 = vrot.lane.b32.xlu1 %v1954_v43, %s7751_s20  ;;  %v4508_v25 = vsel %vm4466_vm11, %v4443_v3, %v3903_v60  ;;  %v11733_v23 = vsel %vm4141_vm6, %v11533_v13, %v15063_v52  ;;  %v6463_v43 = vsel %vm691_vm2, %v6390_v39, 0.0  ;;  %v4249_v20 = vsel %vm4206_vm7, %v11616_v14, %v15064_v29  ;;  %v11745_v13 = vpop.f32.mrb[45].mxu0  ;;  %v1892_v39 = vld [vmem:[#allocation2 + $0x301] sm:$0xff] }
 0x588   :  { %3420 = vrot.lane.b32.xlu0 %v1828_v17, %s7752_s16  ;;  %7508 = vmatmul.mubr.msk.f32.gmra.mrb[72].mxu1 %vm4540_vm12, %v4508_v25  ;;  %v6268_v9 = vsel %vm691_vm2, %v11700_v40, 0.0  ;;  %v6267_v24 = vadd.f32 %v6266_v19, %v6265_v5  ;;  %v6462_v38 = vadd.f32 %v6461_v1, %v6460_v33  ;;  %v11750_v42 = vsel %vm4206_vm7, %v11638_v37, %v15065_v11  ;;  %v11774_v62 = vpop.f32.mrb[46].mxu0 }
 0x589   :  { %v3137_v2 = vpop.permute.xlu1 %3136  ;;  %v6465_v3 = vsel %vm691_vm2, %v6391_v58, 0.0  ;;  %v6393_v14 = vmul.f32 %v11738_v0, %v11738_v0  ;;  %v6392_v15 = vmul.f32 %v11745_v13, %v11745_v13  ;;  %v6270_v58 = vsel %vm691_vm2, %v11745_v13, 0.0 }
 0x58a   :  { %v3393_v44 = vpop.permute.xlu0 %3392  ;;  %v11752_v60 = vpop.f32.mrb[40].mxu1  ;;  %v4314_v1 = vsel %vm4271_vm8, %v4249_v20, %v3137_v2  ;;  %v6464_v27 = vadd.f32 %v6463_v43, %v6462_v38  ;;  %v6272_v33 = vsel %vm691_vm2, %v11738_v0, 0.0  ;;  %v6269_v5 = vadd.f32 %v6268_v9, %v6267_v24 }
 0x58b   :  { %15066 = vst [vmem:[#allocation126_spill] sm:$0xff] %v11752_v60  ;;  %v5262_v19 = vmul.f32 %v11752_v60, %v11752_v60  ;;  %3166 = vrot.lane.b32.xlu1 %v1955_v55, %s7751_s20  ;;  %v11763_v37 = vpop.f32.mrb[41].mxu1  ;;  %v5137_v55 = vsel %vm691_vm2, %v11752_v60, 0.0  ;;  %v6467_v29 = vsel %vm691_vm2, %v6392_v15, 0.0  ;;  %v11779_v20 = vpop.f32.mrb[47].mxu0  ;;  %v4379_v11 = vsel %vm4336_vm9, %v4314_v1, %v3393_v44  ;;  %v1956_v60 = vld [vmem:[#allocation2 + $0x302] sm:$0xff] }
 0x58c   :  { %15067 = vst [vmem:[#allocation186_spill] sm:$0xff] %v11763_v37  ;;  %3676 = vrot.lane.b32.xlu0 %v1892_v39, %s7753_s19  ;;  %v5135_v17 = vsel %vm691_vm2, %v11763_v37, 0.0  ;;  %v5261_v25 = vmul.f32 %v11763_v37, %v11763_v37  ;;  %v6466_v43 = vadd.f32 %v6465_v3, %v6464_v27  ;;  %v1829_v39 = vld [vmem:[#allocation2 + $0x308] sm:$0xff]  ;;  %v6469_v9 = vsel %vm691_vm2, %v6393_v14, 0.0  ;;  %v11793_v1 = vpop.f32.mrb[48].mxu0 }
 0x58d   :  { %v5136_v54 = vadd.f32 %v5135_v17, %v5134_v10  ;;  %v3139_v52 = vpop.permute.xlu1 %3138  ;;  %v6271_v24 = vadd.f32 %v6270_v58, %v6269_v5  ;;  %v5334_v37 = vsel %vm691_vm2, %v5262_v19, 0.0  ;;  %v6395_v15 = vmul.f32 %v11774_v62, %v11774_v62  ;;  %v11799_v5 = vpop.f32.mrb[49].mxu0 }
 0x58e   :  { %v5332_v2 = vsel %vm691_vm2, %v5261_v25, 0.0  ;;  %v3649_v38 = vpop.permute.xlu0 %3648  ;;  %v6468_v3 = vadd.f32 %v6467_v29, %v6466_v43  ;;  %v6274_v44 = vsel %vm691_vm2, %v11779_v20, 0.0  ;;  %v6394_v14 = vmul.f32 %v11779_v20, %v11779_v20 }
 0x58f   :  { %v5333_v28 = vadd.f32 %v5332_v2, %v5331_v6  ;;  %3422 = vrot.lane.b32.xlu1 %v1829_v39, %s7752_s16  ;;  %v5138_v10 = vadd.f32 %v5137_v55, %v5136_v54  ;;  %v6273_v27 = vadd.f32 %v6272_v33, %v6271_v24  ;;  %v6276_v58 = vsel %vm691_vm2, %v11774_v62, 0.0  ;;  %v1893_v54 = vld [vmem:[#allocation2 + $0x309] sm:$0xff] }
 0x590   :  { %3932 = vrot.lane.b32.xlu0 %v1956_v60, %s7754_s5  ;;  %v6470_v17 = vadd.f32 %v6469_v9, %v6468_v3  ;;  %v6397_v25 = vmul.f32 %v11793_v1, %v11793_v1  ;;  %v4444_v33 = vsel %vm4401_vm10, %v4379_v11, %v3649_v38  ;;  %v6473_v43 = vsel %vm691_vm2, %v6395_v15, 0.0  ;;  %v15068_v39 = vld [vmem:[#allocation229_spill] sm:$0xff] }
 0x591   :  { %v3395_v6 = vpop.permute.xlu1 %3394  ;;  %v5335_v19 = vadd.f32 %v5334_v37, %v5333_v28  ;;  %v6275_v29 = vadd.f32 %v6274_v44, %v6273_v27  ;;  %v6471_v2 = vsel %vm691_vm2, %v6394_v14, 0.0  ;;  %v4250_v28 = vsel %vm4206_vm7, %v11643_v8, %v15068_v39  ;;  %v1957_v9 = vld [vmem:[#allocation2 + $0x30a] sm:$0xff]  ;;  %v11816_v8 = vpop.f32.mrb[50].mxu0 }
 0x592   :  { %v3905_v55 = vpop.permute.xlu0 %3904  ;;  %v6472_v24 = vadd.f32 %v6471_v2, %v6470_v17  ;;  %v6278_v38 = vsel %vm691_vm2, %v11799_v5, 0.0  ;;  %v4315_v11 = vsel %vm4271_vm8, %v4250_v28, %v3139_v52  ;;  %v6396_v15 = vmul.f32 %v11799_v5, %v11799_v5  ;;  %v11822_v52 = vpop.f32.mrb[51].mxu0  ;;  %v1830_v28 = vld [vmem:[#allocation2 + $0x318] sm:$0xff] }
 0x593   :  { %v4509_v37 = vsel %vm4466_vm11, %v4444_v33, %v3905_v55  ;;  %3678 = vrot.lane.b32.xlu1 %v1893_v54, %s7753_s19  ;;  %v6277_v3 = vadd.f32 %v6276_v58, %v6275_v29  ;;  %v4380_v27 = vsel %vm4336_vm9, %v4315_v11, %v3395_v6  ;;  %v6280_v14 = vsel %vm691_vm2, %v11793_v1, 0.0 }
 0x594   :  { %3934 = vrot.lane.b32.xlu0 %v1957_v9, %s7754_s5  ;;  %7510 = vmatprep.mubr.msk.f32.mxu1 %vm4540_vm12, %v4509_v37  ;;  %v6477_v17 = vsel %vm691_vm2, %v6397_v25, 0.0  ;;  %v6474_v33 = vadd.f32 %v6473_v43, %v6472_v24  ;;  %v6475_v2 = vsel %vm691_vm2, %v6396_v15, 0.0  ;;  %v6399_v6 = vmul.f32 %v11816_v8, %v11816_v8  ;;  %v11846_v15 = vpop.f32.mrb[52].mxu0 }
 0x595   :  { %v3651_v44 = vpop.permute.xlu1 %3650  ;;  %v6279_v29 = vadd.f32 %v6278_v38, %v6277_v3  ;;  %v6282_v24 = vsel %vm691_vm2, %v11822_v52, 0.0 }
 0x596   :  { %v3907_v55 = vpop.permute.xlu0 %3906  ;;  %v4445_v54 = vsel %vm4401_vm10, %v4380_v27, %v3651_v44  ;;  %v11825_v58 = vpop.f32.mrb[42].mxu1  ;;  %v6476_v37 = vadd.f32 %v6475_v2, %v6474_v33 }
 0x597   :  { %15069 = vst [vmem:[#allocation24_spill] sm:$0xff] %v11825_v58  ;;  %v5264_v39 = vmul.f32 %v11825_v58, %v11825_v58  ;;  %3168 = vrot.lane.b32.xlu1 %v1956_v60, %s7751_s20  ;;  %v11833_v25 = vpop.f32.mrb[43].mxu1  ;;  %v4510_v43 = vsel %vm4466_vm11, %v4445_v54, %v3907_v55  ;;  %v6284_v60 = vsel %vm691_vm2, %v11816_v8, 0.0  ;;  %v6281_v3 = vadd.f32 %v6280_v14, %v6279_v29  ;;  %v11852_v2 = vpop.f32.mrb[53].mxu0 }
 0x598   :  { %15070 = vst [vmem:[#allocation213_spill] sm:$0xff] %v11833_v25  ;;  %3424 = vrot.lane.b32.xlu0 %v1830_v28, %s7752_s16  ;;  %v5139_v38 = vsel %vm691_vm2, %v11833_v25, 0.0  ;;  %v5263_v11 = vmul.f32 %v11833_v25, %v11833_v25  ;;  %7511 = vmatmul.mubr.msk.f32.gmra.mrb[74].mxu1 %vm4540_vm12, %v4510_v43  ;;  %v5141_v27 = vsel %vm691_vm2, %v11825_v58, 0.0  ;;  %v6398_v55 = vmul.f32 %v11822_v52, %v11822_v52 }
 0x599   :  { %v5140_v44 = vadd.f32 %v5139_v38, %v5138_v10  ;;  %v3141_v33 = vpop.permute.xlu1 %3140  ;;  %v6478_v54 = vadd.f32 %v6477_v17, %v6476_v37  ;;  %v5338_v28 = vsel %vm691_vm2, %v5264_v39, 0.0  ;;  %v6481_v14 = vsel %vm691_vm2, %v6399_v6, 0.0  ;;  %v1894_v10 = vld [vmem:[#allocation2 + $0x319] sm:$0xff] }
 0x59a   :  { %v5336_v43 = vsel %vm691_vm2, %v5263_v11, 0.0  ;;  %v3397_v25 = vpop.permute.xlu0 %3396  ;;  %v6283_v29 = vadd.f32 %v6282_v24, %v6281_v3  ;;  %v4316_v58 = vsel %vm4271_vm8, %v11750_v42, %v3141_v33  ;;  %v6479_v17 = vsel %vm691_vm2, %v6398_v55, 0.0  ;;  %v15071_v33 = vld [vmem:[#allocation230_spill] sm:$0xff]  ;;  %v15072_v55 = vld [vmem:[#allocation231_spill] sm:$0xff] }
 0x59b   :  { %v5337_v56 = vadd.f32 %v5336_v43, %v5335_v19  ;;  %3170 = vrot.lane.b32.xlu1 %v1957_v9, %s7751_s20  ;;  %v5142_v38 = vadd.f32 %v5141_v27, %v5140_v44  ;;  %v6480_v37 = vadd.f32 %v6479_v17, %v6478_v54  ;;  %v6401_v39 = vmul.f32 %v11846_v15, %v11846_v15  ;;  %v11866_v19 = vpop.f32.mrb[54].mxu0  ;;  %v1958_v17 = vld [vmem:[#allocation2 + $0x31a] sm:$0xff] }
 0x59c   :  { %3680 = vrot.lane.b32.xlu0 %v1894_v10, %s7753_s19  ;;  %v6285_v11 = vadd.f32 %v6284_v60, %v6283_v29  ;;  %v6286_v6 = vsel %vm691_vm2, %v11852_v2, 0.0  ;;  %v6288_v9 = vsel %vm691_vm2, %v11846_v15, 0.0  ;;  %v6400_v3 = vmul.f32 %v11852_v2, %v11852_v2  ;;  %v11874_v44 = vpop.f32.mrb[55].mxu0 }
 0x59d   :  { %v3143_v24 = vpop.permute.xlu1 %3142  ;;  %v5339_v42 = vadd.f32 %v5338_v28, %v5337_v56  ;;  %v6403_v27 = vmul.f32 %v11866_v19, %v11866_v19  ;;  %v11879_v60 = vsel %vm4206_vm7, %v11716_v30, %v15071_v33  ;;  %v4252_v56 = vsel %vm4206_vm7, %v11728_v31, %v15072_v55  ;;  %v1831_v28 = vld [vmem:[#allocation2 + $0x320] sm:$0xff] }
 0x59e   :  { %v3653_v54 = vpop.permute.xlu0 %3652  ;;  %v6287_v43 = vadd.f32 %v6286_v6, %v6285_v11  ;;  %v6482_v29 = vadd.f32 %v6481_v14, %v6480_v37  ;;  %v4381_v10 = vsel %vm4336_vm9, %v4316_v58, %v3397_v25  ;;  %v6485_v32 = vsel %vm691_vm2, %v6401_v39, 0.0  ;;  %v11895_v25 = vpop.f32.mrb[56].mxu0 }
 0x59f   :  { %3426 = vrot.lane.b32.xlu1 %v1831_v28, %s7752_s16  ;;  %v6483_v49 = vsel %vm691_vm2, %v6400_v3, 0.0  ;;  %v6290_v30 = vsel %vm691_vm2, %v11874_v44, 0.0  ;;  %v6292_v31 = vsel %vm691_vm2, %v11866_v19, 0.0  ;;  %v6402_v58 = vmul.f32 %v11874_v44, %v11874_v44  ;;  %15073 = vst [vmem:[#allocation67_spill] sm:$0xff] %v11895_v25 }
 0x5a0   :  { %3936 = vrot.lane.b32.xlu0 %v1958_v17, %s7754_s5  ;;  %v6484_v33 = vadd.f32 %v6483_v49, %v6482_v29  ;;  %v6289_v11 = vadd.f32 %v6288_v9, %v6287_v43  ;;  %v4446_v14 = vsel %vm4401_vm10, %v4381_v10, %v3653_v54  ;;  %v4317_v37 = vsel %vm4271_vm8, %v4252_v56, %v3143_v24  ;;  %v11902_v49 = vpop.f32.mrb[57].mxu0  ;;  %v1895_v9 = vld [vmem:[#allocation2 + $0x321] sm:$0xff] }
 0x5a1   :  { %v3399_v39 = vpop.permute.xlu1 %3398  ;;  %v6489_v6 = vsel %vm691_vm2, %v6403_v27, 0.0  ;;  %v6405_v3 = vmul.f32 %v11895_v25, %v11895_v25  ;;  %v6487_v16 = vsel %vm691_vm2, %v6402_v58, 0.0  ;;  %v6296_v54 = vsel %vm691_vm2, %v11895_v25, 0.0 }
 0x5a2   :  { %v3909_v55 = vpop.permute.xlu0 %3908  ;;  %v11904_v28 = vpop.f32.mrb[44].mxu1  ;;  %v6291_v43 = vadd.f32 %v6290_v30, %v6289_v11  ;;  %v6486_v29 = vadd.f32 %v6485_v32, %v6484_v33  ;;  %v4382_v27 = vsel %vm4336_vm9, %v4317_v37, %v3399_v39 }
 0x5a3   :  { %15074 = vst [vmem:[#allocation125_spill] sm:$0xff] %v11904_v28  ;;  %v4511_v24 = vsel %vm4466_vm11, %v4446_v14, %v3909_v55  ;;  %v5145_v56 = vsel %vm691_vm2, %v11904_v28, 0.0  ;;  %v5266_v10 = vmul.f32 %v11904_v28, %v11904_v28  ;;  %3682 = vrot.lane.b32.xlu1 %v1895_v9, %s7753_s19  ;;  %v11916_v30 = vpop.f32.mrb[45].mxu1  ;;  %v11924_v14 = vpop.f32.mrb[58].mxu0  ;;  %v6493_v55 = vsel %vm691_vm2, %v6405_v3, 0.0 }
 0x5a4   :  { %15075 = vst [vmem:[#allocation185_spill] sm:$0xff] %v11916_v30  ;;  %3938 = vrot.lane.b32.xlu0 %v1959_v34, %s7754_s5  ;;  %v5143_v32 = vsel %vm691_vm2, %v11916_v30, 0.0  ;;  %v5265_v33 = vmul.f32 %v11916_v30, %v11916_v30  ;;  %7513 = vmatprep.mubr.msk.f32.mxu1 %vm4540_vm12, %v4511_v24  ;;  %v6488_v11 = vadd.f32 %v6487_v16, %v6486_v29  ;;  %15076 = vst [vmem:[#allocation5_spill] sm:$0xff] %v11924_v14  ;;  %v11931_v21 = vpop.f32.mrb[59].mxu0 }
 0x5a5   :  { %v6293_v58 = vadd.f32 %v6292_v31, %v6291_v43  ;;  %v5144_v37 = vadd.f32 %v5143_v32, %v5142_v38  ;;  %v3655_v39 = vpop.permute.xlu1 %3654  ;;  %v6294_v9 = vsel %vm691_vm2, %v11902_v49, 0.0  ;;  %v6404_v28 = vmul.f32 %v11902_v49, %v11902_v49  ;;  %v1832_v38 = vld [vmem:[#allocation2 + $0x330] sm:$0xff] }
 0x5a6   :  { %v5340_v30 = vsel %vm691_vm2, %v5265_v33, 0.0  ;;  %v3911_v35 = vpop.permute.xlu0 %3910  ;;  %v4447_v16 = vsel %vm4401_vm10, %v4382_v27, %v3655_v39  ;;  %v6490_v43 = vadd.f32 %v6489_v6, %v6488_v11  ;;  %v5342_v25 = vsel %vm691_vm2, %v5266_v10, 0.0  ;;  %v15079_v11 = vld [vmem:[#allocation170_spill] sm:$0xff] }
 0x5a7   :  { %v6295_v31 = vadd.f32 %v6294_v9, %v6293_v58  ;;  %v5341_v29 = vadd.f32 %v5340_v30, %v5339_v42  ;;  %3172 = vrot.lane.b32.xlu1 %v1958_v17, %s7751_s20  ;;  %v4512_v3 = vsel %vm4466_vm11, %v4447_v16, %v3911_v35  ;;  %v5146_v24 = vadd.f32 %v5145_v56, %v5144_v37  ;;  %v11943_v42 = vpop.f32.mrb[60].mxu0  ;;  %v1896_v9 = vld [vmem:[#allocation2 + $0x331] sm:$0xff] }
 0x5a8   :  { %v6491_v32 = vsel %vm691_vm2, %v6404_v28, 0.0  ;;  %3428 = vrot.lane.b32.xlu0 %v1832_v38, %s7752_s16  ;;  %7514 = vmatmul.mubr.msk.f32.gmra.mrb[76].mxu1 %vm4540_vm12, %v4512_v3  ;;  %v6407_v27 = vmul.f32 %v11924_v14, %v11924_v14  ;;  %15077 = vst [vmem:[#allocation220_spill] sm:$0xff] %v11943_v42  ;;  %v6300_v35 = vsel %vm691_vm2, %v11924_v14, 0.0  ;;  %v6298_v28 = vsel %vm691_vm2, %v11931_v21, 0.0  ;;  %v11951_v10 = vpop.f32.mrb[61].mxu0 }
 0x5a9   :  { %v6492_v33 = vadd.f32 %v6491_v32, %v6490_v43  ;;  %v6297_v6 = vadd.f32 %v6296_v54, %v6295_v31  ;;  %v3145_v30 = vpop.permute.xlu1 %3144  ;;  %v5343_v17 = vadd.f32 %v5342_v25, %v5341_v29  ;;  %v6406_v56 = vmul.f32 %v11931_v21, %v11931_v21  ;;  %15078 = vst [vmem:[#allocation70_spill] sm:$0xff] %v11951_v10  ;;  %v15080_v29 = vld [vmem:[#allocation233_spill] sm:$0xff]  ;;  %v11973_v3 = vpop.f32.mrb[62].mxu0 }
 0x5aa   :  { %v11956_v58 = vsel %vm4141_vm6, %v11541_v63, %v15079_v11  ;;  %v3401_v54 = vpop.permute.xlu0 %3400  ;;  %v4318_v25 = vsel %vm4271_vm8, %v11879_v60, %v3145_v30  ;;  %v6497_v16 = vsel %vm691_vm2, %v6407_v27, 0.0  ;;  %v6409_v43 = vmul.f32 %v11943_v42, %v11943_v42  ;;  %15081 = vst [vmem:[#allocation128_spill] sm:$0xff] %v11973_v3  ;;  %v11981_v30 = vpop.f32.mrb[63].mxu0 }
 0x5ab   :  { %v6299_v37 = vadd.f32 %v6298_v28, %v6297_v6  ;;  %v6494_v39 = vadd.f32 %v6493_v55, %v6492_v33  ;;  %3174 = vrot.lane.b32.xlu1 %v1959_v34, %s7751_s20  ;;  %v6495_v31 = vsel %vm691_vm2, %v6406_v56, 0.0  ;;  %v6302_v63 = vsel %vm691_vm2, %v11951_v10, 0.0  ;;  %15082 = vst [vmem:[#allocation188_spill] sm:$0xff] %v11981_v30  ;;  %v1833_v56 = vld [vmem:[#allocation2 + $0x338] sm:$0xff] }
 0x5ac   :  { %v4254_v38 = vsel %vm4206_vm7, %v11733_v23, %v15080_v29  ;;  %3684 = vrot.lane.b32.xlu0 %v1896_v9, %s7753_s19  ;;  %v6408_v34 = vmul.f32 %v11951_v10, %v11951_v10  ;;  %v4383_v32 = vsel %vm4336_vm9, %v4318_v25, %v3401_v54  ;;  %v6304_v27 = vsel %vm691_vm2, %v11943_v42, 0.0  ;;  %v1960_v29 = vld [vmem:[#allocation2 + $0x332] sm:$0xff] }
 0x5ad   :  { %v6496_v60 = vadd.f32 %v6495_v31, %v6494_v39  ;;  %v6301_v55 = vadd.f32 %v6300_v35, %v6299_v37  ;;  %v3147_v33 = vpop.permute.xlu1 %3146  ;;  %v6501_v6 = vsel %vm691_vm2, %v6409_v43, 0.0  ;;  %v6411_v23 = vmul.f32 %v11973_v3, %v11973_v3 }
 0x5ae   :  { %v3657_v28 = vpop.permute.xlu0 %3656  ;;  %v11983_v35 = vpop.f32.mrb[46].mxu1  ;;  %v6499_v39 = vsel %vm691_vm2, %v6408_v34, 0.0  ;;  %v6308_v54 = vsel %vm691_vm2, %v11973_v3, 0.0  ;;  %v4319_v9 = vsel %vm4271_vm8, %v4254_v38, %v3147_v33 }
 0x5af   :  { %15083 = vst [vmem:[#allocation26_spill] sm:$0xff] %v11983_v35  ;;  %v6303_v11 = vadd.f32 %v6302_v63, %v6301_v55  ;;  %v6498_v37 = vadd.f32 %v6497_v16, %v6496_v60  ;;  %v4448_v25 = vsel %vm4401_vm10, %v4383_v32, %v3657_v28  ;;  %v5149_v31 = vsel %vm691_vm2, %v11983_v35, 0.0  ;;  %3430 = vrot.lane.b32.xlu1 %v1833_v56, %s7752_s16  ;;  %v11995_v63 = vpop.f32.mrb[47].mxu1  ;;  %v12002_v34 = vpop.f32.mrb[64].mxu0 }
 0x5b0   :  { %v5268_v43 = vmul.f32 %v11983_v35, %v11983_v35  ;;  %15084 = vst [vmem:[#allocation217_spill] sm:$0xff] %v11995_v63  ;;  %3940 = vrot.lane.b32.xlu0 %v1960_v29, %s7754_s5  ;;  %v5147_v16 = vsel %vm691_vm2, %v11995_v63, 0.0  ;;  %v5267_v60 = vmul.f32 %v11995_v63, %v11995_v63  ;;  %15085 = vst [vmem:[#allocation69_spill] sm:$0xff] %v12002_v34  ;;  %v6505_v28 = vsel %vm691_vm2, %v6411_v23, 0.0  ;;  %v12009_v3 = vpop.f32.mrb[65].mxu0  ;;  %v1961_v23 = vld [vmem:[#allocation2 + $0x33a] sm:$0xff] }
 0x5b1   :  { %v6500_v38 = vadd.f32 %v6499_v39, %v6498_v37  ;;  %v6305_v55 = vadd.f32 %v6304_v27, %v6303_v11  ;;  %v5148_v32 = vadd.f32 %v5147_v16, %v5146_v24  ;;  %v3403_v33 = vpop.permute.xlu1 %3402  ;;  %v6306_v56 = vsel %vm691_vm2, %v11981_v30, 0.0  ;;  %15086 = vst [vmem:[#allocation127_spill] sm:$0xff] %v12009_v3  ;;  %v1897_v27 = vld [vmem:[#allocation2 + $0x339] sm:$0xff] }
 0x5b2   :  { %v6410_v35 = vmul.f32 %v11981_v30, %v11981_v30  ;;  %v5344_v42 = vsel %vm691_vm2, %v5267_v60, 0.0  ;;  %v3913_v10 = vpop.permute.xlu0 %3912  ;;  %v4384_v37 = vsel %vm4336_vm9, %v4319_v9, %v3403_v33  ;;  %v5346_v30 = vsel %vm691_vm2, %v5268_v43, 0.0 }
 0x5b3   :  { %v6307_v11 = vadd.f32 %v6306_v56, %v6305_v55  ;;  %v6502_v39 = vadd.f32 %v6501_v6, %v6500_v38  ;;  %v5345_v24 = vadd.f32 %v5344_v42, %v5343_v17  ;;  %v4513_v16 = vsel %vm4466_vm11, %v4448_v25, %v3913_v10  ;;  %3686 = vrot.lane.b32.xlu1 %v1897_v27, %s7753_s19  ;;  %v12021_v42 = vpop.f32.mrb[66].mxu0  ;;  %v1834_v10 = vld [vmem:[#allocation2 + $0x348] sm:$0xff] }
 0x5b4   :  { %v5150_v63 = vadd.f32 %v5149_v31, %v5148_v32  ;;  %v6503_v14 = vsel %vm691_vm2, %v6410_v35, 0.0  ;;  %3942 = vrot.lane.b32.xlu0 %v1961_v23, %s7754_s5  ;;  %7516 = vmatprep.mubr.msk.f32.mxu1 %vm4540_vm12, %v4513_v16  ;;  %v6413_v9 = vmul.f32 %v12002_v34, %v12002_v34  ;;  %15087 = vst [vmem:[#allocation187_spill] sm:$0xff] %v12021_v42  ;;  %v6312_v31 = vsel %vm691_vm2, %v12002_v34, 0.0  ;;  %v12029_v38 = vpop.f32.mrb[67].mxu0 }
 0x5b5   :  { %v6504_v60 = vadd.f32 %v6503_v14, %v6502_v39  ;;  %v6309_v6 = vadd.f32 %v6308_v54, %v6307_v11  ;;  %v3659_v17 = vpop.permute.xlu1 %3658  ;;  %v5347_v25 = vadd.f32 %v5346_v30, %v5345_v24  ;;  %v6310_v35 = vsel %vm691_vm2, %v12009_v3, 0.0  ;;  %15088 = vst [vmem:[#allocation7_spill] sm:$0xff] %v12029_v38  ;;  %v15090_v24 = vld [vmem:[#allocation113_spill] sm:$0xff] }
 0x5b6   :  { %v6412_v43 = vmul.f32 %v12009_v3, %v12009_v3  ;;  %v3915_v14 = vpop.permute.xlu0 %3914  ;;  %v4449_v55 = vsel %vm4401_vm10, %v4384_v37, %v3659_v17  ;;  %v6509_v54 = vsel %vm691_vm2, %v6413_v9, 0.0  ;;  %v6415_v27 = vmul.f32 %v12021_v42, %v12021_v42 }
 0x5b7   :  { %v6311_v32 = vadd.f32 %v6310_v35, %v6309_v6  ;;  %v6506_v33 = vadd.f32 %v6505_v28, %v6504_v60  ;;  %3176 = vrot.lane.b32.xlu1 %v1960_v29, %s7751_s20  ;;  %v4514_v30 = vsel %vm4466_vm11, %v4449_v55, %v3915_v14  ;;  %v6314_v11 = vsel %vm691_vm2, %v12029_v38, 0.0  ;;  %v12044_v29 = vpop.f32.mrb[68].mxu0  ;;  %v15091_v60 = vld [vmem:[#allocation232_spill] sm:$0xff]  ;;  %v15092_v6 = vld [vmem:[#allocation235_spill] sm:$0xff] }
 0x5b8   :  { %v6507_v56 = vsel %vm691_vm2, %v6412_v43, 0.0  ;;  %3432 = vrot.lane.b32.xlu0 %v1834_v10, %s7752_s16  ;;  %7517 = vmatmul.mubr.msk.f32.gmra.mrb[78].mxu1 %vm4540_vm12, %v4514_v30  ;;  %v6414_v28 = vmul.f32 %v12029_v38, %v12029_v38  ;;  %15089 = vst [vmem:[#allocation72_spill] sm:$0xff] %v12044_v29  ;;  %v12049_v16 = vsel %vm4076_vm5, %v11466_v59, %v15090_v24  ;;  %v6316_v35 = vsel %vm691_vm2, %v12021_v42, 0.0  ;;  %v12059_v43 = vpop.f32.mrb[69].mxu0 }
 0x5b9   :  { %v6508_v37 = vadd.f32 %v6507_v56, %v6506_v33  ;;  %v6313_v39 = vadd.f32 %v6312_v31, %v6311_v32  ;;  %v4255_v9 = vsel %vm4206_vm7, %v11723_v51, %v15091_v60  ;;  %v4256_v17 = vsel %vm4206_vm7, %v11956_v58, %v15092_v6  ;;  %v3149_v10 = vpop.permute.xlu1 %3148  ;;  %v1898_v31 = vld [vmem:[#allocation2 + $0x349] sm:$0xff]  ;;  %15093 = vst [vmem:[#allocation130_spill] sm:$0xff] %v12059_v43 }
 0x5ba   :  { %v3405_v14 = vpop.permute.xlu0 %3404  ;;  %v12061_v55 = vpop.f32.mrb[48].mxu1  ;;  %v6513_v59 = vsel %vm691_vm2, %v6415_v27, 0.0  ;;  %v6511_v51 = vsel %vm691_vm2, %v6414_v28, 0.0  ;;  %v4320_v30 = vsel %vm4271_vm8, %v4255_v9, %v3149_v10  ;;  %v6320_v24 = vsel %vm691_vm2, %v12044_v29, 0.0  ;;  %v1962_v10 = vld [vmem:[#allocation2 + $0x34a] sm:$0xff] }
 0x5bb   :  { %15094 = vst [vmem:[#allocation190_spill] sm:$0xff] %v12061_v55  ;;  %v6315_v32 = vadd.f32 %v6314_v11, %v6313_v39  ;;  %v6510_v33 = vadd.f32 %v6509_v54, %v6508_v37  ;;  %v5270_v58 = vmul.f32 %v12061_v55, %v12061_v55  ;;  %3178 = vrot.lane.b32.xlu1 %v1961_v23, %s7751_s20  ;;  %v12069_v56 = vpop.f32.mrb[49].mxu1  ;;  %v1835_v11 = vld [vmem:[#allocation2 + $0x350] sm:$0xff]  ;;  %v12080_v23 = vpop.f32.mrb[70].mxu0  ;;  %v5153_v28 = vsel %vm691_vm2, %v12061_v55, 0.0 }
 0x5bc   :  { %15095 = vst [vmem:[#allocation4_spill] sm:$0xff] %v12069_v56  ;;  %v6417_v60 = vmul.f32 %v12044_v29, %v12044_v29  ;;  %3688 = vrot.lane.b32.xlu0 %v1898_v31, %s7753_s19  ;;  %v5151_v54 = vsel %vm691_vm2, %v12069_v56, 0.0  ;;  %v5269_v27 = vmul.f32 %v12069_v56, %v12069_v56  ;;  %v6318_v31 = vsel %vm691_vm2, %v12059_v43, 0.0  ;;  %v12088_v42 = vpop.f32.mrb[71].mxu0 }
 0x5bd   :  { %v6512_v37 = vadd.f32 %v6511_v51, %v6510_v33  ;;  %v6317_v39 = vadd.f32 %v6316_v35, %v6315_v32  ;;  %v5152_v9 = vadd.f32 %v5151_v54, %v5150_v63  ;;  %v3151_v6 = vpop.permute.xlu1 %3150  ;;  %v6416_v29 = vmul.f32 %v12059_v43, %v12059_v43  ;;  %v1899_v43 = vld [vmem:[#allocation2 + $0x351] sm:$0xff] }
 0x5be   :  { %v5348_v56 = vsel %vm691_vm2, %v5269_v27, 0.0  ;;  %v3661_v33 = vpop.permute.xlu0 %3660  ;;  %v4385_v35 = vsel %vm4336_vm9, %v4320_v30, %v3405_v14  ;;  %v6517_v54 = vsel %vm691_vm2, %v6417_v60, 0.0  ;;  %v5350_v34 = vsel %vm691_vm2, %v5270_v58, 0.0  ;;  %v12105_v58 = vpop.f32.mrb[72].mxu0 }
 0x5bf   :  { %v6319_v32 = vadd.f32 %v6318_v31, %v6317_v39  ;;  %v6514_v51 = vadd.f32 %v6513_v59, %v6512_v37  ;;  %v5349_v38 = vadd.f32 %v5348_v56, %v5347_v25  ;;  %3434 = vrot.lane.b32.xlu1 %v1835_v11, %s7752_s16  ;;  %v5154_v63 = vadd.f32 %v5153_v28, %v5152_v9  ;;  %v12109_v39 = vpop.f32.mrb[73].mxu0 }
 0x5c0   :  { %v6515_v55 = vsel %vm691_vm2, %v6416_v29, 0.0  ;;  %3944 = vrot.lane.b32.xlu0 %v1962_v10, %s7754_s5  ;;  %v6419_v27 = vmul.f32 %v12080_v23, %v12080_v23  ;;  %v6324_v25 = vsel %vm691_vm2, %v12080_v23, 0.0  ;;  %v6322_v56 = vsel %vm691_vm2, %v12088_v42, 0.0  ;;  %v1963_v10 = vld [vmem:[#allocation2 + $0x352] sm:$0xff] }
 0x5c1   :  { %v6516_v3 = vadd.f32 %v6515_v55, %v6514_v51  ;;  %v6321_v14 = vadd.f32 %v6320_v24, %v6319_v32  ;;  %v3407_v30 = vpop.permute.xlu1 %3406  ;;  %v5351_v59 = vadd.f32 %v5350_v34, %v5349_v38  ;;  %v6418_v29 = vmul.f32 %v12088_v42, %v12088_v42 }
 0x5c2   :  { %v4450_v60 = vsel %vm4401_vm10, %v4385_v35, %v3661_v33  ;;  %v4321_v55 = vsel %vm4271_vm8, %v4256_v17, %v3151_v6  ;;  %v3917_v11 = vpop.permute.xlu0 %3916  ;;  %v6521_v38 = vsel %vm691_vm2, %v6419_v27, 0.0  ;;  %v6421_v9 = vmul.f32 %v12105_v58, %v12105_v58  ;;  %v15096_v33 = vld [vmem:[#allocation114_spill] sm:$0xff]  ;;  %v15097_v35 = vld [vmem:[#allocation169_spill] sm:$0xff] }
 0x5c3   :  { %v6323_v37 = vadd.f32 %v6322_v56, %v6321_v14  ;;  %v6518_v24 = vadd.f32 %v6517_v54, %v6516_v3  ;;  %v4515_v34 = vsel %vm4466_vm11, %v4450_v60, %v3917_v11  ;;  %3690 = vrot.lane.b32.xlu1 %v1899_v43, %s7753_s19  ;;  %v6519_v28 = vsel %vm691_vm2, %v6418_v29, 0.0  ;;  %v12133_v14 = vpop.f32.mrb[74].mxu0 }
 0x5c4   :  { %7519 = vmatprep.mubr.msk.f32.mxu1 %vm4540_vm12, %v4515_v34  ;;  %v6326_v3 = vsel %vm691_vm2, %v12109_v39, 0.0  ;;  %v6420_v31 = vmul.f32 %v12109_v39, %v12109_v39  ;;  %v12125_v43 = vsel %vm4076_vm5, %v11472_v26, %v15096_v33  ;;  %v4192_v32 = vsel %vm4141_vm6, %v11529_v61, %v15097_v35  ;;  %15098 = vst [vmem:[#allocation221_spill] sm:$0xff] %v12133_v14 }
 0x5c5   :  { %v6520_v17 = vadd.f32 %v6519_v28, %v6518_v24  ;;  %v6325_v6 = vadd.f32 %v6324_v25, %v6323_v37  ;;  %v4386_v51 = vsel %vm4336_vm9, %v4321_v55, %v3407_v30  ;;  %v3663_v54 = vpop.permute.xlu1 %3662  ;;  %v6328_v27 = vsel %vm691_vm2, %v12105_v58, 0.0  ;;  %v15100_v37 = vld [vmem:[#allocation234_spill] sm:$0xff]  ;;  %v12148_v28 = vpop.f32.mrb[75].mxu0 }
 0x5c6   :  { %v3919_v25 = vpop.permute.xlu0 %3918  ;;  %v4451_v56 = vsel %vm4401_vm10, %v4386_v51, %v3663_v54  ;;  %v12136_v29 = vpop.f32.mrb[50].mxu1  ;;  %v6523_v11 = vsel %vm691_vm2, %v6420_v31, 0.0  ;;  %v4257_v61 = vsel %vm4206_vm7, %v4192_v32, %v15100_v37  ;;  %v6525_v34 = vsel %vm691_vm2, %v6421_v9, 0.0  ;;  %15102 = vst [vmem:[#allocation189_spill] sm:$0xff] %v12148_v28 }
 0x5c7   :  { %15099 = vst [vmem:[#allocation71_spill] sm:$0xff] %v12136_v29  ;;  %v6327_v60 = vadd.f32 %v6326_v3, %v6325_v6  ;;  %v6522_v26 = vadd.f32 %v6521_v38, %v6520_v17  ;;  %v5272_v30 = vmul.f32 %v12136_v29, %v12136_v29  ;;  %3946 = vrot.lane.b32.xlu1 %v1963_v10, %s7754_s5  ;;  %v12144_v55 = vpop.f32.mrb[51].mxu1  ;;  %v5157_v3 = vsel %vm691_vm2, %v12136_v29, 0.0  ;;  %v12161_v32 = vpop.f32.mrb[76].mxu0 }
 0x5c8   :  { %15101 = vst [vmem:[#allocation129_spill] sm:$0xff] %v12144_v55  ;;  %v4516_v24 = vsel %vm4466_vm11, %v4451_v56, %v3919_v25  ;;  %v5155_v38 = vsel %vm691_vm2, %v12144_v55, 0.0  ;;  %v5271_v17 = vmul.f32 %v12144_v55, %v12144_v55  ;;  %v6423_v10 = vmul.f32 %v12133_v14, %v12133_v14  ;;  %15103 = vst [vmem:[#allocation9_spill] sm:$0xff] %v12161_v32 }
 0x5c9   :  { %7520 = vmatmul.mubr.msk.f32.gmra.mrb[80].mxu1 %vm4540_vm12, %v4516_v24  ;;  %v6524_v6 = vadd.f32 %v6523_v11, %v6522_v26  ;;  %v5156_v31 = vadd.f32 %v5155_v38, %v5154_v63  ;;  %v3153_v33 = vpop.permute.xlu1 %3152  ;;  %v6329_v9 = vadd.f32 %v6328_v27, %v6327_v60  ;;  %v6330_v35 = vsel %vm691_vm2, %v12148_v28, 0.0  ;;  %v12169_v11 = vpop.f32.mrb[77].mxu0 }
 0x5ca   :  { %v5354_v51 = vsel %vm691_vm2, %v5272_v30, 0.0  ;;  %v5352_v54 = vsel %vm691_vm2, %v5271_v17, 0.0  ;;  %v3409_v25 = vpop.permute.xlu0 %3408  ;;  %v6332_v56 = vsel %vm691_vm2, %v12133_v14, 0.0  ;;  %v6422_v26 = vmul.f32 %v12148_v28, %v12148_v28 }
 0x5cb   :  { %v5353_v63 = vadd.f32 %v5352_v54, %v5351_v59  ;;  %v4322_v27 = vsel %vm4271_vm8, %v4257_v61, %v3153_v33  ;;  %v5158_v60 = vadd.f32 %v5157_v3, %v5156_v31  ;;  %v6331_v37 = vadd.f32 %v6330_v35, %v6329_v9  ;;  %v12180_v61 = vpop.f32.mrb[78].mxu0  ;;  %v15105_v3 = vld [vmem:[#allocation171_spill] sm:$0xff] }
 0x5cc   :  { %v6529_v24 = vsel %vm691_vm2, %v6423_v10, 0.0  ;;  %v6526_v38 = vadd.f32 %v6525_v34, %v6524_v6  ;;  %v6527_v30 = vsel %vm691_vm2, %v6422_v26, 0.0  ;;  %v6425_v17 = vmul.f32 %v12161_v32, %v12161_v32  ;;  %15104 = vst [vmem:[#allocation74_spill] sm:$0xff] %v12180_v61  ;;  %v15106_v6 = vld [vmem:[#allocation172_spill] sm:$0xff]  ;;  %v12192_v35 = vpop.f32.mrb[79].mxu0 }
 0x5cd   :  { %v3155_v29 = vpop.permute.xlu1 %3154  ;;  %v5355_v55 = vadd.f32 %v5354_v51, %v5353_v63  ;;  %v6333_v14 = vadd.f32 %v6332_v56, %v6331_v37  ;;  %v6334_v28 = vsel %vm691_vm2, %v12169_v11, 0.0  ;;  %v6424_v59 = vmul.f32 %v12169_v11, %v12169_v11  ;;  %15107 = vst [vmem:[#allocation132_spill] sm:$0xff] %v12192_v35  ;;  %v15108_v51 = vld [vmem:[#allocation237_spill] sm:$0xff] }
 0x5ce   :  { %v12185_v34 = vsel %vm4141_vm6, %v11537_v7, %v15105_v3  ;;  %v4193_v10 = vsel %vm4141_vm6, %v11548_v53, %v15106_v6  ;;  %v3665_v31 = vpop.permute.xlu0 %3664  ;;  %v6528_v33 = vadd.f32 %v6527_v30, %v6526_v38  ;;  %v6336_v9 = vsel %vm691_vm2, %v12161_v32, 0.0 }
 0x5cf   :  { %v4258_v54 = vsel %vm4206_vm7, %v4193_v10, %v15108_v51  ;;  %v6335_v56 = vadd.f32 %v6334_v28, %v6333_v14  ;;  %v6531_v26 = vsel %vm691_vm2, %v6424_v59, 0.0  ;;  %v6427_v7 = vmul.f32 %v12180_v61, %v12180_v61  ;;  %v12208_v59 = vpop.f32.mrb[80].mxu0 }
 0x5d0   :  { %v4387_v63 = vsel %vm4336_vm9, %v4322_v27, %v3409_v25  ;;  %v6530_v37 = vadd.f32 %v6529_v24, %v6528_v33  ;;  %v6338_v53 = vsel %vm691_vm2, %v12192_v35, 0.0  ;;  %v6426_v38 = vmul.f32 %v12192_v35, %v12192_v35  ;;  %15109 = vst [vmem:[#allocation192_spill] sm:$0xff] %v12208_v59 }
 0x5d1   :  { %v4323_v30 = vsel %vm4271_vm8, %v4258_v54, %v3155_v29  ;;  %v3411_v3 = vpop.permute.xlu1 %3410  ;;  %v6533_v6 = vsel %vm691_vm2, %v6425_v17, 0.0  ;;  %v6340_v14 = vsel %vm691_vm2, %v12180_v61, 0.0  ;;  %v6337_v28 = vadd.f32 %v6336_v9, %v6335_v56  ;;  %v12221_v56 = vpop.f32.mrb[81].mxu0 }
 0x5d2   :  { %v4452_v25 = vsel %vm4401_vm10, %v4387_v63, %v3665_v31  ;;  %v3921_v27 = vpop.permute.xlu0 %3920  ;;  %v4388_v24 = vsel %vm4336_vm9, %v4323_v30, %v3411_v3  ;;  %v12212_v10 = vpop.f32.mrb[52].mxu1  ;;  %v6532_v33 = vadd.f32 %v6531_v26, %v6530_v37  ;;  %v6537_v51 = vsel %vm691_vm2, %v6427_v7, 0.0  ;;  %15112 = vst [vmem:[#allocation131_spill] sm:$0xff] %v12221_v56 }
 0x5d3   :  { %15110 = vst [vmem:[#allocation6_spill] sm:$0xff] %v12212_v10  ;;  %v4517_v29 = vsel %vm4466_vm11, %v4452_v25, %v3921_v27  ;;  %v12216_v54 = vpop.f32.mrb[53].mxu1  ;;  %v6339_v17 = vadd.f32 %v6338_v53, %v6337_v28  ;;  %v6535_v61 = vsel %vm691_vm2, %v6426_v38, 0.0  ;;  %v6344_v9 = vsel %vm691_vm2, %v12208_v59, 0.0  ;;  %v12234_v28 = vpop.f32.mrb[82].mxu0 }
 0x5d4   :  { %15111 = vst [vmem:[#allocation73_spill] sm:$0xff] %v12216_v54  ;;  %v5274_v31 = vmul.f32 %v12212_v10, %v12212_v10  ;;  %v5159_v26 = vsel %vm691_vm2, %v12216_v54, 0.0  ;;  %v5273_v7 = vmul.f32 %v12216_v54, %v12216_v54  ;;  %7522 = vmatprep.mubr.msk.f32.mxu1 %vm4540_vm12, %v4517_v29  ;;  %v6534_v63 = vadd.f32 %v6533_v6, %v6532_v33  ;;  %v12240_v33 = vpop.f32.mrb[83].mxu0 }
 0x5d5   :  { %v5161_v37 = vsel %vm691_vm2, %v12212_v10, 0.0  ;;  %v5160_v53 = vadd.f32 %v5159_v26, %v5158_v60  ;;  %v3667_v38 = vpop.permute.xlu1 %3666  ;;  %v6341_v30 = vadd.f32 %v6340_v14, %v6339_v17  ;;  %v6342_v3 = vsel %vm691_vm2, %v12221_v56, 0.0  ;;  %15113 = vst [vmem:[#allocation191_spill] sm:$0xff] %v12234_v28  ;;  %15114 = vst [vmem:[#allocation11_spill] sm:$0xff] %v12240_v33 }
 0x5d6   :  { %v5356_v25 = vsel %vm691_vm2, %v5273_v7, 0.0  ;;  %v3923_v27 = vpop.permute.xlu0 %3922  ;;  %v4453_v35 = vsel %vm4401_vm10, %v4388_v24, %v3667_v38  ;;  %v6536_v54 = vadd.f32 %v6535_v61, %v6534_v63  ;;  %v6429_v6 = vmul.f32 %v12208_v59, %v12208_v59 }
 0x5d7   :  { %v5357_v29 = vadd.f32 %v5356_v25, %v5355_v55  ;;  %v4518_v60 = vsel %vm4466_vm11, %v4453_v35, %v3923_v27  ;;  %v5162_v14 = vadd.f32 %v5161_v37, %v5160_v53  ;;  %v6343_v17 = vadd.f32 %v6342_v3, %v6341_v30  ;;  %v12253_v37 = vpop.f32.mrb[84].mxu0  ;;  %v15118_v25 = vld [vmem:[#allocation174_spill] sm:$0xff] }
 0x5d8   :  { %v5358_v26 = vsel %vm691_vm2, %v5274_v31, 0.0  ;;  %7523 = vmatmul.mubr.msk.f32.gmra.mrb[82].mxu1 %vm4540_vm12, %v4518_v60  ;;  %v6428_v7 = vmul.f32 %v12221_v56, %v12221_v56  ;;  %v6538_v10 = vadd.f32 %v6537_v51, %v6536_v54  ;;  %v6431_v61 = vmul.f32 %v12234_v28, %v12234_v28  ;;  %15115 = vst [vmem:[#allocation76_spill] sm:$0xff] %v12253_v37  ;;  %v15116_v31 = vld [vmem:[#allocation236_spill] sm:$0xff]  ;;  %v12262_v3 = vpop.f32.mrb[85].mxu0 }
 0x5d9   :  { %v3157_v24 = vpop.permute.xlu1 %3156  ;;  %v5359_v63 = vadd.f32 %v5358_v26, %v5357_v29  ;;  %v6345_v38 = vadd.f32 %v6344_v9, %v6343_v17  ;;  %v6346_v55 = vsel %vm691_vm2, %v12240_v33, 0.0  ;;  %v6430_v35 = vmul.f32 %v12240_v33, %v12240_v33  ;;  %15117 = vst [vmem:[#allocation134_spill] sm:$0xff] %v12262_v3  ;;  %v15119_v26 = vld [vmem:[#allocation239_spill] sm:$0xff] }
 0x5da   :  { %v4259_v53 = vsel %vm4206_vm7, %v12185_v34, %v15116_v31  ;;  %v3413_v30 = vpop.permute.xlu0 %3412  ;;  %v6541_v51 = vsel %vm691_vm2, %v6429_v6, 0.0  ;;  %v6539_v54 = vsel %vm691_vm2, %v6428_v7, 0.0  ;;  %v6348_v9 = vsel %vm691_vm2, %v12234_v28, 0.0 }
 0x5db   :  { %v4195_v27 = vsel %vm4141_vm6, %v12125_v43, %v15118_v25  ;;  %v4324_v29 = vsel %vm4271_vm8, %v4259_v53, %v3157_v24  ;;  %v6540_v60 = vadd.f32 %v6539_v54, %v6538_v10  ;;  %v6347_v17 = vadd.f32 %v6346_v55, %v6345_v38  ;;  %v12278_v24 = vpop.f32.mrb[86].mxu0 }
 0x5dc   :  { %v4260_v34 = vsel %vm4206_vm7, %v4195_v27, %v15119_v26  ;;  %v6543_v6 = vsel %vm691_vm2, %v6430_v35, 0.0  ;;  %v6433_v7 = vmul.f32 %v12253_v37, %v12253_v37  ;;  %v6432_v31 = vmul.f32 %v12262_v3, %v12262_v3  ;;  %15120 = vst [vmem:[#allocation194_spill] sm:$0xff] %v12278_v24 }
 0x5dd   :  { %v3159_v28 = vpop.permute.xlu1 %3158  ;;  %v6545_v33 = vsel %vm691_vm2, %v6431_v61, 0.0  ;;  %v6542_v59 = vadd.f32 %v6541_v51, %v6540_v60  ;;  %v6349_v43 = vadd.f32 %v6348_v9, %v6347_v17  ;;  %v6350_v10 = vsel %vm691_vm2, %v12262_v3, 0.0 }
 0x5de   :  { %v3669_v38 = vpop.permute.xlu0 %3668  ;;  %v4389_v55 = vsel %vm4336_vm9, %v4324_v29, %v3413_v30  ;;  %v4325_v35 = vsel %vm4271_vm8, %v4260_v34, %v3159_v28  ;;  %v12282_v53 = vpop.f32.mrb[54].mxu1  ;;  %v6352_v54 = vsel %vm691_vm2, %v12253_v37, 0.0  ;;  %v6549_v25 = vsel %vm691_vm2, %v6433_v7, 0.0 }
 0x5df   :  { %15121 = vst [vmem:[#allocation8_spill] sm:$0xff] %v12282_v53  ;;  %v5276_v61 = vmul.f32 %v12282_v53, %v12282_v53  ;;  %v12289_v51 = vpop.f32.mrb[55].mxu1  ;;  %v6544_v9 = vadd.f32 %v6543_v6, %v6542_v59  ;;  %v6547_v27 = vsel %vm691_vm2, %v6432_v31, 0.0  ;;  %v6356_v30 = vsel %vm691_vm2, %v12278_v24, 0.0  ;;  %v12294_v29 = vpop.f32.mrb[87].mxu0 }
 0x5e0   :  { %15122 = vst [vmem:[#allocation75_spill] sm:$0xff] %v12289_v51  ;;  %v5163_v28 = vsel %vm691_vm2, %v12289_v51, 0.0  ;;  %v5275_v60 = vmul.f32 %v12289_v51, %v12289_v51  ;;  %v6351_v17 = vadd.f32 %v6350_v10, %v6349_v43  ;;  %v6435_v26 = vmul.f32 %v12278_v24, %v12278_v24  ;;  %v12305_v37 = vpop.f32.mrb[88].mxu0 }
 0x5e1   :  { %v4454_v34 = vsel %vm4401_vm10, %v4389_v55, %v3669_v38  ;;  %v5164_v59 = vadd.f32 %v5163_v28, %v5162_v14  ;;  %v3415_v6 = vpop.permute.xlu1 %3414  ;;  %v6546_v7 = vadd.f32 %v6545_v33, %v6544_v9  ;;  %v6354_v31 = vsel %vm691_vm2, %v12294_v29, 0.0  ;;  %15123 = vst [vmem:[#allocation133_spill] sm:$0xff] %v12305_v37  ;;  %v12311_v24 = vpop.f32.mrb[89].mxu0 }
 0x5e2   :  { %v5165_v3 = vsel %vm691_vm2, %v12282_v53, 0.0  ;;  %v5362_v56 = vsel %vm691_vm2, %v5276_v61, 0.0  ;;  %v5360_v43 = vsel %vm691_vm2, %v5275_v60, 0.0  ;;  %v3925_v10 = vpop.permute.xlu0 %3924  ;;  %v6353_v51 = vadd.f32 %v6352_v54, %v6351_v17 }
 0x5e3   :  { %v5361_v38 = vadd.f32 %v5360_v43, %v5359_v63  ;;  %v4519_v14 = vsel %vm4466_vm11, %v4454_v34, %v3925_v10  ;;  %v5166_v33 = vadd.f32 %v5165_v3, %v5164_v59  ;;  %v6548_v55 = vadd.f32 %v6547_v27, %v6546_v7  ;;  %v12323_v27 = vpop.f32.mrb[90].mxu0 }
 0x5e4   :  { %v4390_v9 = vsel %vm4336_vm9, %v4325_v35, %v3415_v6  ;;  %7525 = vmatprep.mubr.msk.f32.mxu1 %vm4540_vm12, %v4519_v14  ;;  %v6553_v28 = vsel %vm691_vm2, %v6435_v26, 0.0  ;;  %v6355_v53 = vadd.f32 %v6354_v31, %v6353_v51  ;;  %v6434_v61 = vmul.f32 %v12294_v29, %v12294_v29  ;;  %15124 = vst [vmem:[#allocation193_spill] sm:$0xff] %v12323_v27  ;;  %v12329_v59 = vpop.f32.mrb[91].mxu0  ;;  %v15128_v14 = vld [vmem:[#allocation176_spill] sm:$0xff] }
 0x5e5   :  { %v3671_v60 = vpop.permute.xlu1 %3670  ;;  %v5363_v32 = vadd.f32 %v5362_v56, %v5361_v38  ;;  %v6550_v54 = vadd.f32 %v6549_v25, %v6548_v55  ;;  %v6358_v63 = vsel %vm691_vm2, %v12311_v24, 0.0  ;;  %v6436_v3 = vmul.f32 %v12311_v24, %v12311_v24  ;;  %15125 = vst [vmem:[#allocation13_spill] sm:$0xff] %v12329_v59  ;;  %v15126_v56 = vld [vmem:[#allocation116_spill] sm:$0xff]  ;;  %v15127_v38 = vld [vmem:[#allocation173_spill] sm:$0xff] }
 0x5e6   :  { %v3927_v35 = vpop.permute.xlu0 %3926  ;;  %v4455_v17 = vsel %vm4401_vm10, %v4390_v9, %v3671_v60  ;;  %v6551_v26 = vsel %vm691_vm2, %v6434_v61, 0.0  ;;  %v6437_v51 = vmul.f32 %v12305_v37, %v12305_v37  ;;  %v6357_v34 = vadd.f32 %v6356_v30, %v6355_v53 }
 0x5e7   :  { %v4132_v25 = vsel %vm4076_vm5, %v11477_v47, %v15126_v56  ;;  %v4520_v6 = vsel %vm4466_vm11, %v4455_v17, %v3927_v35  ;;  %v6552_v7 = vadd.f32 %v6551_v26, %v6550_v54  ;;  %v6360_v31 = vsel %vm691_vm2, %v12305_v37, 0.0  ;;  %v12350_v54 = vpop.f32.mrb[92].mxu0 }
 0x5e8   :  { %7526 = vmatmul.mubr.msk.f32.gmra.mrb[84].mxu1 %vm4540_vm12, %v4520_v6  ;;  %v6359_v43 = vadd.f32 %v6358_v63, %v6357_v34  ;;  %v6555_v10 = vsel %vm691_vm2, %v6436_v3, 0.0  ;;  %v6439_v53 = vmul.f32 %v12323_v27, %v12323_v27  ;;  %v6438_v30 = vmul.f32 %v12329_v59, %v12329_v59  ;;  %v15129_v63 = vld [vmem:[#allocation238_spill] sm:$0xff] }
 0x5e9   :  { %v4196_v47 = vsel %vm4141_vm6, %v12049_v16, %v15127_v38  ;;  %v4197_v55 = vsel %vm4141_vm6, %v4132_v25, %v15128_v14  ;;  %v3161_v9 = vpop.permute.xlu1 %3160  ;;  %v6554_v61 = vadd.f32 %v6553_v28, %v6552_v7  ;;  %v6362_v60 = vsel %vm691_vm2, %v12329_v59, 0.0  ;;  %v12364_v38 = vpop.f32.mrb[93].mxu0 }
 0x5ea   :  { %v4261_v3 = vsel %vm4206_vm7, %v4196_v47, %v15129_v63  ;;  %v3417_v35 = vpop.permute.xlu0 %3416  ;;  %v12354_v17 = vpop.f32.mrb[56].mxu1  ;;  %v6557_v26 = vsel %vm691_vm2, %v6437_v51, 0.0  ;;  %v6364_v16 = vsel %vm691_vm2, %v12323_v27, 0.0  ;;  %v6361_v34 = vadd.f32 %v6360_v31, %v6359_v43 }
 0x5eb   :  { %15130 = vst [vmem:[#allocation78_spill] sm:$0xff] %v12354_v17  ;;  %v4326_v56 = vsel %vm4271_vm8, %v4261_v3, %v3161_v9  ;;  %v12360_v28 = vpop.f32.mrb[57].mxu1  ;;  %v6556_v25 = vadd.f32 %v6555_v10, %v6554_v61  ;;  %v6561_v6 = vsel %vm691_vm2, %v6439_v53, 0.0  ;;  %v6559_v7 = vsel %vm691_vm2, %v6438_v30, 0.0  ;;  %v12376_v61 = vpop.f32.mrb[94].mxu0 }
 0x5ec   :  { %15131 = vst [vmem:[#allocation136_spill] sm:$0xff] %v12360_v28  ;;  %v5278_v47 = vmul.f32 %v12354_v17, %v12354_v17  ;;  %v5167_v51 = vsel %vm691_vm2, %v12360_v28, 0.0  ;;  %v5277_v31 = vmul.f32 %v12360_v28, %v12360_v28  ;;  %v6363_v43 = vadd.f32 %v6362_v60, %v6361_v34  ;;  %v12382_v34 = vpop.f32.mrb[95].mxu0 }
 0x5ed   :  { %v5169_v14 = vsel %vm691_vm2, %v12354_v17, 0.0  ;;  %v5168_v10 = vadd.f32 %v5167_v51, %v5166_v33  ;;  %v3163_v9 = vpop.permute.xlu1 %3162  ;;  %v6558_v53 = vadd.f32 %v6557_v26, %v6556_v25  ;;  %v6441_v30 = vmul.f32 %v12350_v54, %v12350_v54 }
 0x5ee   :  { %v5364_v63 = vsel %vm691_vm2, %v5277_v31, 0.0  ;;  %v3673_v3 = vpop.permute.xlu0 %3672  ;;  %v4391_v27 = vsel %vm4336_vm9, %v4326_v56, %v3417_v35  ;;  %v6365_v59 = vadd.f32 %v6364_v16, %v6363_v43  ;;  %v6366_v60 = vsel %vm691_vm2, %v12364_v38, 0.0 }
 0x5ef   :  { %v5365_v17 = vadd.f32 %v5364_v63, %v5363_v32  ;;  %v5170_v33 = vadd.f32 %v5169_v14, %v5168_v10  ;;  %v6560_v51 = vadd.f32 %v6559_v7, %v6558_v53  ;;  %v6368_v26 = vsel %vm691_vm2, %v12350_v54, 0.0 }
 0x5f0   :  { %v5366_v25 = vsel %vm691_vm2, %v5278_v47, 0.0  ;;  %v4456_v28 = vsel %vm4401_vm10, %v4391_v27, %v3673_v3  ;;  %v6367_v31 = vadd.f32 %v6366_v60, %v6365_v59  ;;  %v6440_v35 = vmul.f32 %v12364_v38, %v12364_v38  ;;  %v15132_v59 = vld [vmem:[#allocation241_spill] sm:$0xff] }
 0x5f1   :  { %v3419_v16 = vpop.permute.xlu1 %3418  ;;  %v5367_v56 = vadd.f32 %v5366_v25, %v5365_v17  ;;  %v6565_v43 = vsel %vm691_vm2, %v6441_v30, 0.0  ;;  %v6562_v37 = vadd.f32 %v6561_v6, %v6560_v51  ;;  %v6370_v32 = vsel %vm691_vm2, %v12382_v34, 0.0 }
 0x5f2   :  { %v3929_v7 = vpop.permute.xlu0 %3928  ;;  %v6563_v14 = vsel %vm691_vm2, %v6440_v35, 0.0  ;;  %v6443_v47 = vmul.f32 %v12376_v61, %v12376_v61  ;;  %v6369_v10 = vadd.f32 %v6368_v26, %v6367_v31  ;;  %v6442_v27 = vmul.f32 %v12382_v34, %v12382_v34 }
 0x5f3   :  { %v4262_v53 = vsel %vm4206_vm7, %v4197_v55, %v15132_v59  ;;  %v4521_v17 = vsel %vm4466_vm11, %v4456_v28, %v3929_v7  ;;  %v6564_v30 = vadd.f32 %v6563_v14, %v6562_v37  ;;  %v6372_v6 = vsel %vm691_vm2, %v12376_v61, 0.0 }
 0x5f4   :  { %v4327_v63 = vsel %vm4271_vm8, %v4262_v53, %v3163_v9  ;;  %7528 = vmatprep.mubr.msk.f32.mxu1 %vm4540_vm12, %v4521_v17  ;;  %v6371_v3 = vadd.f32 %v6370_v32, %v6369_v10  ;;  %v6567_v60 = vsel %vm691_vm2, %v6442_v27, 0.0  ;;  %v6569_v37 = vsel %vm691_vm2, %v6443_v47, 0.0  ;;  %v7738_v53 = vld [vmem:[#allocation2 + $0x2d0] sm:$0xff] }
 0x5f5   :  { %v4392_v51 = vsel %vm4336_vm9, %v4327_v63, %v3419_v16  ;;  %v3675_v26 = vpop.permute.xlu1 %3674  ;;  %v6566_v25 = vadd.f32 %v6565_v43, %v6564_v30  ;;  %v15135_v17 = vld [vmem:[#allocation57_spill] sm:$0xff] }
 0x5f6   :  { %v3931_v31 = vpop.permute.xlu0 %3930  ;;  %v4457_v55 = vsel %vm4401_vm10, %v4392_v51, %v3675_v26  ;;  %v12408_v35 = vpop.f32.mrb[58].mxu1  ;;  %v6373_v28 = vadd.f32 %v6372_v6, %v6371_v3  ;;  %v4068_v30 = vsel %vm691_vm2, %v7738_v53, %v15135_v17  ;;  %v15136_v51 = vld [vmem:[#allocation115_spill] sm:$0xff] }
 0x5f7   :  { %15133 = vst [vmem:[#allocation196_spill] sm:$0xff] %v12408_v35  ;;  %v12411_v7 = vpop.f32.mrb[59].mxu1  ;;  %v4522_v9 = vsel %vm4466_vm11, %v4457_v55, %v3931_v31  ;;  %v6568_v14 = vadd.f32 %v6567_v60, %v6566_v25  ;;  %v5280_v32 = vmul.f32 %v12408_v35, %v12408_v35  ;;  %v5173_v6 = vsel %vm691_vm2, %v12408_v35, 0.0 }
 0x5f8   :  { %15134 = vst [vmem:[#allocation10_spill] sm:$0xff] %v12411_v7  ;;  %v5171_v16 = vsel %vm691_vm2, %v12411_v7, 0.0  ;;  %v5279_v43 = vmul.f32 %v12411_v7, %v12411_v7  ;;  %7529 = vmatmul.mubr.msk.f32.gmra.mrb[86].mxu1 %vm4540_vm12, %v4522_v9  ;;  %v6374_v10 = vrot.slane %v6373_v28, 4  ;;  %v4133_v26 = vsel %vm4076_vm5, %v4068_v30, %v15136_v51  ;;  %v7739_v30 = vld [vmem:[#allocation2 + $0x2d8] sm:$0xff] }
 0x5f9   :  { %v5172_v27 = vadd.f32 %v5171_v16, %v5170_v33  ;;  %v3165_v47 = vpop.permute.xlu1 %3164  ;;  %v6570_v59 = vadd.f32 %v6569_v37, %v6568_v14  ;;  %v15137_v33 = vld [vmem:[#allocation175_spill] sm:$0xff]  ;;  %v5370_v9 = vsel %vm691_vm2, %v5280_v32, 0.0  ;;  %v15138_v16 = vld [vmem:[#allocation240_spill] sm:$0xff] }
 0x5fa   :  { %v5368_v63 = vsel %vm691_vm2, %v5279_v43, 0.0  ;;  %v3421_v3 = vpop.permute.xlu0 %3420  ;;  %v6375_v60 = vadd.f32 %v6374_v10, %v6373_v28  ;;  %v4198_v37 = vsel %vm4141_vm6, %v4133_v26, %v15137_v33  ;;  %v15141_v26 = vld [vmem:[#allocation178_spill] sm:$0xff] }
 0x5fb   :  { %v5369_v25 = vadd.f32 %v5368_v63, %v5367_v56  ;;  %v5174_v31 = vadd.f32 %v5173_v6, %v5172_v27  ;;  %v6571_v55 = vrot.slane %v6570_v59, 4  ;;  %v4263_v53 = vsel %vm4206_vm7, %v4198_v37, %v15138_v16  ;;  %v15139_v56 = vld [vmem:[#allocation60_spill] sm:$0xff]  ;;  %v15140_v63 = vld [vmem:[#allocation118_spill] sm:$0xff] }
 0x5fc   :  { %v6376_v14 = vrot.slane %v6375_v60, 2  ;;  %v4328_v28 = vsel %vm4271_vm8, %v4263_v53, %v3165_v47  ;;  %v4069_v27 = vsel %vm691_vm2, %v7739_v30, %v15139_v56 }
 0x5fd   :  { %v3167_v17 = vpop.permute.xlu1 %3166  ;;  %v5371_v35 = vadd.f32 %v5370_v9, %v5369_v25  ;;  %v6572_v43 = vadd.f32 %v6571_v55, %v6570_v59  ;;  %v4134_v51 = vsel %vm4076_vm5, %v4069_v27, %v15140_v63  ;;  %v4393_v37 = vsel %vm4336_vm9, %v4328_v28, %v3421_v3  ;;  %v15142_v55 = vld [vmem:[#allocation243_spill] sm:$0xff] }
 0x5fe   :  { %v3677_v10 = vpop.permute.xlu0 %3676  ;;  %v6377_v7 = vadd.f32 %v6376_v14, %v6375_v60  ;;  %v4199_v33 = vsel %vm4141_vm6, %v4134_v51, %v15141_v26 }
 0x5ff   :  { %v6573_v6 = vrot.slane %v6572_v43, 2  ;;  %v4264_v47 = vsel %vm4206_vm7, %v4199_v33, %v15142_v55  ;;  %v4458_v60 = vsel %vm4401_vm10, %v4393_v37, %v3677_v10 }
 0x600   :  { %v6378_v32 = vrot.slane %v6377_v7, 1  ;;  %v4329_v53 = vsel %vm4271_vm8, %v4264_v47, %v3167_v17 }
 0x601   :  { %v3423_v25 = vpop.permute.xlu1 %3422  ;;  %v6574_v59 = vadd.f32 %v6573_v6, %v6572_v43 }
 0x602   :  { %v3933_v9 = vpop.permute.xlu0 %3932  ;;  %v12444_v14 = vpop.f32.mrb[60].mxu1  ;;  %v6379_v16 = vadd.f32 %v6378_v32, %v6377_v7  ;;  %v4394_v7 = vsel %vm4336_vm9, %v4329_v53, %v3423_v25  ;;  %v7740_v25 = vld [vmem:[#allocation2 + $0x2e8] sm:$0xff] }
 0x603   :  { %15143 = vst [vmem:[#allocation77_spill] sm:$0xff] %v12444_v14  ;;  %v4523_v30 = vsel %vm4466_vm11, %v4458_v60, %v3933_v9  ;;  %v12448_v56 = vpop.f32.mrb[61].mxu1  ;;  %v6575_v27 = vrot.slane %v6574_v59, 1  ;;  %v5282_v3 = vmul.f32 %v12444_v14, %v12444_v14  ;;  %v5177_v51 = vsel %vm691_vm2, %v12444_v14, 0.0  ;;  %v15154_v14 = vld [vmem:[#allocation245_spill] sm:$0xff] }
 0x604   :  { %15144 = vst [vmem:[#allocation135_spill] sm:$0xff] %v12448_v56  ;;  %v5175_v43 = vsel %vm691_vm2, %v12448_v56, 0.0  ;;  %v5281_v28 = vmul.f32 %v12448_v56, %v12448_v56  ;;  %7531 = vmatprep.mubr.msk.f32.mxu1 %vm4540_vm12, %v4523_v30  ;;  %v12457_v10 = vmul.f32 0.001953125, %v6379_v16 }
 0x605   :  { %v5176_v17 = vadd.f32 %v5175_v43, %v5174_v31  ;;  %v3679_v6 = vpop.permute.xlu1 %3678  ;;  %v6576_v63 = vadd.f32 %v6575_v27, %v6574_v59  ;;  %v5374_v31 = vsel %vm691_vm2, %v5282_v3, 0.0  ;;  %v15145_v59 = vld [vmem:[#allocation59_spill] sm:$0xff]  ;;  %v15146_v43 = vld [vmem:[#allocation117_spill] sm:$0xff]  ;;  %v15149_v3 = vld [vmem:[#allocation242_spill] sm:$0xff] }
 0x606   :  { %v5372_v32 = vsel %vm691_vm2, %v5281_v28, 0.0  ;;  %v3935_v26 = vpop.permute.xlu0 %3934  ;;  %v4459_v33 = vsel %vm4401_vm10, %v4394_v7, %v3679_v6  ;;  %v6579_v37 = vmul.f32 %v12457_v10, %v12457_v10  ;;  %v4070_v16 = vsel %vm691_vm2, %v7740_v25, %v15145_v59 }
 0x607   :  { %v5373_v55 = vadd.f32 %v5372_v32, %v5371_v35  ;;  %v4524_v47 = vsel %vm4466_vm11, %v4459_v33, %v3935_v26  ;;  %v5178_v60 = vadd.f32 %v5177_v51, %v5176_v17  ;;  %v6578_v9 = vmul.f32 0.001953125, %v6576_v63  ;;  %v15147_v35 = vld [vmem:[#allocation177_spill] sm:$0xff] }
 0x608   :  { %7532 = vmatmul.mubr.msk.f32.gmra.mrb[88].mxu1 %vm4540_vm12, %v4524_v47  ;;  %v4135_v28 = vsel %vm4076_vm5, %v4070_v16, %v15146_v43  ;;  %v7741_v16 = vld [vmem:[#allocation2 + $0x2f0] sm:$0xff] }
 0x609   :  { %v3169_v53 = vpop.permute.xlu1 %3168  ;;  %v5375_v30 = vadd.f32 %v5374_v31, %v5373_v55  ;;  %v6580_v27 = vsub.f32 %v6578_v9, %v6579_v37  ;;  %v4200_v6 = vsel %vm4141_vm6, %v4135_v28, %v15147_v35 }
 0x60a   :  { %v3425_v7 = vpop.permute.xlu0 %3424  ;;  %v4265_v51 = vsel %vm4206_vm7, %v4200_v6, %v15149_v3  ;;  %v15152_v6 = vld [vmem:[#allocation120_spill] sm:$0xff] }
 0x60b   :  { %v12475_v17 = vpop.f32.mrb[62].mxu1  ;;  %v6581_v63 = vadd.f32 1e-05, %v6580_v27  ;;  %v4330_v47 = vsel %vm4271_vm8, %v4265_v51, %v3169_v53  ;;  %v15151_v27 = vld [vmem:[#allocation62_spill] sm:$0xff]  ;;  %v15153_v51 = vld [vmem:[#allocation180_spill] sm:$0xff] }
 0x60c   :  { %15148 = vst [vmem:[#allocation195_spill] sm:$0xff] %v12475_v17  ;;  %v12479_v32 = vpop.f32.mrb[63].mxu1  ;;  %v5284_v26 = vmul.f32 %v12475_v17, %v12475_v17  ;;  %v5181_v25 = vsel %vm691_vm2, %v12475_v17, 0.0  ;;  %v4071_v43 = vsel %vm691_vm2, %v7741_v16, %v15151_v27  ;;  %v4395_v53 = vsel %vm4336_vm9, %v4330_v47, %v3425_v7  ;;  %v6245_v47 = vld [vmem:[%s14441_s9] sm:$0x1] }
 0x60d   :  { %15150 = vst [vmem:[#allocation15_spill] sm:$0xff] %v12479_v32  ;;  %v5179_v33 = vsel %vm691_vm2, %v12479_v32, 0.0  ;;  %v5283_v37 = vmul.f32 %v12479_v32, %v12479_v32  ;;  %v3171_v55 = vpop.permute.xlu1 %3170  ;;  %7682 = vrsqrt.f32 %v6581_v63  ;;  %v4136_v3 = vsel %vm4076_vm5, %v4071_v43, %v15152_v6  ;;  %v7744_v6 = vld [vmem:[#allocation2 + $0x308] sm:$0xff] }
 0x60e   :  { %v5180_v9 = vadd.f32 %v5179_v33, %v5178_v60  ;;  %v3681_v31 = vpop.permute.xlu0 %3680  ;;  %v5378_v63 = vsel %vm691_vm2, %v5284_v26, 0.0  ;;  %v4201_v33 = vsel %vm4141_vm6, %v4136_v3, %v15153_v51  ;;  %v15157_v3 = vld [vmem:[#allocation64_spill] sm:$0xff] }
 0x60f   :  { %v5376_v59 = vsel %vm691_vm2, %v5283_v37, 0.0  ;;  %v4460_v17 = vsel %vm4401_vm10, %v4395_v53, %v3681_v31  ;;  %v4266_v16 = vsel %vm4206_vm7, %v4201_v33, %v15154_v14  ;;  %v15155_v31 = vld [vmem:[#allocation61_spill] sm:$0xff]  ;;  %v15158_v53 = vld [vmem:[#allocation119_spill] sm:$0xff] }
 0x610   :  { %v5377_v28 = vadd.f32 %v5376_v59, %v5375_v30  ;;  %v5182_v35 = vadd.f32 %v5181_v25, %v5180_v9  ;;  %v4331_v9 = vsel %vm4271_vm8, %v4266_v16, %v3171_v55  ;;  %v7742_v25 = vld [vmem:[#allocation2 + $0x300] sm:$0xff] }
 0x611   :  { %v3427_v60 = vpop.permute.xlu1 %3426  ;;  %v4072_v59 = vsel %vm691_vm2, %v7742_v25, %v15155_v31  ;;  %v7745_v33 = vld [vmem:[#allocation2 + $0x320] sm:$0xff]  ;;  %v15162_v31 = vld [vmem:[#allocation122_spill] sm:$0xff] }
 0x612   :  { %v3937_v37 = vpop.permute.xlu0 %3936  ;;  %v5379_v32 = vadd.f32 %v5378_v63, %v5377_v28  ;;  %v4396_v26 = vsel %vm4336_vm9, %v4331_v9, %v3427_v60  ;;  %v15156_v28 = vld [vmem:[#allocation63_spill] sm:$0xff]  ;;  %v4073_v63 = vsel %vm691_vm2, %v7744_v6, %v15157_v3  ;;  %v4137_v60 = vsel %vm4076_vm5, %v4072_v59, %v15158_v53  ;;  %v15165_v6 = vld [vmem:[#allocation244_spill] sm:$0xff] }
 0x613   :  { %v4525_v30 = vsel %vm4466_vm11, %v4460_v17, %v3937_v37  ;;  %v7743_v17 = vld [vmem:[#allocation2 + $0x318] sm:$0xff]  ;;  %v15159_v37 = vld [vmem:[#allocation65_spill] sm:$0xff] }
 0x614   :  { %7534 = vmatprep.mubr.msk.f32.mxu1 %vm4540_vm12, %v4525_v30  ;;  %v4074_v55 = vsel %vm691_vm2, %v7743_v17, %v15156_v28  ;;  %v4075_v16 = vsel %vm691_vm2, %v7745_v33, %v15159_v37  ;;  %v15160_v30 = vld [vmem:[#allocation121_spill] sm:$0xff]  ;;  %v4138_v17 = vsel %vm4076_vm5, %v4073_v63, %v15162_v31  ;;  %v15163_v28 = vld [vmem:[#allocation123_spill] sm:$0xff] }
 0x615   :  { %v3683_v7 = vpop.permute.xlu1 %3682  ;;  %v4139_v9 = vsel %vm4076_vm5, %v4074_v55, %v15160_v30  ;;  %v4140_v59 = vsel %vm4076_vm5, %v4075_v16, %v15163_v28  ;;  %v15166_v55 = vld [vmem:[#allocation182_spill] sm:$0xff]  ;;  %v15168_v37 = vld [vmem:[#allocation183_spill] sm:$0xff] }
 0x616   :  { %v3939_v27 = vpop.permute.xlu0 %3938  ;;  %v4461_v14 = vsel %vm4401_vm10, %v4396_v26, %v3683_v7  ;;  %v15161_v26 = vld [vmem:[#allocation179_spill] sm:$0xff]  ;;  %v4203_v33 = vsel %vm4141_vm6, %v4138_v17, %v15166_v55  ;;  %v12545_v16 = vsel %vm4141_vm6, %v4140_v59, %v15168_v37  ;;  %v15169_v30 = vld [vmem:[#allocation246_spill] sm:$0xff] }
 0x617   :  { %v7683_v43 = vpop.eup %7682  ;;  %v4526_v51 = vsel %vm4466_vm11, %v4461_v14, %v3939_v27  ;;  %v4202_v7 = vsel %vm4141_vm6, %v4137_v60, %v15161_v26  ;;  %v15164_v27 = vld [vmem:[#allocation181_spill] sm:$0xff]  ;;  %v15170_v26 = vld [vmem:[#allocation247_spill] sm:$0xff] }
 0x618   :  { %7535 = vmatmul.mubr.msk.f32.gmra.mrb[90].mxu1 %vm4540_vm12, %v4526_v51  ;;  %v6583_v25 = vmul.f32 %v7683_v43, %v6245_v47  ;;  %v4204_v14 = vsel %vm4141_vm6, %v4139_v9, %v15164_v27  ;;  %v4267_v3 = vsel %vm4206_vm7, %v4202_v7, %v15165_v6  ;;  %v15167_v43 = vld [vmem:[#allocation27_spill] sm:$0xff]  ;;  %v4268_v7 = vsel %vm4206_vm7, %v4203_v33, %v15170_v26 }
 0x619   :  { %v3173_v53 = vpop.permute.xlu1 %3172  ;;  %v12549_v9 = vsel %vm4206_vm7, %v4204_v14, %v15169_v30 }
 0x61a   :  { %v3429_v60 = vpop.permute.xlu0 %3428  ;;  %v4332_v51 = vsel %vm4271_vm8, %v4267_v3, %v3173_v53  ;;  %v12538_v47 = vmul.f32 %v6583_v25, %v12457_v10  ;;  %v12541_v63 = vrot.slane %v6583_v25, %v15167_v43 }
 0x61b   :  { %v12553_v31 = vpop.f32.mrb[64].mxu1  ;;  %v4397_v28 = vsel %vm4336_vm9, %v4332_v51, %v3429_v60 }
 0x61c   :  { %15171 = vst [vmem:[#allocation80_spill] sm:$0xff] %v12553_v31  ;;  %v5185_v10 = vsel %vm691_vm2, %v12553_v31, 0.0  ;;  %v5286_v25 = vmul.f32 %v12553_v31, %v12553_v31  ;;  %v12559_v17 = vpop.f32.mrb[65].mxu1  ;;  %v12564_v59 = vmul.f32 %v12541_v63, %v11557_v41  ;;  %v12572_v3 = vmul.f32 %v11544_v45, %v12541_v63 }
 0x61d   :  { %15172 = vst [vmem:[#allocation138_spill] sm:$0xff] %v12559_v17  ;;  %v5183_v27 = vsel %vm691_vm2, %v12559_v17, 0.0  ;;  %v5285_v14 = vmul.f32 %v12559_v17, %v12559_v17  ;;  %v3175_v6 = vpop.permute.xlu1 %3174  ;;  %v12576_v53 = vmul.f32 %v12541_v63, %v11589_v18  ;;  %v12582_v51 = vmul.f32 %v11579_v4, %v12541_v63  ;;  %v15190_v17 = vld [vmem:[#allocation248_spill] sm:$0xff] }
 0x61e   :  { %v5382_v55 = vsel %vm691_vm2, %v5286_v25, 0.0  ;;  %v5184_v33 = vadd.f32 %v5183_v27, %v5182_v35  ;;  %v3685_v41 = vpop.permute.xlu0 %3684  ;;  %v4333_v60 = vsel %vm4271_vm8, %v4268_v7, %v3175_v6  ;;  %v12588_v45 = vmul.f32 %v12541_v63, %v11620_v12 }
 0x61f   :  { %v5380_v37 = vsel %vm691_vm2, %v5285_v14, 0.0  ;;  %v4462_v30 = vsel %vm4401_vm10, %v4397_v28, %v3685_v41  ;;  %v12592_v18 = vmul.f32 %v11611_v50, %v12541_v63  ;;  %v12598_v7 = vmul.f32 %v12541_v63, %v11654_v22 }
 0x620   :  { %v5381_v35 = vadd.f32 %v5380_v37, %v5379_v32  ;;  %v12594_v26 = vadd.f32 %v5185_v10, %v5184_v33  ;;  %v12602_v4 = vmul.f32 %v11649_v36, %v12541_v63  ;;  %v12606_v12 = vmul.f32 %v12541_v63, %v11684_v48  ;;  %v15173_v33 = vld [vmem:[#allocation67_spill] sm:$0xff]  ;;  %v15175_v37 = vld [vmem:[#allocation70_spill] sm:$0xff] }
 0x621   :  { %v3431_v25 = vpop.permute.xlu1 %3430  ;;  %v12610_v50 = vmul.f32 %v11679_v46, %v12541_v63  ;;  %v12614_v32 = vmul.f32 %v12541_v63, %v11705_v57  ;;  %v12618_v22 = vmul.f32 %v11700_v40, %v12541_v63  ;;  %v12625_v48 = vmul.f32 %v12541_v63, %v11745_v13 }
 0x622   :  { %v3941_v10 = vpop.permute.xlu0 %3940  ;;  %v4398_v36 = vsel %vm4336_vm9, %v4333_v60, %v3431_v25  ;;  %v12621_v28 = vadd.f32 %v5382_v55, %v5381_v35  ;;  %v12629_v46 = vmul.f32 %v11738_v0, %v12541_v63  ;;  %v12634_v27 = vmul.f32 %v12541_v63, %v11779_v20  ;;  %v15177_v25 = vld [vmem:[#allocation188_spill] sm:$0xff] }
 0x623   :  { %v4527_v57 = vsel %vm4466_vm11, %v4462_v30, %v3941_v10  ;;  %v12638_v40 = vmul.f32 %v11774_v62, %v12541_v63  ;;  %v12642_v14 = vmul.f32 %v12541_v63, %v11799_v5  ;;  %v12647_v0 = vmul.f32 %v11793_v1, %v12541_v63  ;;  %v15176_v30 = vld [vmem:[#allocation220_spill] sm:$0xff] }
 0x624   :  { %7537 = vmatprep.mubr.msk.f32.mxu1 %vm4540_vm12, %v4527_v57  ;;  %v12651_v13 = vmul.f32 %v12541_v63, %v11822_v52  ;;  %v12655_v20 = vmul.f32 %v11816_v8, %v12541_v63  ;;  %v12659_v62 = vmul.f32 %v12541_v63, %v11852_v2  ;;  %v12663_v6 = vmul.f32 %v11846_v15, %v12541_v63  ;;  %v15179_v57 = vld [vmem:[#allocation127_spill] sm:$0xff] }
 0x625   :  { %v3687_v5 = vpop.permute.xlu1 %3686  ;;  %v12667_v1 = vmul.f32 %v12541_v63, %v11874_v44  ;;  %v12671_v52 = vmul.f32 %v11866_v19, %v12541_v63  ;;  %v12675_v8 = vmul.f32 %v12541_v63, %v11902_v49  ;;  %v12680_v41 = vmul.f32 %v15173_v33, %v12541_v63  ;;  %v15174_v44 = vld [vmem:[#allocation5_spill] sm:$0xff]  ;;  %v15181_v33 = vld [vmem:[#allocation7_spill] sm:$0xff] }
 0x626   :  { %v3943_v55 = vpop.permute.xlu0 %3942  ;;  %v4463_v2 = vsel %vm4401_vm10, %v4398_v36, %v3687_v5  ;;  %v12684_v15 = vmul.f32 %v12541_v63, %v11931_v21  ;;  %v12688_v60 = vmul.f32 %v15174_v44, %v12541_v63  ;;  %v12693_v49 = vmul.f32 %v12541_v63, %v15175_v37  ;;  %v15178_v21 = vld [vmem:[#allocation128_spill] sm:$0xff] }
 0x627   :  { %v4528_v19 = vsel %vm4466_vm11, %v4463_v2, %v3943_v55  ;;  %v12697_v35 = vmul.f32 %v15176_v30, %v12541_v63  ;;  %v12701_v10 = vmul.f32 %v12541_v63, %v15177_v25  ;;  %v12706_v36 = vmul.f32 %v15178_v21, %v12541_v63  ;;  %v15180_v55 = vld [vmem:[#allocation69_spill] sm:$0xff]  ;;  %v15183_v30 = vld [vmem:[#allocation187_spill] sm:$0xff]  ;;  %v15185_v21 = vld [vmem:[#allocation130_spill] sm:$0xff] }
 0x628   :  { %7538 = vmatmul.mubr.msk.f32.gmra.mrb[92].mxu1 %vm4540_vm12, %v4528_v19  ;;  %v12710_v5 = vmul.f32 %v12541_v63, %v15179_v57  ;;  %v12714_v2 = vmul.f32 %v15180_v55, %v12541_v63  ;;  %v12718_v44 = vmul.f32 %v12541_v63, %v15181_v33  ;;  %v6246_v19 = vld [vmem:[%s14442_s10] sm:$0x1]  ;;  %v12725_v25 = vmul.f32 %v15183_v30, %v12541_v63  ;;  %v15187_v55 = vld [vmem:[#allocation72_spill] sm:$0xff] }
 0x629   :  { %v3177_v37 = vpop.permute.xlu1 %3176  ;;  %v12729_v57 = vmul.f32 %v12541_v63, %v15185_v21  ;;  %v12733_v31 = vmul.f32 %v15187_v55, %v12541_v63  ;;  %v12737_v33 = vmul.f32 %v12541_v63, %v12088_v42  ;;  %v4270_v56 = vsel %vm4206_vm7, %v12545_v16, %v15190_v17 }
 0x62a   :  { %15182 = vst [vmem:[#allocation198_spill] sm:$0xff] %v12718_v44  ;;  %15184 = vst [vmem:[#allocation12_spill] sm:$0xff] %v12725_v25  ;;  %v3433_v44 = vpop.permute.xlu0 %3432  ;;  %v12744_v30 = vmul.f32 %v12080_v23, %v12541_v63  ;;  %v12748_v21 = vmul.f32 %v12541_v63, %v12109_v39  ;;  %v12752_v55 = vmul.f32 %v12105_v58, %v12541_v63  ;;  %v15197_v23 = vld [vmem:[#allocation221_spill] sm:$0xff] }
 0x62b   :  { %15186 = vst [vmem:[#allocation79_spill] sm:$0xff] %v12729_v57  ;;  %15188 = vst [vmem:[#allocation137_spill] sm:$0xff] %v12733_v31  ;;  %v4334_v42 = vsel %vm4271_vm8, %v12549_v9, %v3177_v37  ;;  %v15195_v31 = vld [vmem:[#allocation189_spill] sm:$0xff]  ;;  %v12764_v17 = vmul.f32 %v15197_v23, %v12541_v63  ;;  %v12768_v39 = vmul.f32 %v12541_v63, %v12169_v11  ;;  %v15209_v57 = vld [vmem:[#allocation192_spill] sm:$0xff] }
 0x62c   :  { %15189 = vst [vmem:[#allocation197_spill] sm:$0xff] %v12737_v33  ;;  %15191 = vst [vmem:[#allocation18_spill] sm:$0xff] %v12744_v30  ;;  %v12756_v33 = vpop.f32.mrb[66].mxu1  ;;  %v12760_v16 = vmul.f32 %v12541_v63, %v15195_v31  ;;  %v6585_v9 = vsub.f32 %v6246_v19, %v12538_v47  ;;  %v15201_v37 = vld [vmem:[#allocation9_spill] sm:$0xff]  ;;  %v15203_v31 = vld [vmem:[#allocation132_spill] sm:$0xff] }
 0x62d   :  { %15192 = vst [vmem:[#allocation82_spill] sm:$0xff] %v12748_v21  ;;  %15193 = vst [vmem:[#allocation140_spill] sm:$0xff] %v12752_v55  ;;  %v5288_v58 = vmul.f32 %v12756_v33, %v12756_v33  ;;  %v12772_v55 = vpop.f32.mrb[67].mxu1  ;;  %v12777_v21 = vmul.f32 %v15201_v37, %v12541_v63  ;;  %v15207_v47 = vld [vmem:[#allocation131_spill] sm:$0xff]  ;;  %v5189_v37 = vsel %vm691_vm2, %v12756_v33, 0.0 }
 0x62e   :  { %15194 = vst [vmem:[#allocation200_spill] sm:$0xff] %v12756_v33  ;;  %15196 = vst [vmem:[#allocation14_spill] sm:$0xff] %v12760_v16  ;;  %v12781_v16 = vmul.f32 %v12541_v63, %v15203_v31  ;;  %v5187_v23 = vsel %vm691_vm2, %v12772_v55, 0.0  ;;  %v5287_v11 = vmul.f32 %v12772_v55, %v12772_v55  ;;  %v12793_v19 = vmul.f32 %v12541_v63, %v15207_v47 }
 0x62f   :  { %15198 = vst [vmem:[#allocation81_spill] sm:$0xff] %v12764_v17  ;;  %15199 = vst [vmem:[#allocation139_spill] sm:$0xff] %v12768_v39  ;;  %v3179_v39 = vpop.permute.xlu1 %3178  ;;  %v15205_v17 = vld [vmem:[#allocation74_spill] sm:$0xff]  ;;  %v5188_v31 = vadd.f32 %v5187_v23, %v12594_v26  ;;  %v5386_v25 = vsel %vm691_vm2, %v5288_v58, 0.0 }
 0x630   :  { %15200 = vst [vmem:[#allocation199_spill] sm:$0xff] %v12772_v55  ;;  %15202 = vst [vmem:[#allocation22_spill] sm:$0xff] %v12777_v21  ;;  %v12789_v30 = vmul.f32 %v15205_v17, %v12541_v63  ;;  %v4399_v21 = vsel %vm4336_vm9, %v4334_v42, %v3433_v44  ;;  %v12801_v55 = vmul.f32 %v15209_v57, %v12541_v63  ;;  %v5384_v17 = vsel %vm691_vm2, %v5287_v11, 0.0  ;;  %v15213_v44 = vld [vmem:[#allocation134_spill] sm:$0xff]  ;;  %v15214_v57 = vld [vmem:[#allocation76_spill] sm:$0xff] }
 0x631   :  { %15204 = vst [vmem:[#allocation84_spill] sm:$0xff] %v12781_v16  ;;  %15208 = vst [vmem:[#allocation202_spill] sm:$0xff] %v12793_v19  ;;  %v3689_v16 = vpop.permute.xlu0 %3688  ;;  %v15212_v19 = vld [vmem:[#allocation191_spill] sm:$0xff]  ;;  %v5385_v26 = vadd.f32 %v5384_v17, %v12621_v28  ;;  %v5190_v23 = vadd.f32 %v5189_v37, %v5188_v31  ;;  %v12816_v42 = vmul.f32 %v12541_v63, %v15213_v44  ;;  %v15219_v37 = vld [vmem:[#allocation133_spill] sm:$0xff] }
 0x632   :  { %15206 = vst [vmem:[#allocation142_spill] sm:$0xff] %v12789_v30  ;;  %v15210_v30 = vld [vmem:[#allocation11_spill] sm:$0xff]  ;;  %v12811_v33 = vmul.f32 %v15212_v19, %v12541_v63  ;;  %v12820_v58 = vmul.f32 %v15214_v57, %v12541_v63  ;;  %v12832_v28 = vmul.f32 %v12541_v63, %v12311_v24  ;;  %v12836_v31 = vmul.f32 %v15219_v37, %v12541_v63 }
 0x633   :  { %v12807_v47 = vmul.f32 %v12541_v63, %v15210_v30  ;;  %v3435_v11 = vpop.permute.xlu1 %3434  ;;  %v12824_v30 = vmul.f32 %v12541_v63, %v12294_v29  ;;  %v4464_v17 = vsel %vm4401_vm10, %v4399_v21, %v3689_v16  ;;  %v5387_v57 = vadd.f32 %v5386_v25, %v5385_v26 }
 0x634   :  { %15215 = vst [vmem:[#allocation83_spill] sm:$0xff] %v12820_v58  ;;  %v15220_v58 = vld [vmem:[#allocation13_spill] sm:$0xff]  ;;  %v12850_v24 = vmul.f32 %v12541_v63, %v12364_v38  ;;  %v12854_v37 = vmul.f32 %v12350_v54, %v12541_v63  ;;  %v12858_v25 = vmul.f32 %v12541_v63, %v12382_v34  ;;  %v4335_v21 = vsel %vm4271_vm8, %v4270_v56, %v3179_v39 }
 0x635   :  { %15211 = vst [vmem:[#allocation17_spill] sm:$0xff] %v12807_v47  ;;  %15216 = vst [vmem:[#allocation141_spill] sm:$0xff] %v12824_v30  ;;  %v15217_v47 = vld [vmem:[#allocation194_spill] sm:$0xff]  ;;  %v3945_v44 = vpop.permute.xlu0 %3944  ;;  %v12841_v29 = vmul.f32 %v12541_v63, %v15220_v58  ;;  %v15221_v30 = vld [vmem:[#allocation193_spill] sm:$0xff]  ;;  %v12864_v16 = vmul.f32 %v12376_v61, %v12541_v63  ;;  %v12867_v26 = vrot.slane %v6585_v9, %v15167_v43 }
 0x636   :  { %v12828_v19 = vmul.f32 %v15217_v47, %v12541_v63  ;;  %v12845_v47 = vmul.f32 %v15221_v30, %v12541_v63  ;;  %v4400_v38 = vsel %vm4336_vm9, %v4335_v21, %v3435_v11 }
 0x637   :  { %v3691_v58 = vpop.permute.xlu1 %3690  ;;  %v12873_v34 = vadd.f32 %v12867_v26, %v12564_v59  ;;  %v12877_v56 = vadd.f32 %v12867_v26, %v12572_v3  ;;  %v12881_v61 = vadd.f32 %v12867_v26, %v12576_v53  ;;  %v12885_v63 = vadd.f32 %v12867_v26, %v12582_v51 }
 0x638   :  { %15218 = vst [vmem:[#allocation201_spill] sm:$0xff] %v12828_v19  ;;  %v4529_v19 = vsel %vm4466_vm11, %v4464_v17, %v3945_v44  ;;  %v4465_v54 = vsel %vm4401_vm10, %v4400_v38, %v3691_v58  ;;  %v12889_v39 = vadd.f32 %v12867_v26, %v12588_v45  ;;  %v12893_v59 = vadd.f32 %v12867_v26, %v12592_v18 }
 0x639   :  { %7540 = vmatprep.mubr.msk.f32.mxu1 %vm4540_vm12, %v4529_v19  ;;  %15222 = vst [vmem:[#allocation28_spill] sm:$0xff] %v12873_v34  ;;  %15223 = vst [vmem:[#allocation86_spill] sm:$0xff] %v12877_v56  ;;  %v12897_v3 = vadd.f32 %v12867_v26, %v12598_v7  ;;  %v12901_v53 = vadd.f32 %v12867_v26, %v12602_v4  ;;  %v12905_v51 = vadd.f32 %v12867_v26, %v12606_v12  ;;  %v15334_v56 = vld [vmem:[#allocation78_spill] sm:$0xff] }
 0x63a   :  { %15224 = vst [vmem:[#allocation144_spill] sm:$0xff] %v12881_v61  ;;  %15225 = vst [vmem:[#allocation204_spill] sm:$0xff] %v12885_v63  ;;  %v12909_v45 = vadd.f32 %v12867_v26, %v12610_v50  ;;  %v12913_v18 = vadd.f32 %v12867_v26, %v12614_v32  ;;  %v12917_v7 = vadd.f32 %v12867_v26, %v12618_v22  ;;  %v15330_v63 = vld [vmem:[#allocation8_spill] sm:$0xff]  ;;  %v15336_v34 = vld [vmem:[#allocation10_spill] sm:$0xff] }
 0x63b   :  { %15226 = vst [vmem:[#allocation21_spill] sm:$0xff] %v12889_v39  ;;  %15227 = vst [vmem:[#allocation85_spill] sm:$0xff] %v12893_v59  ;;  %v3947_v9 = vpop.permute.xlu1 %3946  ;;  %v12921_v4 = vadd.f32 %v12867_v26, %v12625_v48  ;;  %v12925_v12 = vadd.f32 %v12867_v26, %v12629_v46  ;;  %v12929_v50 = vadd.f32 %v12867_v26, %v12634_v27  ;;  %v12944_v46 = vpop.f32.mrb[68].mxu1  ;;  %v15326_v59 = vld [vmem:[#allocation6_spill] sm:$0xff]  ;;  %v15328_v39 = vld [vmem:[#allocation75_spill] sm:$0xff] }
 0x63c   :  { %15228 = vst [vmem:[#allocation143_spill] sm:$0xff] %v12897_v3  ;;  %15229 = vst [vmem:[#allocation203_spill] sm:$0xff] %v12901_v53  ;;  %v4530_v32 = vsel %vm4466_vm11, %v4465_v54, %v3947_v9  ;;  %v12934_v11 = vadd.f32 %v12867_v26, %v12638_v40  ;;  %v12938_v22 = vadd.f32 %v12867_v26, %v12642_v14  ;;  %v5193_v30 = vsel %vm691_vm2, %v12944_v46, 0.0  ;;  %v15324_v53 = vld [vmem:[#allocation71_spill] sm:$0xff]  ;;  %v15325_v3 = vld [vmem:[#allocation73_spill] sm:$0xff] }
 0x63d   :  { %15230 = vst [vmem:[#allocation30_spill] sm:$0xff] %v12905_v51  ;;  %15231 = vst [vmem:[#allocation88_spill] sm:$0xff] %v12909_v45  ;;  %v12942_v48 = vadd.f32 %v12867_v26, %v12647_v0  ;;  %7541 = vmatmul.mubr.msk.f32.gmra.mrb[94].mxu1 %vm4540_vm12, %v4530_v32  ;;  %v12949_v27 = vadd.f32 %v12867_v26, %v12651_v13  ;;  %v12953_v40 = vadd.f32 %v12867_v26, %v12655_v20  ;;  %v12967_v13 = vpop.f32.mrb[69].mxu1  ;;  %v15322_v45 = vld [vmem:[#allocation190_spill] sm:$0xff]  ;;  %v15323_v51 = vld [vmem:[#allocation129_spill] sm:$0xff] }
 0x63e   :  { %15232 = vst [vmem:[#allocation146_spill] sm:$0xff] %v12913_v18  ;;  %15233 = vst [vmem:[#allocation206_spill] sm:$0xff] %v12917_v7  ;;  %v12957_v14 = vadd.f32 %v12867_v26, %v12659_v62  ;;  %v12961_v0 = vadd.f32 %v12867_v26, %v12663_v6  ;;  %v5290_v19 = vmul.f32 %v12944_v46, %v12944_v46  ;;  %v5191_v6 = vsel %vm691_vm2, %v12967_v13, 0.0  ;;  %v15321_v18 = vld [vmem:[#allocation4_spill] sm:$0xff] }
 0x63f   :  { %15234 = vst [vmem:[#allocation29_spill] sm:$0xff] %v12921_v4  ;;  %15235 = vst [vmem:[#allocation87_spill] sm:$0xff] %v12925_v12  ;;  %v12971_v20 = vadd.f32 %v12867_v26, %v12667_v1  ;;  %v12975_v62 = vadd.f32 %v12867_v26, %v12671_v52  ;;  %v5289_v17 = vmul.f32 %v12967_v13, %v12967_v13  ;;  %v15332_v61 = vld [vmem:[#allocation136_spill] sm:$0xff] }
 0x640   :  { %15236 = vst [vmem:[#allocation145_spill] sm:$0xff] %v12929_v50  ;;  %15237 = vst [vmem:[#allocation205_spill] sm:$0xff] %v12934_v11  ;;  %v12983_v44 = vadd.f32 %v12867_v26, %v12675_v8  ;;  %v12987_v21 = vadd.f32 %v12867_v26, %v12680_v41  ;;  %v5390_v1 = vsel %vm691_vm2, %v5290_v19, 0.0  ;;  %v5192_v38 = vadd.f32 %v5191_v6, %v5190_v23 }
 0x641   :  { %15238 = vst [vmem:[#allocation32_spill] sm:$0xff] %v12938_v22  ;;  %15239 = vst [vmem:[#allocation90_spill] sm:$0xff] %v12942_v48  ;;  %v12992_v52 = vadd.f32 %v12867_v26, %v12684_v15  ;;  %v12996_v58 = vadd.f32 %v12867_v26, %v12688_v60  ;;  %v5388_v54 = vsel %vm691_vm2, %v5289_v17, 0.0  ;;  %v13001_v8 = vadd.f32 %v12867_v26, %v12693_v49  ;;  %v15262_v17 = vld [vmem:[#allocation137_spill] sm:$0xff] }
 0x642   :  { %15240 = vst [vmem:[#allocation148_spill] sm:$0xff] %v12949_v27  ;;  %15241 = vst [vmem:[#allocation208_spill] sm:$0xff] %v12953_v40  ;;  %v13005_v41 = vadd.f32 %v12867_v26, %v12697_v35  ;;  %v13009_v23 = vadd.f32 %v12867_v26, %v12701_v10  ;;  %v5389_v15 = vadd.f32 %v5388_v54, %v5387_v57  ;;  %v15256_v35 = vld [vmem:[#allocation198_spill] sm:$0xff]  ;;  %v15258_v10 = vld [vmem:[#allocation12_spill] sm:$0xff] }
 0x643   :  { %15242 = vst [vmem:[#allocation31_spill] sm:$0xff] %v12957_v14  ;;  %15243 = vst [vmem:[#allocation89_spill] sm:$0xff] %v12961_v0  ;;  %v5194_v9 = vadd.f32 %v5193_v30, %v5192_v38  ;;  %v13013_v60 = vadd.f32 %v12867_v26, %v12706_v36  ;;  %v13017_v32 = vadd.f32 %v12867_v26, %v12710_v5  ;;  %v15260_v30 = vld [vmem:[#allocation79_spill] sm:$0xff]  ;;  %v15264_v38 = vld [vmem:[#allocation197_spill] sm:$0xff] }
 0x644   :  { %15244 = vst [vmem:[#allocation147_spill] sm:$0xff] %v12971_v20  ;;  %15245 = vst [vmem:[#allocation207_spill] sm:$0xff] %v12975_v62  ;;  %v13021_v49 = vadd.f32 %v12867_v26, %v12714_v2  ;;  %v13025_v19 = vadd.f32 %v12867_v26, %v15256_v35  ;;  %v13029_v57 = vadd.f32 %v12867_v26, %v15258_v10  ;;  %v15266_v54 = vld [vmem:[#allocation18_spill] sm:$0xff] }
 0x645   :  { %15246 = vst [vmem:[#allocation34_spill] sm:$0xff] %v12983_v44  ;;  %15247 = vst [vmem:[#allocation92_spill] sm:$0xff] %v12987_v21  ;;  %v13033_v36 = vadd.f32 %v12867_v26, %v15260_v30  ;;  %v5391_v6 = vadd.f32 %v5390_v1, %v5389_v15  ;;  %v13037_v5 = vadd.f32 %v12867_v26, %v15262_v17  ;;  %v15272_v1 = vld [vmem:[#allocation14_spill] sm:$0xff]  ;;  %v15274_v17 = vld [vmem:[#allocation81_spill] sm:$0xff] }
 0x646   :  { %15248 = vst [vmem:[#allocation150_spill] sm:$0xff] %v12992_v52  ;;  %15249 = vst [vmem:[#allocation211_spill] sm:$0xff] %v12996_v58  ;;  %v13041_v2 = vadd.f32 %v12867_v26, %v15264_v38  ;;  %v13045_v35 = vadd.f32 %v12867_v26, %v15266_v54  ;;  %v13057_v15 = vadd.f32 %v12867_v26, %v15272_v1 }
 0x647   :  { %15250 = vst [vmem:[#allocation33_spill] sm:$0xff] %v13001_v8  ;;  %15251 = vst [vmem:[#allocation91_spill] sm:$0xff] %v13005_v41  ;;  %v13061_v38 = vadd.f32 %v12867_v26, %v15274_v17 }
 0x648   :  { %15252 = vst [vmem:[#allocation149_spill] sm:$0xff] %v13009_v23  ;;  %15253 = vst [vmem:[#allocation209_spill] sm:$0xff] %v13013_v60 }
 0x649   :  { %15254 = vst [vmem:[#allocation36_spill] sm:$0xff] %v13017_v32  ;;  %15255 = vst [vmem:[#allocation94_spill] sm:$0xff] %v13021_v49 }
 0x64a   :  { %15257 = vst [vmem:[#allocation152_spill] sm:$0xff] %v13025_v19  ;;  %15259 = vst [vmem:[#allocation214_spill] sm:$0xff] %v13029_v57  ;;  %v15268_v19 = vld [vmem:[#allocation82_spill] sm:$0xff]  ;;  %v15270_v57 = vld [vmem:[#allocation140_spill] sm:$0xff] }
 0x64b   :  { %15261 = vst [vmem:[#allocation3_spill] sm:$0xff] %v13033_v36  ;;  %15263 = vst [vmem:[#allocation16_spill] sm:$0xff] %v13037_v5  ;;  %v13049_v10 = vadd.f32 %v12867_v26, %v15268_v19  ;;  %v13053_v30 = vadd.f32 %v12867_v26, %v15270_v57 }
 0x64c   :  { %15265 = vst [vmem:[#allocation151_spill] sm:$0xff] %v13041_v2  ;;  %15267 = vst [vmem:[#allocation212_spill] sm:$0xff] %v13045_v35  ;;  %v15276_v2 = vld [vmem:[#allocation139_spill] sm:$0xff]  ;;  %v15278_v35 = vld [vmem:[#allocation22_spill] sm:$0xff] }
 0x64d   :  { %15269 = vst [vmem:[#allocation25_spill] sm:$0xff] %v13049_v10  ;;  %15271 = vst [vmem:[#allocation20_spill] sm:$0xff] %v13053_v30  ;;  %v13065_v54 = vadd.f32 %v12867_v26, %v15276_v2  ;;  %v13069_v19 = vadd.f32 %v12867_v26, %v15278_v35  ;;  %v15280_v10 = vld [vmem:[#allocation84_spill] sm:$0xff]  ;;  %v15282_v30 = vld [vmem:[#allocation142_spill] sm:$0xff]  ;;  %v13085_v2 = vadd.f32 %v12867_v26, %v12801_v55 }
 0x64e   :  { %15273 = vst [vmem:[#allocation154_spill] sm:$0xff] %v13057_v15  ;;  %15275 = vst [vmem:[#allocation218_spill] sm:$0xff] %v13061_v38  ;;  %v13073_v57 = vadd.f32 %v12867_v26, %v15280_v10  ;;  %v13077_v1 = vadd.f32 %v12867_v26, %v15282_v30  ;;  %v15284_v15 = vld [vmem:[#allocation202_spill] sm:$0xff]  ;;  %v13093_v10 = vadd.f32 %v12867_v26, %v12811_v33 }
 0x64f   :  { %15277 = vst [vmem:[#allocation35_spill] sm:$0xff] %v13065_v54  ;;  %15279 = vst [vmem:[#allocation93_spill] sm:$0xff] %v13069_v19  ;;  %v13081_v17 = vadd.f32 %v12867_v26, %v15284_v15  ;;  %v15287_v54 = vld [vmem:[#allocation17_spill] sm:$0xff]  ;;  %v13097_v30 = vadd.f32 %v12867_v26, %v12816_v42  ;;  %v13113_v33 = vadd.f32 %v12867_v26, %v12832_v28 }
 0x650   :  { %15281 = vst [vmem:[#allocation153_spill] sm:$0xff] %v13073_v57  ;;  %15283 = vst [vmem:[#allocation215_spill] sm:$0xff] %v13077_v1  ;;  %v13089_v35 = vadd.f32 %v12867_v26, %v15287_v54  ;;  %v15291_v1 = vld [vmem:[#allocation83_spill] sm:$0xff]  ;;  %v13117_v42 = vadd.f32 %v12867_v26, %v12836_v31  ;;  %v13133_v28 = vadd.f32 %v12867_v26, %v12854_v37 }
 0x651   :  { %15285 = vst [vmem:[#allocation38_spill] sm:$0xff] %v13081_v17  ;;  %15286 = vst [vmem:[#allocation96_spill] sm:$0xff] %v13085_v2  ;;  %v13101_v15 = vadd.f32 %v12867_v26, %v15291_v1  ;;  %v15293_v17 = vld [vmem:[#allocation141_spill] sm:$0xff]  ;;  %v13121_v1 = vadd.f32 %v12867_v26, %v12841_v29  ;;  %v13137_v31 = vadd.f32 %v12867_v26, %v12858_v25 }
 0x652   :  { %15288 = vst [vmem:[#allocation156_spill] sm:$0xff] %v13089_v35  ;;  %15289 = vst [vmem:[#allocation37_spill] sm:$0xff] %v13093_v10  ;;  %v13105_v55 = vadd.f32 %v12867_v26, %v15293_v17  ;;  %v15295_v2 = vld [vmem:[#allocation201_spill] sm:$0xff]  ;;  %v13125_v17 = vadd.f32 %v12867_v26, %v12845_v47  ;;  %v13141_v29 = vadd.f32 %v12867_v26, %v12864_v16 }
 0x653   :  { %15290 = vst [vmem:[#allocation95_spill] sm:$0xff] %v13097_v30  ;;  %15292 = vst [vmem:[#allocation155_spill] sm:$0xff] %v13101_v15  ;;  %v13109_v54 = vadd.f32 %v12867_v26, %v15295_v2  ;;  %v13129_v2 = vadd.f32 %v12867_v26, %v12850_v24 }
 0x654   :  { %15294 = vst [vmem:[#allocation219_spill] sm:$0xff] %v13105_v55  ;;  %15297 = vst [vmem:[#allocation98_spill] sm:$0xff] %v13113_v33 }
 0x655   :  { %15296 = vst [vmem:[#allocation40_spill] sm:$0xff] %v13109_v54  ;;  %15298 = vst [vmem:[#allocation158_spill] sm:$0xff] %v13117_v42 }
 0x656   :  { %15299 = vst [vmem:[#allocation39_spill] sm:$0xff] %v13121_v1  ;;  %15300 = vst [vmem:[#allocation41_spill] sm:$0xff] %v13125_v17  ;;  %v13143_v1 = vpop.f32.mrb[70].mxu1 }
 0x657   :  { %15301 = vst [vmem:[#allocation223_spill] sm:$0xff] %v13129_v2  ;;  %15302 = vst [vmem:[#allocation43_spill] sm:$0xff] %v13133_v28  ;;  %v13145_v47 = vpop.f32.mrb[71].mxu1  ;;  %v5292_v24 = vmul.f32 %v13143_v1, %v13143_v1  ;;  %v5197_v25 = vsel %vm691_vm2, %v13143_v1, 0.0 }
 0x658   :  { %15303 = vst [vmem:[#allocation42_spill] sm:$0xff] %v13137_v31  ;;  %15304 = vst [vmem:[#allocation45_spill] sm:$0xff] %v13141_v29  ;;  %v5195_v2 = vsel %vm691_vm2, %v13145_v47, 0.0  ;;  %v5291_v37 = vmul.f32 %v13145_v47, %v13145_v47 }
 0x659   :  { %v5196_v28 = vadd.f32 %v5195_v2, %v5194_v9  ;;  %v5394_v31 = vsel %vm691_vm2, %v5292_v24, 0.0 }
 0x65a   :  { %v5392_v16 = vsel %vm691_vm2, %v5291_v37, 0.0 }
 0x65b   :  { %v5393_v26 = vadd.f32 %v5392_v16, %v5391_v6  ;;  %v5198_v29 = vadd.f32 %v5197_v25, %v5196_v28  ;;  %v13157_v42 = vpop.f32.mrb[72].mxu1 }
 0x65c   :  { %v13159_v33 = vpop.f32.mrb[73].mxu1  ;;  %v5294_v54 = vmul.f32 %v13157_v42, %v13157_v42  ;;  %v5201_v6 = vsel %vm691_vm2, %v13157_v42, 0.0 }
 0x65d   :  { %v5395_v17 = vadd.f32 %v5394_v31, %v5393_v26  ;;  %v5199_v9 = vsel %vm691_vm2, %v13159_v33, 0.0  ;;  %v5293_v2 = vmul.f32 %v13159_v33, %v13159_v33 }
 0x65e   :  { %v5200_v55 = vadd.f32 %v5199_v9, %v5198_v29  ;;  %v5398_v37 = vsel %vm691_vm2, %v5294_v54, 0.0 }
 0x65f   :  { %v5396_v28 = vsel %vm691_vm2, %v5293_v2, 0.0 }
 0x660   :  { %v5397_v31 = vadd.f32 %v5396_v28, %v5395_v17  ;;  %v5202_v24 = vadd.f32 %v5201_v6, %v5200_v55 }
 0x662   :  { %v5399_v25 = vadd.f32 %v5398_v37, %v5397_v31 }
 0x66b   :  { %v13171_v16 = vpop.f32.mrb[74].mxu1 }
 0x66c   :  { %v13173_v26 = vpop.f32.mrb[75].mxu1  ;;  %v5296_v15 = vmul.f32 %v13171_v16, %v13171_v16  ;;  %v5205_v55 = vsel %vm691_vm2, %v13171_v16, 0.0 }
 0x66d   :  { %v5203_v29 = vsel %vm691_vm2, %v13173_v26, 0.0  ;;  %v5295_v9 = vmul.f32 %v13173_v26, %v13173_v26 }
 0x66e   :  { %v5204_v30 = vadd.f32 %v5203_v29, %v5202_v24  ;;  %v5402_v6 = vsel %vm691_vm2, %v5296_v15, 0.0 }
 0x66f   :  { %v5400_v54 = vsel %vm691_vm2, %v5295_v9, 0.0 }
 0x670   :  { %v5401_v17 = vadd.f32 %v5400_v54, %v5399_v25  ;;  %v5206_v2 = vadd.f32 %v5205_v55, %v5204_v30 }
 0x672   :  { %v5403_v28 = vadd.f32 %v5402_v6, %v5401_v17 }
 0x67b   :  { %v13185_v31 = vpop.f32.mrb[76].mxu1 }
 0x67c   :  { %v13187_v37 = vpop.f32.mrb[77].mxu1  ;;  %v5298_v10 = vmul.f32 %v13185_v31, %v13185_v31  ;;  %v5209_v30 = vsel %vm691_vm2, %v13185_v31, 0.0 }
 0x67d   :  { %v5207_v24 = vsel %vm691_vm2, %v13187_v37, 0.0  ;;  %v5297_v29 = vmul.f32 %v13187_v37, %v13187_v37 }
 0x67e   :  { %v5208_v35 = vadd.f32 %v5207_v24, %v5206_v2  ;;  %v5406_v55 = vsel %vm691_vm2, %v5298_v10, 0.0 }
 0x67f   :  { %v5404_v15 = vsel %vm691_vm2, %v5297_v29, 0.0 }
 0x680   :  { %v5405_v25 = vadd.f32 %v5404_v15, %v5403_v28  ;;  %v5210_v9 = vadd.f32 %v5209_v30, %v5208_v35 }
 0x682   :  { %v5407_v54 = vadd.f32 %v5406_v55, %v5405_v25 }
 0x68b   :  { %v13199_v17 = vpop.f32.mrb[78].mxu1 }
 0x68c   :  { %v13201_v6 = vpop.f32.mrb[79].mxu1  ;;  %v5300_v57 = vmul.f32 %v13199_v17, %v13199_v17  ;;  %v5213_v35 = vsel %vm691_vm2, %v13199_v17, 0.0 }
 0x68d   :  { %v5211_v2 = vsel %vm691_vm2, %v13201_v6, 0.0  ;;  %v5299_v24 = vmul.f32 %v13201_v6, %v13201_v6 }
 0x68e   :  { %v5212_v19 = vadd.f32 %v5211_v2, %v5210_v9  ;;  %v5410_v30 = vsel %vm691_vm2, %v5300_v57, 0.0 }
 0x68f   :  { %v5408_v10 = vsel %vm691_vm2, %v5299_v24, 0.0 }
 0x690   :  { %v5409_v28 = vadd.f32 %v5408_v10, %v5407_v54  ;;  %v5214_v29 = vadd.f32 %v5213_v35, %v5212_v19 }
 0x692   :  { %v5411_v15 = vadd.f32 %v5410_v30, %v5409_v28 }
 0x69c   :  { %v13213_v25 = vpop.f32.mrb[80].mxu1 }
 0x69d   :  { %v13215_v55 = vpop.f32.mrb[81].mxu1  ;;  %v5302_v38 = vmul.f32 %v13213_v25, %v13213_v25  ;;  %v5217_v19 = vsel %vm691_vm2, %v13213_v25, 0.0 }
 0x69e   :  { %v5215_v9 = vsel %vm691_vm2, %v13215_v55, 0.0  ;;  %v5301_v2 = vmul.f32 %v13215_v55, %v13215_v55 }
 0x69f   :  { %v5216_v5 = vadd.f32 %v5215_v9, %v5214_v29  ;;  %v5414_v35 = vsel %vm691_vm2, %v5302_v38, 0.0 }
 0x6a0   :  { %v5412_v57 = vsel %vm691_vm2, %v5301_v2, 0.0 }
 0x6a1   :  { %v5413_v54 = vadd.f32 %v5412_v57, %v5411_v15  ;;  %v5218_v24 = vadd.f32 %v5217_v19, %v5216_v5 }
 0x6a3   :  { %v5415_v10 = vadd.f32 %v5414_v35, %v5413_v54 }
 0x6ab   :  { %v13227_v28 = vpop.f32.mrb[82].mxu1 }
 0x6ac   :  { %v13229_v30 = vpop.f32.mrb[83].mxu1  ;;  %v5304_v36 = vmul.f32 %v13227_v28, %v13227_v28  ;;  %v5221_v5 = vsel %vm691_vm2, %v13227_v28, 0.0 }
 0x6ad   :  { %v5219_v29 = vsel %vm691_vm2, %v13229_v30, 0.0  ;;  %v5303_v9 = vmul.f32 %v13229_v30, %v13229_v30 }
 0x6ae   :  { %v5220_v49 = vadd.f32 %v5219_v29, %v5218_v24  ;;  %v5418_v19 = vsel %vm691_vm2, %v5304_v36, 0.0 }
 0x6af   :  { %v5416_v38 = vsel %vm691_vm2, %v5303_v9, 0.0 }
 0x6b0   :  { %v5417_v15 = vadd.f32 %v5416_v38, %v5415_v10  ;;  %v5222_v2 = vadd.f32 %v5221_v5, %v5220_v49 }
 0x6b2   :  { %v5419_v57 = vadd.f32 %v5418_v19, %v5417_v15 }
 0x6bb   :  { %v13241_v54 = vpop.f32.mrb[84].mxu1 }
 0x6bc   :  { %v13243_v35 = vpop.f32.mrb[85].mxu1  ;;  %v5306_v32 = vmul.f32 %v13241_v54, %v13241_v54  ;;  %v5225_v49 = vsel %vm691_vm2, %v13241_v54, 0.0 }
 0x6bd   :  { %v5223_v24 = vsel %vm691_vm2, %v13243_v35, 0.0  ;;  %v5305_v29 = vmul.f32 %v13243_v35, %v13243_v35 }
 0x6be   :  { %v5224_v60 = vadd.f32 %v5223_v24, %v5222_v2  ;;  %v5422_v5 = vsel %vm691_vm2, %v5306_v32, 0.0 }
 0x6bf   :  { %v5420_v36 = vsel %vm691_vm2, %v5305_v29, 0.0 }
 0x6c0   :  { %v5421_v10 = vadd.f32 %v5420_v36, %v5419_v57  ;;  %v5226_v9 = vadd.f32 %v5225_v49, %v5224_v60 }
 0x6c2   :  { %v5423_v38 = vadd.f32 %v5422_v5, %v5421_v10 }
 0x6cb   :  { %v13255_v15 = vpop.f32.mrb[86].mxu1 }
 0x6cc   :  { %v13257_v19 = vpop.f32.mrb[87].mxu1  ;;  %v5308_v23 = vmul.f32 %v13255_v15, %v13255_v15  ;;  %v5229_v60 = vsel %vm691_vm2, %v13255_v15, 0.0 }
 0x6cd   :  { %v5227_v2 = vsel %vm691_vm2, %v13257_v19, 0.0  ;;  %v5307_v24 = vmul.f32 %v13257_v19, %v13257_v19 }
 0x6ce   :  { %v5228_v41 = vadd.f32 %v5227_v2, %v5226_v9  ;;  %v5426_v49 = vsel %vm691_vm2, %v5308_v23, 0.0 }
 0x6cf   :  { %v5424_v32 = vsel %vm691_vm2, %v5307_v24, 0.0 }
 0x6d0   :  { %v5425_v57 = vadd.f32 %v5424_v32, %v5423_v38  ;;  %v5230_v29 = vadd.f32 %v5229_v60, %v5228_v41 }
 0x6d2   :  { %v5427_v36 = vadd.f32 %v5426_v49, %v5425_v57 }
 0x6db   :  { %v13269_v10 = vpop.f32.mrb[88].mxu1 }
 0x6dc   :  { %v13271_v5 = vpop.f32.mrb[89].mxu1  ;;  %v5310_v8 = vmul.f32 %v13269_v10, %v13269_v10  ;;  %v5233_v41 = vsel %vm691_vm2, %v13269_v10, 0.0 }
 0x6dd   :  { %v5231_v9 = vsel %vm691_vm2, %v13271_v5, 0.0  ;;  %v5309_v2 = vmul.f32 %v13271_v5, %v13271_v5 }
 0x6de   :  { %v5232_v58 = vadd.f32 %v5231_v9, %v5230_v29  ;;  %v5430_v60 = vsel %vm691_vm2, %v5310_v8, 0.0 }
 0x6df   :  { %v5428_v23 = vsel %vm691_vm2, %v5309_v2, 0.0 }
 0x6e0   :  { %v5429_v38 = vadd.f32 %v5428_v23, %v5427_v36  ;;  %v5234_v24 = vadd.f32 %v5233_v41, %v5232_v58 }
 0x6e2   :  { %v5431_v32 = vadd.f32 %v5430_v60, %v5429_v38 }
 0x6eb   :  { %v13283_v57 = vpop.f32.mrb[90].mxu1 }
 0x6ec   :  { %v13285_v49 = vpop.f32.mrb[91].mxu1  ;;  %v5312_v52 = vmul.f32 %v13283_v57, %v13283_v57  ;;  %v5237_v58 = vsel %vm691_vm2, %v13283_v57, 0.0 }
 0x6ed   :  { %v5235_v29 = vsel %vm691_vm2, %v13285_v49, 0.0  ;;  %v5311_v9 = vmul.f32 %v13285_v49, %v13285_v49 }
 0x6ee   :  { %v5236_v21 = vadd.f32 %v5235_v29, %v5234_v24  ;;  %v5434_v41 = vsel %vm691_vm2, %v5312_v52, 0.0 }
 0x6ef   :  { %v5432_v8 = vsel %vm691_vm2, %v5311_v9, 0.0 }
 0x6f0   :  { %v5433_v36 = vadd.f32 %v5432_v8, %v5431_v32  ;;  %v5238_v2 = vadd.f32 %v5237_v58, %v5236_v21 }
 0x6f2   :  { %v5435_v23 = vadd.f32 %v5434_v41, %v5433_v36 }
 0x6fb   :  { %v13297_v38 = vpop.f32.mrb[92].mxu1 }
 0x6fc   :  { %v13299_v60 = vpop.f32.mrb[93].mxu1  ;;  %v5314_v44 = vmul.f32 %v13297_v38, %v13297_v38  ;;  %v5241_v21 = vsel %vm691_vm2, %v13297_v38, 0.0 }
 0x6fd   :  { %v5239_v24 = vsel %vm691_vm2, %v13299_v60, 0.0  ;;  %v5313_v29 = vmul.f32 %v13299_v60, %v13299_v60 }
 0x6fe   :  { %v5240_v62 = vadd.f32 %v5239_v24, %v5238_v2  ;;  %v5438_v58 = vsel %vm691_vm2, %v5314_v44, 0.0 }
 0x6ff   :  { %v5436_v52 = vsel %vm691_vm2, %v5313_v29, 0.0 }
 0x700   :  { %v5437_v32 = vadd.f32 %v5436_v52, %v5435_v23  ;;  %v5242_v9 = vadd.f32 %v5241_v21, %v5240_v62 }
 0x702   :  { %v5439_v8 = vadd.f32 %v5438_v58, %v5437_v32 }
 0x710   :  { %v13311_v36 = vpop.f32.mrb[94].mxu1 }
 0x711   :  { %v13313_v41 = vpop.f32.mrb[95].mxu1  ;;  %v5316_v20 = vmul.f32 %v13311_v36, %v13311_v36  ;;  %v5245_v62 = vsel %vm691_vm2, %v13311_v36, 0.0 }
 0x712   :  { %v5243_v2 = vsel %vm691_vm2, %v13313_v41, 0.0  ;;  %v5315_v24 = vmul.f32 %v13313_v41, %v13313_v41 }
 0x713   :  { %v5244_v0 = vadd.f32 %v5243_v2, %v5242_v9  ;;  %v5442_v21 = vsel %vm691_vm2, %v5316_v20, 0.0  ;;  %v5118_v20 = vld [vmem:[%s14443_s6] sm:$0x1] }
 0x714   :  { %v5440_v44 = vsel %vm691_vm2, %v5315_v24, 0.0 }
 0x715   :  { %v5246_v23 = vadd.f32 %v5245_v62, %v5244_v0  ;;  %v5441_v29 = vadd.f32 %v5440_v44, %v5439_v8 }
 0x717   :  { %v5247_v52 = vrot.slane %v5246_v23, 4  ;;  %v5443_v32 = vadd.f32 %v5442_v21, %v5441_v29  ;;  %v15309_v21 = vld [vmem:[#allocation23_spill] sm:$0xff] }
 0x719   :  { %v5248_v58 = vadd.f32 %v5247_v52, %v5246_v23  ;;  %v5444_v14 = vrot.slane %v5443_v32, 4 }
 0x71b   :  { %v5249_v40 = vrot.slane %v5248_v58, 2  ;;  %v5445_v27 = vadd.f32 %v5444_v14, %v5443_v32  ;;  %v15307_v14 = vld [vmem:[#allocation124_spill] sm:$0xff] }
 0x71c   :  { %v15310_v32 = vld [vmem:[#allocation184_spill] sm:$0xff] }
 0x71d   :  { %v5250_v48 = vadd.f32 %v5249_v40, %v5248_v58  ;;  %v5446_v22 = vrot.slane %v5445_v27, 2  ;;  %v13331_v40 = vld [vmem:[%s14444_s7] sm:$0x1] }
 0x71f   :  { %v5251_v11 = vrot.slane %v5250_v48, 1  ;;  %v5447_v50 = vadd.f32 %v5446_v22, %v5445_v27 }
 0x721   :  { %v5252_v9 = vadd.f32 %v5251_v11, %v5250_v48  ;;  %v5448_v2 = vrot.slane %v5447_v50, 1  ;;  %v15306_v48 = vld [vmem:[#allocation19_spill] sm:$0xff] }
 0x723   :  { %v5449_v12 = vadd.f32 %v5448_v2, %v5447_v50  ;;  %v5450_v4 = vmul.f32 0.001953125, %v5252_v9  ;;  %v15311_v9 = vld [vmem:[#allocation68_spill] sm:$0xff] }
 0x725   :  { %v5451_v7 = vmul.f32 0.001953125, %v5449_v12  ;;  %v5452_v24 = vmul.f32 %v5450_v4, %v5450_v4  ;;  %v15305_v12 = vld [vmem:[#allocation210_spill] sm:$0xff] }
 0x727   :  { %v5453_v0 = vsub.f32 %v5451_v7, %v5452_v24  ;;  %v15312_v24 = vld [vmem:[#allocation216_spill] sm:$0xff]  ;;  %v15320_v7 = vld [vmem:[#allocation26_spill] sm:$0xff] }
 0x729   :  { %v5454_v8 = vadd.f32 1e-05, %v5453_v0 }
 0x72b   :  { %7684 = vrsqrt.f32 %v5454_v8  ;;  %v15313_v8 = vld [vmem:[#allocation186_spill] sm:$0xff] }
 0x735   :  { %v7685_v62 = vpop.eup %7684 }
 0x736   :  { %v5456_v44 = vmul.f32 %v7685_v62, %v5118_v20  ;;  %v15314_v62 = vld [vmem:[#allocation126_spill] sm:$0xff] }
 0x738   :  { %v13333_v11 = vmul.f32 %v5456_v44, %v5450_v4  ;;  %v13336_v50 = vrot.slane %v5456_v44, %v15167_v43  ;;  %v15308_v4 = vld [vmem:[#allocation66_spill] sm:$0xff] }
 0x73a   :  { %v13342_v22 = vmul.f32 %v13336_v50, %v15305_v12  ;;  %v13346_v27 = vmul.f32 %v15306_v48, %v13336_v50  ;;  %v13350_v23 = vmul.f32 %v13336_v50, %v15307_v14  ;;  %v13354_v29 = vmul.f32 %v15308_v4, %v13336_v50  ;;  %v15315_v12 = vld [vmem:[#allocation213_spill] sm:$0xff]  ;;  %v15316_v14 = vld [vmem:[#allocation24_spill] sm:$0xff] }
 0x73b   :  { %v13358_v52 = vmul.f32 %v13336_v50, %v15309_v21  ;;  %v13362_v58 = vmul.f32 %v15310_v32, %v13336_v50  ;;  %v13366_v2 = vmul.f32 %v13336_v50, %v15311_v9  ;;  %v13370_v0 = vmul.f32 %v15312_v24, %v13336_v50  ;;  %v15317_v21 = vld [vmem:[#allocation185_spill] sm:$0xff] }
 0x73c   :  { %v13374_v20 = vmul.f32 %v13336_v50, %v15313_v8  ;;  %v13378_v44 = vmul.f32 %v15314_v62, %v13336_v50  ;;  %v13382_v48 = vmul.f32 %v13336_v50, %v15315_v12  ;;  %v13386_v4 = vmul.f32 %v15316_v14, %v13336_v50  ;;  %v15318_v9 = vld [vmem:[#allocation125_spill] sm:$0xff] }
 0x73d   :  { %v13390_v32 = vmul.f32 %v13336_v50, %v15317_v21  ;;  %v13394_v24 = vmul.f32 %v15318_v9, %v13336_v50  ;;  %v15319_v8 = vld [vmem:[#allocation217_spill] sm:$0xff]  ;;  %v13402_v12 = vmul.f32 %v15320_v7, %v13336_v50  ;;  %v13406_v14 = vmul.f32 %v13336_v50, %v15321_v18 }
 0x73e   :  { %v13398_v62 = vmul.f32 %v13336_v50, %v15319_v8  ;;  %v13410_v21 = vmul.f32 %v15322_v45, %v13336_v50  ;;  %v13414_v9 = vmul.f32 %v13336_v50, %v15323_v51  ;;  %v13418_v8 = vmul.f32 %v15324_v53, %v13336_v50 }
 0x73f   :  { %v13422_v7 = vmul.f32 %v13336_v50, %v15325_v3  ;;  %v13426_v18 = vmul.f32 %v15326_v59, %v13336_v50  ;;  %v13430_v45 = vmul.f32 %v13336_v50, %v15328_v39  ;;  %v13434_v51 = vmul.f32 %v15330_v63, %v13336_v50 }
 0x740   :  { %v13438_v53 = vmul.f32 %v13336_v50, %v15332_v61  ;;  %v13442_v3 = vmul.f32 %v15334_v56, %v13336_v50  ;;  %v13446_v59 = vmul.f32 %v13336_v50, %v15336_v34 }
 0x741   :  { %15327 = vst [vmem:[#allocation44_spill] sm:$0xff] %v13426_v18  ;;  %15329 = vst [vmem:[#allocation46_spill] sm:$0xff] %v13430_v45  ;;  %v15338_v18 = vld [vmem:[#allocation196_spill] sm:$0xff]  ;;  %v15340_v45 = vld [vmem:[#allocation135_spill] sm:$0xff] }
 0x742   :  { %15331 = vst [vmem:[#allocation47_spill] sm:$0xff] %v13434_v51  ;;  %15333 = vst [vmem:[#allocation49_spill] sm:$0xff] %v13438_v53  ;;  %v13450_v39 = vmul.f32 %v15338_v18, %v13336_v50  ;;  %v13454_v63 = vmul.f32 %v13336_v50, %v15340_v45  ;;  %v15342_v51 = vld [vmem:[#allocation77_spill] sm:$0xff]  ;;  %v15344_v53 = vld [vmem:[#allocation15_spill] sm:$0xff] }
 0x743   :  { %15335 = vst [vmem:[#allocation48_spill] sm:$0xff] %v13442_v3  ;;  %15337 = vst [vmem:[#allocation51_spill] sm:$0xff] %v13446_v59  ;;  %v13458_v61 = vmul.f32 %v15342_v51, %v13336_v50  ;;  %v13462_v56 = vmul.f32 %v13336_v50, %v15344_v53  ;;  %v15345_v3 = vld [vmem:[#allocation195_spill] sm:$0xff]  ;;  %v15346_v59 = vld [vmem:[#allocation138_spill] sm:$0xff] }
 0x744   :  { %15339 = vst [vmem:[#allocation50_spill] sm:$0xff] %v13450_v39  ;;  %15341 = vst [vmem:[#allocation52_spill] sm:$0xff] %v13454_v63  ;;  %v13466_v34 = vmul.f32 %v15345_v3, %v13336_v50  ;;  %v13470_v18 = vmul.f32 %v13336_v50, %v15346_v59  ;;  %v15347_v39 = vld [vmem:[#allocation80_spill] sm:$0xff]  ;;  %v15348_v63 = vld [vmem:[#allocation199_spill] sm:$0xff]  ;;  %v13486_v3 = vmul.f32 %v13336_v50, %v12967_v13 }
 0x745   :  { %15343 = vst [vmem:[#allocation53_spill] sm:$0xff] %v13458_v61  ;;  %v13474_v45 = vmul.f32 %v15347_v39, %v13336_v50  ;;  %v13478_v51 = vmul.f32 %v13336_v50, %v15348_v63  ;;  %v15349_v61 = vld [vmem:[#allocation200_spill] sm:$0xff]  ;;  %v13490_v59 = vmul.f32 %v12944_v46, %v13336_v50  ;;  %v13494_v39 = vmul.f32 %v13336_v50, %v13145_v47 }
 0x746   :  { %v13482_v53 = vmul.f32 %v15349_v61, %v13336_v50  ;;  %v13498_v63 = vmul.f32 %v13143_v1, %v13336_v50  ;;  %v13502_v61 = vmul.f32 %v13336_v50, %v13159_v33  ;;  %v13506_v13 = vmul.f32 %v13157_v42, %v13336_v50 }
 0x747   :  { %v13510_v46 = vmul.f32 %v13336_v50, %v13173_v26  ;;  %v13514_v47 = vmul.f32 %v13171_v16, %v13336_v50  ;;  %v13518_v1 = vmul.f32 %v13336_v50, %v13187_v37  ;;  %v13522_v33 = vmul.f32 %v13185_v31, %v13336_v50 }
 0x748   :  { %v13526_v42 = vmul.f32 %v13336_v50, %v13201_v6  ;;  %v13530_v26 = vmul.f32 %v13199_v17, %v13336_v50  ;;  %v13534_v16 = vmul.f32 %v13336_v50, %v13215_v55  ;;  %v13538_v37 = vmul.f32 %v13213_v25, %v13336_v50 }
 0x749   :  { %v13542_v31 = vmul.f32 %v13336_v50, %v13229_v30  ;;  %v13546_v6 = vmul.f32 %v13227_v28, %v13336_v50  ;;  %v13550_v17 = vmul.f32 %v13336_v50, %v13243_v35  ;;  %v13554_v55 = vmul.f32 %v13241_v54, %v13336_v50 }
 0x74a   :  { %v13558_v25 = vmul.f32 %v13336_v50, %v13257_v19  ;;  %v13562_v30 = vmul.f32 %v13255_v15, %v13336_v50  ;;  %v13566_v28 = vmul.f32 %v13336_v50, %v13271_v5  ;;  %v13570_v35 = vmul.f32 %v13269_v10, %v13336_v50 }
 0x74b   :  { %v13574_v54 = vmul.f32 %v13336_v50, %v13285_v49  ;;  %v13578_v19 = vmul.f32 %v13283_v57, %v13336_v50  ;;  %v13582_v15 = vmul.f32 %v13336_v50, %v13299_v60  ;;  %v13586_v5 = vmul.f32 %v13297_v38, %v13336_v50 }
 0x74c   :  { %v13590_v10 = vmul.f32 %v13336_v50, %v13313_v41  ;;  %v13594_v49 = vmul.f32 %v13311_v36, %v13336_v50  ;;  %v15351_v57 = vsub.f32 %v13331_v40, %v13333_v11 }
 0x74d   :  { %15350 = vst [vmem:[#allocation55_spill] sm:$0xff] %v13578_v19 }
 0x74e   :  { %v13600_v19 = vrot.slane %v15351_v57, %v15167_v43  ;;  %v15360_v57 = vld [vmem:[#allocation49_spill] sm:$0xff] }
 0x750   :  { %v13604_v60 = vadd.f32 %v13600_v19, %v13342_v22  ;;  %v13608_v38 = vadd.f32 %v13600_v19, %v13346_v27  ;;  %v13612_v41 = vadd.f32 %v13600_v19, %v13350_v23  ;;  %v13616_v36 = vadd.f32 %v13600_v19, %v13354_v29 }
 0x751   :  { %v13620_v43 = vadd.f32 %v13600_v19, %v13358_v52  ;;  %v13624_v40 = vadd.f32 %v13600_v19, %v13362_v58  ;;  %v13628_v11 = vadd.f32 %v13600_v19, %v13366_v2  ;;  %v13632_v50 = vadd.f32 %v13600_v19, %v13370_v0 }
 0x752   :  { %v13636_v22 = vadd.f32 %v13600_v19, %v13374_v20  ;;  %v13640_v27 = vadd.f32 %v13600_v19, %v13378_v44  ;;  %v13644_v23 = vadd.f32 %v13600_v19, %v13382_v48  ;;  %v13648_v29 = vadd.f32 %v13600_v19, %v13386_v4 }
 0x753   :  { %v13652_v52 = vadd.f32 %v13600_v19, %v13390_v32  ;;  %v13656_v58 = vadd.f32 %v13600_v19, %v13394_v24  ;;  %v13660_v2 = vadd.f32 %v13600_v19, %v13398_v62  ;;  %v13664_v0 = vadd.f32 %v13600_v19, %v13402_v12  ;;  %v15354_v24 = vld [vmem:[#allocation44_spill] sm:$0xff]  ;;  %v15356_v12 = vld [vmem:[#allocation46_spill] sm:$0xff] }
 0x754   :  { %v13668_v20 = vadd.f32 %v13600_v19, %v13406_v14  ;;  %v13672_v44 = vadd.f32 %v13600_v19, %v13410_v21  ;;  %v13676_v48 = vadd.f32 %v13600_v19, %v13414_v9  ;;  %v13680_v4 = vadd.f32 %v13600_v19, %v13418_v8  ;;  %v15358_v21 = vld [vmem:[#allocation47_spill] sm:$0xff] }
 0x755   :  { %v13684_v32 = vadd.f32 %v13600_v19, %v13422_v7  ;;  %v13688_v62 = vadd.f32 %v13600_v19, %v15354_v24  ;;  %v13692_v14 = vadd.f32 %v13600_v19, %v15356_v12  ;;  %v13696_v9 = vadd.f32 %v13600_v19, %v15358_v21 }
 0x756   :  { %15352 = vst [vmem:[#allocation54_spill] sm:$0xff] %v13680_v4  ;;  %v13700_v8 = vadd.f32 %v13600_v19, %v15360_v57  ;;  %v15361_v4 = vld [vmem:[#allocation48_spill] sm:$0xff] }
 0x757   :  { %15353 = vst [vmem:[#allocation56_spill] sm:$0xff] %v13684_v32  ;;  %15355 = vst [vmem:[#allocation58_spill] sm:$0xff] %v13688_v62  ;;  %v13704_v7 = vadd.f32 %v13600_v19, %v15361_v4  ;;  %v15362_v32 = vld [vmem:[#allocation51_spill] sm:$0xff]  ;;  %v15363_v62 = vld [vmem:[#allocation50_spill] sm:$0xff]  ;;  %v13724_v4 = vadd.f32 %v13600_v19, %v13462_v56  ;;  %v13744_v56 = vadd.f32 %v13600_v19, %v13482_v53 }
 0x758   :  { %15357 = vst [vmem:[#allocation97_spill] sm:$0xff] %v13692_v14  ;;  %15359 = vst [vmem:[#allocation99_spill] sm:$0xff] %v13696_v9  ;;  %v13708_v24 = vadd.f32 %v13600_v19, %v15362_v32  ;;  %v13712_v12 = vadd.f32 %v13600_v19, %v15363_v62  ;;  %v15364_v14 = vld [vmem:[#allocation52_spill] sm:$0xff]  ;;  %v15365_v9 = vld [vmem:[#allocation53_spill] sm:$0xff]  ;;  %v13728_v32 = vadd.f32 %v13600_v19, %v13466_v34 }
 0x759   :  { %v13716_v21 = vadd.f32 %v13600_v19, %v15364_v14  ;;  %v13720_v57 = vadd.f32 %v13600_v19, %v15365_v9  ;;  %v13732_v62 = vadd.f32 %v13600_v19, %v13470_v18  ;;  %v13736_v14 = vadd.f32 %v13600_v19, %v13474_v45 }
 0x75a   :  { %v13740_v9 = vadd.f32 %v13600_v19, %v13478_v51  ;;  %v13748_v34 = vadd.f32 %v13600_v19, %v13486_v3  ;;  %v13752_v18 = vadd.f32 %v13600_v19, %v13490_v59  ;;  %v13756_v45 = vadd.f32 %v13600_v19, %v13494_v39 }
 0x75b   :  { %v13760_v51 = vadd.f32 %v13600_v19, %v13498_v63  ;;  %v13764_v53 = vadd.f32 %v13600_v19, %v13502_v61  ;;  %v13768_v3 = vadd.f32 %v13600_v19, %v13506_v13  ;;  %v13772_v59 = vadd.f32 %v13600_v19, %v13510_v46 }
 0x75c   :  { %v13776_v39 = vadd.f32 %v13600_v19, %v13514_v47  ;;  %v13780_v63 = vadd.f32 %v13600_v19, %v13518_v1  ;;  %v13784_v61 = vadd.f32 %v13600_v19, %v13522_v33  ;;  %v13788_v13 = vadd.f32 %v13600_v19, %v13526_v42 }
 0x75d   :  { %v13792_v46 = vadd.f32 %v13600_v19, %v13530_v26  ;;  %v13796_v47 = vadd.f32 %v13600_v19, %v13534_v16  ;;  %v13800_v1 = vadd.f32 %v13600_v19, %v13538_v37  ;;  %v13804_v33 = vadd.f32 %v13600_v19, %v13542_v31 }
 0x75e   :  { %v13808_v42 = vadd.f32 %v13600_v19, %v13546_v6  ;;  %v13812_v26 = vadd.f32 %v13600_v19, %v13550_v17  ;;  %v13816_v16 = vadd.f32 %v13600_v19, %v13554_v55  ;;  %v13820_v37 = vadd.f32 %v13600_v19, %v13558_v25 }
 0x75f   :  { %v13824_v31 = vadd.f32 %v13600_v19, %v13562_v30  ;;  %v13828_v6 = vadd.f32 %v13600_v19, %v13566_v28  ;;  %v13832_v17 = vadd.f32 %v13600_v19, %v13570_v35  ;;  %v13836_v55 = vadd.f32 %v13600_v19, %v13574_v54 }
 0x760   :  { %15366 = vst [vmem:[#allocation100_spill] sm:$0xff] %v13816_v16  ;;  %v15368_v16 = vld [vmem:[#allocation55_spill] sm:$0xff]  ;;  %v13844_v30 = vadd.f32 %v13600_v19, %v13582_v15  ;;  %v13848_v28 = vadd.f32 %v13600_v19, %v13586_v5  ;;  %v13852_v35 = vadd.f32 %v13600_v19, %v13590_v10  ;;  %v13856_v54 = vadd.f32 %v13600_v19, %v13594_v49  ;;  %v15378_v49 = vld [vmem:[#allocation85_spill] sm:$0xff] }
 0x761   :  { %15367 = vst [vmem:[#allocation101_spill] sm:$0xff] %v13836_v55  ;;  %v13840_v25 = vadd.f32 %v13600_v19, %v15368_v16  ;;  %v15373_v55 = vld [vmem:[#allocation28_spill] sm:$0xff] }
 0x762   :  { %15370 = vst [vmem:[#allocation157_spill] sm:$0xff] %v13844_v30  ;;  %15371 = vst [vmem:[#allocation103_spill] sm:$0xff] %v13848_v28  ;;  %v13860_v16 = vadd.f32 %v15373_v55, %v13604_v60  ;;  %v15375_v30 = vld [vmem:[#allocation144_spill] sm:$0xff]  ;;  %v13880_v60 = vadd.f32 %v15378_v49, %v13624_v40  ;;  %v15379_v55 = vld [vmem:[#allocation143_spill] sm:$0xff] }
 0x763   :  { %15369 = vst [vmem:[#allocation102_spill] sm:$0xff] %v13840_v25  ;;  %15372 = vst [vmem:[#allocation104_spill] sm:$0xff] %v13852_v35  ;;  %v15374_v25 = vld [vmem:[#allocation86_spill] sm:$0xff]  ;;  %v13868_v5 = vadd.f32 %v15375_v30, %v13612_v41  ;;  %v15376_v28 = vld [vmem:[#allocation204_spill] sm:$0xff] }
 0x764   :  { %v13864_v15 = vadd.f32 %v15374_v25, %v13608_v38  ;;  %v13872_v10 = vadd.f32 %v15376_v28, %v13616_v36  ;;  %v15377_v35 = vld [vmem:[#allocation21_spill] sm:$0xff]  ;;  %v13884_v38 = vadd.f32 %v15379_v55, %v13628_v11  ;;  %v15380_v25 = vld [vmem:[#allocation203_spill] sm:$0xff]  ;;  %v15381_v30 = vld [vmem:[#allocation30_spill] sm:$0xff] }
 0x765   :  { %v13876_v19 = vadd.f32 %v15377_v35, %v13620_v43  ;;  %v13888_v41 = vadd.f32 %v15380_v25, %v13632_v50  ;;  %v13892_v36 = vadd.f32 %v15381_v30, %v13636_v22  ;;  %v15382_v28 = vld [vmem:[#allocation88_spill] sm:$0xff]  ;;  %v15383_v35 = vld [vmem:[#allocation146_spill] sm:$0xff]  ;;  %v15385_v55 = vld [vmem:[#allocation29_spill] sm:$0xff] }
 0x766   :  { %v13896_v43 = vadd.f32 %v15382_v28, %v13640_v27  ;;  %v13900_v40 = vadd.f32 %v15383_v35, %v13644_v23  ;;  %v15384_v49 = vld [vmem:[#allocation206_spill] sm:$0xff]  ;;  %v13908_v50 = vadd.f32 %v15385_v55, %v13652_v52  ;;  %v15386_v25 = vld [vmem:[#allocation87_spill] sm:$0xff]  ;;  %v15388_v30 = vld [vmem:[#allocation145_spill] sm:$0xff] }
 0x767   :  { %v13904_v11 = vadd.f32 %v15384_v49, %v13648_v29  ;;  %v13912_v22 = vadd.f32 %v15386_v25, %v13656_v58  ;;  %v13916_v27 = vadd.f32 %v15388_v30, %v13660_v2  ;;  %v15390_v28 = vld [vmem:[#allocation205_spill] sm:$0xff]  ;;  %v15392_v35 = vld [vmem:[#allocation32_spill] sm:$0xff]  ;;  %v15394_v49 = vld [vmem:[#allocation90_spill] sm:$0xff] }
 0x768   :  { %v13920_v23 = vadd.f32 %v15390_v28, %v13664_v0  ;;  %v13924_v29 = vadd.f32 %v15392_v35, %v13668_v20  ;;  %v13928_v52 = vadd.f32 %v15394_v49, %v13672_v44  ;;  %v15396_v55 = vld [vmem:[#allocation148_spill] sm:$0xff]  ;;  %v15397_v25 = vld [vmem:[#allocation54_spill] sm:$0xff]  ;;  %v15403_v35 = vld [vmem:[#allocation97_spill] sm:$0xff] }
 0x769   :  { %15387 = vst [vmem:[#allocation222_spill] sm:$0xff] %v13912_v22  ;;  %15389 = vst [vmem:[#allocation105_spill] sm:$0xff] %v13916_v27  ;;  %v13932_v58 = vadd.f32 %v15396_v55, %v13676_v48  ;;  %v15398_v22 = vld [vmem:[#allocation208_spill] sm:$0xff]  ;;  %v15400_v27 = vld [vmem:[#allocation31_spill] sm:$0xff] }
 0x76a   :  { %15391 = vst [vmem:[#allocation107_spill] sm:$0xff] %v13920_v23  ;;  %15393 = vst [vmem:[#allocation106_spill] sm:$0xff] %v13924_v29  ;;  %v13936_v2 = vadd.f32 %v15398_v22, %v15397_v25  ;;  %v15399_v30 = vld [vmem:[#allocation56_spill] sm:$0xff]  ;;  %v15401_v28 = vld [vmem:[#allocation58_spill] sm:$0xff] }
 0x76b   :  { %15395 = vst [vmem:[#allocation109_spill] sm:$0xff] %v13928_v52  ;;  %v13940_v0 = vadd.f32 %v15400_v27, %v15399_v30  ;;  %v15402_v23 = vld [vmem:[#allocation89_spill] sm:$0xff]  ;;  %v15404_v29 = vld [vmem:[#allocation147_spill] sm:$0xff]  ;;  %v15407_v55 = vld [vmem:[#allocation34_spill] sm:$0xff] }
 0x76c   :  { %v13944_v20 = vadd.f32 %v15402_v23, %v15401_v28  ;;  %v13948_v44 = vadd.f32 %v15404_v29, %v15403_v35  ;;  %v15405_v49 = vld [vmem:[#allocation99_spill] sm:$0xff]  ;;  %v13956_v22 = vadd.f32 %v15407_v55, %v13700_v8  ;;  %v15408_v25 = vld [vmem:[#allocation92_spill] sm:$0xff]  ;;  %v15409_v30 = vld [vmem:[#allocation150_spill] sm:$0xff] }
 0x76d   :  { %v15406_v52 = vld [vmem:[#allocation207_spill] sm:$0xff]  ;;  %v13960_v27 = vadd.f32 %v15408_v25, %v13704_v7  ;;  %v13964_v23 = vadd.f32 %v15409_v30, %v13708_v24  ;;  %v15411_v35 = vld [vmem:[#allocation33_spill] sm:$0xff]  ;;  %v15415_v30 = vld [vmem:[#allocation36_spill] sm:$0xff] }
 0x76e   :  { %v13952_v48 = vadd.f32 %v15406_v52, %v15405_v49  ;;  %v15410_v28 = vld [vmem:[#allocation211_spill] sm:$0xff]  ;;  %v13972_v52 = vadd.f32 %v15411_v35, %v13716_v21  ;;  %v15413_v55 = vld [vmem:[#allocation149_spill] sm:$0xff]  ;;  %v15417_v35 = vld [vmem:[#allocation152_spill] sm:$0xff] }
 0x76f   :  { %v13968_v29 = vadd.f32 %v15410_v28, %v13712_v12  ;;  %v15412_v49 = vld [vmem:[#allocation91_spill] sm:$0xff]  ;;  %v13980_v7 = vadd.f32 %v15413_v55, %v13724_v4  ;;  %v15414_v25 = vld [vmem:[#allocation209_spill] sm:$0xff]  ;;  %v13988_v12 = vadd.f32 %v15415_v30, %v13732_v62  ;;  %v15416_v28 = vld [vmem:[#allocation94_spill] sm:$0xff] }
 0x770   :  { %v13976_v8 = vadd.f32 %v15412_v49, %v13720_v57  ;;  %v13984_v24 = vadd.f32 %v15414_v25, %v13728_v32  ;;  %v13992_v21 = vadd.f32 %v15416_v28, %v13736_v14  ;;  %v13996_v57 = vadd.f32 %v15417_v35, %v13740_v9  ;;  %v15418_v49 = vld [vmem:[#allocation214_spill] sm:$0xff]  ;;  %v15419_v55 = vld [vmem:[#allocation3_spill] sm:$0xff]  ;;  %v15420_v25 = vld [vmem:[#allocation16_spill] sm:$0xff] }
 0x771   :  { %v14000_v4 = vadd.f32 %v15418_v49, %v13744_v56  ;;  %v14004_v32 = vadd.f32 %v15419_v55, %v13748_v34  ;;  %v14008_v62 = vadd.f32 %v15420_v25, %v13752_v18  ;;  %v15421_v30 = vld [vmem:[#allocation151_spill] sm:$0xff]  ;;  %v15422_v28 = vld [vmem:[#allocation212_spill] sm:$0xff]  ;;  %v15423_v35 = vld [vmem:[#allocation25_spill] sm:$0xff] }
 0x772   :  { %v14012_v14 = vadd.f32 %v15421_v30, %v13756_v45  ;;  %v14016_v9 = vadd.f32 %v15422_v28, %v13760_v51  ;;  %v14020_v56 = vadd.f32 %v15423_v35, %v13764_v53  ;;  %v15424_v49 = vld [vmem:[#allocation20_spill] sm:$0xff]  ;;  %v15425_v55 = vld [vmem:[#allocation154_spill] sm:$0xff]  ;;  %v15427_v30 = vld [vmem:[#allocation35_spill] sm:$0xff] }
 0x773   :  { %v14024_v34 = vadd.f32 %v15424_v49, %v13768_v3  ;;  %v14028_v18 = vadd.f32 %v15425_v55, %v13772_v59  ;;  %v15426_v25 = vld [vmem:[#allocation218_spill] sm:$0xff]  ;;  %v14036_v51 = vadd.f32 %v15427_v30, %v13780_v63  ;;  %v15428_v28 = vld [vmem:[#allocation93_spill] sm:$0xff]  ;;  %v15430_v49 = vld [vmem:[#allocation215_spill] sm:$0xff] }
 0x774   :  { %v14032_v45 = vadd.f32 %v15426_v25, %v13776_v39  ;;  %v14040_v53 = vadd.f32 %v15428_v28, %v13784_v61  ;;  %v15429_v35 = vld [vmem:[#allocation153_spill] sm:$0xff]  ;;  %v14048_v59 = vadd.f32 %v15430_v49, %v13792_v46  ;;  %v15432_v55 = vld [vmem:[#allocation38_spill] sm:$0xff]  ;;  %v15433_v25 = vld [vmem:[#allocation96_spill] sm:$0xff] }
 0x775   :  { %v14044_v3 = vadd.f32 %v15429_v35, %v13788_v13  ;;  %v14052_v39 = vadd.f32 %v15432_v55, %v13796_v47  ;;  %v14056_v63 = vadd.f32 %v15433_v25, %v13800_v1  ;;  %v15434_v30 = vld [vmem:[#allocation156_spill] sm:$0xff]  ;;  %v15435_v28 = vld [vmem:[#allocation37_spill] sm:$0xff]  ;;  %v15436_v35 = vld [vmem:[#allocation95_spill] sm:$0xff] }
 0x776   :  { %15431 = vst [vmem:[#allocation108_spill] sm:$0xff] %v14048_v59  ;;  %v14060_v61 = vadd.f32 %v15434_v30, %v13804_v33  ;;  %v14064_v13 = vadd.f32 %v15435_v28, %v13808_v42  ;;  %v14068_v46 = vadd.f32 %v15436_v35, %v13812_v26  ;;  %v15438_v49 = vld [vmem:[#allocation100_spill] sm:$0xff]  ;;  %v15439_v59 = vld [vmem:[#allocation155_spill] sm:$0xff]  ;;  %v15445_v30 = vld [vmem:[#allocation98_spill] sm:$0xff] }
 0x777   :  { %v14072_v47 = vadd.f32 %v15439_v59, %v15438_v49  ;;  %v15441_v55 = vld [vmem:[#allocation219_spill] sm:$0xff]  ;;  %v15443_v25 = vld [vmem:[#allocation40_spill] sm:$0xff]  ;;  %v14084_v42 = vadd.f32 %v15445_v30, %v13828_v6  ;;  %v15447_v28 = vld [vmem:[#allocation158_spill] sm:$0xff] }
 0x778   :  { %15437 = vst [vmem:[#allocation111_spill] sm:$0xff] %v14068_v46  ;;  %v14076_v1 = vadd.f32 %v15441_v55, %v13820_v37  ;;  %v14080_v33 = vadd.f32 %v15443_v25, %v13824_v31  ;;  %v14088_v26 = vadd.f32 %v15447_v28, %v13832_v17  ;;  %v15448_v35 = vld [vmem:[#allocation101_spill] sm:$0xff]  ;;  %v15449_v46 = vld [vmem:[#allocation39_spill] sm:$0xff]  ;;  %v15450_v49 = vld [vmem:[#allocation102_spill] sm:$0xff] }
 0x779   :  { %15440 = vst [vmem:[#allocation110_spill] sm:$0xff] %v14072_v47  ;;  %15446 = vst [vmem:[#allocation225_spill] sm:$0xff] %v14084_v42  ;;  %v14092_v59 = vadd.f32 %v15449_v46, %v15448_v35  ;;  %v15451_v47 = vld [vmem:[#allocation41_spill] sm:$0xff]  ;;  %v15454_v25 = vld [vmem:[#allocation103_spill] sm:$0xff]  ;;  %v6790_v35 = vmax.f32 %v13860_v16, 0.0  ;;  %v6800_v16 = vmax.f32 %v13900_v40, 0.0 }
 0x77a   :  { %15442 = vst [vmem:[#allocation112_spill] sm:$0xff] %v14076_v1  ;;  %15444 = vst [vmem:[#allocation160_spill] sm:$0xff] %v14080_v33  ;;  %v14096_v37 = vadd.f32 %v15451_v47, %v15450_v49  ;;  %v15452_v55 = vld [vmem:[#allocation157_spill] sm:$0xff]  ;;  %v15453_v1 = vld [vmem:[#allocation223_spill] sm:$0xff]  ;;  %v6791_v47 = vmax.f32 %v13864_v15, 0.0  ;;  %v6792_v49 = vmax.f32 %v13868_v5, 0.0 }
 0x77b   :  { %v14100_v31 = vadd.f32 %v15453_v1, %v15452_v55  ;;  %v15455_v33 = vld [vmem:[#allocation43_spill] sm:$0xff]  ;;  %v15456_v30 = vld [vmem:[#allocation104_spill] sm:$0xff]  ;;  %v15457_v42 = vld [vmem:[#allocation42_spill] sm:$0xff]  ;;  %v6793_v1 = vmax.f32 %v13872_v10, 0.0  ;;  %v6794_v55 = vmax.f32 %v13876_v19, 0.0  ;;  %v6801_v15 = vmax.f32 %v13904_v11, 0.0 }
 0x77c   :  { %v14104_v6 = vadd.f32 %v15455_v33, %v15454_v25  ;;  %v14108_v17 = vadd.f32 %v15457_v42, %v15456_v30  ;;  %v15458_v28 = vld [vmem:[#allocation45_spill] sm:$0xff]  ;;  %v6795_v33 = vmax.f32 %v13880_v60, 0.0  ;;  %v6796_v25 = vmax.f32 %v13884_v38, 0.0  ;;  %6854 = vst.msk [vmem:[%s14445_s11] sm:$0xff] %vm691_vm2, %v6790_v35  ;;  %6855 = vst.msk [vmem:[%s14445_s11 + $0x8] sm:$0xff] %vm691_vm2, %v6791_v47  ;;  %v15459_v10 = vld [vmem:[#allocation222_spill] sm:$0xff] }
 0x77d   :  { %v14112_v46 = vadd.f32 %v15458_v28, %v13856_v54  ;;  %v6797_v42 = vmax.f32 %v13888_v41, 0.0  ;;  %v6798_v30 = vmax.f32 %v13892_v36, 0.0  ;;  %v6799_v54 = vmax.f32 %v13896_v43, 0.0  ;;  %6856 = vst.msk [vmem:[%s14445_s11 + $0x10] sm:$0xff] %vm691_vm2, %v6792_v49  ;;  %6857 = vst.msk [vmem:[%s14445_s11 + $0x18] sm:$0xff] %vm691_vm2, %v6793_v1  ;;  %v15460_v60 = vld [vmem:[#allocation105_spill] sm:$0xff] }
 0x77e   :  { %v6802_v5 = vmax.f32 %v13908_v50, 0.0  ;;  %v6803_v19 = vmax.f32 %v15459_v10, 0.0  ;;  %v6804_v38 = vmax.f32 %v15460_v60, 0.0  ;;  %v15461_v41 = vld [vmem:[#allocation107_spill] sm:$0xff]  ;;  %6858 = vst.msk [vmem:[%s14445_s11 + $0x20] sm:$0xff] %vm691_vm2, %v6794_v55  ;;  %6859 = vst.msk [vmem:[%s14445_s11 + $0x28] sm:$0xff] %vm691_vm2, %v6795_v33 }
 0x77f   :  { %v6805_v36 = vmax.f32 %v15461_v41, 0.0  ;;  %6860 = vst.msk [vmem:[%s14445_s11 + $0x30] sm:$0xff] %vm691_vm2, %v6796_v25  ;;  %6861 = vst.msk [vmem:[%s14445_s11 + $0x38] sm:$0xff] %vm691_vm2, %v6797_v42  ;;  %v15462_v43 = vld [vmem:[#allocation106_spill] sm:$0xff]  ;;  %v15463_v11 = vld [vmem:[#allocation109_spill] sm:$0xff]  ;;  %v6808_v28 = vmax.f32 %v13932_v58, 0.0 }
 0x780   :  { %v6806_v40 = vmax.f32 %v15462_v43, 0.0  ;;  %v6807_v50 = vmax.f32 %v15463_v11, 0.0  ;;  %v6809_v35 = vmax.f32 %v13936_v2, 0.0  ;;  %6862 = vst.msk [vmem:[%s14445_s11 + $0x40] sm:$0xff] %vm691_vm2, %v6798_v30  ;;  %6863 = vst.msk [vmem:[%s14445_s11 + $0x48] sm:$0xff] %vm691_vm2, %v6799_v54  ;;  %v6810_v58 = vmax.f32 %v13940_v0, 0.0 }
 0x781   :  { %6864 = vst.msk [vmem:[%s14445_s11 + $0x50] sm:$0xff] %vm691_vm2, %v6800_v16  ;;  %6865 = vst.msk [vmem:[%s14445_s11 + $0x58] sm:$0xff] %vm691_vm2, %v6801_v15  ;;  %v6811_v2 = vmax.f32 %v13944_v20, 0.0  ;;  %v6812_v47 = vmax.f32 %v13948_v44, 0.0  ;;  %v6813_v49 = vmax.f32 %v13952_v48, 0.0  ;;  %v6814_v0 = vmax.f32 %v13956_v22, 0.0 }
 0x782   :  { %6866 = vst.msk [vmem:[%s14445_s11 + $0x60] sm:$0xff] %vm691_vm2, %v6802_v5  ;;  %6867 = vst.msk [vmem:[%s14445_s11 + $0x68] sm:$0xff] %vm691_vm2, %v6803_v19  ;;  %v6815_v20 = vmax.f32 %v13960_v27, 0.0  ;;  %v6816_v44 = vmax.f32 %v13964_v23, 0.0  ;;  %v6817_v48 = vmax.f32 %v13968_v29, 0.0  ;;  %v6818_v22 = vmax.f32 %v13972_v52, 0.0 }
 0x783   :  { %6868 = vst.msk [vmem:[%s14445_s11 + $0x70] sm:$0xff] %vm691_vm2, %v6804_v38  ;;  %6869 = vst.msk [vmem:[%s14445_s11 + $0x78] sm:$0xff] %vm691_vm2, %v6805_v36  ;;  %v6819_v27 = vmax.f32 %v13976_v8, 0.0  ;;  %v6820_v23 = vmax.f32 %v13980_v7, 0.0  ;;  %v6821_v29 = vmax.f32 %v13984_v24, 0.0  ;;  %v6822_v52 = vmax.f32 %v13988_v12, 0.0 }
 0x784   :  { %6870 = vst.msk [vmem:[%s14445_s11 + $0x80] sm:$0xff] %vm691_vm2, %v6806_v40  ;;  %6871 = vst.msk [vmem:[%s14445_s11 + $0x88] sm:$0xff] %vm691_vm2, %v6807_v50  ;;  %v6823_v8 = vmax.f32 %v13992_v21, 0.0  ;;  %v6824_v7 = vmax.f32 %v13996_v57, 0.0  ;;  %v6825_v24 = vmax.f32 %v14000_v4, 0.0  ;;  %v6826_v12 = vmax.f32 %v14004_v32, 0.0 }
 0x785   :  { %6872 = vst.msk [vmem:[%s14445_s11 + $0x90] sm:$0xff] %vm691_vm2, %v6808_v28  ;;  %6873 = vst.msk [vmem:[%s14445_s11 + $0x98] sm:$0xff] %vm691_vm2, %v6809_v35  ;;  %v6827_v21 = vmax.f32 %v14008_v62, 0.0  ;;  %v6828_v57 = vmax.f32 %v14012_v14, 0.0  ;;  %v6829_v4 = vmax.f32 %v14016_v9, 0.0  ;;  %v6830_v32 = vmax.f32 %v14020_v56, 0.0 }
 0x786   :  { %6874 = vst.msk [vmem:[%s14445_s11 + $0xa0] sm:$0xff] %vm691_vm2, %v6810_v58  ;;  %6875 = vst.msk [vmem:[%s14445_s11 + $0xa8] sm:$0xff] %vm691_vm2, %v6811_v2  ;;  %v6831_v62 = vmax.f32 %v14024_v34, 0.0  ;;  %v6832_v14 = vmax.f32 %v14028_v18, 0.0  ;;  %v6833_v9 = vmax.f32 %v14032_v45, 0.0  ;;  %v6834_v56 = vmax.f32 %v14036_v51, 0.0 }
 0x787   :  { %6876 = vst.msk [vmem:[%s14445_s11 + $0xb0] sm:$0xff] %vm691_vm2, %v6812_v47  ;;  %6877 = vst.msk [vmem:[%s14445_s11 + $0xb8] sm:$0xff] %vm691_vm2, %v6813_v49  ;;  %v6835_v34 = vmax.f32 %v14040_v53, 0.0  ;;  %v6836_v18 = vmax.f32 %v14044_v3, 0.0  ;;  %v15464_v45 = vld [vmem:[#allocation108_spill] sm:$0xff]  ;;  %v6838_v51 = vmax.f32 %v14052_v39, 0.0 }
 0x788   :  { %6878 = vst.msk [vmem:[%s14445_s11 + $0xc0] sm:$0xff] %vm691_vm2, %v6814_v0  ;;  %6879 = vst.msk [vmem:[%s14445_s11 + $0xc8] sm:$0xff] %vm691_vm2, %v6815_v20  ;;  %v6837_v1 = vmax.f32 %v15464_v45, 0.0  ;;  %v6839_v53 = vmax.f32 %v14056_v63, 0.0  ;;  %v6840_v3 = vmax.f32 %v14060_v61, 0.0  ;;  %v6841_v55 = vmax.f32 %v14064_v13, 0.0 }
 0x789   :  { %6880 = vst.msk [vmem:[%s14445_s11 + $0xd0] sm:$0xff] %vm691_vm2, %v6816_v44  ;;  %6881 = vst.msk [vmem:[%s14445_s11 + $0xd8] sm:$0xff] %vm691_vm2, %v6817_v48  ;;  %v15465_v39 = vld [vmem:[#allocation111_spill] sm:$0xff]  ;;  %v15466_v61 = vld [vmem:[#allocation110_spill] sm:$0xff]  ;;  %v6847_v15 = vmax.f32 %v14088_v26, 0.0  ;;  %v6848_v5 = vmax.f32 %v14092_v59, 0.0 }
 0x78a   :  { %6882 = vst.msk [vmem:[%s14445_s11 + $0xe0] sm:$0xff] %vm691_vm2, %v6818_v22  ;;  %6883 = vst.msk [vmem:[%s14445_s11 + $0xe8] sm:$0xff] %vm691_vm2, %v6819_v27  ;;  %v6842_v63 = vmax.f32 %v15465_v39, 0.0  ;;  %v6843_v13 = vmax.f32 %v15466_v61, 0.0  ;;  %v15467_v33 = vld [vmem:[#allocation112_spill] sm:$0xff]  ;;  %v15469_v54 = vld [vmem:[#allocation225_spill] sm:$0xff] }
 0x78b   :  { %6884 = vst.msk [vmem:[%s14445_s11 + $0xf0] sm:$0xff] %vm691_vm2, %v6820_v23  ;;  %6885 = vst.msk [vmem:[%s14445_s11 + $0xf8] sm:$0xff] %vm691_vm2, %v6821_v29  ;;  %v6844_v25 = vmax.f32 %v15467_v33, 0.0  ;;  %v15468_v42 = vld [vmem:[#allocation160_spill] sm:$0xff]  ;;  %v6846_v16 = vmax.f32 %v15469_v54, 0.0  ;;  %v6849_v10 = vmax.f32 %v14096_v37, 0.0 }
 0x78c   :  { %6886 = vst.msk [vmem:[%s14445_s11 + $0x100] sm:$0xff] %vm691_vm2, %v6822_v52  ;;  %6887 = vst.msk [vmem:[%s14445_s11 + $0x108] sm:$0xff] %vm691_vm2, %v6823_v8  ;;  %v6845_v30 = vmax.f32 %v15468_v42, 0.0  ;;  %v6850_v26 = vmax.f32 %v14100_v31, 0.0  ;;  %v6851_v59 = vmax.f32 %v14104_v6, 0.0  ;;  %v6852_v37 = vmax.f32 %v14108_v17, 0.0 }
 0x78d   :  { %6888 = vst.msk [vmem:[%s14445_s11 + $0x110] sm:$0xff] %vm691_vm2, %v6824_v7  ;;  %6889 = vst.msk [vmem:[%s14445_s11 + $0x118] sm:$0xff] %vm691_vm2, %v6825_v24  ;;  %v6853_v19 = vmax.f32 %v14112_v46, 0.0 }
 0x78e   :  { %6890 = vst.msk [vmem:[%s14445_s11 + $0x120] sm:$0xff] %vm691_vm2, %v6826_v12  ;;  %6891 = vst.msk [vmem:[%s14445_s11 + $0x128] sm:$0xff] %vm691_vm2, %v6827_v21 }
 0x78f   :  { %6892 = vst.msk [vmem:[%s14445_s11 + $0x130] sm:$0xff] %vm691_vm2, %v6828_v57  ;;  %6893 = vst.msk [vmem:[%s14445_s11 + $0x138] sm:$0xff] %vm691_vm2, %v6829_v4 }
 0x790   :  { %6894 = vst.msk [vmem:[%s14445_s11 + $0x140] sm:$0xff] %vm691_vm2, %v6830_v32  ;;  %6895 = vst.msk [vmem:[%s14445_s11 + $0x148] sm:$0xff] %vm691_vm2, %v6831_v62 }
 0x791   :  { %6896 = vst.msk [vmem:[%s14445_s11 + $0x150] sm:$0xff] %vm691_vm2, %v6832_v14  ;;  %6897 = vst.msk [vmem:[%s14445_s11 + $0x158] sm:$0xff] %vm691_vm2, %v6833_v9 }
 0x792   :  { %6898 = vst.msk [vmem:[%s14445_s11 + $0x160] sm:$0xff] %vm691_vm2, %v6834_v56  ;;  %6899 = vst.msk [vmem:[%s14445_s11 + $0x168] sm:$0xff] %vm691_vm2, %v6835_v34 }
 0x793   :  { %6900 = vst.msk [vmem:[%s14445_s11 + $0x170] sm:$0xff] %vm691_vm2, %v6836_v18  ;;  %6901 = vst.msk [vmem:[%s14445_s11 + $0x178] sm:$0xff] %vm691_vm2, %v6837_v1 }
 0x794   :  { %6902 = vst.msk [vmem:[%s14445_s11 + $0x180] sm:$0xff] %vm691_vm2, %v6838_v51  ;;  %6903 = vst.msk [vmem:[%s14445_s11 + $0x188] sm:$0xff] %vm691_vm2, %v6839_v53 }
 0x795   :  { %6904 = vst.msk [vmem:[%s14445_s11 + $0x190] sm:$0xff] %vm691_vm2, %v6840_v3  ;;  %6905 = vst.msk [vmem:[%s14445_s11 + $0x198] sm:$0xff] %vm691_vm2, %v6841_v55 }
 0x796   :  { %6906 = vst.msk [vmem:[%s14445_s11 + $0x1a0] sm:$0xff] %vm691_vm2, %v6842_v63  ;;  %6907 = vst.msk [vmem:[%s14445_s11 + $0x1a8] sm:$0xff] %vm691_vm2, %v6843_v13 }
 0x797   :  { %6908 = vst.msk [vmem:[%s14445_s11 + $0x1b0] sm:$0xff] %vm691_vm2, %v6844_v25  ;;  %6909 = vst.msk [vmem:[%s14445_s11 + $0x1b8] sm:$0xff] %vm691_vm2, %v6845_v30 }
 0x798   :  { %6910 = vst.msk [vmem:[%s14445_s11 + $0x1c0] sm:$0xff] %vm691_vm2, %v6846_v16  ;;  %6911 = vst.msk [vmem:[%s14445_s11 + $0x1c8] sm:$0xff] %vm691_vm2, %v6847_v15 }
 0x799   :  { %6912 = vst.msk [vmem:[%s14445_s11 + $0x1d0] sm:$0xff] %vm691_vm2, %v6848_v5  ;;  %6913 = vst.msk [vmem:[%s14445_s11 + $0x1d8] sm:$0xff] %vm691_vm2, %v6849_v10 }
 0x79a   :  { %6914 = vst.msk [vmem:[%s14445_s11 + $0x1e0] sm:$0xff] %vm691_vm2, %v6850_v26  ;;  %6915 = vst.msk [vmem:[%s14445_s11 + $0x1e8] sm:$0xff] %vm691_vm2, %v6851_v59 }
 0x79b   :  { %6916 = vst.msk [vmem:[%s14445_s11 + $0x1f0] sm:$0xff] %vm691_vm2, %v6852_v37  ;;  %6917 = vst.msk [vmem:[%s14445_s11 + $0x1f8] sm:$0xff] %vm691_vm2, %v6853_v19 }

</bundles_post_ra>
